<compile_context>
chip_gen: v7x
topology: tpu7x:2x2x1
jax: 0.10.0
libtpu: 0.0.40
codegen_flags: <defaults>
</compile_context>

<pallas_src>
import jax
import jax.numpy as jnp
from jax import lax
from jax.experimental import pallas as pl
from jax.experimental.pallas import tpu as pltpu

# ----------------------------- layer sizes --------------------------------
IN_F = 85
IN_F_PAD = 128                    # zero-padded input width (lane-aligned K)
H1, H2, H3 = 64, 256, 512
H4 = 1028                         # true fc4 width (PyTorch spec)
H4_PAD = 1152                     # next multiple of 128 (zero-padded, exact)
N_ACTIONS = 1968
HEAD_PAD = 2048                   # lane-dense fused head width (16 * 128)
VAL_GROUP = 1920                  # start of the 128-lane group holding the value
VAL_LANE = N_ACTIONS - VAL_GROUP  # = 48: value logit lane inside that group
NEG_BIG = -1e30                   # "minus infinity" for dead softmax columns


def _round_up(n, m):
    return (n + m - 1) // m * m


def _default_block_b():
    # v6e/v7x: 256-wide MXU -> TB=256 doubles fill on the head matmul.
    # v5e: 128x128 MXU tiles and lowest HBM BW -> keep TB=128.
    try:
        kind = jax.devices()[0].device_kind.lower()
        if "v5 lite" in kind or "v5lite" in kind or "v5e" in kind:
            return 128
    except Exception:
        pass
    return 256


def _mish(x):
    # mish(x) = x * tanh(softplus(x)) = x * (t^2 + 2t) / (t^2 + 2t + 2), t=e^x.
    # One exp + one EUP reciprocal.  Clamp at 20: for x >= 20 the ratio is 1.0
    # to fp32 precision (mish(x) == x) and t^2 cannot overflow.
    # (approx reciprocal here adds ~1e-3 rel error; bf16 matmuls dominate.)
    t = jnp.exp(jnp.minimum(x, 20.0))
    n = t * (t + 2.0)
    return x * n * pl.reciprocal(n + 2.0, approx=True)


# ------------------------------ the kernel ---------------------------------
def net_kernel(x_ref,
               w1_ref, b1_ref, w2_ref, b2_ref, w3_ref, b3_ref,
               w4_ref, b4_ref, wh_ref, bh_ref,
               act_ref, val_ref):
    bf16 = jnp.bfloat16
    f32 = jnp.float32

    x = x_ref[...]                                               # (TB, 128) bf16

    h = _mish(jnp.dot(x, w1_ref[...], preferred_element_type=f32)
              + b1_ref[...])
    h = _mish(jnp.dot(h.astype(bf16), w2_ref[...], preferred_element_type=f32)
              + b2_ref[...])
    h = _mish(jnp.dot(h.astype(bf16), w3_ref[...], preferred_element_type=f32)
              + b3_ref[...])
    h = _mish(jnp.dot(h.astype(bf16), w4_ref[...], preferred_element_type=f32)
              + b4_ref[...])                                     # (TB, 1152) f32

    # Fused lane-dense head: cols [0,1968) action logits, col 1968 value
    # logit, cols [1969,2048) dead (bias -1e30 -> exp == 0).
    head = (jnp.dot(h.astype(bf16), wh_ref[...], preferred_element_type=f32)
            + bh_ref[...])                                       # (TB, 2048) f32

    # Split at a 128-lane boundary: only the last group needs masking.
    left = head[:, :VAL_GROUP]                                   # (TB, 1920)
    right = head[:, VAL_GROUP:]                                  # (TB, 128)

    lane = lax.broadcasted_iota(jnp.int32, right.shape, 1)
    is_val = lane == VAL_LANE
    v = jnp.sum(jnp.where(is_val, right, 0.0),
                axis=-1, keepdims=True)                          # (TB, 1) value logit
    right = jnp.where(is_val, NEG_BIG, right)                    # exclude from softmax

    # softmax over the action columns (dim=1), fp32 throughout.
    m = jnp.maximum(jnp.max(left, axis=-1, keepdims=True),
                    jnp.max(right, axis=-1, keepdims=True))
    e_l = jnp.exp(left - m)
    e_r = jnp.exp(right - m)
    s = jnp.sum(e_l, axis=-1, keepdims=True) + jnp.sum(e_r, axis=-1, keepdims=True)
    inv = 1.0 / s                                                # exact normalization

    act_ref[:, :VAL_GROUP] = e_l * inv                           # lane-aligned stores
    act_ref[:, VAL_GROUP:] = e_r * inv
    val_ref[...] = jnp.tanh(v)


# ------------------------------ host wrapper --------------------------------
def net_forward(x, kparams, *, block_b=None):
    """x: (B, 85) float32.  kparams: output of prepare_params()."""
    B = x.shape[0]
    if block_b is None:
        block_b = _default_block_b()
    TB = min(block_b, _round_up(B, 8))
    B_pad = _round_up(B, TB)

    # zero-pad batch (to TB multiple) and features (85 -> 128), cast bf16.
    x_p = jnp.pad(x, ((0, B_pad - B), (0, IN_F_PAD - IN_F))).astype(jnp.bfloat16)

    grid = (B_pad // TB,)

    # Weights/biases: whole-array blocks with constant index_maps -> DMA'd
    # once, VMEM-resident across all grid steps.
    weight_specs = [pl.BlockSpec(p.shape, lambda i: (0, 0)) for p in kparams]
    in_specs = [pl.BlockSpec((TB, IN_F_PAD), lambda i: (i, 0))] + weight_specs
    out_specs = (pl.BlockSpec((TB, HEAD_PAD), lambda i: (i, 0)),
                 pl.BlockSpec((TB, 1), lambda i: (i, 0)))
    out_shape = (jax.ShapeDtypeStruct((B_pad, HEAD_PAD), jnp.float32),
                 jax.ShapeDtypeStruct((B_pad, 1), jnp.float32))

    # Megacore only pays off when there are enough steps to amortize each
    # core's own copy of the ~6 MiB weight set.
    sem = "parallel" if grid[0] >= 4 else "arbitrary"

    act, val = pl.pallas_call(
        net_kernel,
        out_shape=out_shape,
        grid_spec=pltpu.PrefetchScalarGridSpec(
            num_scalar_prefetch=0,
            grid=grid,
            in_specs=in_specs,
            out_specs=out_specs,
        ),
        compiler_params=pltpu.CompilerParams(
            dimension_semantics=(sem,),
            vmem_limit_bytes=40 * 1024 * 1024,   # fits v7x's 64 MiB physical VMEM
        ),
    )(x_p, *kparams)

    # Slice away batch padding, dead head columns, and the value column.
    return act[:B, :N_ACTIONS], val[:B]


# --------------------------- parameter handling -----------------------------
def init_params(key):
    """PyTorch-equivalent fp32 params: W stored transposed (in, out),
    b of shape (1, out); init U(-1/sqrt(in), 1/sqrt(in))."""
    dims = [(IN_F, H1), (H1, H2), (H2, H3), (H3, H4),
            (H4, N_ACTIONS), (H4, 1)]
    params = []
    for fan_in, fan_out in dims:
        key, kw, kb = jax.random.split(key, 3)
        bound = 1.0 / jnp.sqrt(float(fan_in))
        w = jax.random.uniform(kw, (fan_in, fan_out), jnp.float32,
                               minval=-bound, maxval=bound)
        b = jax.random.uniform(kb, (1, fan_out), jnp.float32,
                               minval=-bound, maxval=bound)
        params += [w, b]
    return params


def prepare_params(params):
    """Convert fp32 PyTorch-layout params into the kernel's layout:
    bf16 weights, fp32 biases, IN_F padded 85->128, H4 padded 1028->1152,
    value head folded into a lane-dense 2048-wide head (value = col 1968,
    cols 1969..2047 dead with bias -1e30)."""
    (w1, b1, w2, b2, w3, b3, w4, b4, wa, ba, wv, bv) = params

    w1p = jnp.pad(w1, ((0, IN_F_PAD - IN_F), (0, 0)))            # (128, 64)
    w4p = jnp.pad(w4, ((0, 0), (0, H4_PAD - H4)))                # (512, 1152)
    b4p = jnp.pad(b4, ((0, 0), (0, H4_PAD - H4)))                # (1, 1152)

    n_pad = HEAD_PAD - (N_ACTIONS + 1)                           # 79 dead cols
    wh = jnp.concatenate([wa, wv], axis=1)                       # (1028, 1969)
    wh = jnp.pad(wh, ((0, H4_PAD - H4), (0, n_pad)))             # (1152, 2048)
    bh = jnp.concatenate([ba, bv], axis=1)                       # (1, 1969)
    bh = jnp.pad(bh, ((0, 0), (0, n_pad)),
                 constant_values=NEG_BIG)                        # (1, 2048)

    bf = lambda w: w.astype(jnp.bfloat16)
    return (bf(w1p), b1, bf(w2), b2, bf(w3), b3,
            bf(w4p), b4p, bf(wh), bh)


# ----------------------------- pure-JAX reference ---------------------------
def net_reference(x, params):
    """Mirrors the kernel numerics (bf16 matmul operands, fp32 accumulate)."""
    (w1, b1, w2, b2, w3, b3, w4, b4, wa, ba, wv, bv) = params

    def lin(h, w, b):
        hb = h.astype(jnp.bfloat16).astype(jnp.float32)
        wb = w.astype(jnp.bfloat16).astype(jnp.float32)
        return jnp.dot(hb, wb) + b

    mish = lambda z: z * jnp.tanh(jax.nn.softplus(z))
    h = mish(lin(x, w1, b1))
    h = mish(lin(h, w2, b2))
    h = mish(lin(h, w3, b3))
    h = mish(lin(h, w4, b4))
    logits = lin(h, wa, ba)
    value = lin(h, wv, bv)
    return jax.nn.softmax(logits, axis=1), jnp.tanh(value)


# ----------------------------------- main -----------------------------------
if __name__ == "__main__":
    key = jax.random.PRNGKey(0)
    k_x, k_p, k_x2 = jax.random.split(key, 3)

    params = init_params(k_p)
    kparams = prepare_params(params)

    # --- small batch (grid = 1 block) ---
    B = 8
    x = jax.random.normal(k_x, (B, IN_F), jnp.float32)
    act, val = net_forward(x, kparams)
    jax.block_until_ready((act, val))

    assert act.shape == (B, N_ACTIONS) and val.shape == (B, 1)
    assert bool(jnp.allclose(jnp.sum(act, axis=1), 1.0, atol=2e-3))
    assert bool(jnp.all(jnp.abs(val) <= 1.0))

    ref_act, ref_val = net_reference(x, params)
    assert bool(jnp.allclose(act, ref_act, rtol=1e-2, atol=2e-3))
    assert bool(jnp.allclose(val, ref_val, rtol=1e-2, atol=3e-3))

    # --- larger batch (exercises batch padding + wider tiles) ---
    B2 = 200
    x2 = jax.random.normal(k_x2, (B2, IN_F), jnp.float32)
    act2, val2 = net_forward(x2, kparams)
    jax.block_until_ready((act2, val2))

    assert act2.shape == (B2, N_ACTIONS) and val2.shape == (B2, 1)
    ref_act2, ref_val2 = net_reference(x2, params)
    assert bool(jnp.allclose(jnp.sum(act2, axis=1), 1.0, atol=2e-3))
    assert bool(jnp.allclose(act2, ref_act2, rtol=1e-2, atol=2e-3))
    assert bool(jnp.allclose(val2, ref_val2, rtol=1e-2, atol=3e-3))

    print("KERNEL_OK")
</pallas_src>

<mosaic_0001>
module attributes {stable_mosaic.version = 11 : i64} {
  func.func @net_kernel(%arg0: i32, %arg1: memref<8x128xbf16, #tpu.memory_space<vmem>>, %arg2: memref<128x64xbf16, #tpu.memory_space<vmem>>, %arg3: memref<1x64xf32, #tpu.memory_space<vmem>>, %arg4: memref<64x256xbf16, #tpu.memory_space<vmem>>, %arg5: memref<1x256xf32, #tpu.memory_space<vmem>>, %arg6: memref<256x512xbf16, #tpu.memory_space<vmem>>, %arg7: memref<1x512xf32, #tpu.memory_space<vmem>>, %arg8: memref<512x1152xbf16, #tpu.memory_space<vmem>>, %arg9: memref<1x1152xf32, #tpu.memory_space<vmem>>, %arg10: memref<1152x2048xbf16, #tpu.memory_space<vmem>>, %arg11: memref<1x2048xf32, #tpu.memory_space<vmem>>, %arg12: memref<8x2048xf32, #tpu.memory_space<vmem>>, %arg13: memref<8x1xf32, #tpu.memory_space<vmem>>) attributes {dimension_semantics = [#tpu.dimension_semantics<arbitrary>], iteration_bounds = array<i64: 1>, scalar_prefetch = 0 : i64, scratch_operands = 0 : i64, tpu.core_type = #tpu.core_type<tc>, window_params = [{transform_indices = @transform_0, window_bounds = array<i64: 8, 128>}, {pipeline_mode = #tpu.pipeline_mode<synchronous>, transform_indices = @transform_1, window_bounds = array<i64: 128, 64>}, {pipeline_mode = #tpu.pipeline_mode<synchronous>, transform_indices = @transform_2, window_bounds = array<i64: 1, 64>}, {pipeline_mode = #tpu.pipeline_mode<synchronous>, transform_indices = @transform_3, window_bounds = array<i64: 64, 256>}, {pipeline_mode = #tpu.pipeline_mode<synchronous>, transform_indices = @transform_4, window_bounds = array<i64: 1, 256>}, {pipeline_mode = #tpu.pipeline_mode<synchronous>, transform_indices = @transform_5, window_bounds = array<i64: 256, 512>}, {pipeline_mode = #tpu.pipeline_mode<synchronous>, transform_indices = @transform_6, window_bounds = array<i64: 1, 512>}, {pipeline_mode = #tpu.pipeline_mode<synchronous>, transform_indices = @transform_7, window_bounds = array<i64: 512, 1152>}, {pipeline_mode = #tpu.pipeline_mode<synchronous>, transform_indices = @transform_8, window_bounds = array<i64: 1, 1152>}, {pipeline_mode = #tpu.pipeline_mode<synchronous>, transform_indices = @transform_9, window_bounds = array<i64: 1152, 2048>}, {pipeline_mode = #tpu.pipeline_mode<synchronous>, transform_indices = @transform_10, window_bounds = array<i64: 1, 2048>}, {transform_indices = @transform_11, window_bounds = array<i64: 8, 2048>}, {transform_indices = @transform_12, window_bounds = array<i64: 8, 1>}]} {
    %c0 = arith.constant 0 : index
    %c0_0 = arith.constant 0 : index
    %0 = vector.load %arg1[%c0, %c0_0] : memref<8x128xbf16, #tpu.memory_space<vmem>>, vector<8x128xbf16>
    %c0_1 = arith.constant 0 : index
    %c0_2 = arith.constant 0 : index
    %1 = vector.load %arg2[%c0_1, %c0_2] : memref<128x64xbf16, #tpu.memory_space<vmem>>, vector<128x64xbf16>
    %cst = arith.constant dense<0.000000e+00> : vector<8x64xf32>
    %2 = tpu.matmul %0, %1, %cst {dimension_numbers = #tpu.dot_dimension_numbers<[1], [0], [0], [1], [0, 0, 1, 1], [], []>} : vector<8x128xbf16>, vector<128x64xbf16>, vector<8x64xf32> -> vector<8x64xf32>
    %c0_3 = arith.constant 0 : index
    %c0_4 = arith.constant 0 : index
    %3 = vector.load %arg3[%c0_3, %c0_4] : memref<1x64xf32, #tpu.memory_space<vmem>>, vector<1x64xf32>
    %4 = vector.broadcast %3 : vector<1x64xf32> to vector<8x64xf32>
    %5 = arith.addf %2, %4 : vector<8x64xf32>
    %cst_5 = arith.constant 2.000000e+01 : f32
    %6 = vector.broadcast %cst_5 : f32 to vector<8x64xf32>
    %7 = arith.minimumf %5, %6 : vector<8x64xf32>
    %8 = math.exp %7 : vector<8x64xf32>
    %cst_6 = arith.constant 2.000000e+00 : f32
    %9 = vector.broadcast %cst_6 : f32 to vector<8x64xf32>
    %10 = arith.addf %8, %9 : vector<8x64xf32>
    %11 = arith.mulf %8, %10 : vector<8x64xf32>
    %12 = arith.mulf %5, %11 : vector<8x64xf32>
    %cst_7 = arith.constant 2.000000e+00 : f32
    %13 = vector.broadcast %cst_7 : f32 to vector<8x64xf32>
    %14 = arith.addf %11, %13 : vector<8x64xf32>
    %15 = tpu.reciprocal %14 {approx = true} : vector<8x64xf32> -> vector<8x64xf32>
    %16 = arith.mulf %12, %15 : vector<8x64xf32>
    %17 = arith.truncf %16 : vector<8x64xf32> to vector<8x64xbf16>
    %c0_8 = arith.constant 0 : index
    %c0_9 = arith.constant 0 : index
    %18 = vector.load %arg4[%c0_8, %c0_9] : memref<64x256xbf16, #tpu.memory_space<vmem>>, vector<64x256xbf16>
    %cst_10 = arith.constant dense<0.000000e+00> : vector<8x256xf32>
    %19 = tpu.matmul %17, %18, %cst_10 {dimension_numbers = #tpu.dot_dimension_numbers<[1], [0], [0], [1], [0, 0, 1, 1], [], []>} : vector<8x64xbf16>, vector<64x256xbf16>, vector<8x256xf32> -> vector<8x256xf32>
    %c0_11 = arith.constant 0 : index
    %c0_12 = arith.constant 0 : index
    %20 = vector.load %arg5[%c0_11, %c0_12] : memref<1x256xf32, #tpu.memory_space<vmem>>, vector<1x256xf32>
    %21 = vector.broadcast %20 : vector<1x256xf32> to vector<8x256xf32>
    %22 = arith.addf %19, %21 : vector<8x256xf32>
    %cst_13 = arith.constant 2.000000e+01 : f32
    %23 = vector.broadcast %cst_13 : f32 to vector<8x256xf32>
    %24 = arith.minimumf %22, %23 : vector<8x256xf32>
    %25 = math.exp %24 : vector<8x256xf32>
    %cst_14 = arith.constant 2.000000e+00 : f32
    %26 = vector.broadcast %cst_14 : f32 to vector<8x256xf32>
    %27 = arith.addf %25, %26 : vector<8x256xf32>
    %28 = arith.mulf %25, %27 : vector<8x256xf32>
    %29 = arith.mulf %22, %28 : vector<8x256xf32>
    %cst_15 = arith.constant 2.000000e+00 : f32
    %30 = vector.broadcast %cst_15 : f32 to vector<8x256xf32>
    %31 = arith.addf %28, %30 : vector<8x256xf32>
    %32 = tpu.reciprocal %31 {approx = true} : vector<8x256xf32> -> vector<8x256xf32>
    %33 = arith.mulf %29, %32 : vector<8x256xf32>
    %34 = arith.truncf %33 : vector<8x256xf32> to vector<8x256xbf16>
    %c0_16 = arith.constant 0 : index
    %c0_17 = arith.constant 0 : index
    %35 = vector.load %arg6[%c0_16, %c0_17] : memref<256x512xbf16, #tpu.memory_space<vmem>>, vector<256x512xbf16>
    %cst_18 = arith.constant dense<0.000000e+00> : vector<8x512xf32>
    %36 = tpu.matmul %34, %35, %cst_18 {dimension_numbers = #tpu.dot_dimension_numbers<[1], [0], [0], [1], [0, 0, 1, 1], [], []>} : vector<8x256xbf16>, vector<256x512xbf16>, vector<8x512xf32> -> vector<8x512xf32>
    %c0_19 = arith.constant 0 : index
    %c0_20 = arith.constant 0 : index
    %37 = vector.load %arg7[%c0_19, %c0_20] : memref<1x512xf32, #tpu.memory_space<vmem>>, vector<1x512xf32>
    %38 = vector.broadcast %37 : vector<1x512xf32> to vector<8x512xf32>
    %39 = arith.addf %36, %38 : vector<8x512xf32>
    %cst_21 = arith.constant 2.000000e+01 : f32
    %40 = vector.broadcast %cst_21 : f32 to vector<8x512xf32>
    %41 = arith.minimumf %39, %40 : vector<8x512xf32>
    %42 = math.exp %41 : vector<8x512xf32>
    %cst_22 = arith.constant 2.000000e+00 : f32
    %43 = vector.broadcast %cst_22 : f32 to vector<8x512xf32>
    %44 = arith.addf %42, %43 : vector<8x512xf32>
    %45 = arith.mulf %42, %44 : vector<8x512xf32>
    %46 = arith.mulf %39, %45 : vector<8x512xf32>
    %cst_23 = arith.constant 2.000000e+00 : f32
    %47 = vector.broadcast %cst_23 : f32 to vector<8x512xf32>
    %48 = arith.addf %45, %47 : vector<8x512xf32>
    %49 = tpu.reciprocal %48 {approx = true} : vector<8x512xf32> -> vector<8x512xf32>
    %50 = arith.mulf %46, %49 : vector<8x512xf32>
    %51 = arith.truncf %50 : vector<8x512xf32> to vector<8x512xbf16>
    %c0_24 = arith.constant 0 : index
    %c0_25 = arith.constant 0 : index
    %52 = vector.load %arg8[%c0_24, %c0_25] : memref<512x1152xbf16, #tpu.memory_space<vmem>>, vector<512x1152xbf16>
    %cst_26 = arith.constant dense<0.000000e+00> : vector<8x1152xf32>
    %53 = tpu.matmul %51, %52, %cst_26 {dimension_numbers = #tpu.dot_dimension_numbers<[1], [0], [0], [1], [0, 0, 1, 1], [], []>} : vector<8x512xbf16>, vector<512x1152xbf16>, vector<8x1152xf32> -> vector<8x1152xf32>
    %c0_27 = arith.constant 0 : index
    %c0_28 = arith.constant 0 : index
    %54 = vector.load %arg9[%c0_27, %c0_28] : memref<1x1152xf32, #tpu.memory_space<vmem>>, vector<1x1152xf32>
    %55 = vector.broadcast %54 : vector<1x1152xf32> to vector<8x1152xf32>
    %56 = arith.addf %53, %55 : vector<8x1152xf32>
    %cst_29 = arith.constant 2.000000e+01 : f32
    %57 = vector.broadcast %cst_29 : f32 to vector<8x1152xf32>
    %58 = arith.minimumf %56, %57 : vector<8x1152xf32>
    %59 = math.exp %58 : vector<8x1152xf32>
    %cst_30 = arith.constant 2.000000e+00 : f32
    %60 = vector.broadcast %cst_30 : f32 to vector<8x1152xf32>
    %61 = arith.addf %59, %60 : vector<8x1152xf32>
    %62 = arith.mulf %59, %61 : vector<8x1152xf32>
    %63 = arith.mulf %56, %62 : vector<8x1152xf32>
    %cst_31 = arith.constant 2.000000e+00 : f32
    %64 = vector.broadcast %cst_31 : f32 to vector<8x1152xf32>
    %65 = arith.addf %62, %64 : vector<8x1152xf32>
    %66 = tpu.reciprocal %65 {approx = true} : vector<8x1152xf32> -> vector<8x1152xf32>
    %67 = arith.mulf %63, %66 : vector<8x1152xf32>
    %68 = arith.truncf %67 : vector<8x1152xf32> to vector<8x1152xbf16>
    %c0_32 = arith.constant 0 : index
    %c0_33 = arith.constant 0 : index
    %69 = vector.load %arg10[%c0_32, %c0_33] : memref<1152x2048xbf16, #tpu.memory_space<vmem>>, vector<1152x2048xbf16>
    %cst_34 = arith.constant dense<0.000000e+00> : vector<8x2048xf32>
    %70 = tpu.matmul %68, %69, %cst_34 {dimension_numbers = #tpu.dot_dimension_numbers<[1], [0], [0], [1], [0, 0, 1, 1], [], []>} : vector<8x1152xbf16>, vector<1152x2048xbf16>, vector<8x2048xf32> -> vector<8x2048xf32>
    %c0_35 = arith.constant 0 : index
    %c0_36 = arith.constant 0 : index
    %71 = vector.load %arg11[%c0_35, %c0_36] : memref<1x2048xf32, #tpu.memory_space<vmem>>, vector<1x2048xf32>
    %72 = vector.broadcast %71 : vector<1x2048xf32> to vector<8x2048xf32>
    %73 = arith.addf %70, %72 : vector<8x2048xf32>
    %74 = vector.extract_strided_slice %73 {offsets = [0, 0], sizes = [8, 1920], strides = [1, 1]} : vector<8x2048xf32> to vector<8x1920xf32>
    %75 = vector.extract_strided_slice %73 {offsets = [0, 1920], sizes = [8, 128], strides = [1, 1]} : vector<8x2048xf32> to vector<8x128xf32>
    %76 = tpu.iota {dimensions = array<i32: 1>} : vector<8x128xi32>
    %c48_i32 = arith.constant 48 : i32
    %77 = vector.broadcast %c48_i32 : i32 to vector<8x128xi32>
    %78 = arith.cmpi eq, %76, %77 : vector<8x128xi32>
    %cst_37 = arith.constant 0.000000e+00 : f32
    %79 = vector.broadcast %cst_37 : f32 to vector<8x128xf32>
    %80 = arith.select %78, %75, %79 : vector<8x128xi1>, vector<8x128xf32>
    %cst_38 = arith.constant dense<0.000000e+00> : vector<8xf32>
    %81 = vector.multi_reduction <add>, %80, %cst_38 [1] : vector<8x128xf32> to vector<8xf32>
    %82 = vector.shape_cast %81 : vector<8xf32> to vector<8x1xf32>
    %cst_39 = arith.constant -1.000000e+30 : f32
    %83 = vector.broadcast %cst_39 : f32 to vector<8x128xf32>
    %84 = arith.select %78, %83, %75 : vector<8x128xi1>, vector<8x128xf32>
    %cst_40 = arith.constant dense<0xFF800000> : vector<8xf32>
    %85 = vector.multi_reduction <maximumf>, %74, %cst_40 [1] : vector<8x1920xf32> to vector<8xf32>
    %86 = vector.shape_cast %85 : vector<8xf32> to vector<8x1xf32>
    %cst_41 = arith.constant dense<0xFF800000> : vector<8xf32>
    %87 = vector.multi_reduction <maximumf>, %84, %cst_41 [1] : vector<8x128xf32> to vector<8xf32>
    %88 = vector.shape_cast %87 : vector<8xf32> to vector<8x1xf32>
    %89 = arith.maximumf %86, %88 : vector<8x1xf32>
    %90 = vector.broadcast %89 : vector<8x1xf32> to vector<8x1920xf32>
    %91 = arith.subf %74, %90 : vector<8x1920xf32>
    %92 = math.exp %91 : vector<8x1920xf32>
    %93 = vector.broadcast %89 : vector<8x1xf32> to vector<8x128xf32>
    %94 = arith.subf %84, %93 : vector<8x128xf32>
    %95 = math.exp %94 : vector<8x128xf32>
    %cst_42 = arith.constant dense<0.000000e+00> : vector<8xf32>
    %96 = vector.multi_reduction <add>, %92, %cst_42 [1] : vector<8x1920xf32> to vector<8xf32>
    %97 = vector.shape_cast %96 : vector<8xf32> to vector<8x1xf32>
    %cst_43 = arith.constant dense<0.000000e+00> : vector<8xf32>
    %98 = vector.multi_reduction <add>, %95, %cst_43 [1] : vector<8x128xf32> to vector<8xf32>
    %99 = vector.shape_cast %98 : vector<8xf32> to vector<8x1xf32>
    %100 = arith.addf %97, %99 : vector<8x1xf32>
    %cst_44 = arith.constant 1.000000e+00 : f32
    %101 = vector.broadcast %cst_44 : f32 to vector<8x1xf32>
    %102 = arith.divf %101, %100 : vector<8x1xf32>
    %103 = vector.broadcast %102 : vector<8x1xf32> to vector<8x1920xf32>
    %104 = arith.mulf %92, %103 : vector<8x1920xf32>
    %c0_45 = arith.constant 0 : index
    %c0_46 = arith.constant 0 : index
    %105 = vector.load %arg12[%c0_45, %c0_46] : memref<8x2048xf32, #tpu.memory_space<vmem>>, vector<8x1920xf32>
    tpu.vector_store %arg12[%c0_45, %c0_46], %104 {strides = array<i32>} : memref<8x2048xf32, #tpu.memory_space<vmem>>, vector<8x1920xf32>,
    %106 = vector.broadcast %102 : vector<8x1xf32> to vector<8x128xf32>
    %107 = arith.mulf %95, %106 : vector<8x128xf32>
    %c0_47 = arith.constant 0 : index
    %c1920 = arith.constant 1920 : index
    %108 = vector.load %arg12[%c0_47, %c1920] : memref<8x2048xf32, #tpu.memory_space<vmem>>, vector<8x128xf32>
    tpu.vector_store %arg12[%c0_47, %c1920], %107 {strides = array<i32>} : memref<8x2048xf32, #tpu.memory_space<vmem>>, vector<8x128xf32>,
    %109 = math.tanh %82 : vector<8x1xf32>
    %c0_48 = arith.constant 0 : index
    %c0_49 = arith.constant 0 : index
    %110 = vector.load %arg13[%c0_48, %c0_49] : memref<8x1xf32, #tpu.memory_space<vmem>>, vector<8x1xf32>
    tpu.vector_store %arg13[%c0_48, %c0_49], %109 {strides = array<i32>} : memref<8x1xf32, #tpu.memory_space<vmem>>, vector<8x1xf32>,
    return
  }
  func.func @transform_0(%arg0: i32) -> (i32, i32) {
    %c0_i32 = arith.constant 0 : i32
    %c0_i32_0 = arith.constant 0 : i32
    return %arg0, %c0_i32 : i32, i32
  }
  func.func @transform_1(%arg0: i32) -> (i32, i32) {
    %c0_i32 = arith.constant 0 : i32
    %c0_i32_0 = arith.constant 0 : i32
    %c0_i32_1 = arith.constant 0 : i32
    return %c0_i32, %c0_i32_0 : i32, i32
  }
  func.func @transform_2(%arg0: i32) -> (i32, i32) {
    %c0_i32 = arith.constant 0 : i32
    %c0_i32_0 = arith.constant 0 : i32
    %c0_i32_1 = arith.constant 0 : i32
    return %c0_i32, %c0_i32_0 : i32, i32
  }
  func.func @transform_3(%arg0: i32) -> (i32, i32) {
    %c0_i32 = arith.constant 0 : i32
    %c0_i32_0 = arith.constant 0 : i32
    %c0_i32_1 = arith.constant 0 : i32
    return %c0_i32, %c0_i32_0 : i32, i32
  }
  func.func @transform_4(%arg0: i32) -> (i32, i32) {
    %c0_i32 = arith.constant 0 : i32
    %c0_i32_0 = arith.constant 0 : i32
    %c0_i32_1 = arith.constant 0 : i32
    return %c0_i32, %c0_i32_0 : i32, i32
  }
  func.func @transform_5(%arg0: i32) -> (i32, i32) {
    %c0_i32 = arith.constant 0 : i32
    %c0_i32_0 = arith.constant 0 : i32
    %c0_i32_1 = arith.constant 0 : i32
    return %c0_i32, %c0_i32_0 : i32, i32
  }
  func.func @transform_6(%arg0: i32) -> (i32, i32) {
    %c0_i32 = arith.constant 0 : i32
    %c0_i32_0 = arith.constant 0 : i32
    %c0_i32_1 = arith.constant 0 : i32
    return %c0_i32, %c0_i32_0 : i32, i32
  }
  func.func @transform_7(%arg0: i32) -> (i32, i32) {
    %c0_i32 = arith.constant 0 : i32
    %c0_i32_0 = arith.constant 0 : i32
    %c0_i32_1 = arith.constant 0 : i32
    return %c0_i32, %c0_i32_0 : i32, i32
  }
  func.func @transform_8(%arg0: i32) -> (i32, i32) {
    %c0_i32 = arith.constant 0 : i32
    %c0_i32_0 = arith.constant 0 : i32
    %c0_i32_1 = arith.constant 0 : i32
    return %c0_i32, %c0_i32_0 : i32, i32
  }
  func.func @transform_9(%arg0: i32) -> (i32, i32) {
    %c0_i32 = arith.constant 0 : i32
    %c0_i32_0 = arith.constant 0 : i32
    %c0_i32_1 = arith.constant 0 : i32
    return %c0_i32, %c0_i32_0 : i32, i32
  }
  func.func @transform_10(%arg0: i32) -> (i32, i32) {
    %c0_i32 = arith.constant 0 : i32
    %c0_i32_0 = arith.constant 0 : i32
    %c0_i32_1 = arith.constant 0 : i32
    return %c0_i32, %c0_i32_0 : i32, i32
  }
  func.func @transform_11(%arg0: i32) -> (i32, i32) {
    %c0_i32 = arith.constant 0 : i32
    %c0_i32_0 = arith.constant 0 : i32
    return %arg0, %c0_i32 : i32, i32
  }
  func.func @transform_12(%arg0: i32) -> (i32, i32) {
    %c0_i32 = arith.constant 0 : i32
    %c0_i32_0 = arith.constant 0 : i32
    return %arg0, %c0_i32 : i32, i32
  }
}

</mosaic_0001>

<bundles_post_ra>
// kernel: tpu_custom_call.1
= control target key start
LH: loop header
LB: loop body
LE: loop exit
PB: predicated region body
PF: predicated region fallthrough
CT: control target
= control target key end

     0   :  { %18 = vsyncpa [#allocation3], 0  ;;  %s15381_s0 = inlined_call_operand.hbm [shape: bf16[8,128], index: 0, kind: input, shape index: {}]   ;;  %s15382_s1 = inlined_call_operand.vmem [shape: bf16[128,64], index: 1, kind: input, shape index: {}]   ;;  %s15383_s2 = inlined_call_operand.hbm [shape: f32[1,64], index: 2, kind: input, shape index: {}]   ;;  %s15384_s3 = inlined_call_operand.hbm [shape: bf16[64,256], index: 3, kind: input, shape index: {}]   ;;  %s15385_s4 = inlined_call_operand.hbm [shape: f32[1,256], index: 4, kind: input, shape index: {}]   ;;  %s15386_s5 = inlined_call_operand.hbm [shape: bf16[256,512], index: 5, kind: input, shape index: {}]   ;;  %s15387_s6 = inlined_call_operand.hbm [shape: f32[1,512], index: 6, kind: input, shape index: {}]   ;;  %s15388_s7 = inlined_call_operand.hbm [shape: bf16[512,1152], index: 7, kind: input, shape index: {}]   ;;  %s15389_s8 = inlined_call_operand.hbm [shape: f32[1,1152], index: 8, kind: input, shape index: {}]   ;;  %s15390_s9 = inlined_call_operand.hbm [shape: bf16[1152,2048], index: 9, kind: input, shape index: {}]   ;;  %s15391_s10 = inlined_call_operand.hbm [shape: f32[1,2048], index: 10, kind: input, shape index: {}]   ;;  %s15392_s11 = inlined_call_operand.hbm [shape: f32[8,2048], index: 11, kind: output, shape index: {0}]   ;;  %s15393_s12 = inlined_call_operand.vmem [shape: f32[8,1], index: 12, kind: output, shape index: {1}]  }
   0x1   :  { %19 = vsyncpa [#allocation6], 0 }
   0x2   :  { %20 = vsyncpa [#allocation9], 0 }
   0x3   :  { %21 = vsyncpa [#allocation12], 0 }
   0x4   :  { %22 = vsyncpa [#allocation15], 0 }
   0x5   :  { %23 = vsyncpa [#allocation18], 0 }
   0x6   :  { %24 = vsyncpa [#allocation4], 0  ;;  %s14745_s21 = smov [#allocation5]   ;;  %s14746_s23 = smov [#allocation8]  }
   0x7   :  { %s43_s22 = sshll.u32 %s14745_s21, 4  ;;  %s65_s24 = sshll.u32 %s14746_s23, 4  ;;  %s44_s22 = int_to_ptr.vmem [resolvable:$true] %s43_s22  ;;  %s66_s24 = int_to_ptr.vmem [resolvable:$true] %s65_s24 }
   0x8   :  { %s14489_s27 = scalar_lea.hbm %s15383_s2, 16 }
   0x9   :  { %p14490_p0 = scmp.ne.s32.totalorder %s15383_s2, %s14489_s27  ;;  %p14493_p1 = scmp.lt.u32.totalorder %s14489_s27, %s15383_s2 }
   0xb   :  { %p14495_p2 = pnand %p14493_p1, %p14490_p0 }
   0xd   :  { %14498 = shalt.err (!%p14495_p2)
}
   0xe   :  { %s14499_s14 = scalar_lea.vmem %s44_s22, 16  ;;  %s14503_s15 = scalar_lea.vmem %s44_s22, 32 }
   0xf   :  { %p14500_p3 = scmp.ne.s32.totalorder %s44_s22, %s14499_s14  ;;  %p14504_p4 = scmp.lt.s32.totalorder %s44_s22, %s44_s22 }
  0x10   :  { %p14505_p5 = scmp.lt.s32.totalorder %s14503_s15, %s14499_s14 }
  0x12   :  { %p14506_p6 = por %p14505_p5, %p14504_p4 }
  0x14   :  { %p14507_p7 = pnand %p14506_p6, %p14500_p3 }
  0x16   :  { %14510 = shalt.err (!%p14507_p7)
}
  0x17   :  { %46 = dma.hbm_to_vmem [thread:$0]  %s15383_s2, 16, %s44_s22, [#allocation6]  }
  0x18   :  { %s14511_s20 = scalar_lea.hbm %s15385_s4, 32 }
  0x19   :  { %p14512_p8 = scmp.ne.s32.totalorder %s15385_s4, %s14511_s20  ;;  %p14515_p9 = scmp.lt.u32.totalorder %s14511_s20, %s15385_s4 }
  0x1b   :  { %p14517_p10 = pnand %p14515_p9, %p14512_p8 }
  0x1d   :  { %14520 = shalt.err (!%p14517_p10)
}
  0x1e   :  { %s14521_s27 = scalar_lea.vmem %s66_s24, 32  ;;  %p14526_p12 = scmp.lt.s32.totalorder %s66_s24, %s66_s24 }
  0x1f   :  { %p14522_p11 = scmp.ne.s32.totalorder %s66_s24, %s14521_s27  ;;  %p14527_p13 = scmp.lt.s32.totalorder %s14521_s27, %s14521_s27 }
  0x21   :  { %p14528_p0 = por %p14527_p13, %p14526_p12 }
  0x23   :  { %p14529_p1 = pnand %p14528_p0, %p14522_p11 }
  0x25   :  { %14532 = shalt.err (!%p14529_p1)
}
  0x26   :  { %68 = dma.hbm_to_vmem [thread:$0]  %s15385_s4, 32, %s66_s24, [#allocation9]  }
  0x27   :  { %s14747_s28 = smov [#allocation11]   ;;  %s14748_s30 = smov [#allocation14]  }
  0x28   :  { %s87_s29 = sshll.u32 %s14747_s28, 4  ;;  %s109_s13 = sshll.u32 %s14748_s30, 4  ;;  %s88_s29 = int_to_ptr.vmem [resolvable:$true] %s87_s29  ;;  %s110_s13 = int_to_ptr.vmem [resolvable:$true] %s109_s13 }
  0x29   :  { %s14533_s16 = scalar_lea.hbm %s15387_s6, 64 }
  0x2a   :  { %p14534_p2 = scmp.ne.s32.totalorder %s15387_s6, %s14533_s16  ;;  %p14537_p3 = scmp.lt.u32.totalorder %s14533_s16, %s15387_s6 }
  0x2c   :  { %p14539_p4 = pnand %p14537_p3, %p14534_p2 }
  0x2e   :  { %14542 = shalt.err (!%p14539_p4)
}
  0x2f   :  { %s14543_s4 = scalar_lea.vmem %s88_s29, 64  ;;  %p14548_p6 = scmp.lt.s32.totalorder %s88_s29, %s88_s29 }
  0x30   :  { %p14544_p5 = scmp.ne.s32.totalorder %s88_s29, %s14543_s4  ;;  %p14549_p7 = scmp.lt.s32.totalorder %s14543_s4, %s14543_s4 }
  0x32   :  { %p14550_p8 = por %p14549_p7, %p14548_p6 }
  0x34   :  { %p14551_p9 = pnand %p14550_p8, %p14544_p5 }
  0x36   :  { %14554 = shalt.err (!%p14551_p9)
}
  0x37   :  { %90 = dma.hbm_to_vmem [thread:$0]  %s15387_s6, 64, %s88_s29, [#allocation12]  }
  0x38   :  { %s14555_s26 = scalar_lea.hbm %s15389_s8, 144 }
  0x39   :  { %p14556_p10 = scmp.ne.s32.totalorder %s15389_s8, %s14555_s26  ;;  %p14559_p11 = scmp.lt.u32.totalorder %s14555_s26, %s15389_s8 }
  0x3b   :  { %p14561_p12 = pnand %p14559_p11, %p14556_p10 }
  0x3d   :  { %14564 = shalt.err (!%p14561_p12)
}
  0x3e   :  { %s14565_s30 = scalar_lea.vmem %s110_s13, 144  ;;  %s14569_s14 = scalar_lea.vmem %s110_s13, 160 }
  0x3f   :  { %p14566_p13 = scmp.ne.s32.totalorder %s110_s13, %s14565_s30  ;;  %p14570_p0 = scmp.lt.s32.totalorder %s110_s13, %s110_s13 }
  0x40   :  { %p14571_p1 = scmp.lt.s32.totalorder %s14569_s14, %s14565_s30 }
  0x42   :  { %p14572_p2 = por %p14571_p1, %p14570_p0 }
  0x44   :  { %p14573_p3 = pnand %p14572_p2, %p14566_p13 }
  0x46   :  { %14576 = shalt.err (!%p14573_p3)
}
  0x47   :  { %112 = dma.hbm_to_vmem [thread:$0]  %s15389_s8, 144, %s110_s13, [#allocation15]  }
  0x48   :  { %s14749_s15 = smov [#allocation2]   ;;  %s14750_s17 = smov [#allocation7]  }
  0x49   :  { %s31_s16 = sshll.u32 %s14749_s15, 4  ;;  %s52_s18 = sshll.u32 %s14750_s17, 4  ;;  %s32_s16 = int_to_ptr.vmem [resolvable:$true] %s31_s16  ;;  %s14880_s18 = int_to_ptr.vmem [resolvable:$true] %s52_s18 }
  0x4a   :  { %s14577_s4 = scalar_lea.hbm %s15381_s0, 64 }
  0x4b   :  { %p14578_p4 = scmp.ne.s32.totalorder %s15381_s0, %s14577_s4  ;;  %p14581_p5 = scmp.lt.u32.totalorder %s14577_s4, %s15381_s0 }
  0x4d   :  { %p14583_p6 = pnand %p14581_p5, %p14578_p4 }
  0x4f   :  { %14586 = shalt.err (!%p14583_p6)
}
  0x50   :  { %s14587_s8 = scalar_lea.vmem %s32_s16, 64  ;;  %p14592_p8 = scmp.lt.s32.totalorder %s32_s16, %s32_s16 }
  0x51   :  { %p14588_p7 = scmp.ne.s32.totalorder %s32_s16, %s14587_s8  ;;  %p14593_p9 = scmp.lt.s32.totalorder %s14587_s8, %s14587_s8 }
  0x53   :  { %p14594_p10 = por %p14593_p9, %p14592_p8 }
  0x55   :  { %p14595_p11 = pnand %p14594_p10, %p14588_p7 }
  0x57   :  { %14598 = shalt.err (!%p14595_p11)
}
  0x58   :  { %34 = dma.hbm_to_vmem [thread:$0]  %s15381_s0, 64, %s32_s16, [#allocation3]  }
  0x59   :  { %s14599_s22 = scalar_lea.hbm %s15384_s3, 1024 }
  0x5a   :  { %p14600_p12 = scmp.ne.s32.totalorder %s15384_s3, %s14599_s22  ;;  %p14603_p13 = scmp.lt.u32.totalorder %s14599_s22, %s15384_s3 }
  0x5c   :  { %p14605_p0 = pnand %p14603_p13, %p14600_p12 }
  0x5e   :  { %14608 = shalt.err (!%p14605_p0)
}
  0x5f   :  { %s14609_s29 = scalar_lea.vmem %s14880_s18, 1024  ;;  %p14614_p2 = scmp.lt.s32.totalorder %s14880_s18, %s14880_s18 }
  0x60   :  { %p14610_p1 = scmp.ne.s32.totalorder %s14880_s18, %s14609_s29  ;;  %p14615_p3 = scmp.lt.s32.totalorder %s14609_s29, %s14609_s29 }
  0x62   :  { %p14616_p4 = por %p14615_p3, %p14614_p2 }
  0x64   :  { %p14617_p5 = pnand %p14616_p4, %p14610_p1 }
  0x66   :  { %14620 = shalt.err (!%p14617_p5)
}
  0x67   :  { %s14751_s0 = smov 128   ;;  %s14752_s15 = smov 8  }
  0x68   :  { %58 = dma.hbm_to_vmem [thread:$0]  %s15384_s3, 1024, %s14880_s18, [#allocation6], %s14751_s0, %s14751_s0, %s14752_s15  }
  0x69   :  { %s14753_s19 = smov [#allocation10]   ;;  %s14621_s21 = scalar_lea.hbm %s15386_s5, 8192 }
  0x6a   :  { %s74_s20 = sshll.u32 %s14753_s19, 4  ;;  %p14622_p6 = scmp.ne.s32.totalorder %s15386_s5, %s14621_s21  ;;  %s75_s20 = int_to_ptr.vmem [resolvable:$true] %s74_s20 }
  0x6b   :  { %p14625_p7 = scmp.lt.u32.totalorder %s14621_s21, %s15386_s5 }
  0x6d   :  { %p14627_p8 = pnand %p14625_p7, %p14622_p6 }
  0x6f   :  { %14630 = shalt.err (!%p14627_p8)
}
  0x70   :  { %s14631_s26 = scalar_lea.vmem %s75_s20, 8192  ;;  %p14636_p10 = scmp.lt.s32.totalorder %s75_s20, %s75_s20 }
  0x71   :  { %p14632_p9 = scmp.ne.s32.totalorder %s75_s20, %s14631_s26  ;;  %p14637_p11 = scmp.lt.s32.totalorder %s14631_s26, %s14631_s26 }
  0x73   :  { %p14638_p12 = por %p14637_p11, %p14636_p10 }
  0x75   :  { %p14639_p13 = pnand %p14638_p12, %p14632_p9 }
  0x77   :  { %14642 = shalt.err (!%p14639_p13)
}
  0x78   :  { %s14754_s3 = smov 256   ;;  %s14755_s18 = smov 16  }
  0x79   :  { %80 = dma.hbm_to_vmem [thread:$0]  %s15386_s5, 8192, %s75_s20, [#allocation9], %s14754_s3, %s14754_s3, %s14755_s18  }
  0x7a   :  { %s14756_s22 = smov [#allocation13]   ;;  %s14643_s6 = scalar_lea.hbm %s15388_s7, 36864 }
  0x7b   :  { %s96_s28 = sshll.u32 %s14756_s22, 4  ;;  %p14644_p0 = scmp.ne.s32.totalorder %s15388_s7, %s14643_s6  ;;  %s97_s28 = int_to_ptr.vmem [resolvable:$true] %s96_s28 }
  0x7c   :  { %p14647_p1 = scmp.lt.u32.totalorder %s14643_s6, %s15388_s7 }
  0x7e   :  { %p14649_p2 = pnand %p14647_p1, %p14644_p0 }
  0x80   :  { %14652 = shalt.err (!%p14649_p2)
}
  0x81   :  { %s14653_s17 = scalar_lea.vmem %s97_s28, 36864  ;;  %p14658_p4 = scmp.lt.s32.totalorder %s97_s28, %s97_s28 }
  0x82   :  { %p14654_p3 = scmp.ne.s32.totalorder %s97_s28, %s14653_s17  ;;  %p14659_p5 = scmp.lt.s32.totalorder %s14653_s17, %s14653_s17 }
  0x84   :  { %p14660_p6 = por %p14659_p5, %p14658_p4 }
  0x86   :  { %p14661_p7 = pnand %p14660_p6, %p14654_p3 }
  0x88   :  { %14664 = shalt.err (!%p14661_p7)
}
  0x89   :  { %s14757_s5 = smov 576   ;;  %s14758_s19 = smov 36  }
  0x8a   :  { %102 = dma.hbm_to_vmem [thread:$0]  %s15388_s7, 36864, %s97_s28, [#allocation12], %s14757_s5, %s14757_s5, %s14758_s19  }
  0x8b   :  { %s14759_s24 = smov [#allocation16]   ;;  %s14665_s8 = scalar_lea.hbm %s15390_s9, 147456 }
  0x8c   :  { %s118_s21 = sshll.u32 %s14759_s24, 4  ;;  %p14666_p8 = scmp.ne.s32.totalorder %s15390_s9, %s14665_s8  ;;  %s119_s21 = int_to_ptr.vmem [resolvable:$true] %s118_s21 }
  0x8d   :  { %p14669_p9 = scmp.lt.u32.totalorder %s14665_s8, %s15390_s9 }
  0x8f   :  { %p14671_p10 = pnand %p14669_p9, %p14666_p8 }
  0x91   :  { %14674 = shalt.err (!%p14671_p10)
}
  0x92   :  { %s14675_s27 = scalar_lea.vmem %s119_s21, 147456  ;;  %p14680_p12 = scmp.lt.s32.totalorder %s119_s21, %s119_s21 }
  0x93   :  { %p14676_p11 = scmp.ne.s32.totalorder %s119_s21, %s14675_s27  ;;  %p14681_p13 = scmp.lt.s32.totalorder %s14675_s27, %s14675_s27 }
  0x95   :  { %p14682_p0 = por %p14681_p13, %p14680_p12 }
  0x97   :  { %p14683_p1 = pnand %p14682_p0, %p14676_p11 }
  0x99   :  { %14686 = shalt.err (!%p14683_p1)
}
  0x9a   :  { %s14760_s7 = smov 1024   ;;  %s14761_s2 = smov 64  }
  0x9b   :  { %124 = dma.hbm_to_vmem [thread:$0]  %s15390_s9, 147456, %s119_s21, [#allocation15], %s14760_s7, %s14760_s7, %s14761_s2  }
  0x9c   :  { %s14762_s30 = smov [#allocation17]   ;;  %s14687_s0 = scalar_lea.hbm %s15391_s10, 256 }
  0x9d   :  { %s131_s14 = sshll.u32 %s14762_s30, 4  ;;  %p14688_p2 = scmp.ne.s32.totalorder %s15391_s10, %s14687_s0  ;;  %s132_s14 = int_to_ptr.vmem [resolvable:$true] %s131_s14 }
  0x9e   :  { %p14691_p3 = scmp.lt.u32.totalorder %s14687_s0, %s15391_s10 }
  0xa0   :  { %p14693_p4 = pnand %p14691_p3, %p14688_p2 }
  0xa2   :  { %14696 = shalt.err (!%p14693_p4)
}
  0xa3   :  { %s14697_s19 = scalar_lea.vmem %s132_s14, 256  ;;  %p14702_p6 = scmp.lt.s32.totalorder %s132_s14, %s132_s14 }
  0xa4   :  { %p14698_p5 = scmp.ne.s32.totalorder %s132_s14, %s14697_s19  ;;  %p14703_p7 = scmp.lt.s32.totalorder %s14697_s19, %s14697_s19 }
  0xa6   :  { %p14704_p8 = por %p14703_p7, %p14702_p6 }
  0xa8   :  { %p14705_p9 = pnand %p14704_p8, %p14698_p5 }
  0xaa   :  { %14708 = shalt.err (!%p14705_p9)
}
  0xab   :  { %134 = dma.hbm_to_vmem [thread:$0]  %s15391_s10, 256, %s132_s14, [#allocation18]  }
  0xac   :  { %14731 = dma.done.wait [#allocation3], 64  }
  0xad   :  { %14732 = vsyncadd [#allocation3], 4294967232 }
  0xae   :  { %14733 = dma.done.wait [#allocation6], 1040  }
  0xaf   :  { %14734 = vsyncadd [#allocation6], 4294966256 }
  0xb0   :  { %14735 = dma.done.wait [#allocation9], 8224  }
  0xb1   :  { %14736 = vsyncadd [#allocation9], 4294959072 }
  0xb2   :  { %14737 = dma.done.wait [#allocation12], 36928  }
  0xb3   :  { %14738 = vsyncadd [#allocation12], 4294930368 }
  0xb4   :  { %14739 = dma.done.wait [#allocation15], 147600  }
  0xb5   :  { %14740 = vsyncadd [#allocation15], 4294819696 }
  0xb6   :  { %14741 = dma.done.wait [#allocation18], 256  }
  0xb7   :  { %14742 = vsyncadd [#allocation18], 4294967040  ;;  %v14763_v0 = vmov 0.0   ;;  %vm14764_vm0 = vmmov 0   ;;  %v13856_v1 = vld [vmem:[%s15382_s1] sm:$0xff]   ;;  %v13857_v2 = vld [vmem:[%s15382_s1 + $0x8] sm:$0xff]  }
  0xb8   :  { %13646 = vmatprep.subr.bf16.mxu0 %v14763_v0  ;;  %13662 = vmatprep.mubr.msk.bf16.mxu0 %vm14764_vm0, %v14763_v0  ;;  %v13858_v3 = vld [vmem:[%s15382_s1 + $0x10] sm:$0xff]   ;;  %v13859_v4 = vld [vmem:[%s15382_s1 + $0x18] sm:$0xff]   ;;  %v13860_v5 = vld [vmem:[%s15382_s1 + $0x20] sm:$0xff]   ;;  %v14765_v18 = vmov 0   ;;  %vm348_vm1 = vcmask 523264   ;;  %vm12044_vm3 = vcmask 7168  }
  0xb9   :  { %13647 = vmatpush3.bf16.msra.mxu0 %v13856_v1  ;;  %v13861_v6 = vld [vmem:[%s15382_s1 + $0x28] sm:$0xff]   ;;  %v13862_v7 = vld [vmem:[%s15382_s1 + $0x30] sm:$0xff]   ;;  %v13863_v8 = vld [vmem:[%s15382_s1 + $0x38] sm:$0xff]   ;;  %384 = vmatprep.mubr.bf16.mxu1 %v14765_v18 }
  0xba   :  { %13648 = vmatprep.subr.bf16.mxu0 %v14763_v0  ;;  %v166_v9 = vld [vmem:[#allocation2] sm:$0xf]  ;;  %v13864_v10 = vld [vmem:[#allocation7 + $0x4] ss:$8 sps:$4 sm:$0xff]   ;;  %v13866_v11 = vld [vmem:[#allocation7] ss:$8 sps:$4 sm:$0xff]  }
  0xbb   :  { %352 = vmatprep.subr.bf16.mxu1 %v13864_v10  ;;  %v13867_v12 = vld [vmem:[#allocation7 + $0x14] ss:$8 sps:$4 sm:$0xff]   ;;  %v13869_v13 = vld [vmem:[#allocation7 + $0x10] ss:$8 sps:$4 sm:$0xff]   ;;  %v13870_v14 = vld [vmem:[#allocation7 + $0x24] ss:$8 sps:$4 sm:$0xff]  }
  0xbc   :  { %353 = vmatpush1.bf16.msra.mxu1 %v13866_v11  ;;  %v13872_v15 = vld [vmem:[#allocation7 + $0x20] ss:$8 sps:$4 sm:$0xff]   ;;  %v13873_v16 = vld [vmem:[#allocation7 + $0x34] ss:$8 sps:$4 sm:$0xff]   ;;  %v13875_v17 = vld [vmem:[#allocation7 + $0x30] ss:$8 sps:$4 sm:$0xff]  }
  0xbd   :  { %13649 = vmatpush3.bf16.msra.mxu0 %v13857_v2  ;;  %354 = vmatprep.subr.bf16.mxu1 %v13867_v12  ;;  %v13878_v19 = vld [vmem:[#allocation10 + $0x4] ss:$16 sps:$4 sm:$0xff]   ;;  %v13879_v20 = vld [vmem:[#allocation10 + $0x8] ss:$16 sps:$4 sm:$0xff]   ;;  %v13881_v21 = vld [vmem:[#allocation10 + $0xc] ss:$16 sps:$4 sm:$0xff]  }
  0xbe   :  { %13650 = vmatprep.subr.bf16.mxu0 %v14763_v0  ;;  %v13887_v22 = vld [vmem:[#allocation10 + $0x2c] ss:$16 sps:$4 sm:$0xff]   ;;  %v13885_v23 = vld [vmem:[#allocation10 + $0x28] ss:$16 sps:$4 sm:$0xff]   ;;  %v13876_v47 = vld [vmem:[#allocation10] ss:$16 sps:$4 sm:$0xff]  }
  0xbf   :  { %v13893_v24 = vld [vmem:[#allocation10 + $0x4c] ss:$16 sps:$4 sm:$0xff]   ;;  %v13891_v25 = vld [vmem:[#allocation10 + $0x48] ss:$16 sps:$4 sm:$0xff]   ;;  %v13884_v49 = vld [vmem:[#allocation10 + $0x24] ss:$16 sps:$4 sm:$0xff]  }
  0xc0   :  { %355 = vmatpush1.bf16.msra.mxu1 %v13869_v13  ;;  %v13899_v26 = vld [vmem:[#allocation10 + $0x6c] ss:$16 sps:$4 sm:$0xff]   ;;  %v13897_v27 = vld [vmem:[#allocation10 + $0x68] ss:$16 sps:$4 sm:$0xff]   ;;  %v13882_v50 = vld [vmem:[#allocation10 + $0x20] ss:$16 sps:$4 sm:$0xff]  }
  0xc1   :  { %13651 = vmatpush3.bf16.msra.mxu0 %v13858_v3  ;;  %356 = vmatprep.subr.bf16.mxu1 %v13870_v14  ;;  %v13905_v28 = vld [vmem:[#allocation10 + $0x8c] ss:$16 sps:$4 sm:$0xff]   ;;  %v13903_v29 = vld [vmem:[#allocation10 + $0x88] ss:$16 sps:$4 sm:$0xff]   ;;  %v13890_v51 = vld [vmem:[#allocation10 + $0x44] ss:$16 sps:$4 sm:$0xff]  }
  0xc2   :  { %13652 = vmatprep.subr.bf16.mxu0 %v14763_v0  ;;  %v13911_v30 = vld [vmem:[#allocation10 + $0xac] ss:$16 sps:$4 sm:$0xff]   ;;  %v13909_v31 = vld [vmem:[#allocation10 + $0xa8] ss:$16 sps:$4 sm:$0xff]   ;;  %v13888_v52 = vld [vmem:[#allocation10 + $0x40] ss:$16 sps:$4 sm:$0xff]  }
  0xc3   :  { %v12070_v32 = vld [vmem:[#allocation5] ss:$0 sm:$0xff]  ;;  %v13896_v53 = vld [vmem:[#allocation10 + $0x64] ss:$16 sps:$4 sm:$0xff]   ;;  %v13894_v54 = vld [vmem:[#allocation10 + $0x60] ss:$16 sps:$4 sm:$0xff]  }
  0xc4   :  { %357 = vmatpush1.bf16.msra.mxu1 %v13872_v15  ;;  %v13902_v55 = vld [vmem:[#allocation10 + $0x84] ss:$16 sps:$4 sm:$0xff]   ;;  %v13900_v56 = vld [vmem:[#allocation10 + $0x80] ss:$16 sps:$4 sm:$0xff]   ;;  %v13917_v60 = vld [vmem:[#allocation10 + $0xcc] ss:$16 sps:$4 sm:$0xff]  }
  0xc5   :  { %13653 = vmatpush3.bf16.msra.mxu0 %v13859_v4  ;;  %358 = vmatprep.subr.bf16.mxu1 %v13873_v16  ;;  %v13908_v57 = vld [vmem:[#allocation10 + $0xa4] ss:$16 sps:$4 sm:$0xff]   ;;  %v13906_v58 = vld [vmem:[#allocation10 + $0xa0] ss:$16 sps:$4 sm:$0xff]   ;;  %v13915_v62 = vld [vmem:[#allocation10 + $0xc8] ss:$16 sps:$4 sm:$0xff]  }
  0xc6   :  { %13654 = vmatprep.subr.bf16.mxu0 %v14763_v0  ;;  %v13914_v59 = vld [vmem:[#allocation10 + $0xc4] ss:$16 sps:$4 sm:$0xff]   ;;  %v13912_v61 = vld [vmem:[#allocation10 + $0xc0] ss:$16 sps:$4 sm:$0xff]   ;;  %v13921_v2 = vld [vmem:[#allocation10 + $0xe8] ss:$16 sps:$4 sm:$0xff]  }
  0xc7   :  { %v13920_v63 = vld [vmem:[#allocation10 + $0xe4] ss:$16 sps:$4 sm:$0xff]   ;;  %v13918_v1 = vld [vmem:[#allocation10 + $0xe0] ss:$16 sps:$4 sm:$0xff]   ;;  %v13929_v4 = vld [vmem:[#allocation10 + $0x10c] ss:$16 sps:$4 sm:$0xff]  }
  0xc8   :  { %359 = vmatpush1.bf16.msra.mxu1 %v13875_v17  ;;  %v13926_v3 = vld [vmem:[#allocation10 + $0x104] ss:$16 sps:$4 sm:$0xff]   ;;  %v13933_v10 = vld [vmem:[#allocation10 + $0x128] ss:$16 sps:$4 sm:$0xff]   ;;  %v13941_v12 = vld [vmem:[#allocation10 + $0x14c] ss:$16 sps:$4 sm:$0xff]  }
  0xc9   :  { %13655 = vmatpush3.bf16.msra.mxu0 %v13860_v5  ;;  %819 = vmatprep.subr.bf16.mxu1 %v13878_v19  ;;  %v13924_v5 = vld [vmem:[#allocation10 + $0x100] ss:$16 sps:$4 sm:$0xff]   ;;  %v13938_v11 = vld [vmem:[#allocation10 + $0x144] ss:$16 sps:$4 sm:$0xff]   ;;  %v13939_v14 = vld [vmem:[#allocation10 + $0x148] ss:$16 sps:$4 sm:$0xff]  }
  0xca   :  { %13656 = vmatprep.subr.bf16.mxu0 %v14763_v0  ;;  %v13936_v13 = vld [vmem:[#allocation10 + $0x140] ss:$16 sps:$4 sm:$0xff]   ;;  %v13944_v15 = vld [vmem:[#allocation10 + $0x164] ss:$16 sps:$4 sm:$0xff]   ;;  %v13947_v16 = vld [vmem:[#allocation10 + $0x16c] ss:$16 sps:$4 sm:$0xff]  }
  0xcb   :  { %v13942_v17 = vld [vmem:[#allocation10 + $0x160] ss:$16 sps:$4 sm:$0xff]   ;;  %v13945_v19 = vld [vmem:[#allocation10 + $0x168] ss:$16 sps:$4 sm:$0xff]  }
  0xcd   :  { %13657 = vmatpush3.bf16.msra.mxu0 %v13861_v6  ;;  %v13927_v6 = vld [vmem:[#allocation10 + $0x108] ss:$16 sps:$4 sm:$0xff]  }
  0xce   :  { %13658 = vmatprep.subr.bf16.mxu0 %v14763_v0 }
  0xd1   :  { %13659 = vmatpush3.bf16.msra.mxu0 %v13862_v7  ;;  %v13932_v7 = vld [vmem:[#allocation10 + $0x124] ss:$16 sps:$4 sm:$0xff]  }
  0xd2   :  { %13660 = vmatprep.subr.bf16.mxu0 %v14763_v0  ;;  %v13923_v0 = vld [vmem:[#allocation10 + $0xec] ss:$16 sps:$4 sm:$0xff]  }
  0xd5   :  { %13661 = vmatpush3.bf16.msra.mxu0 %v13863_v8  ;;  %v13935_v8 = vld [vmem:[#allocation10 + $0x12c] ss:$16 sps:$4 sm:$0xff]  }
  0xd6   :  { %860 = vmatprep.subr.bf16.mxu0 %v13881_v21  ;;  %v13953_v21 = vld [vmem:[#allocation10 + $0x18c] ss:$16 sps:$4 sm:$0xff]  }
  0xd8   :  { %13663 = vmatmul.mubr.bf16.vlgmr.msra.gmra.mrb[0].mxu0 %v166_v9  ;;  %v13930_v9 = vld [vmem:[#allocation10 + $0x120] ss:$16 sps:$4 sm:$0xff]  }
  0xd9   :  { %861 = vmatpush1.bf16.msra.mxu0 %v13879_v20  ;;  %v13950_v20 = vld [vmem:[#allocation10 + $0x184] ss:$16 sps:$4 sm:$0xff]  }
  0xda   :  { %862 = vmatprep.subr.bf16.mxu0 %v13887_v22  ;;  %v13948_v22 = vld [vmem:[#allocation10 + $0x180] ss:$16 sps:$4 sm:$0xff]  }
  0xdd   :  { %863 = vmatpush1.bf16.msra.mxu0 %v13885_v23  ;;  %v13951_v23 = vld [vmem:[#allocation10 + $0x188] ss:$16 sps:$4 sm:$0xff]  }
  0xde   :  { %864 = vmatprep.subr.bf16.mxu0 %v13893_v24  ;;  %v13956_v24 = vld [vmem:[#allocation10 + $0x1a4] ss:$16 sps:$4 sm:$0xff]  }
  0xe1   :  { %865 = vmatpush1.bf16.msra.mxu0 %v13891_v25  ;;  %v13959_v25 = vld [vmem:[#allocation10 + $0x1ac] ss:$16 sps:$4 sm:$0xff]  }
  0xe2   :  { %866 = vmatprep.subr.bf16.mxu0 %v13899_v26  ;;  %v13954_v26 = vld [vmem:[#allocation10 + $0x1a0] ss:$16 sps:$4 sm:$0xff]  }
  0xe5   :  { %867 = vmatpush1.bf16.msra.mxu0 %v13897_v27  ;;  %v13957_v27 = vld [vmem:[#allocation10 + $0x1a8] ss:$16 sps:$4 sm:$0xff]  }
  0xe6   :  { %868 = vmatprep.subr.bf16.mxu0 %v13905_v28  ;;  %v13962_v28 = vld [vmem:[#allocation10 + $0x1c4] ss:$16 sps:$4 sm:$0xff]  }
  0xe9   :  { %869 = vmatpush1.bf16.msra.mxu0 %v13903_v29  ;;  %v13965_v29 = vld [vmem:[#allocation10 + $0x1cc] ss:$16 sps:$4 sm:$0xff]  }
  0xea   :  { %870 = vmatprep.subr.bf16.mxu0 %v13911_v30  ;;  %v13960_v30 = vld [vmem:[#allocation10 + $0x1c0] ss:$16 sps:$4 sm:$0xff]  }
  0xed   :  { %871 = vmatpush1.bf16.msra.mxu0 %v13909_v31  ;;  %v13963_v31 = vld [vmem:[#allocation10 + $0x1c8] ss:$16 sps:$4 sm:$0xff]  }
  0xee   :  { %872 = vmatprep.subr.bf16.mxu0 %v13917_v60 }
  0xf1   :  { %873 = vmatpush1.bf16.msra.mxu0 %v13915_v62 }
  0xf2   :  { %874 = vmatprep.subr.bf16.mxu0 %v13923_v0 }
  0xf5   :  { %875 = vmatpush1.bf16.msra.mxu0 %v13921_v2 }
  0xf6   :  { %876 = vmatprep.subr.bf16.mxu0 %v13929_v4 }
  0xf9   :  { %877 = vmatpush1.bf16.msra.mxu0 %v13927_v6  ;;  %v13972_v6 = vld [vmem:[#allocation13] ss:$36 sps:$4 sm:$0xff]  }
  0xfa   :  { %878 = vmatprep.subr.bf16.mxu0 %v13935_v8 }
  0xfd   :  { %879 = vmatpush1.bf16.msra.mxu0 %v13933_v10  ;;  %v13983_v10 = vld [vmem:[#allocation13 + $0x54] ss:$36 sps:$4 sm:$0xff]  }
  0xfe   :  { %880 = vmatprep.subr.bf16.mxu0 %v13941_v12  ;;  %v13981_v12 = vld [vmem:[#allocation13 + $0x50] ss:$36 sps:$4 sm:$0xff]  }
 0x101   :  { %881 = vmatpush1.bf16.msra.mxu0 %v13939_v14  ;;  %v13989_v14 = vld [vmem:[#allocation13 + $0x9c] ss:$36 sps:$4 sm:$0xff]  }
 0x102   :  { %882 = vmatprep.subr.bf16.mxu0 %v13947_v16  ;;  %v13987_v16 = vld [vmem:[#allocation13 + $0x98] ss:$36 sps:$4 sm:$0xff]  }
 0x105   :  { %883 = vmatpush1.bf16.msra.mxu0 %v13945_v19  ;;  %v13995_v19 = vld [vmem:[#allocation13 + $0xe4] ss:$36 sps:$4 sm:$0xff]  }
 0x106   :  { %884 = vmatprep.subr.bf16.mxu0 %v13953_v21  ;;  %v13993_v21 = vld [vmem:[#allocation13 + $0xe0] ss:$36 sps:$4 sm:$0xff]  }
 0x109   :  { %885 = vmatpush1.bf16.msra.mxu0 %v13951_v23  ;;  %v14001_v23 = vld [vmem:[#allocation13 + $0x12c] ss:$36 sps:$4 sm:$0xff]  }
 0x10a   :  { %886 = vmatprep.subr.bf16.mxu0 %v13959_v25  ;;  %v13999_v25 = vld [vmem:[#allocation13 + $0x128] ss:$36 sps:$4 sm:$0xff]  }
 0x10d   :  { %887 = vmatpush1.bf16.msra.mxu0 %v13957_v27  ;;  %v14007_v27 = vld [vmem:[#allocation13 + $0x174] ss:$36 sps:$4 sm:$0xff]  }
 0x10e   :  { %888 = vmatprep.subr.bf16.mxu0 %v13965_v29  ;;  %v14005_v29 = vld [vmem:[#allocation13 + $0x170] ss:$36 sps:$4 sm:$0xff]  }
 0x111   :  { %889 = vmatpush1.bf16.msra.mxu0 %v13963_v31  ;;  %v14013_v31 = vld [vmem:[#allocation13 + $0x1bc] ss:$36 sps:$4 sm:$0xff]  }
 0x1ab   :  { %v272_v33 = vpop.f32.mrb[0].mxu0 }
 0x1ac   :  { %v273_v34 = vadd.f32 %v12070_v32, %v272_v33  ;;  %v13664_v35 = vpop.f32.mrb[1].mxu0  ;;  %v13968_v32 = vld [vmem:[#allocation10 + $0x1e4] ss:$16 sps:$4 sm:$0xff]   ;;  %v13971_v33 = vld [vmem:[#allocation10 + $0x1ec] ss:$16 sps:$4 sm:$0xff]  }
 0x1ad   :  { %v275_v36 = vpop.f32.mrb[2].mxu0  ;;  %v13969_v35 = vld [vmem:[#allocation10 + $0x1e8] ss:$16 sps:$4 sm:$0xff]   ;;  %890 = vmatprep.subr.bf16.mxu0 %v13971_v33  ;;  %v14011_v33 = vld [vmem:[#allocation13 + $0x1b8] ss:$36 sps:$4 sm:$0xff]  }
 0x1ae   :  { %v278_v37 = vmin.f32 %v273_v34, 20.0  ;;  %v13665_v38 = vpop.f32.mrb[3].mxu0  ;;  %891 = vmatpush1.bf16.msra.mxu0 %v13969_v35  ;;  %v13974_v36 = vld [vmem:[#allocation13 + $0x4] ss:$36 sps:$4 sm:$0xff]  }
 0x1af   :  { %v298_v38 = vlaneseq  ;;  %v14019_v35 = vld [vmem:[#allocation13 + $0x204] ss:$36 sps:$4 sm:$0xff]  }
 0x1b0   :  { %v279_v39 = vmul.f32 1.442695, %v278_v37  ;;  %v13977_v37 = vld [vmem:[#allocation13 + $0xc] ss:$36 sps:$4 sm:$0xff]  }
 0x1b1   :  { %2864 = vmatprep.subr.bf16.mxu0 %v13977_v37  ;;  %v14017_v37 = vld [vmem:[#allocation13 + $0x200] ss:$36 sps:$4 sm:$0xff]  }
 0x1b2   :  { %14388 = vpow2.f32 %v279_v39  ;;  %v14985_v39 = vshrl.u32 %v298_v38, 7 }
 0x1bc   :  { %v14389_v40 = vpop.eup %14388 }
 0x1bd   :  { %v281_v41 = vadd.f32 2.0, %v14389_v40 }
 0x1bf   :  { %v282_v42 = vmul.f32 %v14389_v40, %v281_v41  ;;  %v14988_v40 = vsub.s32 0, %v14985_v39  ;;  %v296_v41 = vld [vmem:[#allocation8] sm:$0x3] }
 0x1c1   :  { %v284_v43 = vadd.f32 2.0, %v282_v42  ;;  %v283_v44 = vmul.f32 %v282_v42, %v273_v34  ;;  %v13966_v34 = vld [vmem:[#allocation10 + $0x1e0] ss:$16 sps:$4 sm:$0xff]   ;;  %v14991_v42 = vsub.s32 1, %v14985_v39 }
 0x1c3   :  { %14390 = vrcp.f32 %v284_v43  ;;  %v301_v43 = vrot.slane %v296_v41, %v14988_v40 }
 0x1cd   :  { %v14391_v45 = vpop.eup %14390 }
 0x1ce   :  { %v286_v46 = vmul.f32 %v14391_v45, %v283_v44  ;;  %v305_v44 = vrot.slane %v296_v41, %v14991_v42  ;;  %v14022_v41 = vld [vmem:[#allocation13 + $0x244] ss:$36 sps:$4 sm:$0xff]  }
 0x1d0   :  { %v287_v48 = vpack.c.bf16 %v286_v46, %v286_v46 }
 0x1d2   :  { %12087 = vmatmul.mubr.msk.bf16.vlgmr.msra.gmra.mrb[0].mxu1 %vm348_vm1, %v287_v48 }
 0x1d3   :  { %820 = vmatpush1.bf16.msra.mxu1 %v13876_v47 }
 0x1d4   :  { %821 = vmatprep.subr.bf16.mxu1 %v13884_v49 }
 0x1d7   :  { %822 = vmatpush1.bf16.msra.mxu1 %v13882_v50 }
 0x1d8   :  { %823 = vmatprep.subr.bf16.mxu1 %v13890_v51 }
 0x1db   :  { %824 = vmatpush1.bf16.msra.mxu1 %v13888_v52 }
 0x1dc   :  { %825 = vmatprep.subr.bf16.mxu1 %v13896_v53 }
 0x1df   :  { %826 = vmatpush1.bf16.msra.mxu1 %v13894_v54 }
 0x1e0   :  { %827 = vmatprep.subr.bf16.mxu1 %v13902_v55 }
 0x1e3   :  { %828 = vmatpush1.bf16.msra.mxu1 %v13900_v56 }
 0x1e4   :  { %829 = vmatprep.subr.bf16.mxu1 %v13908_v57 }
 0x1e7   :  { %830 = vmatpush1.bf16.msra.mxu1 %v13906_v58 }
 0x1e8   :  { %831 = vmatprep.subr.bf16.mxu1 %v13914_v59 }
 0x1eb   :  { %832 = vmatpush1.bf16.msra.mxu1 %v13912_v61 }
 0x1ec   :  { %833 = vmatprep.subr.bf16.mxu1 %v13920_v63 }
 0x1ef   :  { %834 = vmatpush1.bf16.msra.mxu1 %v13918_v1 }
 0x1f0   :  { %835 = vmatprep.subr.bf16.mxu1 %v13926_v3 }
 0x1f3   :  { %836 = vmatpush1.bf16.msra.mxu1 %v13924_v5 }
 0x1f4   :  { %837 = vmatprep.subr.bf16.mxu1 %v13932_v7  ;;  %v13975_v7 = vld [vmem:[#allocation13 + $0x8] ss:$36 sps:$4 sm:$0xff]  }
 0x1f7   :  { %838 = vmatpush1.bf16.msra.mxu1 %v13930_v9  ;;  %v13980_v9 = vld [vmem:[#allocation13 + $0x4c] ss:$36 sps:$4 sm:$0xff]  }
 0x1f8   :  { %839 = vmatprep.subr.bf16.mxu1 %v13938_v11  ;;  %v13978_v11 = vld [vmem:[#allocation13 + $0x48] ss:$36 sps:$4 sm:$0xff]  }
 0x1fb   :  { %840 = vmatpush1.bf16.msra.mxu1 %v13936_v13  ;;  %v13986_v13 = vld [vmem:[#allocation13 + $0x94] ss:$36 sps:$4 sm:$0xff]  }
 0x1fc   :  { %841 = vmatprep.subr.bf16.mxu1 %v13944_v15  ;;  %v13984_v15 = vld [vmem:[#allocation13 + $0x90] ss:$36 sps:$4 sm:$0xff]  }
 0x1ff   :  { %842 = vmatpush1.bf16.msra.mxu1 %v13942_v17  ;;  %v13992_v17 = vld [vmem:[#allocation13 + $0xdc] ss:$36 sps:$4 sm:$0xff]  }
 0x200   :  { %843 = vmatprep.subr.bf16.mxu1 %v13950_v20  ;;  %v13990_v20 = vld [vmem:[#allocation13 + $0xd8] ss:$36 sps:$4 sm:$0xff]  }
 0x203   :  { %844 = vmatpush1.bf16.msra.mxu1 %v13948_v22  ;;  %v13998_v22 = vld [vmem:[#allocation13 + $0x124] ss:$36 sps:$4 sm:$0xff]  }
 0x204   :  { %845 = vmatprep.subr.bf16.mxu1 %v13956_v24  ;;  %v13996_v24 = vld [vmem:[#allocation13 + $0x120] ss:$36 sps:$4 sm:$0xff]  }
 0x207   :  { %846 = vmatpush1.bf16.msra.mxu1 %v13954_v26  ;;  %v14004_v26 = vld [vmem:[#allocation13 + $0x16c] ss:$36 sps:$4 sm:$0xff]  }
 0x208   :  { %847 = vmatprep.subr.bf16.mxu1 %v13962_v28  ;;  %v14002_v28 = vld [vmem:[#allocation13 + $0x168] ss:$36 sps:$4 sm:$0xff]  }
 0x20b   :  { %848 = vmatpush1.bf16.msra.mxu1 %v13960_v30  ;;  %v14010_v30 = vld [vmem:[#allocation13 + $0x1b4] ss:$36 sps:$4 sm:$0xff]  }
 0x20c   :  { %849 = vmatprep.subr.bf16.mxu1 %v13968_v32  ;;  %v14008_v32 = vld [vmem:[#allocation13 + $0x1b0] ss:$36 sps:$4 sm:$0xff]  }
 0x20f   :  { %850 = vmatpush1.bf16.msra.mxu1 %v13966_v34  ;;  %v14016_v34 = vld [vmem:[#allocation13 + $0x1fc] ss:$36 sps:$4 sm:$0xff]  }
 0x210   :  { %2782 = vmatprep.subr.bf16.mxu1 %v13974_v36  ;;  %v14014_v36 = vld [vmem:[#allocation13 + $0x1f8] ss:$36 sps:$4 sm:$0xff]  }
 0x2a5   :  { %v386_v45 = vpop.f32.mrb[0].mxu1 }
 0x2a6   :  { %v387_v46 = vadd.f32 %v386_v45, %v301_v43  ;;  %v388_v47 = vpop.f32.mrb[1].mxu1  ;;  %v14025_v43 = vld [vmem:[#allocation13 + $0x24c] ss:$36 sps:$4 sm:$0xff]  }
 0x2a7   :  { %v389_v48 = vadd.f32 %v388_v47, %v305_v44  ;;  %v390_v49 = vpop.f32.mrb[2].mxu1  ;;  %v14020_v44 = vld [vmem:[#allocation13 + $0x240] ss:$36 sps:$4 sm:$0xff]   ;;  %v14023_v45 = vld [vmem:[#allocation13 + $0x248] ss:$36 sps:$4 sm:$0xff]  }
 0x2a8   :  { %v393_v50 = vmin.f32 %v387_v46, 20.0  ;;  %v391_v51 = vpop.f32.mrb[3].mxu1  ;;  %v14031_v47 = vld [vmem:[#allocation13 + $0x294] ss:$36 sps:$4 sm:$0xff]  }
 0x2a9   :  { %v394_v52 = vmin.f32 %v389_v48, 20.0  ;;  %v14029_v49 = vld [vmem:[#allocation13 + $0x290] ss:$36 sps:$4 sm:$0xff]   ;;  %v14037_v51 = vld [vmem:[#allocation13 + $0x2dc] ss:$36 sps:$4 sm:$0xff]  }
 0x2aa   :  { %v395_v53 = vmul.f32 1.442695, %v393_v50  ;;  %v14034_v50 = vld [vmem:[#allocation13 + $0x2d4] ss:$36 sps:$4 sm:$0xff]  }
 0x2ab   :  { %v397_v54 = vmul.f32 1.442695, %v394_v52  ;;  %v14032_v52 = vld [vmem:[#allocation13 + $0x2d0] ss:$36 sps:$4 sm:$0xff]  }
 0x2ac   :  { %14392 = vpow2.f32 %v395_v53  ;;  %v14035_v53 = vld [vmem:[#allocation13 + $0x2d8] ss:$36 sps:$4 sm:$0xff]  }
 0x2ad   :  { %14394 = vpow2.f32 %v397_v54  ;;  %v14040_v54 = vld [vmem:[#allocation13 + $0x31c] ss:$36 sps:$4 sm:$0xff]  }
 0x2b6   :  { %v14393_v55 = vpop.eup %14392 }
 0x2b7   :  { %v14395_v56 = vpop.eup %14394  ;;  %v399_v57 = vadd.f32 2.0, %v14393_v55 }
 0x2b8   :  { %v400_v58 = vadd.f32 2.0, %v14395_v56 }
 0x2b9   :  { %v401_v59 = vmul.f32 %v14393_v55, %v399_v57  ;;  %v14043_v55 = vld [vmem:[#allocation13 + $0x324] ss:$36 sps:$4 sm:$0xff]  }
 0x2ba   :  { %v402_v60 = vmul.f32 %v14395_v56, %v400_v58  ;;  %v14038_v56 = vld [vmem:[#allocation13 + $0x318] ss:$36 sps:$4 sm:$0xff]   ;;  %v14041_v57 = vld [vmem:[#allocation13 + $0x320] ss:$36 sps:$4 sm:$0xff]  }
 0x2bb   :  { %v405_v61 = vadd.f32 2.0, %v401_v59  ;;  %v403_v63 = vmul.f32 %v401_v59, %v387_v46  ;;  %v14028_v46 = vld [vmem:[#allocation13 + $0x28c] ss:$36 sps:$4 sm:$0xff]   ;;  %v14046_v58 = vld [vmem:[#allocation13 + $0x364] ss:$36 sps:$4 sm:$0xff]  }
 0x2bc   :  { %v406_v62 = vadd.f32 2.0, %v402_v60  ;;  %v404_v1 = vmul.f32 %v402_v60, %v389_v48  ;;  %v14026_v48 = vld [vmem:[#allocation13 + $0x288] ss:$36 sps:$4 sm:$0xff]   ;;  %v14044_v60 = vld [vmem:[#allocation13 + $0x360] ss:$36 sps:$4 sm:$0xff]  }
 0x2bd   :  { %14396 = vrcp.f32 %v405_v61  ;;  %v14049_v59 = vld [vmem:[#allocation13 + $0x36c] ss:$36 sps:$4 sm:$0xff]  }
 0x2be   :  { %14398 = vrcp.f32 %v406_v62  ;;  %v14047_v61 = vld [vmem:[#allocation13 + $0x368] ss:$36 sps:$4 sm:$0xff]  }
 0x2bf   :  { %v14052_v62 = vld [vmem:[#allocation13 + $0x3ac] ss:$36 sps:$4 sm:$0xff]  }
 0x2c7   :  { %v14397_v0 = vpop.eup %14396 }
 0x2c8   :  { %v14399_v2 = vpop.eup %14398  ;;  %v409_v3 = vmul.f32 %v14397_v0, %v403_v63  ;;  %v14055_v63 = vld [vmem:[#allocation13 + $0x3b4] ss:$36 sps:$4 sm:$0xff]   ;;  %v14050_v0 = vld [vmem:[#allocation13 + $0x3a8] ss:$36 sps:$4 sm:$0xff]  }
 0x2c9   :  { %v410_v4 = vmul.f32 %v14399_v2, %v404_v1  ;;  %v14053_v1 = vld [vmem:[#allocation13 + $0x3b0] ss:$36 sps:$4 sm:$0xff]  }
 0x2ca   :  { %v411_v8 = vpack.c.bf16 %v409_v3, %v409_v3  ;;  %v14058_v2 = vld [vmem:[#allocation13 + $0x3f4] ss:$36 sps:$4 sm:$0xff]   ;;  %v14061_v3 = vld [vmem:[#allocation13 + $0x3fc] ss:$36 sps:$4 sm:$0xff]  }
 0x2cb   :  { %v412_v5 = vpack.c.bf16 %v410_v4, %v410_v4  ;;  %v14056_v4 = vld [vmem:[#allocation13 + $0x3f0] ss:$36 sps:$4 sm:$0xff]  }
 0x2cd   :  { %851 = vmatprep.mubr.bf16.mxu1 %v412_v5  ;;  %892 = vmatprep.mubr.bf16.mxu0 %v412_v5  ;;  %v14059_v5 = vld [vmem:[#allocation13 + $0x3f8] ss:$36 sps:$4 sm:$0xff]  }
 0x2ce   :  { %852 = vmatmul.mubr.bf16.vlgmr.msra.gmra.mrb[4].mxu1 %v411_v8  ;;  %893 = vmatmul.mubr.bf16.vlgmr.msra.gmra.mrb[4].mxu0 %v411_v8  ;;  %v14062_v8 = vld [vmem:[#allocation13 + $0x438] ss:$36 sps:$4 sm:$0xff]  }
 0x2cf   :  { %2783 = vmatpush1.bf16.msra.mxu1 %v13972_v6  ;;  %2865 = vmatpush1.bf16.msra.mxu0 %v13975_v7  ;;  %v14064_v6 = vld [vmem:[#allocation13 + $0x43c] ss:$36 sps:$4 sm:$0xff]   ;;  %v14067_v7 = vld [vmem:[#allocation13 + $0x444] ss:$36 sps:$4 sm:$0xff]  }
 0x2d0   :  { %2784 = vmatprep.subr.bf16.mxu1 %v13980_v9  ;;  %2866 = vmatprep.subr.bf16.mxu0 %v13983_v10  ;;  %v14065_v9 = vld [vmem:[#allocation13 + $0x440] ss:$36 sps:$4 sm:$0xff]  }
 0x2d1   :  { %v14070_v10 = vld [vmem:[#allocation13 + $0x484] ss:$36 sps:$4 sm:$0xff]  }
 0x2d3   :  { %2785 = vmatpush1.bf16.msra.mxu1 %v13978_v11  ;;  %2867 = vmatpush1.bf16.msra.mxu0 %v13981_v12  ;;  %v14073_v11 = vld [vmem:[#allocation13 + $0x48c] ss:$36 sps:$4 sm:$0xff]   ;;  %v14995_v12 = vld [vmem:[#allocation11] sm:$0xf] }
 0x2d4   :  { %2786 = vmatprep.subr.bf16.mxu1 %v13986_v13  ;;  %2868 = vmatprep.subr.bf16.mxu0 %v13989_v14  ;;  %v14998_v13 = vsub.s32 3, %v14985_v39  ;;  %v482_v14 = vrot.slane %v14995_v12, %v14988_v40 }
 0x2d7   :  { %2787 = vmatpush1.bf16.msra.mxu1 %v13984_v15  ;;  %2869 = vmatpush1.bf16.msra.mxu0 %v13987_v16  ;;  %v486_v15 = vrot.slane %v14995_v12, %v14991_v42  ;;  %v494_v16 = vrot.slane %v14995_v12, %v14998_v13 }
 0x2d8   :  { %2788 = vmatprep.subr.bf16.mxu1 %v13992_v17  ;;  %2870 = vmatprep.subr.bf16.mxu0 %v13995_v19 }
 0x2db   :  { %2789 = vmatpush1.bf16.msra.mxu1 %v13990_v20  ;;  %2871 = vmatpush1.bf16.msra.mxu0 %v13993_v21 }
 0x2dc   :  { %2790 = vmatprep.subr.bf16.mxu1 %v13998_v22  ;;  %2872 = vmatprep.subr.bf16.mxu0 %v14001_v23 }
 0x2df   :  { %2791 = vmatpush1.bf16.msra.mxu1 %v13996_v24  ;;  %2873 = vmatpush1.bf16.msra.mxu0 %v13999_v25 }
 0x2e0   :  { %2792 = vmatprep.subr.bf16.mxu1 %v14004_v26  ;;  %2874 = vmatprep.subr.bf16.mxu0 %v14007_v27 }
 0x2e3   :  { %2793 = vmatpush1.bf16.msra.mxu1 %v14002_v28  ;;  %2875 = vmatpush1.bf16.msra.mxu0 %v14005_v29 }
 0x2e4   :  { %2794 = vmatprep.subr.bf16.mxu1 %v14010_v30  ;;  %2876 = vmatprep.subr.bf16.mxu0 %v14013_v31 }
 0x2e7   :  { %2795 = vmatpush1.bf16.msra.mxu1 %v14008_v32  ;;  %2877 = vmatpush1.bf16.msra.mxu0 %v14011_v33 }
 0x2e8   :  { %2796 = vmatprep.subr.bf16.mxu1 %v14016_v34  ;;  %2878 = vmatprep.subr.bf16.mxu0 %v14019_v35 }
 0x2eb   :  { %2797 = vmatpush1.bf16.msra.mxu1 %v14014_v36  ;;  %2879 = vmatpush1.bf16.msra.mxu0 %v14017_v37 }
 0x2ec   :  { %2798 = vmatprep.subr.bf16.mxu1 %v14022_v41  ;;  %2880 = vmatprep.subr.bf16.mxu0 %v14025_v43 }
 0x2ef   :  { %2799 = vmatpush1.bf16.msra.mxu1 %v14020_v44  ;;  %2881 = vmatpush1.bf16.msra.mxu0 %v14023_v45 }
 0x2f0   :  { %2800 = vmatprep.subr.bf16.mxu1 %v14028_v46  ;;  %2882 = vmatprep.subr.bf16.mxu0 %v14031_v47 }
 0x2f3   :  { %2801 = vmatpush1.bf16.msra.mxu1 %v14026_v48  ;;  %2883 = vmatpush1.bf16.msra.mxu0 %v14029_v49 }
 0x2f4   :  { %2802 = vmatprep.subr.bf16.mxu1 %v14034_v50  ;;  %2884 = vmatprep.subr.bf16.mxu0 %v14037_v51 }
 0x2f7   :  { %2803 = vmatpush1.bf16.msra.mxu1 %v14032_v52  ;;  %2885 = vmatpush1.bf16.msra.mxu0 %v14035_v53 }
 0x2f8   :  { %2804 = vmatprep.subr.bf16.mxu1 %v14040_v54  ;;  %2886 = vmatprep.subr.bf16.mxu0 %v14043_v55 }
 0x2fb   :  { %2805 = vmatpush1.bf16.msra.mxu1 %v14038_v56  ;;  %2887 = vmatpush1.bf16.msra.mxu0 %v14041_v57 }
 0x2fc   :  { %2806 = vmatprep.subr.bf16.mxu1 %v14046_v58  ;;  %2888 = vmatprep.subr.bf16.mxu0 %v14049_v59 }
 0x2ff   :  { %2807 = vmatpush1.bf16.msra.mxu1 %v14044_v60  ;;  %2889 = vmatpush1.bf16.msra.mxu0 %v14047_v61  ;;  %v14068_v61 = vld [vmem:[#allocation13 + $0x480] ss:$36 sps:$4 sm:$0xff]  }
 0x300   :  { %2808 = vmatprep.subr.bf16.mxu1 %v14052_v62  ;;  %2890 = vmatprep.subr.bf16.mxu0 %v14055_v63  ;;  %v14071_v62 = vld [vmem:[#allocation13 + $0x488] ss:$36 sps:$4 sm:$0xff]  }
 0x303   :  { %2809 = vmatpush1.bf16.msra.mxu1 %v14050_v0  ;;  %2891 = vmatpush1.bf16.msra.mxu0 %v14053_v1  ;;  %v14076_v0 = vld [vmem:[#allocation13 + $0x4cc] ss:$36 sps:$4 sm:$0xff]   ;;  %v14079_v1 = vld [vmem:[#allocation13 + $0x4d4] ss:$36 sps:$4 sm:$0xff]  }
 0x304   :  { %2810 = vmatprep.subr.bf16.mxu1 %v14058_v2  ;;  %2892 = vmatprep.subr.bf16.mxu0 %v14061_v3  ;;  %v15015_v2 = vsub.s32 2, %v14985_v39 }
 0x307   :  { %2811 = vmatpush1.bf16.msra.mxu1 %v14056_v4  ;;  %2893 = vmatpush1.bf16.msra.mxu0 %v14059_v5  ;;  %v14074_v4 = vld [vmem:[#allocation13 + $0x4c8] ss:$36 sps:$4 sm:$0xff]   ;;  %v14077_v5 = vld [vmem:[#allocation13 + $0x4d0] ss:$36 sps:$4 sm:$0xff]  }
 0x308   :  { %2812 = vmatprep.subr.bf16.mxu1 %v14064_v6  ;;  %2894 = vmatprep.subr.bf16.mxu0 %v14067_v7  ;;  %v14082_v6 = vld [vmem:[#allocation13 + $0x514] ss:$36 sps:$4 sm:$0xff]   ;;  %v14085_v7 = vld [vmem:[#allocation13 + $0x51c] ss:$36 sps:$4 sm:$0xff]  }
 0x30b   :  { %2813 = vmatpush1.bf16.msra.mxu1 %v14062_v8  ;;  %2895 = vmatpush1.bf16.msra.mxu0 %v14065_v9  ;;  %v490_v8 = vrot.slane %v14995_v12, %v15015_v2  ;;  %v14080_v9 = vld [vmem:[#allocation13 + $0x510] ss:$36 sps:$4 sm:$0xff]  }
 0x30c   :  { %2823 = vmatprep.subr.bf16.mxu1 %v14070_v10  ;;  %2905 = vmatprep.subr.bf16.mxu0 %v14073_v11  ;;  %v14083_v10 = vld [vmem:[#allocation13 + $0x518] ss:$36 sps:$4 sm:$0xff]  }
 0x30d   :  { %v14088_v11 = vld [vmem:[#allocation13 + $0x55c] ss:$36 sps:$4 sm:$0xff]  }
 0x3a1   :  { %v853_v17 = vpop.f32.mrb[4].mxu1  ;;  %v15006_v19 = vpop.f32.mrb[4].mxu0 }
 0x3a2   :  { %v854_v20 = vadd.f32 %v853_v17, %v482_v14  ;;  %v855_v21 = vpop.f32.mrb[5].mxu1  ;;  %v896_v22 = vpop.f32.mrb[5].mxu0  ;;  %v14091_v14 = vld [vmem:[#allocation13 + $0x564] ss:$36 sps:$4 sm:$0xff]  }
 0x3a3   :  { %v856_v23 = vadd.f32 %v855_v21, %v486_v15  ;;  %v897_v24 = vadd.f32 %v896_v22, %v494_v16  ;;  %v857_v25 = vpop.f32.mrb[6].mxu1  ;;  %v898_v26 = vpop.f32.mrb[6].mxu0  ;;  %v15026_v15 = vadd.f32 %v15006_v19, %v490_v8  ;;  %v14086_v16 = vld [vmem:[#allocation13 + $0x558] ss:$36 sps:$4 sm:$0xff]   ;;  %v14089_v17 = vld [vmem:[#allocation13 + $0x560] ss:$36 sps:$4 sm:$0xff]  }
 0x3a4   :  { %v901_v27 = vmin.f32 %v854_v20, 20.0  ;;  %v858_v28 = vpop.f32.mrb[7].mxu1  ;;  %v899_v29 = vpop.f32.mrb[7].mxu0  ;;  %v14097_v21 = vld [vmem:[#allocation13 + $0x5ac] ss:$36 sps:$4 sm:$0xff]  }
 0x3a5   :  { %v902_v30 = vmin.f32 %v856_v23, 20.0  ;;  %v904_v31 = vmin.f32 %v897_v24, 20.0  ;;  %v903_v12 = vmin.f32 %v15026_v15, 20.0  ;;  %v14092_v22 = vld [vmem:[#allocation13 + $0x5a0] ss:$36 sps:$4 sm:$0xff]  }
 0x3a6   :  { %v905_v32 = vmul.f32 1.442695, %v901_v27  ;;  %v14103_v25 = vld [vmem:[#allocation13 + $0x5f4] ss:$36 sps:$4 sm:$0xff]   ;;  %v14098_v26 = vld [vmem:[#allocation13 + $0x5e8] ss:$36 sps:$4 sm:$0xff]  }
 0x3a7   :  { %v907_v33 = vmul.f32 1.442695, %v902_v30  ;;  %v911_v34 = vmul.f32 1.442695, %v904_v31  ;;  %v909_v19 = vmul.f32 1.442695, %v903_v12 }
 0x3a8   :  { %14400 = vpow2.f32 %v905_v32  ;;  %v14101_v27 = vld [vmem:[#allocation13 + $0x5f0] ss:$36 sps:$4 sm:$0xff]   ;;  %v14109_v29 = vld [vmem:[#allocation13 + $0x63c] ss:$36 sps:$4 sm:$0xff]  }
 0x3a9   :  { %14402 = vpow2.f32 %v907_v33  ;;  %v14106_v28 = vld [vmem:[#allocation13 + $0x634] ss:$36 sps:$4 sm:$0xff]   ;;  %v14112_v32 = vld [vmem:[#allocation13 + $0x67c] ss:$36 sps:$4 sm:$0xff]   ;;  %v14115_v33 = vld [vmem:[#allocation13 + $0x684] ss:$36 sps:$4 sm:$0xff]  }
 0x3aa   :  { %14404 = vpow2.f32 %v911_v34  ;;  %v14104_v30 = vld [vmem:[#allocation13 + $0x630] ss:$36 sps:$4 sm:$0xff]   ;;  %v14107_v31 = vld [vmem:[#allocation13 + $0x638] ss:$36 sps:$4 sm:$0xff]   ;;  %v14161_v12 = vld [vmem:[#allocation13 + $0x8c0] ss:$36 sps:$4 sm:$0xff]  }
 0x3ab   :  { %v14110_v34 = vld [vmem:[#allocation13 + $0x678] ss:$36 sps:$4 sm:$0xff]  }
 0x3ac   :  { %v14154_v8 = vld [vmem:[#allocation13 + $0x874] ss:$36 sps:$4 sm:$0xff]  }
 0x3b2   :  { %v14401_v35 = vpop.eup %14400 }
 0x3b3   :  { %v913_v36 = vadd.f32 2.0, %v14401_v35  ;;  %v14403_v37 = vpop.eup %14402 }
 0x3b4   :  { %v14405_v41 = vpop.eup %14404  ;;  %v914_v44 = vadd.f32 2.0, %v14403_v37 }
 0x3b5   :  { %v917_v43 = vmul.f32 %v14401_v35, %v913_v36  ;;  %v916_v45 = vadd.f32 2.0, %v14405_v41  ;;  %v14113_v35 = vld [vmem:[#allocation13 + $0x680] ss:$36 sps:$4 sm:$0xff]  }
 0x3b6   :  { %v918_v47 = vmul.f32 %v14403_v37, %v914_v44  ;;  %v14118_v36 = vld [vmem:[#allocation13 + $0x6c4] ss:$36 sps:$4 sm:$0xff]   ;;  %v14121_v37 = vld [vmem:[#allocation13 + $0x6cc] ss:$36 sps:$4 sm:$0xff]  }
 0x3b7   :  { %v925_v46 = vadd.f32 2.0, %v917_v43  ;;  %v920_v48 = vmul.f32 %v14405_v41, %v916_v45  ;;  %v921_v52 = vmul.f32 %v917_v43, %v854_v20  ;;  %v14094_v20 = vld [vmem:[#allocation13 + $0x5a4] ss:$36 sps:$4 sm:$0xff]   ;;  %v14124_v45 = vld [vmem:[#allocation13 + $0x70c] ss:$36 sps:$4 sm:$0xff]  }
 0x3b8   :  { %v926_v49 = vadd.f32 2.0, %v918_v47  ;;  %v922_v53 = vmul.f32 %v918_v47, %v856_v23  ;;  %v14095_v23 = vld [vmem:[#allocation13 + $0x5a8] ss:$36 sps:$4 sm:$0xff]   ;;  %v14116_v41 = vld [vmem:[#allocation13 + $0x6c0] ss:$36 sps:$4 sm:$0xff]  }
 0x3b9   :  { %14406 = vrcp.f32 %v925_v46  ;;  %v928_v50 = vadd.f32 2.0, %v920_v48  ;;  %v924_v56 = vmul.f32 %v920_v48, %v897_v24  ;;  %v14100_v24 = vld [vmem:[#allocation13 + $0x5ec] ss:$36 sps:$4 sm:$0xff]   ;;  %v14127_v46 = vld [vmem:[#allocation13 + $0x714] ss:$36 sps:$4 sm:$0xff]  }
 0x3ba   :  { %14408 = vrcp.f32 %v926_v49  ;;  %v14119_v43 = vld [vmem:[#allocation13 + $0x6c8] ss:$36 sps:$4 sm:$0xff]   ;;  %v14125_v49 = vld [vmem:[#allocation13 + $0x710] ss:$36 sps:$4 sm:$0xff]  }
 0x3bb   :  { %14410 = vrcp.f32 %v928_v50  ;;  %v14122_v48 = vld [vmem:[#allocation13 + $0x708] ss:$36 sps:$4 sm:$0xff]   ;;  %v14130_v50 = vld [vmem:[#allocation13 + $0x754] ss:$36 sps:$4 sm:$0xff]  }
 0x3bc   :  { %14412 = vpow2.f32 %v909_v19 }
 0x3c3   :  { %v14407_v51 = vpop.eup %14406 }
 0x3c4   :  { %v14409_v54 = vpop.eup %14408  ;;  %v933_v55 = vmul.f32 %v14407_v51, %v921_v52  ;;  %v14133_v51 = vld [vmem:[#allocation13 + $0x75c] ss:$36 sps:$4 sm:$0xff]  }
 0x3c5   :  { %v14411_v57 = vpop.eup %14410  ;;  %v934_v58 = vmul.f32 %v14409_v54, %v922_v53  ;;  %v14128_v53 = vld [vmem:[#allocation13 + $0x750] ss:$36 sps:$4 sm:$0xff]   ;;  %v14131_v54 = vld [vmem:[#allocation13 + $0x758] ss:$36 sps:$4 sm:$0xff]  }
 0x3c6   :  { %v936_v59 = vmul.f32 %v14411_v57, %v924_v56  ;;  %v15010_v63 = vpack.c.bf16 %v933_v55, %v933_v55  ;;  %v14413_v44 = vpop.eup %14412  ;;  %v14136_v55 = vld [vmem:[#allocation13 + $0x79c] ss:$36 sps:$4 sm:$0xff]   ;;  %v14139_v56 = vld [vmem:[#allocation13 + $0x7a4] ss:$36 sps:$4 sm:$0xff]  }
 0x3c7   :  { %v15008_v60 = vpack.c.bf16 %v934_v58, %v934_v58  ;;  %v915_v47 = vadd.f32 2.0, %v14413_v44  ;;  %v14134_v58 = vld [vmem:[#allocation13 + $0x798] ss:$36 sps:$4 sm:$0xff]  }
 0x3c8   :  { %v15017_v3 = vpack.c.bf16 %v936_v59, %v936_v59  ;;  %v14137_v59 = vld [vmem:[#allocation13 + $0x7a0] ss:$36 sps:$4 sm:$0xff]  }
 0x3c9   :  { %2814 = vmatprep.mubr.bf16.mxu1 %v15008_v60  ;;  %2896 = vmatprep.mubr.bf16.mxu0 %v15008_v60  ;;  %v919_v52 = vmul.f32 %v14413_v44, %v915_v47  ;;  %v14188_v44 = vld [vmem:[#allocation13 + $0x130] ss:$36 sps:$4 sm:$0xff]   ;;  %v14199_v47 = vld [vmem:[#allocation13 + $0x184] ss:$36 sps:$4 sm:$0xff]  }
 0x3ca   :  { %2815 = vmatmul.mubr.bf16.vlgmr.msra.gmra.mrb[8].mxu1 %v15010_v63  ;;  %2897 = vmatmul.mubr.bf16.vlgmr.msra.gmra.mrb[8].mxu0 %v15010_v63 }
 0x3cb   :  { %2824 = vmatpush1.bf16.msra.mxu1 %v14068_v61  ;;  %2906 = vmatpush1.bf16.msra.mxu0 %v14071_v62  ;;  %v927_v57 = vadd.f32 2.0, %v919_v52  ;;  %v14142_v61 = vld [vmem:[#allocation13 + $0x7e4] ss:$36 sps:$4 sm:$0xff]   ;;  %v14145_v62 = vld [vmem:[#allocation13 + $0x7ec] ss:$36 sps:$4 sm:$0xff]  }
 0x3cc   :  { %2855 = vmatprep.mubr.bf16.mxu1 %v15017_v3  ;;  %2937 = vmatprep.mubr.bf16.mxu0 %v15017_v3 }
 0x3cd   :  { %2825 = vmatprep.subr.bf16.mxu1 %v14076_v0  ;;  %2907 = vmatprep.subr.bf16.mxu0 %v14079_v1  ;;  %14414 = vrcp.f32 %v927_v57  ;;  %v14140_v0 = vld [vmem:[#allocation13 + $0x7e0] ss:$36 sps:$4 sm:$0xff]   ;;  %v14143_v1 = vld [vmem:[#allocation13 + $0x7e8] ss:$36 sps:$4 sm:$0xff]   ;;  %v14209_v57 = vld [vmem:[#allocation13 + $0x210] ss:$36 sps:$4 sm:$0xff]  }
 0x3cf   :  { %2826 = vmatpush1.bf16.msra.mxu1 %v14074_v4  ;;  %2908 = vmatpush1.bf16.msra.mxu0 %v14077_v5  ;;  %v14148_v4 = vld [vmem:[#allocation13 + $0x82c] ss:$36 sps:$4 sm:$0xff]   ;;  %v14151_v5 = vld [vmem:[#allocation13 + $0x834] ss:$36 sps:$4 sm:$0xff]  }
 0x3d0   :  { %2827 = vmatprep.subr.bf16.mxu1 %v14082_v6  ;;  %2909 = vmatprep.subr.bf16.mxu0 %v14085_v7  ;;  %v14146_v6 = vld [vmem:[#allocation13 + $0x828] ss:$36 sps:$4 sm:$0xff]   ;;  %v14149_v7 = vld [vmem:[#allocation13 + $0x830] ss:$36 sps:$4 sm:$0xff]  }
 0x3d3   :  { %2828 = vmatpush1.bf16.msra.mxu1 %v14080_v9  ;;  %2910 = vmatpush1.bf16.msra.mxu0 %v14083_v10  ;;  %v14157_v9 = vld [vmem:[#allocation13 + $0x87c] ss:$36 sps:$4 sm:$0xff]   ;;  %v14152_v10 = vld [vmem:[#allocation13 + $0x870] ss:$36 sps:$4 sm:$0xff]  }
 0x3d4   :  { %2829 = vmatprep.subr.bf16.mxu1 %v14088_v11  ;;  %2911 = vmatprep.subr.bf16.mxu0 %v14091_v14  ;;  %v14155_v11 = vld [vmem:[#allocation13 + $0x878] ss:$36 sps:$4 sm:$0xff]  }
 0x3d5   :  { %v14160_v14 = vld [vmem:[#allocation13 + $0x8bc] ss:$36 sps:$4 sm:$0xff]  }
 0x3d7   :  { %2830 = vmatpush1.bf16.msra.mxu1 %v14086_v16  ;;  %2912 = vmatpush1.bf16.msra.mxu0 %v14089_v17  ;;  %v14163_v16 = vld [vmem:[#allocation13 + $0x8c4] ss:$36 sps:$4 sm:$0xff]   ;;  %v14415_v17 = vpop.eup %14414 }
 0x3d8   :  { %2831 = vmatprep.subr.bf16.mxu1 %v14094_v20  ;;  %2913 = vmatprep.subr.bf16.mxu0 %v14097_v21  ;;  %v923_v20 = vmul.f32 %v919_v52, %v15026_v15  ;;  %v14158_v21 = vld [vmem:[#allocation13 + $0x8b8] ss:$36 sps:$4 sm:$0xff]   ;;  %v14200_v52 = vld [vmem:[#allocation13 + $0x1c0] ss:$36 sps:$4 sm:$0xff]  }
 0x3d9   :  { %v14170_v15 = vld [vmem:[#allocation13 + $0x58] ss:$36 sps:$4 sm:$0xff]  }
 0x3db   :  { %2832 = vmatpush1.bf16.msra.mxu1 %v14092_v22  ;;  %2914 = vmatpush1.bf16.msra.mxu0 %v14095_v23  ;;  %v935_v22 = vmul.f32 %v14415_v17, %v923_v20  ;;  %v14166_v23 = vld [vmem:[#allocation13 + $0x14] ss:$36 sps:$4 sm:$0xff]   ;;  %v14241_v20 = vld [vmem:[#allocation13 + $0x37c] ss:$36 sps:$4 sm:$0xff]  }
 0x3dc   :  { %2833 = vmatprep.subr.bf16.mxu1 %v14100_v24  ;;  %2915 = vmatprep.subr.bf16.mxu0 %v14103_v25  ;;  %v14169_v24 = vld [vmem:[#allocation13 + $0x1c] ss:$36 sps:$4 sm:$0xff]   ;;  %v14164_v25 = vld [vmem:[#allocation13 + $0x10] ss:$36 sps:$4 sm:$0xff]  }
 0x3dd   :  { %v15030_v19 = vpack.c.bf16 %v935_v22, %v935_v22  ;;  %v14238_v17 = vld [vmem:[#allocation13 + $0x374] ss:$36 sps:$4 sm:$0xff]   ;;  %v14244_v22 = vld [vmem:[#allocation13 + $0x3bc] ss:$36 sps:$4 sm:$0xff]  }
 0x3df   :  { %2834 = vmatpush1.bf16.msra.mxu1 %v14098_v26  ;;  %2916 = vmatpush1.bf16.msra.mxu0 %v14101_v27  ;;  %v14167_v26 = vld [vmem:[#allocation13 + $0x18] ss:$36 sps:$4 sm:$0xff]  }
 0x3e0   :  { %2835 = vmatprep.subr.bf16.mxu1 %v14106_v28  ;;  %2917 = vmatprep.subr.bf16.mxu0 %v14109_v29  ;;  %v14172_v27 = vld [vmem:[#allocation13 + $0x5c] ss:$36 sps:$4 sm:$0xff]   ;;  %v14175_v28 = vld [vmem:[#allocation13 + $0x64] ss:$36 sps:$4 sm:$0xff]  }
 0x3e1   :  { %v14173_v29 = vld [vmem:[#allocation13 + $0x60] ss:$36 sps:$4 sm:$0xff]  }
 0x3e3   :  { %2836 = vmatpush1.bf16.msra.mxu1 %v14104_v30  ;;  %2918 = vmatpush1.bf16.msra.mxu0 %v14107_v31  ;;  %v14178_v30 = vld [vmem:[#allocation13 + $0xa4] ss:$36 sps:$4 sm:$0xff]   ;;  %v14181_v31 = vld [vmem:[#allocation13 + $0xac] ss:$36 sps:$4 sm:$0xff]  }
 0x3e4   :  { %2837 = vmatprep.subr.bf16.mxu1 %v14112_v32  ;;  %2919 = vmatprep.subr.bf16.mxu0 %v14115_v33  ;;  %v14176_v32 = vld [vmem:[#allocation13 + $0xa0] ss:$36 sps:$4 sm:$0xff]   ;;  %v14179_v33 = vld [vmem:[#allocation13 + $0xa8] ss:$36 sps:$4 sm:$0xff]  }
 0x3e7   :  { %2838 = vmatpush1.bf16.msra.mxu1 %v14110_v34  ;;  %2920 = vmatpush1.bf16.msra.mxu0 %v14113_v35  ;;  %v14184_v34 = vld [vmem:[#allocation13 + $0xec] ss:$36 sps:$4 sm:$0xff]   ;;  %v14187_v35 = vld [vmem:[#allocation13 + $0xf4] ss:$36 sps:$4 sm:$0xff]  }
 0x3e8   :  { %2839 = vmatprep.subr.bf16.mxu1 %v14118_v36  ;;  %2921 = vmatprep.subr.bf16.mxu0 %v14121_v37  ;;  %v14182_v36 = vld [vmem:[#allocation13 + $0xe8] ss:$36 sps:$4 sm:$0xff]   ;;  %v14185_v37 = vld [vmem:[#allocation13 + $0xf0] ss:$36 sps:$4 sm:$0xff]  }
 0x3eb   :  { %2840 = vmatpush1.bf16.msra.mxu1 %v14116_v41  ;;  %2922 = vmatpush1.bf16.msra.mxu0 %v14119_v43  ;;  %v14190_v41 = vld [vmem:[#allocation13 + $0x134] ss:$36 sps:$4 sm:$0xff]   ;;  %v14193_v43 = vld [vmem:[#allocation13 + $0x13c] ss:$36 sps:$4 sm:$0xff]  }
 0x3ec   :  { %2841 = vmatprep.subr.bf16.mxu1 %v14124_v45  ;;  %2923 = vmatprep.subr.bf16.mxu0 %v14127_v46  ;;  %v14191_v45 = vld [vmem:[#allocation13 + $0x138] ss:$36 sps:$4 sm:$0xff]  }
 0x3ed   :  { %v14196_v46 = vld [vmem:[#allocation13 + $0x17c] ss:$36 sps:$4 sm:$0xff]  }
 0x3ef   :  { %2842 = vmatpush1.bf16.msra.mxu1 %v14122_v48  ;;  %2924 = vmatpush1.bf16.msra.mxu0 %v14125_v49  ;;  %v14194_v48 = vld [vmem:[#allocation13 + $0x178] ss:$36 sps:$4 sm:$0xff]   ;;  %v14197_v49 = vld [vmem:[#allocation13 + $0x180] ss:$36 sps:$4 sm:$0xff]  }
 0x3f0   :  { %2843 = vmatprep.subr.bf16.mxu1 %v14130_v50  ;;  %2925 = vmatprep.subr.bf16.mxu0 %v14133_v51  ;;  %v14202_v50 = vld [vmem:[#allocation13 + $0x1c4] ss:$36 sps:$4 sm:$0xff]   ;;  %v14205_v51 = vld [vmem:[#allocation13 + $0x1cc] ss:$36 sps:$4 sm:$0xff]  }
 0x3f3   :  { %2844 = vmatpush1.bf16.msra.mxu1 %v14128_v53  ;;  %2926 = vmatpush1.bf16.msra.mxu0 %v14131_v54  ;;  %v14203_v53 = vld [vmem:[#allocation13 + $0x1c8] ss:$36 sps:$4 sm:$0xff]  }
 0x3f4   :  { %2845 = vmatprep.subr.bf16.mxu1 %v14136_v55  ;;  %2927 = vmatprep.subr.bf16.mxu0 %v14139_v56  ;;  %v14208_v54 = vld [vmem:[#allocation13 + $0x20c] ss:$36 sps:$4 sm:$0xff]   ;;  %v14211_v55 = vld [vmem:[#allocation13 + $0x214] ss:$36 sps:$4 sm:$0xff]  }
 0x3f5   :  { %v14206_v56 = vld [vmem:[#allocation13 + $0x208] ss:$36 sps:$4 sm:$0xff]  }
 0x3f7   :  { %2846 = vmatpush1.bf16.msra.mxu1 %v14134_v58  ;;  %2928 = vmatpush1.bf16.msra.mxu0 %v14137_v59  ;;  %v14214_v58 = vld [vmem:[#allocation13 + $0x254] ss:$36 sps:$4 sm:$0xff]   ;;  %v14217_v59 = vld [vmem:[#allocation13 + $0x25c] ss:$36 sps:$4 sm:$0xff]  }
 0x3f8   :  { %2847 = vmatprep.subr.bf16.mxu1 %v14142_v61  ;;  %2929 = vmatprep.subr.bf16.mxu0 %v14145_v62  ;;  %v14212_v61 = vld [vmem:[#allocation13 + $0x250] ss:$36 sps:$4 sm:$0xff]   ;;  %v14215_v62 = vld [vmem:[#allocation13 + $0x258] ss:$36 sps:$4 sm:$0xff]  }
 0x3fb   :  { %2848 = vmatpush1.bf16.msra.mxu1 %v14140_v0  ;;  %2930 = vmatpush1.bf16.msra.mxu0 %v14143_v1  ;;  %v14220_v0 = vld [vmem:[#allocation13 + $0x29c] ss:$36 sps:$4 sm:$0xff]   ;;  %v14223_v1 = vld [vmem:[#allocation13 + $0x2a4] ss:$36 sps:$4 sm:$0xff]  }
 0x3fc   :  { %2849 = vmatprep.subr.bf16.mxu1 %v14148_v4  ;;  %2931 = vmatprep.subr.bf16.mxu0 %v14151_v5  ;;  %v14218_v4 = vld [vmem:[#allocation13 + $0x298] ss:$36 sps:$4 sm:$0xff]   ;;  %v14221_v5 = vld [vmem:[#allocation13 + $0x2a0] ss:$36 sps:$4 sm:$0xff]  }
 0x3ff   :  { %2850 = vmatpush1.bf16.msra.mxu1 %v14146_v6  ;;  %2932 = vmatpush1.bf16.msra.mxu0 %v14149_v7  ;;  %v14226_v6 = vld [vmem:[#allocation13 + $0x2e4] ss:$36 sps:$4 sm:$0xff]   ;;  %v14229_v7 = vld [vmem:[#allocation13 + $0x2ec] ss:$36 sps:$4 sm:$0xff]  }
 0x400   :  { %2851 = vmatprep.subr.bf16.mxu1 %v14154_v8  ;;  %2933 = vmatprep.subr.bf16.mxu0 %v14157_v9  ;;  %v14224_v8 = vld [vmem:[#allocation13 + $0x2e0] ss:$36 sps:$4 sm:$0xff]   ;;  %v14227_v9 = vld [vmem:[#allocation13 + $0x2e8] ss:$36 sps:$4 sm:$0xff]  }
 0x403   :  { %2852 = vmatpush1.bf16.msra.mxu1 %v14152_v10  ;;  %2934 = vmatpush1.bf16.msra.mxu0 %v14155_v11  ;;  %v14232_v10 = vld [vmem:[#allocation13 + $0x32c] ss:$36 sps:$4 sm:$0xff]   ;;  %v14235_v11 = vld [vmem:[#allocation13 + $0x334] ss:$36 sps:$4 sm:$0xff]  }
 0x404   :  { %2853 = vmatprep.subr.bf16.mxu1 %v14160_v14  ;;  %2935 = vmatprep.subr.bf16.mxu0 %v14163_v16  ;;  %v14230_v14 = vld [vmem:[#allocation13 + $0x328] ss:$36 sps:$4 sm:$0xff]   ;;  %v14233_v16 = vld [vmem:[#allocation13 + $0x330] ss:$36 sps:$4 sm:$0xff]  }
 0x407   :  { %2854 = vmatpush1.bf16.msra.mxu1 %v14158_v21  ;;  %2936 = vmatpush1.bf16.msra.mxu0 %v14161_v12  ;;  %v14236_v21 = vld [vmem:[#allocation13 + $0x370] ss:$36 sps:$4 sm:$0xff]   ;;  %v14239_v12 = vld [vmem:[#allocation13 + $0x378] ss:$36 sps:$4 sm:$0xff]  }
 0x408   :  { %2946 = vmatprep.subr.bf16.mxu1 %v14166_v23  ;;  %3028 = vmatprep.subr.bf16.mxu0 %v14169_v24  ;;  %v14247_v23 = vld [vmem:[#allocation13 + $0x3c4] ss:$36 sps:$4 sm:$0xff]   ;;  %v14242_v24 = vld [vmem:[#allocation13 + $0x3b8] ss:$36 sps:$4 sm:$0xff]  }
 0x40a   :  { %2856 = vmatmul.mubr.bf16.vlgmr.msra.gmra.mrb[8].mxu1 %v15030_v19  ;;  %2938 = vmatmul.mubr.bf16.vlgmr.msra.gmra.mrb[8].mxu0 %v15030_v19 }
 0x40b   :  { %2947 = vmatpush1.bf16.msra.mxu1 %v14164_v25  ;;  %2978 = vmatprep.mubr.bf16.mxu1 %v15008_v60  ;;  %v14245_v25 = vld [vmem:[#allocation13 + $0x3c0] ss:$36 sps:$4 sm:$0xff]  }
 0x40c   :  { %3029 = vmatpush1.bf16.msra.mxu0 %v14167_v26  ;;  %3060 = vmatprep.mubr.bf16.mxu0 %v15008_v60  ;;  %v14250_v26 = vld [vmem:[#allocation13 + $0x404] ss:$36 sps:$4 sm:$0xff]  }
 0x40d   :  { %2948 = vmatprep.subr.bf16.mxu1 %v14172_v27  ;;  %3030 = vmatprep.subr.bf16.mxu0 %v14175_v28  ;;  %v14253_v27 = vld [vmem:[#allocation13 + $0x40c] ss:$36 sps:$4 sm:$0xff]   ;;  %v14248_v28 = vld [vmem:[#allocation13 + $0x400] ss:$36 sps:$4 sm:$0xff]  }
 0x40f   :  { %2949 = vmatpush1.bf16.msra.mxu1 %v14170_v15  ;;  %v14251_v15 = vld [vmem:[#allocation13 + $0x408] ss:$36 sps:$4 sm:$0xff]  }
 0x410   :  { %3031 = vmatpush1.bf16.msra.mxu0 %v14173_v29  ;;  %2950 = vmatprep.subr.bf16.mxu1 %v14178_v30  ;;  %v14256_v29 = vld [vmem:[#allocation13 + $0x44c] ss:$36 sps:$4 sm:$0xff]   ;;  %v14259_v30 = vld [vmem:[#allocation13 + $0x454] ss:$36 sps:$4 sm:$0xff]  }
 0x411   :  { %3032 = vmatprep.subr.bf16.mxu0 %v14181_v31  ;;  %v14254_v31 = vld [vmem:[#allocation13 + $0x448] ss:$36 sps:$4 sm:$0xff]  }
 0x413   :  { %2951 = vmatpush1.bf16.msra.mxu1 %v14176_v32  ;;  %v14257_v32 = vld [vmem:[#allocation13 + $0x450] ss:$36 sps:$4 sm:$0xff]  }
 0x414   :  { %3033 = vmatpush1.bf16.msra.mxu0 %v14179_v33  ;;  %2952 = vmatprep.subr.bf16.mxu1 %v14184_v34  ;;  %v14262_v33 = vld [vmem:[#allocation13 + $0x494] ss:$36 sps:$4 sm:$0xff]   ;;  %v14265_v34 = vld [vmem:[#allocation13 + $0x49c] ss:$36 sps:$4 sm:$0xff]  }
 0x415   :  { %3034 = vmatprep.subr.bf16.mxu0 %v14187_v35  ;;  %v14260_v35 = vld [vmem:[#allocation13 + $0x490] ss:$36 sps:$4 sm:$0xff]  }
 0x417   :  { %2953 = vmatpush1.bf16.msra.mxu1 %v14182_v36  ;;  %v14263_v36 = vld [vmem:[#allocation13 + $0x498] ss:$36 sps:$4 sm:$0xff]  }
 0x418   :  { %3035 = vmatpush1.bf16.msra.mxu0 %v14185_v37  ;;  %2954 = vmatprep.subr.bf16.mxu1 %v14190_v41  ;;  %v14268_v37 = vld [vmem:[#allocation13 + $0x4dc] ss:$36 sps:$4 sm:$0xff]   ;;  %v14271_v41 = vld [vmem:[#allocation13 + $0x4e4] ss:$36 sps:$4 sm:$0xff]  }
 0x419   :  { %3036 = vmatprep.subr.bf16.mxu0 %v14193_v43  ;;  %v14266_v43 = vld [vmem:[#allocation13 + $0x4d8] ss:$36 sps:$4 sm:$0xff]  }
 0x41b   :  { %2955 = vmatpush1.bf16.msra.mxu1 %v14188_v44  ;;  %v14269_v44 = vld [vmem:[#allocation13 + $0x4e0] ss:$36 sps:$4 sm:$0xff]  }
 0x41c   :  { %3037 = vmatpush1.bf16.msra.mxu0 %v14191_v45  ;;  %2956 = vmatprep.subr.bf16.mxu1 %v14196_v46  ;;  %v14274_v45 = vld [vmem:[#allocation13 + $0x524] ss:$36 sps:$4 sm:$0xff]   ;;  %v14277_v46 = vld [vmem:[#allocation13 + $0x52c] ss:$36 sps:$4 sm:$0xff]  }
 0x41d   :  { %3038 = vmatprep.subr.bf16.mxu0 %v14199_v47  ;;  %v14272_v47 = vld [vmem:[#allocation13 + $0x520] ss:$36 sps:$4 sm:$0xff]  }
 0x41f   :  { %2957 = vmatpush1.bf16.msra.mxu1 %v14194_v48  ;;  %v14275_v48 = vld [vmem:[#allocation13 + $0x528] ss:$36 sps:$4 sm:$0xff]  }
 0x420   :  { %3039 = vmatpush1.bf16.msra.mxu0 %v14197_v49  ;;  %2958 = vmatprep.subr.bf16.mxu1 %v14202_v50  ;;  %v14280_v49 = vld [vmem:[#allocation13 + $0x56c] ss:$36 sps:$4 sm:$0xff]   ;;  %v14283_v50 = vld [vmem:[#allocation13 + $0x574] ss:$36 sps:$4 sm:$0xff]  }
 0x421   :  { %3040 = vmatprep.subr.bf16.mxu0 %v14205_v51  ;;  %v14278_v51 = vld [vmem:[#allocation13 + $0x568] ss:$36 sps:$4 sm:$0xff]  }
 0x423   :  { %2959 = vmatpush1.bf16.msra.mxu1 %v14200_v52  ;;  %v14281_v52 = vld [vmem:[#allocation13 + $0x570] ss:$36 sps:$4 sm:$0xff]  }
 0x424   :  { %3041 = vmatpush1.bf16.msra.mxu0 %v14203_v53  ;;  %2960 = vmatprep.subr.bf16.mxu1 %v14208_v54  ;;  %v14286_v53 = vld [vmem:[#allocation13 + $0x5b4] ss:$36 sps:$4 sm:$0xff]   ;;  %v14289_v54 = vld [vmem:[#allocation13 + $0x5bc] ss:$36 sps:$4 sm:$0xff]  }
 0x425   :  { %3042 = vmatprep.subr.bf16.mxu0 %v14211_v55  ;;  %v14284_v55 = vld [vmem:[#allocation13 + $0x5b0] ss:$36 sps:$4 sm:$0xff]  }
 0x427   :  { %2961 = vmatpush1.bf16.msra.mxu1 %v14206_v56  ;;  %v14287_v56 = vld [vmem:[#allocation13 + $0x5b8] ss:$36 sps:$4 sm:$0xff]  }
 0x428   :  { %3043 = vmatpush1.bf16.msra.mxu0 %v14209_v57  ;;  %2962 = vmatprep.subr.bf16.mxu1 %v14214_v58  ;;  %v14292_v57 = vld [vmem:[#allocation13 + $0x5fc] ss:$36 sps:$4 sm:$0xff]   ;;  %v14295_v58 = vld [vmem:[#allocation13 + $0x604] ss:$36 sps:$4 sm:$0xff]  }
 0x429   :  { %3044 = vmatprep.subr.bf16.mxu0 %v14217_v59  ;;  %v14290_v59 = vld [vmem:[#allocation13 + $0x5f8] ss:$36 sps:$4 sm:$0xff]  }
 0x42b   :  { %2963 = vmatpush1.bf16.msra.mxu1 %v14212_v61  ;;  %v14293_v61 = vld [vmem:[#allocation13 + $0x600] ss:$36 sps:$4 sm:$0xff]  }
 0x42c   :  { %3045 = vmatpush1.bf16.msra.mxu0 %v14215_v62  ;;  %2964 = vmatprep.subr.bf16.mxu1 %v14220_v0  ;;  %v14298_v62 = vld [vmem:[#allocation13 + $0x644] ss:$36 sps:$4 sm:$0xff]   ;;  %v14301_v0 = vld [vmem:[#allocation13 + $0x64c] ss:$36 sps:$4 sm:$0xff]  }
 0x42d   :  { %3046 = vmatprep.subr.bf16.mxu0 %v14223_v1  ;;  %v14296_v1 = vld [vmem:[#allocation13 + $0x640] ss:$36 sps:$4 sm:$0xff]  }
 0x42f   :  { %2965 = vmatpush1.bf16.msra.mxu1 %v14218_v4  ;;  %v14299_v4 = vld [vmem:[#allocation13 + $0x648] ss:$36 sps:$4 sm:$0xff]  }
 0x430   :  { %3047 = vmatpush1.bf16.msra.mxu0 %v14221_v5  ;;  %2966 = vmatprep.subr.bf16.mxu1 %v14226_v6  ;;  %v14304_v5 = vld [vmem:[#allocation13 + $0x68c] ss:$36 sps:$4 sm:$0xff]   ;;  %v14307_v6 = vld [vmem:[#allocation13 + $0x694] ss:$36 sps:$4 sm:$0xff]  }
 0x431   :  { %3048 = vmatprep.subr.bf16.mxu0 %v14229_v7  ;;  %v14302_v7 = vld [vmem:[#allocation13 + $0x688] ss:$36 sps:$4 sm:$0xff]  }
 0x433   :  { %2967 = vmatpush1.bf16.msra.mxu1 %v14224_v8  ;;  %v14305_v8 = vld [vmem:[#allocation13 + $0x690] ss:$36 sps:$4 sm:$0xff]  }
 0x434   :  { %3049 = vmatpush1.bf16.msra.mxu0 %v14227_v9  ;;  %2968 = vmatprep.subr.bf16.mxu1 %v14232_v10  ;;  %v14310_v9 = vld [vmem:[#allocation13 + $0x6d4] ss:$36 sps:$4 sm:$0xff]   ;;  %v14313_v10 = vld [vmem:[#allocation13 + $0x6dc] ss:$36 sps:$4 sm:$0xff]  }
 0x435   :  { %3050 = vmatprep.subr.bf16.mxu0 %v14235_v11  ;;  %v14308_v11 = vld [vmem:[#allocation13 + $0x6d0] ss:$36 sps:$4 sm:$0xff]  }
 0x437   :  { %2969 = vmatpush1.bf16.msra.mxu1 %v14230_v14  ;;  %v14311_v14 = vld [vmem:[#allocation13 + $0x6d8] ss:$36 sps:$4 sm:$0xff]  }
 0x438   :  { %3051 = vmatpush1.bf16.msra.mxu0 %v14233_v16  ;;  %2970 = vmatprep.subr.bf16.mxu1 %v14238_v17  ;;  %v14316_v16 = vld [vmem:[#allocation13 + $0x71c] ss:$36 sps:$4 sm:$0xff]   ;;  %v14319_v17 = vld [vmem:[#allocation13 + $0x724] ss:$36 sps:$4 sm:$0xff]  }
 0x439   :  { %3052 = vmatprep.subr.bf16.mxu0 %v14241_v20  ;;  %v14314_v20 = vld [vmem:[#allocation13 + $0x718] ss:$36 sps:$4 sm:$0xff]  }
 0x43b   :  { %2971 = vmatpush1.bf16.msra.mxu1 %v14236_v21  ;;  %v14317_v21 = vld [vmem:[#allocation13 + $0x720] ss:$36 sps:$4 sm:$0xff]  }
 0x43c   :  { %3053 = vmatpush1.bf16.msra.mxu0 %v14239_v12  ;;  %2972 = vmatprep.subr.bf16.mxu1 %v14244_v22  ;;  %v14322_v12 = vld [vmem:[#allocation13 + $0x764] ss:$36 sps:$4 sm:$0xff]   ;;  %v14325_v22 = vld [vmem:[#allocation13 + $0x76c] ss:$36 sps:$4 sm:$0xff]  }
 0x43d   :  { %3054 = vmatprep.subr.bf16.mxu0 %v14247_v23  ;;  %v14320_v23 = vld [vmem:[#allocation13 + $0x760] ss:$36 sps:$4 sm:$0xff]  }
 0x43f   :  { %2973 = vmatpush1.bf16.msra.mxu1 %v14242_v24  ;;  %v14323_v24 = vld [vmem:[#allocation13 + $0x768] ss:$36 sps:$4 sm:$0xff]  }
 0x440   :  { %3055 = vmatpush1.bf16.msra.mxu0 %v14245_v25  ;;  %2974 = vmatprep.subr.bf16.mxu1 %v14250_v26  ;;  %v14328_v25 = vld [vmem:[#allocation13 + $0x7ac] ss:$36 sps:$4 sm:$0xff]   ;;  %v14331_v26 = vld [vmem:[#allocation13 + $0x7b4] ss:$36 sps:$4 sm:$0xff]  }
 0x441   :  { %3056 = vmatprep.subr.bf16.mxu0 %v14253_v27  ;;  %v14326_v27 = vld [vmem:[#allocation13 + $0x7a8] ss:$36 sps:$4 sm:$0xff]  }
 0x443   :  { %2975 = vmatpush1.bf16.msra.mxu1 %v14248_v28  ;;  %v14329_v28 = vld [vmem:[#allocation13 + $0x7b0] ss:$36 sps:$4 sm:$0xff]  }
 0x444   :  { %3057 = vmatpush1.bf16.msra.mxu0 %v14251_v15  ;;  %2976 = vmatprep.subr.bf16.mxu1 %v14256_v29  ;;  %v14334_v15 = vld [vmem:[#allocation13 + $0x7f4] ss:$36 sps:$4 sm:$0xff]   ;;  %v14337_v29 = vld [vmem:[#allocation13 + $0x7fc] ss:$36 sps:$4 sm:$0xff]  }
 0x445   :  { %3058 = vmatprep.subr.bf16.mxu0 %v14259_v30  ;;  %v14332_v30 = vld [vmem:[#allocation13 + $0x7f0] ss:$36 sps:$4 sm:$0xff]  }
 0x447   :  { %2977 = vmatpush1.bf16.msra.mxu1 %v14254_v31  ;;  %v14335_v31 = vld [vmem:[#allocation13 + $0x7f8] ss:$36 sps:$4 sm:$0xff]  }
 0x448   :  { %3059 = vmatpush1.bf16.msra.mxu0 %v14257_v32  ;;  %2987 = vmatprep.subr.bf16.mxu1 %v14262_v33  ;;  %v14340_v32 = vld [vmem:[#allocation13 + $0x83c] ss:$36 sps:$4 sm:$0xff]   ;;  %v14343_v33 = vld [vmem:[#allocation13 + $0x844] ss:$36 sps:$4 sm:$0xff]  }
 0x449   :  { %3069 = vmatprep.subr.bf16.mxu0 %v14265_v34  ;;  %v14338_v34 = vld [vmem:[#allocation13 + $0x838] ss:$36 sps:$4 sm:$0xff]  }
 0x44a   :  { %2979 = vmatmul.mubr.bf16.vlgmr.msra.gmra.mrb[12].mxu1 %v15010_v63 }
 0x44b   :  { %3061 = vmatmul.mubr.bf16.vlgmr.msra.gmra.mrb[12].mxu0 %v15010_v63  ;;  %2988 = vmatpush1.bf16.msra.mxu1 %v14260_v35  ;;  %v14341_v35 = vld [vmem:[#allocation13 + $0x840] ss:$36 sps:$4 sm:$0xff]  }
 0x44c   :  { %3019 = vmatprep.mubr.bf16.mxu1 %v15017_v3  ;;  %3070 = vmatpush1.bf16.msra.mxu0 %v14263_v36  ;;  %v14346_v36 = vld [vmem:[#allocation13 + $0x884] ss:$36 sps:$4 sm:$0xff]  }
 0x44d   :  { %3101 = vmatprep.mubr.bf16.mxu0 %v15017_v3  ;;  %2989 = vmatprep.subr.bf16.mxu1 %v14268_v37  ;;  %v14349_v37 = vld [vmem:[#allocation13 + $0x88c] ss:$36 sps:$4 sm:$0xff]  }
 0x44e   :  { %3071 = vmatprep.subr.bf16.mxu0 %v14271_v41  ;;  %v14344_v41 = vld [vmem:[#allocation13 + $0x880] ss:$36 sps:$4 sm:$0xff]  }
 0x44f   :  { %2990 = vmatpush1.bf16.msra.mxu1 %v14266_v43  ;;  %v14347_v43 = vld [vmem:[#allocation13 + $0x888] ss:$36 sps:$4 sm:$0xff]  }
 0x450   :  { %3072 = vmatpush1.bf16.msra.mxu0 %v14269_v44  ;;  %2991 = vmatprep.subr.bf16.mxu1 %v14274_v45  ;;  %v14352_v44 = vld [vmem:[#allocation13 + $0x8cc] ss:$36 sps:$4 sm:$0xff]   ;;  %v14355_v45 = vld [vmem:[#allocation13 + $0x8d4] ss:$36 sps:$4 sm:$0xff]  }
 0x451   :  { %3073 = vmatprep.subr.bf16.mxu0 %v14277_v46  ;;  %v14350_v46 = vld [vmem:[#allocation13 + $0x8c8] ss:$36 sps:$4 sm:$0xff]  }
 0x453   :  { %2992 = vmatpush1.bf16.msra.mxu1 %v14272_v47  ;;  %v14353_v47 = vld [vmem:[#allocation13 + $0x8d0] ss:$36 sps:$4 sm:$0xff]  }
 0x454   :  { %3074 = vmatpush1.bf16.msra.mxu0 %v14275_v48  ;;  %2993 = vmatprep.subr.bf16.mxu1 %v14280_v49  ;;  %v14356_v48 = vld [vmem:[#allocation13 + $0x260] ss:$36 sps:$4 sm:$0xff]  }
 0x455   :  { %3075 = vmatprep.subr.bf16.mxu0 %v14283_v50  ;;  %v14357_v49 = vld [vmem:[#allocation13 + $0x6e0] ss:$36 sps:$4 sm:$0xff]  }
 0x456   :  { %v14358_v50 = vld [vmem:[#allocation13 + $0x20] ss:$36 sps:$4 sm:$0xff]  }
 0x457   :  { %2994 = vmatpush1.bf16.msra.mxu1 %v14278_v51  ;;  %v14359_v51 = vld [vmem:[#allocation13 + $0x4a0] ss:$36 sps:$4 sm:$0xff]  }
 0x458   :  { %3076 = vmatpush1.bf16.msra.mxu0 %v14281_v52  ;;  %2995 = vmatprep.subr.bf16.mxu1 %v14286_v53  ;;  %v14360_v52 = vld [vmem:[#allocation13 + $0x2a8] ss:$36 sps:$4 sm:$0xff]  }
 0x459   :  { %3077 = vmatprep.subr.bf16.mxu0 %v14289_v54  ;;  %v14361_v53 = vld [vmem:[#allocation13 + $0x728] ss:$36 sps:$4 sm:$0xff]  }
 0x45a   :  { %v14362_v54 = vld [vmem:[#allocation13 + $0x68] ss:$36 sps:$4 sm:$0xff]  }
 0x45b   :  { %2996 = vmatpush1.bf16.msra.mxu1 %v14284_v55  ;;  %v14363_v55 = vld [vmem:[#allocation13 + $0x4e8] ss:$36 sps:$4 sm:$0xff]  }
 0x45c   :  { %3078 = vmatpush1.bf16.msra.mxu0 %v14287_v56  ;;  %2997 = vmatprep.subr.bf16.mxu1 %v14292_v57  ;;  %v14364_v56 = vld [vmem:[#allocation13 + $0x2f0] ss:$36 sps:$4 sm:$0xff]  }
 0x45d   :  { %3079 = vmatprep.subr.bf16.mxu0 %v14295_v58  ;;  %v14365_v57 = vld [vmem:[#allocation13 + $0x770] ss:$36 sps:$4 sm:$0xff]  }
 0x45e   :  { %v14366_v58 = vld [vmem:[#allocation13 + $0xb0] ss:$36 sps:$4 sm:$0xff]  }
 0x45f   :  { %2998 = vmatpush1.bf16.msra.mxu1 %v14290_v59  ;;  %v14367_v59 = vld [vmem:[#allocation13 + $0x530] ss:$36 sps:$4 sm:$0xff]  }
 0x460   :  { %3080 = vmatpush1.bf16.msra.mxu0 %v14293_v61  ;;  %2999 = vmatprep.subr.bf16.mxu1 %v14298_v62  ;;  %v14368_v61 = vld [vmem:[#allocation13 + $0x338] ss:$36 sps:$4 sm:$0xff]  }
 0x461   :  { %3081 = vmatprep.subr.bf16.mxu0 %v14301_v0  ;;  %v14369_v62 = vld [vmem:[#allocation13 + $0x7b8] ss:$36 sps:$4 sm:$0xff]  }
 0x462   :  { %v14370_v0 = vld [vmem:[#allocation13 + $0xf8] ss:$36 sps:$4 sm:$0xff]  }
 0x463   :  { %3000 = vmatpush1.bf16.msra.mxu1 %v14296_v1  ;;  %v14372_v1 = vld [vmem:[#allocation13 + $0x380] ss:$36 sps:$4 sm:$0xff]  }
 0x464   :  { %3082 = vmatpush1.bf16.msra.mxu0 %v14299_v4  ;;  %3001 = vmatprep.subr.bf16.mxu1 %v14304_v5  ;;  %v14373_v4 = vld [vmem:[#allocation13 + $0x800] ss:$36 sps:$4 sm:$0xff]  }
 0x465   :  { %3083 = vmatprep.subr.bf16.mxu0 %v14307_v6  ;;  %v14375_v5 = vld [vmem:[#allocation13 + $0x5c0] ss:$36 sps:$4 sm:$0xff]   ;;  %v14376_v6 = vld [vmem:[#allocation13 + $0x3c8] ss:$36 sps:$4 sm:$0xff]  }
 0x467   :  { %3002 = vmatpush1.bf16.msra.mxu1 %v14302_v7  ;;  %v14377_v7 = vld [vmem:[#allocation13 + $0x848] ss:$36 sps:$4 sm:$0xff]  }
 0x468   :  { %3084 = vmatpush1.bf16.msra.mxu0 %v14305_v8  ;;  %3003 = vmatprep.subr.bf16.mxu1 %v14310_v9  ;;  %v14378_v8 = vld [vmem:[#allocation13 + $0x188] ss:$36 sps:$4 sm:$0xff]  }
 0x469   :  { %3085 = vmatprep.subr.bf16.mxu0 %v14313_v10  ;;  %v14379_v9 = vld [vmem:[#allocation13 + $0x608] ss:$36 sps:$4 sm:$0xff]   ;;  %v14380_v10 = vld [vmem:[#allocation13 + $0x410] ss:$36 sps:$4 sm:$0xff]  }
 0x46b   :  { %3004 = vmatpush1.bf16.msra.mxu1 %v14308_v11  ;;  %v14381_v11 = vld [vmem:[#allocation13 + $0x890] ss:$36 sps:$4 sm:$0xff]  }
 0x46c   :  { %3086 = vmatpush1.bf16.msra.mxu0 %v14311_v14  ;;  %3005 = vmatprep.subr.bf16.mxu1 %v14316_v16  ;;  %v14382_v14 = vld [vmem:[#allocation13 + $0x1d0] ss:$36 sps:$4 sm:$0xff]  }
 0x46d   :  { %3087 = vmatprep.subr.bf16.mxu0 %v14319_v17  ;;  %v14383_v16 = vld [vmem:[#allocation13 + $0x650] ss:$36 sps:$4 sm:$0xff]   ;;  %v14384_v17 = vld [vmem:[#allocation13 + $0x458] ss:$36 sps:$4 sm:$0xff]  }
 0x46f   :  { %3006 = vmatpush1.bf16.msra.mxu1 %v14314_v20  ;;  %v14385_v20 = vld [vmem:[#allocation13 + $0x8d8] ss:$36 sps:$4 sm:$0xff]  }
 0x470   :  { %3088 = vmatpush1.bf16.msra.mxu0 %v14317_v21  ;;  %3007 = vmatprep.subr.bf16.mxu1 %v14322_v12  ;;  %v3280_v21 = vld [vmem:[#allocation16] sm:$0xff] }
 0x471   :  { %3089 = vmatprep.subr.bf16.mxu0 %v14325_v22  ;;  %v3288_v12 = vld [vmem:[#allocation16 + $0x40] sm:$0xff]  ;;  %v3281_v22 = vld [vmem:[#allocation16 + $0x8] sm:$0xff] }
 0x473   :  { %3008 = vmatpush1.bf16.msra.mxu1 %v14320_v23  ;;  %v3289_v23 = vld [vmem:[#allocation16 + $0x48] sm:$0xff] }
 0x474   :  { %3090 = vmatpush1.bf16.msra.mxu0 %v14323_v24  ;;  %3009 = vmatprep.subr.bf16.mxu1 %v14328_v25  ;;  %v14386_v24 = vld [vmem:[#allocation13 + $0x218] ss:$36 sps:$4 sm:$0xff]  }
 0x475   :  { %3091 = vmatprep.subr.bf16.mxu0 %v14331_v26  ;;  %v14387_v25 = vld [vmem:[#allocation13 + $0x698] ss:$36 sps:$4 sm:$0xff]   ;;  %v12442_v26 = vcombine.high %v3280_v21, %v3288_v12 }
 0x477   :  { %3010 = vmatpush1.bf16.msra.mxu1 %v14326_v27  ;;  %v12444_v27 = vcombine.high %v3281_v22, %v3289_v23 }
 0x478   :  { %3092 = vmatpush1.bf16.msra.mxu0 %v14329_v28  ;;  %3011 = vmatprep.subr.bf16.mxu1 %v14334_v15  ;;  %v3296_v28 = vld [vmem:[#allocation16 + $0x80] sm:$0xff] }
 0x479   :  { %3093 = vmatprep.subr.bf16.mxu0 %v14337_v29  ;;  %v3304_v15 = vld [vmem:[#allocation16 + $0xc0] sm:$0xff]  ;;  %v3297_v29 = vld [vmem:[#allocation16 + $0x88] sm:$0xff] }
 0x47b   :  { %3012 = vmatpush1.bf16.msra.mxu1 %v14332_v30  ;;  %v3305_v30 = vld [vmem:[#allocation16 + $0xc8] sm:$0xff] }
 0x47c   :  { %3094 = vmatpush1.bf16.msra.mxu0 %v14335_v31  ;;  %3013 = vmatprep.subr.bf16.mxu1 %v14340_v32  ;;  %v12441_v31 = vcombine.low %v3280_v21, %v3288_v12  ;;  %v12443_v32 = vcombine.low %v3281_v22, %v3289_v23  ;;  %v3400_v21 = vld [vmem:[#allocation16 + $0x3c0] sm:$0xff]  ;;  %v3393_v12 = vld [vmem:[#allocation16 + $0x388] sm:$0xff] }
 0x47d   :  { %3095 = vmatprep.subr.bf16.mxu0 %v14343_v33  ;;  %v12458_v33 = vcombine.high %v3296_v28, %v3304_v15  ;;  %v3401_v22 = vld [vmem:[#allocation16 + $0x3c8] sm:$0xff] }
 0x47f   :  { %3014 = vmatpush1.bf16.msra.mxu1 %v14338_v34  ;;  %v12460_v34 = vcombine.high %v3297_v29, %v3305_v30 }
 0x480   :  { %3096 = vmatpush1.bf16.msra.mxu0 %v14341_v35  ;;  %3015 = vmatprep.subr.bf16.mxu1 %v14346_v36  ;;  %v3312_v35 = vld [vmem:[#allocation16 + $0x100] sm:$0xff] }
 0x481   :  { %3097 = vmatprep.subr.bf16.mxu0 %v14349_v37  ;;  %v3320_v36 = vld [vmem:[#allocation16 + $0x140] sm:$0xff]  ;;  %v3313_v37 = vld [vmem:[#allocation16 + $0x108] sm:$0xff] }
 0x483   :  { %3016 = vmatpush1.bf16.msra.mxu1 %v14344_v41  ;;  %v3321_v41 = vld [vmem:[#allocation16 + $0x148] sm:$0xff] }
 0x484   :  { %3098 = vmatpush1.bf16.msra.mxu0 %v14347_v43  ;;  %3017 = vmatprep.subr.bf16.mxu1 %v14352_v44  ;;  %v12457_v43 = vcombine.low %v3296_v28, %v3304_v15  ;;  %v12459_v44 = vcombine.low %v3297_v29, %v3305_v30  ;;  %v3416_v28 = vld [vmem:[#allocation16 + $0x440] sm:$0xff]  ;;  %v3409_v15 = vld [vmem:[#allocation16 + $0x408] sm:$0xff] }
 0x485   :  { %3099 = vmatprep.subr.bf16.mxu0 %v14355_v45  ;;  %v12474_v45 = vcombine.high %v3312_v35, %v3320_v36  ;;  %v3417_v29 = vld [vmem:[#allocation16 + $0x448] sm:$0xff] }
 0x487   :  { %3018 = vmatpush1.bf16.msra.mxu1 %v14350_v46  ;;  %v12476_v46 = vcombine.high %v3313_v37, %v3321_v41 }
 0x488   :  { %3100 = vmatpush1.bf16.msra.mxu0 %v14353_v47  ;;  %13602 = vmatprep.subr.bf16.mxu1 %v14356_v48  ;;  %v3328_v47 = vld [vmem:[#allocation16 + $0x180] sm:$0xff] }
 0x489   :  { %13624 = vmatprep.subr.bf16.mxu0 %v14357_v49  ;;  %v3336_v48 = vld [vmem:[#allocation16 + $0x1c0] sm:$0xff]  ;;  %v3329_v49 = vld [vmem:[#allocation16 + $0x188] sm:$0xff] }
 0x48a   :  { %3020 = vmatmul.mubr.bf16.vlgmr.msra.gmra.mrb[12].mxu1 %v15030_v19 }
 0x48b   :  { %3102 = vmatmul.mubr.bf16.vlgmr.msra.gmra.mrb[12].mxu0 %v15030_v19  ;;  %13603 = vmatpush3.bf16.msra.mxu1 %v14358_v50  ;;  %v3337_v50 = vld [vmem:[#allocation16 + $0x1c8] sm:$0xff] }
 0x48c   :  { %3142 = vmatprep.mubr.bf16.mxu1 %v15008_v60  ;;  %13625 = vmatpush3.bf16.msra.mxu0 %v14359_v51  ;;  %v14371_v60 = vld [vmem:[#allocation13 + $0x578] ss:$36 sps:$4 sm:$0xff]   ;;  %v12473_v51 = vcombine.low %v3312_v35, %v3320_v36  ;;  %v3432_v35 = vld [vmem:[#allocation16 + $0x4c0] sm:$0xff] }
 0x48d   :  { %3182 = vmatprep.mubr.bf16.mxu0 %v15017_v3  ;;  %13604 = vmatprep.subr.bf16.mxu1 %v14360_v52  ;;  %v14374_v3 = vld [vmem:[#allocation13 + $0x140] ss:$36 sps:$4 sm:$0xff]   ;;  %v12490_v52 = vcombine.high %v3328_v47, %v3336_v48  ;;  %v3425_v36 = vld [vmem:[#allocation16 + $0x488] sm:$0xff] }
 0x48e   :  { %13626 = vmatprep.subr.bf16.mxu0 %v14361_v53  ;;  %v3344_v53 = vld [vmem:[#allocation16 + $0x200] sm:$0xff] }
 0x48f   :  { %13605 = vmatpush3.bf16.msra.mxu1 %v14362_v54  ;;  %v3352_v54 = vld [vmem:[#allocation16 + $0x240] sm:$0xff] }
 0x490   :  { %13627 = vmatpush3.bf16.msra.mxu0 %v14363_v55  ;;  %13606 = vmatprep.subr.bf16.mxu1 %v14364_v56  ;;  %v3345_v55 = vld [vmem:[#allocation16 + $0x208] sm:$0xff] }
 0x491   :  { %13628 = vmatprep.subr.bf16.mxu0 %v14365_v57  ;;  %v3353_v56 = vld [vmem:[#allocation16 + $0x248] sm:$0xff]  ;;  %v12489_v57 = vcombine.low %v3328_v47, %v3336_v48  ;;  %v3448_v47 = vld [vmem:[#allocation16 + $0x540] sm:$0xff] }
 0x492   :  { %v3441_v48 = vld [vmem:[#allocation16 + $0x508] sm:$0xff] }
 0x493   :  { %13607 = vmatpush3.bf16.msra.mxu1 %v14366_v58  ;;  %v12491_v58 = vcombine.low %v3329_v49, %v3337_v50 }
 0x494   :  { %13629 = vmatpush3.bf16.msra.mxu0 %v14367_v59  ;;  %13608 = vmatprep.subr.bf16.mxu1 %v14368_v61  ;;  %v12506_v59 = vcombine.high %v3344_v53, %v3352_v54  ;;  %v12508_v61 = vcombine.high %v3345_v55, %v3353_v56 }
 0x495   :  { %13630 = vmatprep.subr.bf16.mxu0 %v14369_v62  ;;  %v3360_v62 = vld [vmem:[#allocation16 + $0x280] sm:$0xff] }
 0x497   :  { %13609 = vmatpush3.bf16.msra.mxu1 %v14370_v0  ;;  %v3368_v0 = vld [vmem:[#allocation16 + $0x2c0] sm:$0xff] }
 0x498   :  { %13631 = vmatpush3.bf16.msra.mxu0 %v14371_v60  ;;  %13610 = vmatprep.subr.bf16.mxu1 %v14372_v1  ;;  %v3361_v60 = vld [vmem:[#allocation16 + $0x288] sm:$0xff] }
 0x499   :  { %13632 = vmatprep.subr.bf16.mxu0 %v14373_v4  ;;  %v3369_v1 = vld [vmem:[#allocation16 + $0x2c8] sm:$0xff]  ;;  %v12505_v4 = vcombine.low %v3344_v53, %v3352_v54  ;;  %v3464_v53 = vld [vmem:[#allocation16 + $0x5c0] sm:$0xff] }
 0x49a   :  { %v3457_v54 = vld [vmem:[#allocation16 + $0x588] sm:$0xff] }
 0x49b   :  { %13611 = vmatpush3.bf16.msra.mxu1 %v14374_v3  ;;  %v12507_v3 = vcombine.low %v3345_v55, %v3353_v56  ;;  %v3465_v55 = vld [vmem:[#allocation16 + $0x5c8] sm:$0xff] }
 0x49c   :  { %13633 = vmatpush3.bf16.msra.mxu0 %v14375_v5  ;;  %13612 = vmatprep.subr.bf16.mxu1 %v14376_v6  ;;  %v12522_v5 = vcombine.high %v3360_v62, %v3368_v0  ;;  %v12524_v6 = vcombine.high %v3361_v60, %v3369_v1 }
 0x49d   :  { %13634 = vmatprep.subr.bf16.mxu0 %v14377_v7  ;;  %v3376_v7 = vld [vmem:[#allocation16 + $0x300] sm:$0xff] }
 0x49f   :  { %13613 = vmatpush3.bf16.msra.mxu1 %v14378_v8  ;;  %v3384_v8 = vld [vmem:[#allocation16 + $0x340] sm:$0xff] }
 0x4a0   :  { %13635 = vmatpush3.bf16.msra.mxu0 %v14379_v9  ;;  %13614 = vmatprep.subr.bf16.mxu1 %v14380_v10  ;;  %v3377_v9 = vld [vmem:[#allocation16 + $0x308] sm:$0xff]  ;;  %v12537_v23 = vcombine.low %v3376_v7, %v3384_v8 }
 0x4a1   :  { %13636 = vmatprep.subr.bf16.mxu0 %v14381_v11  ;;  %v3385_v10 = vld [vmem:[#allocation16 + $0x348] sm:$0xff]  ;;  %v12521_v11 = vcombine.low %v3360_v62, %v3368_v0  ;;  %v3480_v62 = vld [vmem:[#allocation16 + $0x640] sm:$0xff] }
 0x4a2   :  { %v3473_v0 = vld [vmem:[#allocation16 + $0x608] sm:$0xff] }
 0x4a3   :  { %13615 = vmatpush3.bf16.msra.mxu1 %v14382_v14  ;;  %v12523_v14 = vcombine.low %v3361_v60, %v3369_v1  ;;  %v3481_v60 = vld [vmem:[#allocation16 + $0x648] sm:$0xff] }
 0x4a4   :  { %13637 = vmatpush3.bf16.msra.mxu0 %v14383_v16  ;;  %13616 = vmatprep.subr.bf16.mxu1 %v14384_v17  ;;  %v12538_v16 = vcombine.high %v3376_v7, %v3384_v8  ;;  %v12540_v17 = vcombine.high %v3377_v9, %v3385_v10  ;;  %v3496_v7 = vld [vmem:[#allocation16 + $0x6c0] sm:$0xff]  ;;  %v3489_v8 = vld [vmem:[#allocation16 + $0x688] sm:$0xff] }
 0x4a5   :  { %13638 = vmatprep.subr.bf16.mxu0 %v14385_v20  ;;  %v3392_v20 = vld [vmem:[#allocation16 + $0x380] sm:$0xff] }
 0x4a6   :  { %v12553_v30 = vcombine.low %v3392_v20, %v3400_v21 }
 0x4a7   :  { %13617 = vmatpush3.bf16.msra.mxu1 %v14386_v24  ;;  %v12539_v24 = vcombine.low %v3377_v9, %v3385_v10  ;;  %v3497_v9 = vld [vmem:[#allocation16 + $0x6c8] sm:$0xff]  ;;  %v15046_v10 = vld [vmem:[#allocation14] sm:$0xff] }
 0x4a8   :  { %13639 = vmatpush3.bf16.msra.mxu0 %v14387_v25  ;;  %10276 = vmatprep.subr.bf16.mxu1 %v12442_v26  ;;  %v12554_v25 = vcombine.high %v3392_v20, %v3400_v21  ;;  %v12556_v26 = vcombine.high %v3393_v12, %v3401_v22  ;;  %v3504_v20 = vld [vmem:[#allocation16 + $0x700] sm:$0xff] }
 0x4a9   :  { %10481 = vmatprep.subr.bf16.mxu0 %v12444_v27  ;;  %v3408_v27 = vld [vmem:[#allocation16 + $0x400] sm:$0xff] }
 0x4aa   :  { %3143 = vmatmul.mubr.bf16.vlgmr.msra.gmra.mrb[16].mxu1 %v15010_v63  ;;  %v12475_v63 = vcombine.low %v3313_v37, %v3321_v41  ;;  %v3433_v37 = vld [vmem:[#allocation16 + $0x4c8] sm:$0xff]  ;;  %v12569_v41 = vcombine.low %v3408_v27, %v3416_v28  ;;  %v3512_v21 = vld [vmem:[#allocation16 + $0x740] sm:$0xff] }
 0x4ab   :  { %3183 = vmatmul.mubr.bf16.vlgmr.msra.gmra.mrb[16].mxu0 %v15030_v19  ;;  %10277 = vmatpush1.bf16.msra.mxu1 %v12441_v31  ;;  %v12492_v19 = vcombine.high %v3329_v49, %v3337_v50  ;;  %v12555_v31 = vcombine.low %v3393_v12, %v3401_v22  ;;  %v3449_v49 = vld [vmem:[#allocation16 + $0x548] sm:$0xff]  ;;  %v1268_v12 = vrot.slane %v15046_v10, %v14988_v40 }
 0x4ac   :  { %10482 = vmatpush1.bf16.msra.mxu0 %v12443_v32  ;;  %10278 = vmatprep.subr.bf16.mxu1 %v12458_v33  ;;  %v12570_v32 = vcombine.high %v3408_v27, %v3416_v28  ;;  %v12572_v33 = vcombine.high %v3409_v15, %v3417_v29  ;;  %v3505_v22 = vld [vmem:[#allocation16 + $0x708] sm:$0xff]  ;;  %v12651_v27 = vcombine.low %v3489_v8, %v3497_v9 }
 0x4ad   :  { %10483 = vmatprep.subr.bf16.mxu0 %v12460_v34  ;;  %v3424_v34 = vld [vmem:[#allocation16 + $0x480] sm:$0xff]  ;;  %v12666_v28 = vcombine.high %v3504_v20, %v3512_v21 }
 0x4ae   :  { %v12585_v50 = vcombine.low %v3424_v34, %v3432_v35 }
 0x4af   :  { %10279 = vmatpush1.bf16.msra.mxu1 %v12457_v43  ;;  %v12571_v43 = vcombine.low %v3409_v15, %v3417_v29 }
 0x4b0   :  { %10484 = vmatpush1.bf16.msra.mxu0 %v12459_v44  ;;  %10280 = vmatprep.subr.bf16.mxu1 %v12474_v45  ;;  %v12586_v44 = vcombine.high %v3424_v34, %v3432_v35  ;;  %v12588_v45 = vcombine.high %v3425_v36, %v3433_v37 }
 0x4b1   :  { %10485 = vmatprep.subr.bf16.mxu0 %v12476_v46  ;;  %v3440_v46 = vld [vmem:[#allocation16 + $0x500] sm:$0xff] }
 0x4b2   :  { %v12601_v56 = vcombine.low %v3440_v46, %v3448_v47 }
 0x4b3   :  { %10281 = vmatpush1.bf16.msra.mxu1 %v12473_v51  ;;  %v12587_v51 = vcombine.low %v3425_v36, %v3433_v37  ;;  %v3521_v36 = vld [vmem:[#allocation16 + $0x788] sm:$0xff] }
 0x4b4   :  { %10486 = vmatpush1.bf16.msra.mxu0 %v12475_v63  ;;  %10282 = vmatprep.subr.bf16.mxu1 %v12490_v52  ;;  %v12602_v63 = vcombine.high %v3440_v46, %v3448_v47  ;;  %v12604_v52 = vcombine.high %v3441_v48, %v3449_v49  ;;  %v3529_v37 = vld [vmem:[#allocation16 + $0x7c8] sm:$0xff]  ;;  %v12665_v46 = vcombine.low %v3504_v20, %v3512_v21 }
 0x4b5   :  { %10487 = vmatprep.subr.bf16.mxu0 %v12492_v19  ;;  %v3456_v19 = vld [vmem:[#allocation16 + $0x580] sm:$0xff] }
 0x4b6   :  { %v12617_v1 = vcombine.low %v3456_v19, %v3464_v53 }
 0x4b7   :  { %10283 = vmatpush1.bf16.msra.mxu1 %v12489_v57  ;;  %v12603_v57 = vcombine.low %v3441_v48, %v3449_v49 }
 0x4b8   :  { %10488 = vmatpush1.bf16.msra.mxu0 %v12491_v58  ;;  %10284 = vmatprep.subr.bf16.mxu1 %v12506_v59  ;;  %v12618_v58 = vcombine.high %v3456_v19, %v3464_v53  ;;  %v12620_v59 = vcombine.high %v3457_v54, %v3465_v55  ;;  %v12684_v19 = vcombine.high %v3521_v36, %v3529_v37  ;;  %v15056_v53 = vld [vmem:[#allocation16 + $0x800] sm:$0xff] }
 0x4b9   :  { %10489 = vmatprep.subr.bf16.mxu0 %v12508_v61  ;;  %v3472_v61 = vld [vmem:[#allocation16 + $0x600] sm:$0xff] }
 0x4bb   :  { %10285 = vmatpush1.bf16.msra.mxu1 %v12505_v4  ;;  %v12619_v4 = vcombine.low %v3457_v54, %v3465_v55  ;;  %v15058_v54 = vld [vmem:[#allocation16 + $0x840] sm:$0xff] }
 0x4bc   :  { %10490 = vmatpush1.bf16.msra.mxu0 %v12507_v3  ;;  %10286 = vmatprep.subr.bf16.mxu1 %v12522_v5  ;;  %v12634_v3 = vcombine.high %v3472_v61, %v3480_v62  ;;  %v12636_v5 = vcombine.high %v3473_v0, %v3481_v60 }
 0x4bd   :  { %10491 = vmatprep.subr.bf16.mxu0 %v12524_v6  ;;  %v3488_v6 = vld [vmem:[#allocation16 + $0x680] sm:$0xff] }
 0x4bf   :  { %10287 = vmatpush1.bf16.msra.mxu1 %v12521_v11  ;;  %v12633_v11 = vcombine.low %v3472_v61, %v3480_v62  ;;  %v12683_v62 = vcombine.low %v3521_v36, %v3529_v37 }
 0x4c0   :  { %10492 = vmatpush1.bf16.msra.mxu0 %v12523_v14  ;;  %10288 = vmatprep.subr.bf16.mxu1 %v12538_v16  ;;  %v12635_v14 = vcombine.low %v3473_v0, %v3481_v60  ;;  %v12650_v16 = vcombine.high %v3488_v6, %v3496_v7  ;;  %v12698_v0 = vcombine.high %v15056_v53, %v15058_v54 }
 0x4c1   :  { %10493 = vmatprep.subr.bf16.mxu0 %v12540_v17  ;;  %v12652_v17 = vcombine.high %v3489_v8, %v3497_v9 }
 0x4c3   :  { %10289 = vmatpush1.bf16.msra.mxu1 %v12537_v23  ;;  %v3513_v23 = vld [vmem:[#allocation16 + $0x748] sm:$0xff] }
 0x4c4   :  { %10494 = vmatpush1.bf16.msra.mxu0 %v12539_v24  ;;  %10290 = vmatprep.subr.bf16.mxu1 %v12554_v25  ;;  %v1272_v24 = vrot.slane %v15046_v10, %v14991_v42  ;;  %v1280_v25 = vrot.slane %v15046_v10, %v14998_v13 }
 0x4c5   :  { %10495 = vmatprep.subr.bf16.mxu0 %v12556_v26  ;;  %v12649_v26 = vcombine.low %v3488_v6, %v3496_v7 }
 0x4c7   :  { %10291 = vmatpush1.bf16.msra.mxu1 %v12553_v30  ;;  %v12668_v30 = vcombine.high %v3505_v22, %v3513_v23 }
 0x4c8   :  { %10496 = vmatpush1.bf16.msra.mxu0 %v12555_v31  ;;  %10292 = vmatprep.subr.bf16.mxu1 %v12570_v32  ;;  %v3520_v31 = vld [vmem:[#allocation16 + $0x780] sm:$0xff] }
 0x4c9   :  { %10497 = vmatprep.subr.bf16.mxu0 %v12572_v33  ;;  %v3528_v32 = vld [vmem:[#allocation16 + $0x7c0] sm:$0xff] }
 0x4ca   :  { %v12681_v61 = vcombine.low %v3520_v31, %v3528_v32 }
 0x4cb   :  { %10293 = vmatpush1.bf16.msra.mxu1 %v12569_v41 }
 0x4cc   :  { %10498 = vmatpush1.bf16.msra.mxu0 %v12571_v43  ;;  %10294 = vmatprep.subr.bf16.mxu1 %v12586_v44 }
 0x4cd   :  { %10499 = vmatprep.subr.bf16.mxu0 %v12588_v45 }
 0x4cf   :  { %10295 = vmatpush1.bf16.msra.mxu1 %v12585_v50  ;;  %v12667_v50 = vcombine.low %v3505_v22, %v3513_v23 }
 0x4d0   :  { %10500 = vmatpush1.bf16.msra.mxu0 %v12587_v51  ;;  %10296 = vmatprep.subr.bf16.mxu1 %v12602_v63  ;;  %v12682_v51 = vcombine.high %v3520_v31, %v3528_v32  ;;  %v3561_v31 = vld [vmem:[#allocation16 + $0x8c8] sm:$0xff] }
 0x4d1   :  { %10501 = vmatprep.subr.bf16.mxu0 %v12604_v52 }
 0x4d3   :  { %10297 = vmatpush1.bf16.msra.mxu1 %v12601_v56  ;;  %v15060_v56 = vld [vmem:[#allocation16 + $0x808] sm:$0xff] }
 0x4d4   :  { %10502 = vmatpush1.bf16.msra.mxu0 %v12603_v57  ;;  %10298 = vmatprep.subr.bf16.mxu1 %v12618_v58  ;;  %v3545_v57 = vld [vmem:[#allocation16 + $0x848] sm:$0xff] }
 0x4d5   :  { %10503 = vmatprep.subr.bf16.mxu0 %v12620_v59  ;;  %v12700_v60 = vcombine.high %v15060_v56, %v3545_v57 }
 0x4d7   :  { %10299 = vmatpush1.bf16.msra.mxu1 %v12617_v1 }
 0x4d8   :  { %10504 = vmatpush1.bf16.msra.mxu0 %v12619_v4  ;;  %10300 = vmatprep.subr.bf16.mxu1 %v12634_v3 }
 0x4d9   :  { %10505 = vmatprep.subr.bf16.mxu0 %v12636_v5 }
 0x4db   :  { %10301 = vmatpush1.bf16.msra.mxu1 %v12633_v11 }
 0x4dc   :  { %10506 = vmatpush1.bf16.msra.mxu0 %v12635_v14  ;;  %10302 = vmatprep.subr.bf16.mxu1 %v12650_v16 }
 0x4dd   :  { %v2857_v15 = vpop.f32.mrb[8].mxu1  ;;  %v15054_v29 = vpop.f32.mrb[8].mxu0  ;;  %10507 = vmatprep.subr.bf16.mxu0 %v12652_v17 }
 0x4de   :  { %v13666_v33 = vadd.f32 %v2857_v15, %v1268_v12  ;;  %v2859_v34 = vpop.f32.mrb[9].mxu1  ;;  %v2941_v35 = vpop.f32.mrb[9].mxu0  ;;  %v3560_v15 = vld [vmem:[#allocation16 + $0x8c0] sm:$0xff] }
 0x4df   :  { %v13667_v41 = vadd.f32 %v2859_v34, %v1272_v24  ;;  %v13669_v43 = vadd.f32 %v2941_v35, %v1280_v25  ;;  %v2861_v44 = vpop.f32.mrb[10].mxu1  ;;  %v2943_v45 = vpop.f32.mrb[10].mxu0  ;;  %10303 = vmatpush1.bf16.msra.mxu1 %v12649_v26  ;;  %v12697_v34 = vcombine.low %v15056_v53, %v15058_v54  ;;  %v12699_v35 = vcombine.low %v15060_v56, %v3545_v57 }
 0x4e0   :  { %v3190_v47 = vmin.f32 %v13666_v33, 20.0  ;;  %v2862_v48 = vpop.f32.mrb[11].mxu1  ;;  %v2944_v49 = vpop.f32.mrb[11].mxu0  ;;  %10508 = vmatpush1.bf16.msra.mxu0 %v12651_v27  ;;  %10304 = vmatprep.subr.bf16.mxu1 %v12666_v28  ;;  %v3552_v27 = vld [vmem:[#allocation16 + $0x880] sm:$0xff]  ;;  %v3569_v44 = vld [vmem:[#allocation16 + $0x908] sm:$0xff]  ;;  %v1276_v53 = vrot.slane %v15046_v10, %v15015_v2 }
 0x4e1   :  { %v3191_v63 = vmin.f32 %v13667_v41, 20.0  ;;  %v3193_v52 = vmin.f32 %v13669_v43, 20.0  ;;  %10509 = vmatprep.subr.bf16.mxu0 %v12668_v30  ;;  %v3553_v30 = vld [vmem:[#allocation16 + $0x888] sm:$0xff]  ;;  %v12714_v37 = vcombine.high %v3552_v27, %v3560_v15 }
 0x4e2   :  { %v3199_v55 = vmul.f32 1.442695, %v3190_v47  ;;  %v3577_v45 = vld [vmem:[#allocation16 + $0x948] sm:$0xff]  ;;  %v12713_v47 = vcombine.low %v3552_v27, %v3560_v15  ;;  %v12715_v48 = vcombine.low %v3553_v30, %v3561_v31  ;;  %v3648_v27 = vld [vmem:[#allocation16 + $0xb80] sm:$0xff] }
 0x4e3   :  { %v3201_v58 = vmul.f32 1.442695, %v3191_v63  ;;  %v3205_v59 = vmul.f32 1.442695, %v3193_v52  ;;  %10305 = vmatpush1.bf16.msra.mxu1 %v12665_v46  ;;  %v3592_v63 = vld [vmem:[#allocation16 + $0x9c0] sm:$0xff]  ;;  %v3585_v52 = vld [vmem:[#allocation16 + $0x988] sm:$0xff] }
 0x4e4   :  { %14416 = vpow2.f32 %v3199_v55  ;;  %10510 = vmatpush1.bf16.msra.mxu0 %v12667_v50  ;;  %10306 = vmatprep.subr.bf16.mxu1 %v12682_v51  ;;  %v12732_v50 = vcombine.high %v3569_v44, %v3577_v45  ;;  %v3584_v51 = vld [vmem:[#allocation16 + $0x980] sm:$0xff]  ;;  %v12731_v55 = vcombine.low %v3569_v44, %v3577_v45  ;;  %v3649_v15 = vld [vmem:[#allocation16 + $0xb88] sm:$0xff] }
 0x4e5   :  { %10511 = vmatprep.subr.bf16.mxu0 %v12684_v19  ;;  %14418 = vpow2.f32 %v3201_v58  ;;  %v3593_v19 = vld [vmem:[#allocation16 + $0x9c8] sm:$0xff]  ;;  %v12746_v56 = vcombine.high %v3584_v51, %v3592_v63  ;;  %v3600_v58 = vld [vmem:[#allocation16 + $0xa00] sm:$0xff] }
 0x4e6   :  { %14420 = vpow2.f32 %v3205_v59  ;;  %v12748_v57 = vcombine.high %v3585_v52, %v3593_v19  ;;  %v3608_v59 = vld [vmem:[#allocation16 + $0xa40] sm:$0xff]  ;;  %v3673_v44 = vld [vmem:[#allocation16 + $0xc48] sm:$0xff] }
 0x4e7   :  { %10307 = vmatpush1.bf16.msra.mxu1 %v12681_v61  ;;  %v3601_v61 = vld [vmem:[#allocation16 + $0xa08] sm:$0xff] }
 0x4e8   :  { %10512 = vmatpush1.bf16.msra.mxu0 %v12683_v62  ;;  %10317 = vmatprep.subr.bf16.mxu1 %v12698_v0  ;;  %v3609_v62 = vld [vmem:[#allocation16 + $0xa48] sm:$0xff]  ;;  %v15083_v0 = vadd.f32 %v15054_v29, %v1276_v53 }
 0x4e9   :  { %10522 = vmatprep.subr.bf16.mxu0 %v12700_v60  ;;  %v12745_v60 = vcombine.low %v3584_v51, %v3592_v63  ;;  %v3688_v51 = vld [vmem:[#allocation16 + $0xcc0] sm:$0xff]  ;;  %v3681_v63 = vld [vmem:[#allocation16 + $0xc88] sm:$0xff] }
 0x4ee   :  { %v14417_v1 = vpop.eup %14416 }
 0x4ef   :  { %v3217_v4 = vadd.f32 2.0, %v14417_v1  ;;  %v14419_v3 = vpop.eup %14418 }
 0x4f0   :  { %v14421_v5 = vpop.eup %14420  ;;  %v3218_v7 = vadd.f32 2.0, %v14419_v3 }
 0x4f1   :  { %v3226_v6 = vmul.f32 %v14417_v1, %v3217_v4  ;;  %v3220_v8 = vadd.f32 2.0, %v14421_v5  ;;  %v12747_v1 = vcombine.low %v3585_v52, %v3593_v19  ;;  %v12762_v4 = vcombine.high %v3600_v58, %v3608_v59  ;;  %v3689_v52 = vld [vmem:[#allocation16 + $0xcc8] sm:$0xff] }
 0x4f2   :  { %v3227_v11 = vmul.f32 %v14419_v3, %v3218_v7  ;;  %v12764_v3 = vcombine.high %v3601_v61, %v3609_v62  ;;  %v3617_v7 = vld [vmem:[#allocation16 + $0xa88] sm:$0xff] }
 0x4f3   :  { %v3244_v9 = vadd.f32 2.0, %v3226_v6  ;;  %v3229_v14 = vmul.f32 %v14421_v5, %v3220_v8  ;;  %v3235_v21 = vmul.f32 %v13666_v33, %v3226_v6  ;;  %v3568_v33 = vld [vmem:[#allocation16 + $0x900] sm:$0xff]  ;;  %v3625_v8 = vld [vmem:[#allocation16 + $0xac8] sm:$0xff] }
 0x4f4   :  { %v3245_v16 = vadd.f32 2.0, %v3227_v11  ;;  %v3236_v12 = vmul.f32 %v13667_v41, %v3227_v11  ;;  %v12716_v41 = vcombine.high %v3553_v30, %v3561_v31  ;;  %v3616_v5 = vld [vmem:[#allocation16 + $0xa80] sm:$0xff]  ;;  %v12761_v11 = vcombine.low %v3600_v58, %v3608_v59  ;;  %v3657_v30 = vld [vmem:[#allocation16 + $0xbc8] sm:$0xff] }
 0x4f5   :  { %14422 = vrcp.f32 %v3244_v9  ;;  %v3247_v17 = vadd.f32 2.0, %v3229_v14  ;;  %v3238_v24 = vmul.f32 %v13669_v43, %v3229_v14  ;;  %v3576_v43 = vld [vmem:[#allocation16 + $0x940] sm:$0xff]  ;;  %v3192_v9 = vmin.f32 %v15083_v0, 20.0  ;;  %v3697_v59 = vld [vmem:[#allocation16 + $0xd08] sm:$0xff] }
 0x4f6   :  { %14424 = vrcp.f32 %v3245_v16  ;;  %v12730_v49 = vcombine.high %v3568_v33, %v3576_v43  ;;  %v12729_v54 = vcombine.low %v3568_v33, %v3576_v43  ;;  %v3624_v6 = vld [vmem:[#allocation16 + $0xac0] sm:$0xff]  ;;  %v12763_v14 = vcombine.low %v3601_v61, %v3609_v62  ;;  %v3665_v43 = vld [vmem:[#allocation16 + $0xc08] sm:$0xff] }
 0x4f7   :  { %14426 = vrcp.f32 %v3247_v17  ;;  %v12778_v29 = vcombine.high %v3616_v5, %v3624_v6  ;;  %v12780_v16 = vcombine.high %v3617_v7, %v3625_v8  ;;  %v3632_v17 = vld [vmem:[#allocation16 + $0xb00] sm:$0xff]  ;;  %v12812_v33 = vcombine.high %v3649_v15, %v3657_v30  ;;  %v3705_v61 = vld [vmem:[#allocation16 + $0xd48] sm:$0xff] }
 0x4f8   :  { %v12827_v53 = vcombine.low %v3665_v43, %v3673_v44  ;;  %v3704_v58 = vld [vmem:[#allocation16 + $0xd40] sm:$0xff] }
 0x4ff   :  { %v14423_v20 = vpop.eup %14422 }
 0x500   :  { %v14425_v22 = vpop.eup %14424  ;;  %v3262_v23 = vmul.f32 %v14423_v20, %v3235_v21  ;;  %v3640_v20 = vld [vmem:[#allocation16 + $0xb40] sm:$0xff]  ;;  %v3633_v21 = vld [vmem:[#allocation16 + $0xb08] sm:$0xff] }
 0x501   :  { %v14427_v25 = vpop.eup %14426  ;;  %v3263_v26 = vmul.f32 %v14425_v22, %v3236_v12  ;;  %v3641_v12 = vld [vmem:[#allocation16 + $0xb48] sm:$0xff]  ;;  %v3203_v22 = vmul.f32 1.442695, %v3192_v9  ;;  %v12793_v31 = vcombine.low %v3632_v17, %v3640_v20 }
 0x502   :  { %v3265_v28 = vmul.f32 %v14427_v25, %v3238_v24  ;;  %v15070_v36 = vpack.c.bf16 %v3262_v23, %v3262_v23  ;;  %v12777_v23 = vcombine.low %v3616_v5, %v3624_v6  ;;  %v12779_v24 = vcombine.low %v3617_v7, %v3625_v8  ;;  %v3712_v5 = vld [vmem:[#allocation16 + $0xd80] sm:$0xff]  ;;  %v3713_v7 = vld [vmem:[#allocation16 + $0xd88] sm:$0xff] }
 0x503   :  { %v15065_v32 = vpack.c.bf16 %v3263_v26, %v3263_v26  ;;  %v12794_v25 = vcombine.high %v3632_v17, %v3640_v20  ;;  %v12796_v26 = vcombine.high %v3633_v21, %v3641_v12  ;;  %14428 = vpow2.f32 %v3203_v22  ;;  %v3720_v6 = vld [vmem:[#allocation16 + $0xdc0] sm:$0xff]  ;;  %v3721_v8 = vld [vmem:[#allocation16 + $0xdc8] sm:$0xff] }
 0x504   :  { %v15074_v46 = vpack.c.bf16 %v3265_v28, %v3265_v28  ;;  %v3656_v28 = vld [vmem:[#allocation16 + $0xbc0] sm:$0xff] }
 0x505   :  { %10308 = vmatprep.mubr.bf16.mxu1 %v15065_v32  ;;  %10513 = vmatprep.mubr.bf16.mxu0 %v15065_v32  ;;  %v12809_v45 = vcombine.low %v3648_v27, %v3656_v28  ;;  %v3728_v17 = vld [vmem:[#allocation16 + $0xe00] sm:$0xff] }
 0x506   :  { %10309 = vmatmul.mubr.bf16.vlgmr.msra.gmra.mrb[20].mxu1 %v15070_v36  ;;  %10514 = vmatmul.mubr.bf16.vlgmr.msra.gmra.mrb[20].mxu0 %v15070_v36  ;;  %v3736_v20 = vld [vmem:[#allocation16 + $0xe40] sm:$0xff] }
 0x507   :  { %10318 = vmatpush1.bf16.msra.mxu1 %v12697_v34  ;;  %10523 = vmatpush1.bf16.msra.mxu0 %v12699_v35  ;;  %v12795_v34 = vcombine.low %v3633_v21, %v3641_v12  ;;  %v12810_v35 = vcombine.high %v3648_v27, %v3656_v28  ;;  %v3729_v21 = vld [vmem:[#allocation16 + $0xe08] sm:$0xff]  ;;  %v3744_v27 = vld [vmem:[#allocation16 + $0xe80] sm:$0xff] }
 0x508   :  { %10349 = vmatprep.mubr.bf16.mxu1 %v15074_v46  ;;  %10554 = vmatprep.mubr.bf16.mxu0 %v15074_v46  ;;  %v3737_v12 = vld [vmem:[#allocation16 + $0xe48] sm:$0xff]  ;;  %v3752_v28 = vld [vmem:[#allocation16 + $0xec0] sm:$0xff] }
 0x509   :  { %10319 = vmatprep.subr.bf16.mxu1 %v12714_v37  ;;  %10524 = vmatprep.subr.bf16.mxu0 %v12716_v41  ;;  %v3664_v37 = vld [vmem:[#allocation16 + $0xc00] sm:$0xff] }
 0x50a   :  { %v3672_v41 = vld [vmem:[#allocation16 + $0xc40] sm:$0xff] }
 0x50b   :  { %10320 = vmatpush1.bf16.msra.mxu1 %v12713_v47  ;;  %10525 = vmatpush1.bf16.msra.mxu0 %v12715_v48  ;;  %v12811_v47 = vcombine.low %v3649_v15, %v3657_v30  ;;  %v12826_v48 = vcombine.high %v3664_v37, %v3672_v41  ;;  %v12825_v19 = vcombine.low %v3664_v37, %v3672_v41  ;;  %v3745_v15 = vld [vmem:[#allocation16 + $0xe88] sm:$0xff]  ;;  %v3760_v37 = vld [vmem:[#allocation16 + $0xf00] sm:$0xff] }
 0x50c   :  { %10321 = vmatprep.subr.bf16.mxu1 %v12730_v49  ;;  %10526 = vmatprep.subr.bf16.mxu0 %v12732_v50  ;;  %v12828_v49 = vcombine.high %v3665_v43, %v3673_v44  ;;  %v3680_v50 = vld [vmem:[#allocation16 + $0xc80] sm:$0xff]  ;;  %v3753_v30 = vld [vmem:[#allocation16 + $0xec8] sm:$0xff] }
 0x50d   :  { %v3768_v41 = vld [vmem:[#allocation16 + $0xf40] sm:$0xff]  ;;  %v3761_v43 = vld [vmem:[#allocation16 + $0xf08] sm:$0xff] }
 0x50e   :  { %v3769_v44 = vld [vmem:[#allocation16 + $0xf48] sm:$0xff] }
 0x50f   :  { %10322 = vmatpush1.bf16.msra.mxu1 %v12729_v54  ;;  %10527 = vmatpush1.bf16.msra.mxu0 %v12731_v55  ;;  %v14429_v54 = vpop.eup %14428  ;;  %v12842_v55 = vcombine.high %v3680_v50, %v3688_v51 }
 0x510   :  { %10323 = vmatprep.subr.bf16.mxu1 %v12746_v56  ;;  %10528 = vmatprep.subr.bf16.mxu0 %v12748_v57  ;;  %v12844_v56 = vcombine.high %v3681_v63, %v3689_v52  ;;  %v3696_v57 = vld [vmem:[#allocation16 + $0xd00] sm:$0xff]  ;;  %v3219_v62 = vadd.f32 2.0, %v14429_v54 }
 0x512   :  { %v15086_v9 = vmul.f32 %v14429_v54, %v3219_v62 }
 0x513   :  { %10324 = vmatpush1.bf16.msra.mxu1 %v12745_v60  ;;  %10529 = vmatpush1.bf16.msra.mxu0 %v12747_v1  ;;  %v12841_v60 = vcombine.low %v3680_v50, %v3688_v51  ;;  %v12843_v1 = vcombine.low %v3681_v63, %v3689_v52  ;;  %v3776_v50 = vld [vmem:[#allocation16 + $0xf80] sm:$0xff]  ;;  %v3777_v63 = vld [vmem:[#allocation16 + $0xf88] sm:$0xff] }
 0x514   :  { %10325 = vmatprep.subr.bf16.mxu1 %v12762_v4  ;;  %10530 = vmatprep.subr.bf16.mxu0 %v12764_v3  ;;  %v12858_v4 = vcombine.high %v3696_v57, %v3704_v58  ;;  %v12860_v3 = vcombine.high %v3697_v59, %v3705_v61  ;;  %v3246_v22 = vadd.f32 2.0, %v15086_v9  ;;  %v3784_v51 = vld [vmem:[#allocation16 + $0xfc0] sm:$0xff]  ;;  %v3785_v52 = vld [vmem:[#allocation16 + $0xfc8] sm:$0xff]  ;;  %v3237_v62 = vmul.f32 %v15083_v0, %v15086_v9 }
 0x515   :  { %v12938_v54 = vcombine.high %v3776_v50, %v3784_v51 }
 0x516   :  { %14430 = vrcp.f32 %v3246_v22 }
 0x517   :  { %10326 = vmatpush1.bf16.msra.mxu1 %v12761_v11  ;;  %10531 = vmatpush1.bf16.msra.mxu0 %v12763_v14  ;;  %v12857_v11 = vcombine.low %v3696_v57, %v3704_v58  ;;  %v12859_v14 = vcombine.low %v3697_v59, %v3705_v61  ;;  %v3800_v58 = vld [vmem:[#allocation16 + $0x1040] sm:$0xff]  ;;  %v3793_v59 = vld [vmem:[#allocation16 + $0x1008] sm:$0xff] }
 0x518   :  { %10327 = vmatprep.subr.bf16.mxu1 %v12778_v29  ;;  %10532 = vmatprep.subr.bf16.mxu0 %v12780_v16  ;;  %v12874_v29 = vcombine.high %v3712_v5, %v3720_v6  ;;  %v12876_v16 = vcombine.high %v3713_v7, %v3721_v8  ;;  %v3801_v61 = vld [vmem:[#allocation16 + $0x1048] sm:$0xff] }
 0x51b   :  { %10328 = vmatpush1.bf16.msra.mxu1 %v12777_v23  ;;  %10533 = vmatpush1.bf16.msra.mxu0 %v12779_v24  ;;  %v12873_v23 = vcombine.low %v3712_v5, %v3720_v6  ;;  %v12875_v24 = vcombine.low %v3713_v7, %v3721_v8  ;;  %v12956_v5 = vcombine.high %v3793_v59, %v3801_v61  ;;  %v3808_v6 = vld [vmem:[#allocation16 + $0x1080] sm:$0xff]  ;;  %v3809_v8 = vld [vmem:[#allocation16 + $0x1088] sm:$0xff] }
 0x51c   :  { %10329 = vmatprep.subr.bf16.mxu1 %v12794_v25  ;;  %10534 = vmatprep.subr.bf16.mxu0 %v12796_v26  ;;  %v12890_v25 = vcombine.high %v3728_v17, %v3736_v20  ;;  %v12892_v26 = vcombine.high %v3729_v21, %v3737_v12  ;;  %v3816_v7 = vld [vmem:[#allocation16 + $0x10c0] sm:$0xff] }
 0x51d   :  { %v12970_v0 = vcombine.high %v3808_v6, %v3816_v7  ;;  %v12969_v22 = vcombine.low %v3808_v6, %v3816_v7  ;;  %v3912_v7 = vld [vmem:[#allocation16 + $0x13c0] sm:$0xff] }
 0x51f   :  { %10330 = vmatpush1.bf16.msra.mxu1 %v12793_v31  ;;  %10535 = vmatpush1.bf16.msra.mxu0 %v12795_v34  ;;  %v12889_v31 = vcombine.low %v3728_v17, %v3736_v20  ;;  %v12891_v34 = vcombine.low %v3729_v21, %v3737_v12  ;;  %v3824_v17 = vld [vmem:[#allocation16 + $0x1100] sm:$0xff]  ;;  %v3825_v21 = vld [vmem:[#allocation16 + $0x1108] sm:$0xff] }
 0x520   :  { %10331 = vmatprep.subr.bf16.mxu1 %v12810_v35  ;;  %10536 = vmatprep.subr.bf16.mxu0 %v12812_v33  ;;  %v12906_v35 = vcombine.high %v3744_v27, %v3752_v28  ;;  %v12908_v33 = vcombine.high %v3745_v15, %v3753_v30  ;;  %v14431_v57 = vpop.eup %14430  ;;  %v3832_v20 = vld [vmem:[#allocation16 + $0x1140] sm:$0xff]  ;;  %v3833_v12 = vld [vmem:[#allocation16 + $0x1148] sm:$0xff] }
 0x523   :  { %10332 = vmatpush1.bf16.msra.mxu1 %v12809_v45  ;;  %10537 = vmatpush1.bf16.msra.mxu0 %v12811_v47  ;;  %v12905_v45 = vcombine.low %v3744_v27, %v3752_v28  ;;  %v12907_v47 = vcombine.low %v3745_v15, %v3753_v30  ;;  %v3848_v27 = vld [vmem:[#allocation16 + $0x11c0] sm:$0xff]  ;;  %v3841_v28 = vld [vmem:[#allocation16 + $0x1188] sm:$0xff]  ;;  %v12985_v30 = vcombine.low %v3824_v17, %v3832_v20 }
 0x524   :  { %10333 = vmatprep.subr.bf16.mxu1 %v12826_v48  ;;  %10538 = vmatprep.subr.bf16.mxu0 %v12828_v49  ;;  %v12922_v48 = vcombine.high %v3760_v37, %v3768_v41  ;;  %v12924_v49 = vcombine.high %v3761_v43, %v3769_v44  ;;  %v3849_v15 = vld [vmem:[#allocation16 + $0x11c8] sm:$0xff] }
 0x527   :  { %10334 = vmatpush1.bf16.msra.mxu1 %v12825_v19  ;;  %10539 = vmatpush1.bf16.msra.mxu0 %v12827_v53  ;;  %v12921_v19 = vcombine.low %v3760_v37, %v3768_v41  ;;  %v12923_v53 = vcombine.low %v3761_v43, %v3769_v44  ;;  %v3864_v37 = vld [vmem:[#allocation16 + $0x1240] sm:$0xff]  ;;  %v3857_v41 = vld [vmem:[#allocation16 + $0x1208] sm:$0xff] }
 0x528   :  { %10335 = vmatprep.subr.bf16.mxu1 %v12842_v55  ;;  %10540 = vmatprep.subr.bf16.mxu0 %v12844_v56  ;;  %v12940_v55 = vcombine.high %v3777_v63, %v3785_v52  ;;  %v3792_v56 = vld [vmem:[#allocation16 + $0x1000] sm:$0xff]  ;;  %v3865_v43 = vld [vmem:[#allocation16 + $0x1248] sm:$0xff] }
 0x52b   :  { %10336 = vmatpush1.bf16.msra.mxu1 %v12841_v60  ;;  %10541 = vmatpush1.bf16.msra.mxu0 %v12843_v1  ;;  %v12937_v60 = vcombine.low %v3776_v50, %v3784_v51  ;;  %v12939_v1 = vcombine.low %v3777_v63, %v3785_v52  ;;  %v3880_v50 = vld [vmem:[#allocation16 + $0x12c0] sm:$0xff]  ;;  %v3873_v51 = vld [vmem:[#allocation16 + $0x1288] sm:$0xff] }
 0x52c   :  { %10337 = vmatprep.subr.bf16.mxu1 %v12858_v4  ;;  %10542 = vmatprep.subr.bf16.mxu0 %v12860_v3  ;;  %v3264_v4 = vmul.f32 %v14431_v57, %v3237_v62  ;;  %v12954_v3 = vcombine.high %v3792_v56, %v3800_v58  ;;  %v3881_v63 = vld [vmem:[#allocation16 + $0x12c8] sm:$0xff]  ;;  %v3896_v57 = vld [vmem:[#allocation16 + $0x1340] sm:$0xff] }
 0x52f   :  { %10338 = vmatpush1.bf16.msra.mxu1 %v12857_v11  ;;  %10543 = vmatpush1.bf16.msra.mxu0 %v12859_v14  ;;  %v3817_v11 = vld [vmem:[#allocation16 + $0x10c8] sm:$0xff]  ;;  %v12953_v14 = vcombine.low %v3792_v56, %v3800_v58  ;;  %v15096_v56 = vsub.s32 4, %v14985_v39 }
 0x530   :  { %10339 = vmatprep.subr.bf16.mxu1 %v12874_v29  ;;  %10544 = vmatprep.subr.bf16.mxu0 %v12876_v16  ;;  %v12955_v29 = vcombine.low %v3793_v59, %v3801_v61  ;;  %v15091_v16 = vpack.c.bf16 %v3264_v4, %v3264_v4  ;;  %v12972_v9 = vcombine.high %v3809_v8, %v3817_v11  ;;  %v3889_v58 = vld [vmem:[#allocation16 + $0x1308] sm:$0xff]  ;;  %v15099_v61 = vsub.s32 5, %v14985_v39 }
 0x531   :  { %v3897_v59 = vld [vmem:[#allocation16 + $0x1348] sm:$0xff]  ;;  %v1284_v6 = vrot.slane %v15046_v10, %v15096_v56 }
 0x533   :  { %10340 = vmatpush1.bf16.msra.mxu1 %v12873_v23  ;;  %10545 = vmatpush1.bf16.msra.mxu0 %v12875_v24  ;;  %v12971_v23 = vcombine.low %v3809_v8, %v3817_v11  ;;  %v12986_v24 = vcombine.high %v3824_v17, %v3832_v20  ;;  %v3905_v8 = vld [vmem:[#allocation16 + $0x1388] sm:$0xff] }
 0x534   :  { %10341 = vmatprep.subr.bf16.mxu1 %v12890_v25  ;;  %10546 = vmatprep.subr.bf16.mxu0 %v12892_v26  ;;  %v12988_v25 = vcombine.high %v3825_v21, %v3833_v12  ;;  %v3840_v26 = vld [vmem:[#allocation16 + $0x1180] sm:$0xff]  ;;  %v3913_v11 = vld [vmem:[#allocation16 + $0x13c8] sm:$0xff] }
 0x535   :  { %v13001_v44 = vcombine.low %v3840_v26, %v3848_v27 }
 0x537   :  { %10342 = vmatpush1.bf16.msra.mxu1 %v12889_v31  ;;  %10547 = vmatpush1.bf16.msra.mxu0 %v12891_v34  ;;  %v12987_v31 = vcombine.low %v3825_v21, %v3833_v12  ;;  %v13002_v34 = vcombine.high %v3840_v26, %v3848_v27  ;;  %v13068_v21 = vcombine.high %v3905_v8, %v3913_v11  ;;  %v3920_v12 = vld [vmem:[#allocation16 + $0x1400] sm:$0xff]  ;;  %v3921_v26 = vld [vmem:[#allocation16 + $0x1408] sm:$0xff] }
 0x538   :  { %10343 = vmatprep.subr.bf16.mxu1 %v12906_v35  ;;  %10548 = vmatprep.subr.bf16.mxu0 %v12908_v33  ;;  %v13004_v35 = vcombine.high %v3841_v28, %v3849_v15  ;;  %v3856_v33 = vld [vmem:[#allocation16 + $0x1200] sm:$0xff]  ;;  %v3929_v27 = vld [vmem:[#allocation16 + $0x1448] sm:$0xff] }
 0x539   :  { %v13017_v52 = vcombine.low %v3856_v33, %v3864_v37 }
 0x53b   :  { %10344 = vmatpush1.bf16.msra.mxu1 %v12905_v45  ;;  %10549 = vmatpush1.bf16.msra.mxu0 %v12907_v47  ;;  %v13003_v45 = vcombine.low %v3841_v28, %v3849_v15  ;;  %v13018_v47 = vcombine.high %v3856_v33, %v3864_v37  ;;  %v13067_v37 = vcombine.low %v3905_v8, %v3913_v11  ;;  %v3976_v8 = vld [vmem:[#allocation16 + $0x15c0] sm:$0xff]  ;;  %v3969_v11 = vld [vmem:[#allocation16 + $0x1588] sm:$0xff] }
 0x53c   :  { %10345 = vmatprep.subr.bf16.mxu1 %v12922_v48  ;;  %10550 = vmatprep.subr.bf16.mxu0 %v12924_v49  ;;  %v13020_v48 = vcombine.high %v3857_v41, %v3865_v43  ;;  %v3872_v49 = vld [vmem:[#allocation16 + $0x1280] sm:$0xff] }
 0x53d   :  { %v13033_v62 = vcombine.low %v3872_v49, %v3880_v50 }
 0x53f   :  { %10346 = vmatpush1.bf16.msra.mxu1 %v12921_v19  ;;  %10551 = vmatpush1.bf16.msra.mxu0 %v12923_v53  ;;  %v13019_v19 = vcombine.low %v3857_v41, %v3865_v43  ;;  %v13034_v53 = vcombine.high %v3872_v49, %v3880_v50  ;;  %v3944_v50 = vld [vmem:[#allocation16 + $0x14c0] sm:$0xff] }
 0x540   :  { %10347 = vmatprep.subr.bf16.mxu1 %v12938_v54  ;;  %10552 = vmatprep.subr.bf16.mxu0 %v12940_v55  ;;  %v13036_v54 = vcombine.high %v3873_v51, %v3881_v63  ;;  %v3888_v55 = vld [vmem:[#allocation16 + $0x1300] sm:$0xff] }
 0x541   :  { %v13050_v4 = vcombine.high %v3888_v55, %v3896_v57 }
 0x543   :  { %10348 = vmatpush1.bf16.msra.mxu1 %v12937_v60  ;;  %10553 = vmatpush1.bf16.msra.mxu0 %v12939_v1  ;;  %v13035_v60 = vcombine.low %v3873_v51, %v3881_v63  ;;  %v15102_v1 = vsub.s32 7, %v14985_v39  ;;  %v3937_v51 = vld [vmem:[#allocation16 + $0x1488] sm:$0xff] }
 0x544   :  { %10358 = vmatprep.subr.bf16.mxu1 %v12954_v3  ;;  %10563 = vmatprep.subr.bf16.mxu0 %v12956_v5  ;;  %v13052_v3 = vcombine.high %v3889_v58, %v3897_v59  ;;  %v3904_v5 = vld [vmem:[#allocation16 + $0x1380] sm:$0xff]  ;;  %v3945_v63 = vld [vmem:[#allocation16 + $0x14c8] sm:$0xff] }
 0x545   :  { %v13066_v20 = vcombine.high %v3904_v5, %v3912_v7  ;;  %v13065_v33 = vcombine.low %v3904_v5, %v3912_v7  ;;  %v3968_v7 = vld [vmem:[#allocation16 + $0x1580] sm:$0xff] }
 0x546   :  { %10350 = vmatmul.mubr.bf16.vlgmr.msra.gmra.mrb[20].mxu1 %v15091_v16  ;;  %10555 = vmatmul.mubr.bf16.vlgmr.msra.gmra.mrb[20].mxu0 %v15091_v16 }
 0x547   :  { %10359 = vmatpush1.bf16.msra.mxu1 %v12953_v14  ;;  %10564 = vmatpush1.bf16.msra.mxu0 %v12955_v29  ;;  %v1288_v14 = vrot.slane %v15046_v10, %v15099_v61  ;;  %v13049_v29 = vcombine.low %v3888_v55, %v3896_v57  ;;  %v13100_v57 = vcombine.high %v3937_v51, %v3945_v63 }
 0x548   :  { %10360 = vmatprep.subr.bf16.mxu1 %v12970_v0  ;;  %10565 = vmatprep.subr.bf16.mxu0 %v12972_v9  ;;  %v13051_v0 = vcombine.low %v3889_v58, %v3897_v59  ;;  %v1296_v9 = vrot.slane %v15046_v10, %v15102_v1  ;;  %v3952_v58 = vld [vmem:[#allocation16 + $0x1500] sm:$0xff] }
 0x549   :  { %v3960_v59 = vld [vmem:[#allocation16 + $0x1540] sm:$0xff] }
 0x54a   :  { %v13114_v5 = vcombine.high %v3952_v58, %v3960_v59 }
 0x54b   :  { %10361 = vmatpush1.bf16.msra.mxu1 %v12969_v22  ;;  %10566 = vmatpush1.bf16.msra.mxu0 %v12971_v23 }
 0x54c   :  { %10362 = vmatprep.subr.bf16.mxu1 %v12986_v24  ;;  %10567 = vmatprep.subr.bf16.mxu0 %v12988_v25  ;;  %v3928_v25 = vld [vmem:[#allocation16 + $0x1440] sm:$0xff] }
 0x54f   :  { %10363 = vmatpush1.bf16.msra.mxu1 %v12985_v30  ;;  %10568 = vmatpush1.bf16.msra.mxu0 %v12987_v31 }
 0x550   :  { %10364 = vmatprep.subr.bf16.mxu1 %v13002_v34  ;;  %10569 = vmatprep.subr.bf16.mxu0 %v13004_v35 }
 0x553   :  { %10365 = vmatpush1.bf16.msra.mxu1 %v13001_v44  ;;  %10570 = vmatpush1.bf16.msra.mxu0 %v13003_v45  ;;  %v13082_v44 = vcombine.high %v3920_v12, %v3928_v25  ;;  %v13084_v45 = vcombine.high %v3921_v26, %v3929_v27 }
 0x554   :  { %10366 = vmatprep.subr.bf16.mxu1 %v13018_v47  ;;  %10571 = vmatprep.subr.bf16.mxu0 %v13020_v48  ;;  %v3936_v47 = vld [vmem:[#allocation16 + $0x1480] sm:$0xff] }
 0x555   :  { %v13098_v55 = vcombine.high %v3936_v47, %v3944_v50 }
 0x557   :  { %10367 = vmatpush1.bf16.msra.mxu1 %v13017_v52  ;;  %10572 = vmatpush1.bf16.msra.mxu0 %v13019_v19 }
 0x558   :  { %10368 = vmatprep.subr.bf16.mxu1 %v13034_v53  ;;  %10573 = vmatprep.subr.bf16.mxu0 %v13036_v54  ;;  %v13081_v53 = vcombine.low %v3920_v12, %v3928_v25  ;;  %v13083_v54 = vcombine.low %v3921_v26, %v3929_v27  ;;  %v3992_v12 = vld [vmem:[#allocation16 + $0x1640] sm:$0xff]  ;;  %v3993_v25 = vld [vmem:[#allocation16 + $0x1648] sm:$0xff] }
 0x55b   :  { %10369 = vmatpush1.bf16.msra.mxu1 %v13033_v62  ;;  %10574 = vmatpush1.bf16.msra.mxu0 %v13035_v60  ;;  %v3953_v62 = vld [vmem:[#allocation16 + $0x1508] sm:$0xff] }
 0x55c   :  { %10370 = vmatprep.subr.bf16.mxu1 %v13050_v4  ;;  %10575 = vmatprep.subr.bf16.mxu0 %v13052_v3  ;;  %v3961_v60 = vld [vmem:[#allocation16 + $0x1548] sm:$0xff]  ;;  %v13097_v4 = vcombine.low %v3936_v47, %v3944_v50  ;;  %v13099_v3 = vcombine.low %v3937_v51, %v3945_v63 }
 0x55d   :  { %v3021_v17 = vpop.f32.mrb[12].mxu1  ;;  %v4009_v47 = vld [vmem:[#allocation16 + $0x16c8] sm:$0xff] }
 0x55e   :  { %v15110_v22 = vadd.f32 %v3021_v17, %v1284_v6  ;;  %v15112_v23 = vpop.f32.mrb[12].mxu0  ;;  %v3023_v24 = vpop.f32.mrb[13].mxu1  ;;  %v13116_v6 = vcombine.high %v3953_v62, %v3961_v60 }
 0x55f   :  { %v15114_v28 = vadd.f32 %v3023_v24, %v1288_v14  ;;  %v3105_v15 = vpop.f32.mrb[13].mxu0  ;;  %v3025_v30 = vpop.f32.mrb[14].mxu1  ;;  %10371 = vmatpush1.bf16.msra.mxu1 %v13049_v29  ;;  %10576 = vmatpush1.bf16.msra.mxu0 %v13051_v0  ;;  %v3977_v14 = vld [vmem:[#allocation16 + $0x15c8] sm:$0xff]  ;;  %v13113_v29 = vcombine.low %v3952_v58, %v3960_v59  ;;  %v13115_v0 = vcombine.low %v3953_v62, %v3961_v60 }
 0x560   :  { %v3194_v10 = vmin.f32 %v15110_v22, 20.0  ;;  %v15117_v31 = vadd.f32 %v3105_v15, %v1296_v9  ;;  %v3107_v34 = vpop.f32.mrb[14].mxu0  ;;  %v3026_v35 = vpop.f32.mrb[15].mxu1  ;;  %10372 = vmatprep.subr.bf16.mxu1 %v13066_v20  ;;  %10577 = vmatprep.subr.bf16.mxu0 %v13068_v21  ;;  %v13130_v9 = vcombine.high %v3968_v7, %v3976_v8  ;;  %v13132_v17 = vcombine.high %v3969_v11, %v3977_v14  ;;  %v3984_v20 = vld [vmem:[#allocation16 + $0x1600] sm:$0xff]  ;;  %v3985_v24 = vld [vmem:[#allocation16 + $0x1608] sm:$0xff] }
 0x561   :  { %v3195_v41 = vmin.f32 %v15114_v28, 20.0  ;;  %v3108_v43 = vpop.f32.mrb[15].mxu0  ;;  %v13129_v15 = vcombine.low %v3968_v7, %v3976_v8  ;;  %v13131_v30 = vcombine.low %v3969_v11, %v3977_v14  ;;  %v13145_v51 = vcombine.low %v3984_v20, %v3992_v12  ;;  %v4017_v58 = vld [vmem:[#allocation16 + $0x1708] sm:$0xff] }
 0x562   :  { %v3207_v48 = vmul.f32 1.442695, %v3194_v10  ;;  %v3197_v49 = vmin.f32 %v15117_v31, 20.0  ;;  %v13147_v63 = vcombine.low %v3985_v24, %v3993_v25  ;;  %v4025_v59 = vld [vmem:[#allocation16 + $0x1748] sm:$0xff] }
 0x563   :  { %v3209_v52 = vmul.f32 1.442695, %v3195_v41  ;;  %10373 = vmatpush1.bf16.msra.mxu1 %v13065_v33  ;;  %10578 = vmatpush1.bf16.msra.mxu0 %v13067_v37  ;;  %v13146_v33 = vcombine.high %v3984_v20, %v3992_v12  ;;  %v13148_v37 = vcombine.high %v3985_v24, %v3993_v25  ;;  %v4000_v41 = vld [vmem:[#allocation16 + $0x1680] sm:$0xff]  ;;  %v4033_v7 = vld [vmem:[#allocation16 + $0x1788] sm:$0xff]  ;;  %v13179_v14 = vcombine.low %v4017_v58, %v4025_v59  ;;  %v12152_v25 = vld [vmem:[#allocation14 + $0x8] ss:$0 sm:$0xff] }
 0x564   :  { %14432 = vpow2.f32 %v3207_v48  ;;  %v3213_v19 = vmul.f32 1.442695, %v3197_v49  ;;  %10374 = vmatprep.subr.bf16.mxu1 %v13082_v44  ;;  %10579 = vmatprep.subr.bf16.mxu0 %v13084_v45  ;;  %v4008_v44 = vld [vmem:[#allocation16 + $0x16c0] sm:$0xff]  ;;  %v4001_v45 = vld [vmem:[#allocation16 + $0x1688] sm:$0xff] }
 0x565   :  { %14434 = vpow2.f32 %v3209_v52  ;;  %v13161_v62 = vcombine.low %v4000_v41, %v4008_v44  ;;  %v13163_v60 = vcombine.low %v4001_v45, %v4009_v47  ;;  %v4041_v8 = vld [vmem:[#allocation16 + $0x17c8] sm:$0xff] }
 0x566   :  { %14436 = vpow2.f32 %v3213_v19  ;;  %v13162_v19 = vcombine.high %v4000_v41, %v4008_v44  ;;  %v13196_v20 = vcombine.high %v4033_v7, %v4041_v8  ;;  %v4057_v12 = vld [vmem:[#allocation16 + $0x1848] sm:$0xff] }
 0x567   :  { %10375 = vmatpush1.bf16.msra.mxu1 %v13081_v53  ;;  %10580 = vmatpush1.bf16.msra.mxu0 %v13083_v54  ;;  %v13164_v53 = vcombine.high %v4001_v45, %v4009_v47  ;;  %v4016_v54 = vld [vmem:[#allocation16 + $0x1700] sm:$0xff] }
 0x568   :  { %10376 = vmatprep.subr.bf16.mxu1 %v13098_v55  ;;  %10581 = vmatprep.subr.bf16.mxu0 %v13100_v57  ;;  %v4024_v57 = vld [vmem:[#allocation16 + $0x1740] sm:$0xff] }
 0x569   :  { %v13177_v11 = vcombine.low %v4016_v54, %v4024_v57 }
 0x56b   :  { %10377 = vmatpush1.bf16.msra.mxu1 %v13097_v4  ;;  %10582 = vmatpush1.bf16.msra.mxu0 %v13099_v3  ;;  %v13178_v4 = vcombine.high %v4016_v54, %v4024_v57  ;;  %v13180_v3 = vcombine.high %v4017_v58, %v4025_v59  ;;  %v4064_v54 = vld [vmem:[#allocation16 + $0x1880] sm:$0xff]  ;;  %v4065_v57 = vld [vmem:[#allocation16 + $0x1888] sm:$0xff] }
 0x56c   :  { %10378 = vmatprep.subr.bf16.mxu1 %v13114_v5  ;;  %10583 = vmatprep.subr.bf16.mxu0 %v13116_v6  ;;  %v4032_v5 = vld [vmem:[#allocation16 + $0x1780] sm:$0xff]  ;;  %v4073_v58 = vld [vmem:[#allocation16 + $0x18c8] sm:$0xff] }
 0x56d   :  { %v4040_v6 = vld [vmem:[#allocation16 + $0x17c0] sm:$0xff] }
 0x56e   :  { %v14433_v21 = vpop.eup %14432 }
 0x56f   :  { %v3221_v26 = vadd.f32 2.0, %v14433_v21  ;;  %v14435_v27 = vpop.eup %14434  ;;  %10379 = vmatpush1.bf16.msra.mxu1 %v13113_v29  ;;  %10584 = vmatpush1.bf16.msra.mxu0 %v13115_v0  ;;  %v4048_v29 = vld [vmem:[#allocation16 + $0x1800] sm:$0xff] }
 0x570   :  { %v14437_v10 = vpop.eup %14436  ;;  %v3222_v35 = vadd.f32 2.0, %v14435_v27  ;;  %10380 = vmatprep.subr.bf16.mxu1 %v13130_v9  ;;  %10585 = vmatprep.subr.bf16.mxu0 %v13132_v17  ;;  %v4056_v0 = vld [vmem:[#allocation16 + $0x1840] sm:$0xff]  ;;  %v13194_v17 = vcombine.high %v4032_v5, %v4040_v6 }
 0x571   :  { %v3230_v34 = vmul.f32 %v14433_v21, %v3221_v26  ;;  %v3224_v43 = vadd.f32 2.0, %v14437_v10  ;;  %v4049_v21 = vld [vmem:[#allocation16 + $0x1808] sm:$0xff]  ;;  %v13210_v41 = vcombine.high %v4048_v29, %v4056_v0 }
 0x572   :  { %v3231_v49 = vmul.f32 %v14435_v27, %v3222_v35  ;;  %v13193_v27 = vcombine.low %v4032_v5, %v4040_v6  ;;  %v4088_v5 = vld [vmem:[#allocation16 + $0x1940] sm:$0xff]  ;;  %v4081_v6 = vld [vmem:[#allocation16 + $0x1908] sm:$0xff] }
 0x573   :  { %v3248_v48 = vadd.f32 2.0, %v3230_v34  ;;  %v15121_v50 = vmul.f32 %v14437_v10, %v3224_v43  ;;  %10381 = vmatpush1.bf16.msra.mxu1 %v13129_v15  ;;  %10586 = vmatpush1.bf16.msra.mxu0 %v13131_v30  ;;  %v3239_v30 = vmul.f32 %v15110_v22, %v3230_v34 }
 0x574   :  { %v3249_v52 = vadd.f32 2.0, %v3231_v49  ;;  %10382 = vmatprep.subr.bf16.mxu1 %v13146_v33  ;;  %10587 = vmatprep.subr.bf16.mxu0 %v13148_v37  ;;  %v13195_v37 = vcombine.low %v4033_v7, %v4041_v8  ;;  %v3240_v43 = vmul.f32 %v15114_v28, %v3231_v49  ;;  %v4072_v49 = vld [vmem:[#allocation16 + $0x18c0] sm:$0xff]  ;;  %v4089_v7 = vld [vmem:[#allocation16 + $0x1948] sm:$0xff]  ;;  %v15137_v8 = vsub.s32 6, %v14985_v39 }
 0x575   :  { %14438 = vrcp.f32 %v3248_v48  ;;  %v3251_v55 = vadd.f32 2.0, %v15121_v50  ;;  %v13212_v48 = vcombine.high %v4049_v21, %v4057_v12  ;;  %v4104_v39 = vld [vmem:[#allocation16 + $0x19c0] sm:$0xff] }
 0x576   :  { %14440 = vrcp.f32 %v3249_v52  ;;  %v3242_v52 = vmul.f32 %v15117_v31, %v15121_v50  ;;  %v4080_v50 = vld [vmem:[#allocation16 + $0x1900] sm:$0xff] }
 0x577   :  { %14442 = vrcp.f32 %v3251_v55  ;;  %10383 = vmatpush1.bf16.msra.mxu1 %v13145_v51  ;;  %10588 = vmatpush1.bf16.msra.mxu0 %v13147_v63 }
 0x578   :  { %10384 = vmatprep.subr.bf16.mxu1 %v13162_v19  ;;  %10589 = vmatprep.subr.bf16.mxu0 %v13164_v53 }
 0x57b   :  { %10385 = vmatpush1.bf16.msra.mxu1 %v13161_v62  ;;  %10590 = vmatpush1.bf16.msra.mxu0 %v13163_v60  ;;  %v13209_v62 = vcombine.low %v4048_v29, %v4056_v0  ;;  %v13211_v60 = vcombine.low %v4049_v21, %v4057_v12  ;;  %v13227_v29 = vcombine.low %v4065_v57, %v4073_v58  ;;  %v4105_v21 = vld [vmem:[#allocation16 + $0x19c8] sm:$0xff]  ;;  %v14488_v12 = vld [vmem:[#allocation14] sm:$0xff] }
 0x57c   :  { %10386 = vmatprep.subr.bf16.mxu1 %v13178_v4  ;;  %10591 = vmatprep.subr.bf16.mxu0 %v13180_v3  ;;  %v13226_v4 = vcombine.high %v4064_v54, %v4072_v49  ;;  %v13228_v3 = vcombine.high %v4065_v57, %v4073_v58  ;;  %v13242_v0 = vcombine.high %v4080_v50, %v4088_v5 }
 0x57d   :  { %v13618_v9 = vpop.f32.mrb[16].mxu1 }
 0x57e   :  { %v13640_v24 = vpop.f32.mrb[16].mxu0  ;;  %v13619_v26 = vpop.f32.mrb[17].mxu1 }
 0x57f   :  { %v14439_v15 = vpop.eup %14438  ;;  %v13620_v10 = vadd.f32 %v13619_v26, %v13618_v9  ;;  %v13641_v35 = vpop.f32.mrb[17].mxu0  ;;  %10387 = vmatpush1.bf16.msra.mxu1 %v13177_v11  ;;  %10592 = vmatpush1.bf16.msra.mxu0 %v13179_v14  ;;  %v13225_v14 = vcombine.low %v4064_v54, %v4072_v49  ;;  %v13244_v9 = vcombine.high %v4081_v6, %v4089_v7  ;;  %v4152_v54 = vld [vmem:[#allocation16 + $0x1b40] sm:$0xff]  ;;  %v4153_v49 = vld [vmem:[#allocation16 + $0x1b48] sm:$0xff] }
 0x580   :  { %v13621_v33 = vpop.f32.mrb[18].mxu1  ;;  %v13642_v44 = vadd.f32 %v13641_v35, %v13640_v24  ;;  %v13643_v45 = vpop.f32.mrb[18].mxu0  ;;  %v3266_v63 = vmul.f32 %v14439_v15, %v3239_v30  ;;  %10388 = vmatprep.subr.bf16.mxu1 %v13194_v17  ;;  %10593 = vmatprep.subr.bf16.mxu0 %v13196_v20  ;;  %v4096_v17 = vld [vmem:[#allocation16 + $0x1980] sm:$0xff]  ;;  %v4097_v20 = vld [vmem:[#allocation16 + $0x1988] sm:$0xff]  ;;  %v1292_v24 = vrot.slane %v14488_v12, %v15137_v8 }
 0x581   :  { %v13622_v47 = vpop.f32.mrb[19].mxu1  ;;  %v14441_v51 = vpop.eup %14440  ;;  %v3145_v19 = vadd.f32 %v13620_v10, %v12152_v25  ;;  %v13241_v25 = vcombine.low %v4080_v50, %v4088_v5  ;;  %v13243_v26 = vcombine.low %v4081_v6, %v4089_v7  ;;  %v13260_v15 = vcombine.high %v4097_v20, %v4105_v21  ;;  %v4112_v30 = vld [vmem:[#allocation16 + $0x1a00] sm:$0xff]  ;;  %v4113_v35 = vld [vmem:[#allocation16 + $0x1a08] sm:$0xff] }
 0x582   :  { %v13644_v22 = vpop.f32.mrb[19].mxu0  ;;  %v14443_v34 = vpop.eup %14442  ;;  %v3267_v53 = vmul.f32 %v14441_v51, %v3240_v43  ;;  %v15132_v31 = vpack.c.bf16 %v3266_v63, %v3266_v63  ;;  %v4120_v10 = vld [vmem:[#allocation16 + $0x1a40] sm:$0xff]  ;;  %v4121_v33 = vld [vmem:[#allocation16 + $0x1a48] sm:$0xff]  ;;  %v13259_v43 = vcombine.low %v4097_v20, %v4105_v21 }
 0x583   :  { %v3269_v55 = vmul.f32 %v14443_v34, %v3242_v52  ;;  %v15128_v28 = vadd.f32 %v13642_v44, %v3145_v19  ;;  %10389 = vmatpush1.bf16.msra.mxu1 %v13193_v27  ;;  %10594 = vmatpush1.bf16.msra.mxu0 %v13195_v37  ;;  %v13258_v27 = vcombine.high %v4096_v17, %v4104_v39  ;;  %v4128_v47 = vld [vmem:[#allocation16 + $0x1a80] sm:$0xff]  ;;  %v4129_v51 = vld [vmem:[#allocation16 + $0x1a88] sm:$0xff] }
 0x584   :  { %v15130_v59 = vpack.c.bf16 %v3267_v53, %v3267_v53  ;;  %10399 = vmatprep.subr.bf16.mxu1 %v13210_v41  ;;  %10604 = vmatprep.subr.bf16.mxu0 %v13212_v48  ;;  %v15147_v37 = vadd.f32 %v15112_v23, %v1292_v24  ;;  %v13257_v41 = vcombine.low %v4096_v17, %v4104_v39  ;;  %v4136_v48 = vld [vmem:[#allocation16 + $0x1ac0] sm:$0xff]  ;;  %v4137_v63 = vld [vmem:[#allocation16 + $0x1ac8] sm:$0xff] }
 0x585   :  { %v15139_v11 = vpack.c.bf16 %v3269_v55, %v3269_v55  ;;  %v13274_v44 = vcombine.high %v4112_v30, %v4120_v10  ;;  %v13276_v45 = vcombine.high %v4113_v35, %v4121_v33  ;;  %v13273_v19 = vcombine.low %v4112_v30, %v4120_v10  ;;  %v4144_v53 = vld [vmem:[#allocation16 + $0x1b00] sm:$0xff]  ;;  %v4145_v55 = vld [vmem:[#allocation16 + $0x1b08] sm:$0xff] }
 0x586   :  { %10390 = vmatprep.mubr.bf16.mxu1 %v15130_v59  ;;  %10595 = vmatprep.mubr.bf16.mxu0 %v15130_v59  ;;  %v3196_v52 = vmin.f32 %v15147_v37, 20.0  ;;  %v13275_v22 = vcombine.low %v4113_v35, %v4121_v33  ;;  %v13290_v23 = vcombine.high %v4128_v47, %v4136_v48  ;;  %v13292_v34 = vcombine.high %v4129_v51, %v4137_v63  ;;  %v4161_v5 = vld [vmem:[#allocation16 + $0x1b88] sm:$0xff]  ;;  %v4184_v17 = vld [vmem:[#allocation16 + $0x1c40] sm:$0xff] }
 0x587   :  { %10391 = vmatmul.mubr.bf16.vlgmr.msra.gmra.mrb[20].mxu1 %v15132_v31  ;;  %10596 = vmatmul.mubr.bf16.vlgmr.msra.gmra.mrb[20].mxu0 %v15132_v31  ;;  %v13289_v58 = vcombine.low %v4128_v47, %v4136_v48  ;;  %v13308_v50 = vcombine.high %v4145_v55, %v4153_v49  ;;  %v4169_v6 = vld [vmem:[#allocation16 + $0x1bc8] sm:$0xff]  ;;  %v13305_v7 = vcombine.low %v4144_v53, %v4152_v54 }
 0x588   :  { %10400 = vmatpush1.bf16.msra.mxu1 %v13209_v62  ;;  %10605 = vmatpush1.bf16.msra.mxu0 %v13211_v60  ;;  %v3211_v57 = vmul.f32 1.442695, %v3196_v52  ;;  %v13291_v62 = vcombine.low %v4129_v51, %v4137_v63  ;;  %v13306_v60 = vcombine.high %v4144_v53, %v4152_v54  ;;  %v4177_v39 = vld [vmem:[#allocation16 + $0x1c08] sm:$0xff]  ;;  %v13323_v12 = vcombine.low %v4161_v5, %v4169_v6 }
 0x589   :  { %10431 = vmatprep.mubr.bf16.mxu1 %v15139_v11  ;;  %10636 = vmatprep.mubr.bf16.mxu0 %v15139_v11  ;;  %v4185_v20 = vld [vmem:[#allocation16 + $0x1c48] sm:$0xff] }
 0x58a   :  { %10401 = vmatprep.subr.bf16.mxu1 %v13226_v4  ;;  %10606 = vmatprep.subr.bf16.mxu0 %v13228_v3  ;;  %v4160_v4 = vld [vmem:[#allocation16 + $0x1b80] sm:$0xff]  ;;  %14444 = vpow2.f32 %v3211_v57  ;;  %v4201_v30 = vld [vmem:[#allocation16 + $0x1cc8] sm:$0xff]  ;;  %v13339_v35 = vcombine.low %v4177_v39, %v4185_v20 }
 0x58b   :  { %v4168_v3 = vld [vmem:[#allocation16 + $0x1bc0] sm:$0xff]  ;;  %v4209_v47 = vld [vmem:[#allocation16 + $0x1d08] sm:$0xff] }
 0x58c   :  { %10402 = vmatpush1.bf16.msra.mxu1 %v13225_v14  ;;  %10607 = vmatpush1.bf16.msra.mxu0 %v13227_v29  ;;  %v13307_v14 = vcombine.low %v4145_v55, %v4153_v49  ;;  %v13322_v29 = vcombine.high %v4160_v4, %v4168_v3  ;;  %v13321_v21 = vcombine.low %v4160_v4, %v4168_v3  ;;  %v4217_v48 = vld [vmem:[#allocation16 + $0x1d48] sm:$0xff] }
 0x58d   :  { %10403 = vmatprep.subr.bf16.mxu1 %v13242_v0  ;;  %10608 = vmatprep.subr.bf16.mxu0 %v13244_v9  ;;  %v13324_v0 = vcombine.high %v4161_v5, %v4169_v6  ;;  %v4176_v9 = vld [vmem:[#allocation16 + $0x1c00] sm:$0xff]  ;;  %v4225_v53 = vld [vmem:[#allocation16 + $0x1d88] sm:$0xff]  ;;  %v13371_v57 = vcombine.low %v4209_v47, %v4217_v48 }
 0x58e   :  { %v13338_v24 = vcombine.high %v4176_v9, %v4184_v17  ;;  %v13337_v10 = vcombine.low %v4176_v9, %v4184_v17  ;;  %v4233_v54 = vld [vmem:[#allocation16 + $0x1dc8] sm:$0xff]  ;;  %v4264_v9 = vld [vmem:[#allocation16 + $0x1ec0] sm:$0xff] }
 0x58f   :  { %v4241_v4 = vld [vmem:[#allocation16 + $0x1e08] sm:$0xff] }
 0x590   :  { %10404 = vmatpush1.bf16.msra.mxu1 %v13241_v25  ;;  %10609 = vmatpush1.bf16.msra.mxu0 %v13243_v26  ;;  %v13340_v25 = vcombine.high %v4177_v39, %v4185_v20  ;;  %v4192_v26 = vld [vmem:[#allocation16 + $0x1c80] sm:$0xff]  ;;  %v4249_v3 = vld [vmem:[#allocation16 + $0x1e48] sm:$0xff]  ;;  %v3198_v20 = vmin.f32 %v15128_v28, 20.0 }
 0x591   :  { %10405 = vmatprep.subr.bf16.mxu1 %v13258_v27  ;;  %10610 = vmatprep.subr.bf16.mxu0 %v13260_v15  ;;  %v4200_v27 = vld [vmem:[#allocation16 + $0x1cc0] sm:$0xff]  ;;  %v4193_v15 = vld [vmem:[#allocation16 + $0x1c88] sm:$0xff] }
 0x592   :  { %v13353_v63 = vcombine.low %v4192_v26, %v4200_v27  ;;  %v13355_v52 = vcombine.low %v4193_v15, %v4201_v30  ;;  %v4257_v17 = vld [vmem:[#allocation16 + $0x1e88] sm:$0xff] }
 0x593   :  { %v4265_v39 = vld [vmem:[#allocation16 + $0x1ec8] sm:$0xff] }
 0x594   :  { %10406 = vmatpush1.bf16.msra.mxu1 %v13257_v41  ;;  %10611 = vmatpush1.bf16.msra.mxu0 %v13259_v43  ;;  %v14445_v33 = vpop.eup %14444  ;;  %v13354_v41 = vcombine.high %v4192_v26, %v4200_v27  ;;  %v13356_v43 = vcombine.high %v4193_v15, %v4201_v30  ;;  %v4272_v26 = vld [vmem:[#allocation16 + $0x1f00] sm:$0xff]  ;;  %v4273_v15 = vld [vmem:[#allocation16 + $0x1f08] sm:$0xff] }
 0x595   :  { %10407 = vmatprep.subr.bf16.mxu1 %v13274_v44  ;;  %10612 = vmatprep.subr.bf16.mxu0 %v13276_v45  ;;  %v4208_v44 = vld [vmem:[#allocation16 + $0x1d00] sm:$0xff]  ;;  %v3223_v51 = vadd.f32 2.0, %v14445_v33  ;;  %v4281_v30 = vld [vmem:[#allocation16 + $0x1f48] sm:$0xff] }
 0x596   :  { %v4216_v45 = vld [vmem:[#allocation16 + $0x1d40] sm:$0xff] }
 0x597   :  { %v15150_v55 = vmul.f32 %v14445_v33, %v3223_v51  ;;  %v13369_v49 = vcombine.low %v4208_v44, %v4216_v45  ;;  %v4280_v27 = vld [vmem:[#allocation16 + $0x1f40] sm:$0xff]  ;;  %v13419_v33 = vcombine.low %v4257_v17, %v4265_v39 }
 0x598   :  { %10408 = vmatpush1.bf16.msra.mxu1 %v13273_v19  ;;  %10613 = vmatpush1.bf16.msra.mxu0 %v13275_v22  ;;  %v13370_v19 = vcombine.high %v4208_v44, %v4216_v45  ;;  %v13372_v22 = vcombine.high %v4209_v47, %v4217_v48  ;;  %v4288_v44 = vld [vmem:[#allocation16 + $0x1f80] sm:$0xff]  ;;  %v4289_v47 = vld [vmem:[#allocation16 + $0x1f88] sm:$0xff]  ;;  %v13433_v51 = vcombine.low %v4272_v26, %v4280_v27 }
 0x599   :  { %10409 = vmatprep.subr.bf16.mxu1 %v13290_v23  ;;  %10614 = vmatprep.subr.bf16.mxu0 %v13292_v34  ;;  %v4224_v23 = vld [vmem:[#allocation16 + $0x1d80] sm:$0xff]  ;;  %v3250_v5 = vadd.f32 2.0, %v15150_v55  ;;  %v4297_v48 = vld [vmem:[#allocation16 + $0x1fc8] sm:$0xff] }
 0x59a   :  { %v4232_v34 = vld [vmem:[#allocation16 + $0x1dc0] sm:$0xff] }
 0x59b   :  { %v13385_v6 = vcombine.low %v4224_v23, %v4232_v34  ;;  %14446 = vrcp.f32 %v3250_v5  ;;  %v4296_v45 = vld [vmem:[#allocation16 + $0x1fc0] sm:$0xff]  ;;  %v4321_v5 = vld [vmem:[#allocation16 + $0x2088] sm:$0xff] }
 0x59c   :  { %10410 = vmatpush1.bf16.msra.mxu1 %v13289_v58  ;;  %10615 = vmatpush1.bf16.msra.mxu0 %v13291_v62  ;;  %v13386_v58 = vcombine.high %v4224_v23, %v4232_v34  ;;  %v13388_v62 = vcombine.high %v4225_v53, %v4233_v54  ;;  %v4312_v34 = vld [vmem:[#allocation16 + $0x2040] sm:$0xff] }
 0x59d   :  { %10411 = vmatprep.subr.bf16.mxu1 %v13306_v60  ;;  %10616 = vmatprep.subr.bf16.mxu0 %v13308_v50  ;;  %v4240_v60 = vld [vmem:[#allocation16 + $0x1e00] sm:$0xff] }
 0x59e   :  { %v4248_v50 = vld [vmem:[#allocation16 + $0x1e40] sm:$0xff] }
 0x5a0   :  { %10412 = vmatpush1.bf16.msra.mxu1 %v13305_v7  ;;  %10617 = vmatpush1.bf16.msra.mxu0 %v13307_v14  ;;  %v13387_v7 = vcombine.low %v4225_v53, %v4233_v54  ;;  %v13402_v14 = vcombine.high %v4240_v60, %v4248_v50  ;;  %v4305_v53 = vld [vmem:[#allocation16 + $0x2008] sm:$0xff] }
 0x5a1   :  { %10413 = vmatprep.subr.bf16.mxu1 %v13322_v29  ;;  %10618 = vmatprep.subr.bf16.mxu0 %v13324_v0  ;;  %v13404_v29 = vcombine.high %v4241_v4, %v4249_v3  ;;  %v4256_v0 = vld [vmem:[#allocation16 + $0x1e80] sm:$0xff]  ;;  %v4313_v54 = vld [vmem:[#allocation16 + $0x2048] sm:$0xff] }
 0x5a4   :  { %10414 = vmatpush1.bf16.msra.mxu1 %v13321_v21  ;;  %10619 = vmatpush1.bf16.msra.mxu0 %v13323_v12  ;;  %v13401_v21 = vcombine.low %v4240_v60, %v4248_v50  ;;  %v13403_v12 = vcombine.low %v4241_v4, %v4249_v3  ;;  %v13468_v50 = vcombine.high %v4305_v53, %v4313_v54  ;;  %v4320_v4 = vld [vmem:[#allocation16 + $0x2080] sm:$0xff] }
 0x5a5   :  { %10415 = vmatprep.subr.bf16.mxu1 %v13338_v24  ;;  %10620 = vmatprep.subr.bf16.mxu0 %v13340_v25  ;;  %v13418_v24 = vcombine.high %v4256_v0, %v4264_v9  ;;  %v13420_v25 = vcombine.high %v4257_v17, %v4265_v39  ;;  %v14447_v23 = vpop.eup %14446  ;;  %v4328_v3 = vld [vmem:[#allocation16 + $0x20c0] sm:$0xff]  ;;  %v4337_v39 = vld [vmem:[#allocation16 + $0x2108] sm:$0xff] }
 0x5a6   :  { %v4344_v17 = vld [vmem:[#allocation16 + $0x2140] sm:$0xff] }
 0x5a8   :  { %10416 = vmatpush1.bf16.msra.mxu1 %v13337_v10  ;;  %10621 = vmatpush1.bf16.msra.mxu0 %v13339_v35  ;;  %v3215_v10 = vmul.f32 1.442695, %v3198_v20  ;;  %v13417_v35 = vcombine.low %v4256_v0, %v4264_v9  ;;  %v4336_v9 = vld [vmem:[#allocation16 + $0x2100] sm:$0xff]  ;;  %v4345_v20 = vld [vmem:[#allocation16 + $0x2148] sm:$0xff] }
 0x5a9   :  { %10417 = vmatprep.subr.bf16.mxu1 %v13354_v41  ;;  %10622 = vmatprep.subr.bf16.mxu0 %v13356_v43  ;;  %v13434_v41 = vcombine.high %v4272_v26, %v4280_v27  ;;  %v13436_v43 = vcombine.high %v4273_v15, %v4281_v30  ;;  %v13500_v26 = vcombine.high %v4337_v39, %v4345_v20  ;;  %v4352_v27 = vld [vmem:[#allocation16 + $0x2180] sm:$0xff] }
 0x5aa   :  { %14448 = vpow2.f32 %v3215_v10  ;;  %v4361_v10 = vld [vmem:[#allocation16 + $0x21c8] sm:$0xff] }
 0x5ac   :  { %10418 = vmatpush1.bf16.msra.mxu1 %v13353_v63  ;;  %10623 = vmatpush1.bf16.msra.mxu0 %v13355_v52  ;;  %v13435_v63 = vcombine.low %v4273_v15, %v4281_v30  ;;  %v13450_v52 = vcombine.high %v4288_v44, %v4296_v45  ;;  %v4360_v15 = vld [vmem:[#allocation16 + $0x21c0] sm:$0xff]  ;;  %v4353_v30 = vld [vmem:[#allocation16 + $0x2188] sm:$0xff] }
 0x5ad   :  { %10419 = vmatprep.subr.bf16.mxu1 %v13370_v19  ;;  %10624 = vmatprep.subr.bf16.mxu0 %v13372_v22  ;;  %v13452_v19 = vcombine.high %v4289_v47, %v4297_v48  ;;  %v4304_v22 = vld [vmem:[#allocation16 + $0x2000] sm:$0xff] }
 0x5ae   :  { %v13466_v60 = vcombine.high %v4304_v22, %v4312_v34 }
 0x5b0   :  { %10420 = vmatpush1.bf16.msra.mxu1 %v13369_v49  ;;  %10625 = vmatpush1.bf16.msra.mxu0 %v13371_v57  ;;  %v3241_v49 = vmul.f32 %v15147_v37, %v15150_v55  ;;  %v13449_v57 = vcombine.low %v4288_v44, %v4296_v45  ;;  %v13482_v37 = vcombine.high %v4320_v4, %v4328_v3  ;;  %v4368_v45 = vld [vmem:[#allocation16 + $0x2200] sm:$0xff] }
 0x5b1   :  { %10421 = vmatprep.subr.bf16.mxu1 %v13386_v58  ;;  %10626 = vmatprep.subr.bf16.mxu0 %v13388_v62  ;;  %v13451_v58 = vcombine.low %v4289_v47, %v4297_v48  ;;  %v13516_v44 = vcombine.high %v4353_v30, %v4361_v10  ;;  %v4376_v47 = vld [vmem:[#allocation16 + $0x2240] sm:$0xff]  ;;  %v4369_v48 = vld [vmem:[#allocation16 + $0x2208] sm:$0xff] }
 0x5b2   :  { %v3268_v62 = vmul.f32 %v14447_v23, %v3241_v49  ;;  %v4393_v49 = vld [vmem:[#allocation16 + $0x22c8] sm:$0xff] }
 0x5b4   :  { %10422 = vmatpush1.bf16.msra.mxu1 %v13385_v6  ;;  %10627 = vmatpush1.bf16.msra.mxu0 %v13387_v7  ;;  %v4329_v6 = vld [vmem:[#allocation16 + $0x20c8] sm:$0xff]  ;;  %v13465_v7 = vcombine.low %v4304_v22, %v4312_v34  ;;  %v15156_v0 = vpack.c.bf16 %v3268_v62, %v3268_v62  ;;  %v13530_v22 = vcombine.high %v4368_v45, %v4376_v47  ;;  %v4384_v34 = vld [vmem:[#allocation16 + $0x2280] sm:$0xff] }
 0x5b5   :  { %10423 = vmatprep.subr.bf16.mxu1 %v13402_v14  ;;  %10628 = vmatprep.subr.bf16.mxu0 %v13404_v29  ;;  %v13467_v14 = vcombine.low %v4305_v53, %v4313_v54  ;;  %v14449_v29 = vpop.eup %14448  ;;  %v13484_v55 = vcombine.high %v4321_v5, %v4329_v6  ;;  %v4392_v53 = vld [vmem:[#allocation16 + $0x22c0] sm:$0xff]  ;;  %v4385_v54 = vld [vmem:[#allocation16 + $0x2288] sm:$0xff] }
 0x5b6   :  { %v13546_v62 = vcombine.high %v4384_v34, %v4392_v53 }
 0x5b8   :  { %10424 = vmatpush1.bf16.msra.mxu1 %v13401_v21  ;;  %10629 = vmatpush1.bf16.msra.mxu0 %v13403_v12  ;;  %v3225_v21 = vadd.f32 2.0, %v14449_v29  ;;  %v13481_v12 = vcombine.low %v4320_v4, %v4328_v3  ;;  %v4408_v4 = vld [vmem:[#allocation16 + $0x2340] sm:$0xff]  ;;  %v4401_v3 = vld [vmem:[#allocation16 + $0x2308] sm:$0xff] }
 0x5b9   :  { %10425 = vmatprep.subr.bf16.mxu1 %v13418_v24  ;;  %10630 = vmatprep.subr.bf16.mxu0 %v13420_v25  ;;  %v13483_v24 = vcombine.low %v4321_v5, %v4329_v6  ;;  %v13498_v25 = vcombine.high %v4336_v9, %v4344_v17  ;;  %v4409_v5 = vld [vmem:[#allocation16 + $0x2348] sm:$0xff]  ;;  %v13545_v6 = vcombine.low %v4384_v34, %v4392_v53  ;;  %v3315_v34 = vld [vmem:[#allocation16 + $0x118] sm:$0xff] }
 0x5ba   :  { %v3323_v53 = vld [vmem:[#allocation16 + $0x158] sm:$0xff] }
 0x5bc   :  { %10426 = vmatpush1.bf16.msra.mxu1 %v13417_v35  ;;  %10631 = vmatpush1.bf16.msra.mxu0 %v13419_v33  ;;  %v15162_v35 = vmul.f32 %v14449_v29, %v3225_v21  ;;  %v13497_v33 = vcombine.low %v4336_v9, %v4344_v17  ;;  %v13564_v29 = vcombine.high %v4401_v3, %v4409_v5  ;;  %v4417_v9 = vld [vmem:[#allocation16 + $0x2388] sm:$0xff] }
 0x5bd   :  { %10427 = vmatprep.subr.bf16.mxu1 %v13434_v41  ;;  %10632 = vmatprep.subr.bf16.mxu0 %v13436_v43  ;;  %v13499_v41 = vcombine.low %v4337_v39, %v4345_v20  ;;  %v13514_v43 = vcombine.high %v4352_v27, %v4360_v15  ;;  %v4425_v17 = vld [vmem:[#allocation16 + $0x23c8] sm:$0xff]  ;;  %v13563_v20 = vcombine.low %v4401_v3, %v4409_v5 }
 0x5be   :  { %v12479_v5 = vcombine.low %v3315_v34, %v3323_v53 }
 0x5c0   :  { %10428 = vmatpush1.bf16.msra.mxu1 %v13433_v51  ;;  %10633 = vmatpush1.bf16.msra.mxu0 %v13435_v63  ;;  %v4377_v51 = vld [vmem:[#allocation16 + $0x2248] sm:$0xff]  ;;  %v3252_v63 = vadd.f32 2.0, %v15162_v35 }
 0x5c1   :  { %10429 = vmatprep.subr.bf16.mxu1 %v13450_v52  ;;  %10634 = vmatprep.subr.bf16.mxu0 %v13452_v19  ;;  %v13513_v52 = vcombine.low %v4352_v27, %v4360_v15  ;;  %v13515_v19 = vcombine.low %v4353_v30, %v4361_v10  ;;  %v13532_v23 = vcombine.high %v4369_v48, %v4377_v51  ;;  %v3283_v27 = vld [vmem:[#allocation16 + $0x18] sm:$0xff] }
 0x5c2   :  { %14450 = vrcp.f32 %v3252_v63  ;;  %v3291_v15 = vld [vmem:[#allocation16 + $0x58] sm:$0xff]  ;;  %v3243_v30 = vmul.f32 %v15162_v35, %v15128_v28 }
 0x5c3   :  { %v12447_v28 = vcombine.low %v3283_v27, %v3291_v15 }
 0x5c4   :  { %10430 = vmatpush1.bf16.msra.mxu1 %v13449_v57  ;;  %10635 = vmatpush1.bf16.msra.mxu0 %v13451_v58  ;;  %v13529_v57 = vcombine.low %v4368_v45, %v4376_v47  ;;  %v13531_v58 = vcombine.low %v4369_v48, %v4377_v51  ;;  %v3298_v45 = vld [vmem:[#allocation16 + $0x90] sm:$0xff]  ;;  %v3299_v48 = vld [vmem:[#allocation16 + $0x98] sm:$0xff] }
 0x5c5   :  { %10440 = vmatprep.subr.bf16.mxu1 %v13466_v60  ;;  %10645 = vmatprep.subr.bf16.mxu0 %v13468_v50  ;;  %v13548_v60 = vcombine.high %v4385_v54, %v4393_v49  ;;  %v4400_v50 = vld [vmem:[#allocation16 + $0x2300] sm:$0xff]  ;;  %v3306_v47 = vld [vmem:[#allocation16 + $0xd0] sm:$0xff]  ;;  %v3307_v51 = vld [vmem:[#allocation16 + $0xd8] sm:$0xff] }
 0x5c6   :  { %v13561_v39 = vcombine.low %v4400_v50, %v4408_v4  ;;  %v12462_v35 = vcombine.high %v3298_v45, %v3306_v47 }
 0x5c7   :  { %10432 = vmatmul.mubr.bf16.vlgmr.msra.gmra.mrb[20].mxu1 %v15156_v0  ;;  %10637 = vmatmul.mubr.bf16.vlgmr.msra.gmra.mrb[20].mxu0 %v15156_v0 }
 0x5c8   :  { %10441 = vmatpush1.bf16.msra.mxu1 %v13465_v7  ;;  %10646 = vmatpush1.bf16.msra.mxu0 %v13467_v14  ;;  %v13547_v7 = vcombine.low %v4385_v54, %v4393_v49  ;;  %v13562_v14 = vcombine.high %v4400_v50, %v4408_v4  ;;  %v12461_v54 = vcombine.low %v3298_v45, %v3306_v47  ;;  %v3331_v50 = vld [vmem:[#allocation16 + $0x198] sm:$0xff] }
 0x5c9   :  { %10442 = vmatprep.subr.bf16.mxu1 %v13482_v37  ;;  %10647 = vmatprep.subr.bf16.mxu0 %v13484_v55  ;;  %v4416_v37 = vld [vmem:[#allocation16 + $0x2380] sm:$0xff]  ;;  %v12463_v49 = vcombine.low %v3299_v48, %v3307_v51  ;;  %v3339_v4 = vld [vmem:[#allocation16 + $0x1d8] sm:$0xff] }
 0x5ca   :  { %10472 = vmatprep.mubr.bf16.mxu1 %v14765_v18  ;;  %10677 = vmatprep.mubr.bf16.mxu0 %v14765_v18  ;;  %v4424_v55 = vld [vmem:[#allocation16 + $0x23c0] sm:$0xff] }
 0x5cb   :  { %v13578_v21 = vcombine.high %v4416_v37, %v4424_v55  ;;  %v13577_v10 = vcombine.low %v4416_v37, %v4424_v55  ;;  %v3347_v37 = vld [vmem:[#allocation16 + $0x218] sm:$0xff] }
 0x5cc   :  { %10443 = vmatpush1.bf16.msra.mxu1 %v13481_v12  ;;  %10648 = vmatpush1.bf16.msra.mxu0 %v13483_v24  ;;  %v13580_v12 = vcombine.high %v4417_v9, %v4425_v17  ;;  %v3282_v24 = vld [vmem:[#allocation16 + $0x10] sm:$0xff]  ;;  %v3355_v55 = vld [vmem:[#allocation16 + $0x258] sm:$0xff] }
 0x5cd   :  { %10444 = vmatprep.subr.bf16.mxu1 %v13498_v25  ;;  %10649 = vmatprep.subr.bf16.mxu0 %v13500_v26  ;;  %v14451_v25 = vpop.eup %14450  ;;  %v3290_v26 = vld [vmem:[#allocation16 + $0x50] sm:$0xff] }
 0x5ce   :  { %v12445_v63 = vcombine.low %v3282_v24, %v3290_v26 }
 0x5d0   :  { %10445 = vmatpush1.bf16.msra.mxu1 %v13497_v33  ;;  %10650 = vmatpush1.bf16.msra.mxu0 %v13499_v41  ;;  %v13579_v33 = vcombine.low %v4417_v9, %v4425_v17  ;;  %v3270_v41 = vmul.f32 %v14451_v25, %v3243_v30  ;;  %v12495_v17 = vcombine.low %v3331_v50, %v3339_v4  ;;  %v3371_v25 = vld [vmem:[#allocation16 + $0x2d8] sm:$0xff] }
 0x5d1   :  { %10446 = vmatprep.subr.bf16.mxu1 %v13514_v43  ;;  %10651 = vmatprep.subr.bf16.mxu0 %v13516_v44  ;;  %v12446_v43 = vcombine.high %v3282_v24, %v3290_v26  ;;  %v12448_v44 = vcombine.high %v3283_v27, %v3291_v15  ;;  %v3363_v24 = vld [vmem:[#allocation16 + $0x298] sm:$0xff]  ;;  %v12511_v27 = vcombine.low %v3347_v37, %v3355_v55 }
 0x5d2   :  { %v12528_v30 = vcombine.high %v3363_v24, %v3371_v25  ;;  %v12527_v45 = vcombine.low %v3363_v24, %v3371_v25  ;;  %v3458_v25 = vld [vmem:[#allocation16 + $0x590] sm:$0xff] }
 0x5d4   :  { %10447 = vmatpush1.bf16.msra.mxu1 %v13513_v52  ;;  %10652 = vmatpush1.bf16.msra.mxu0 %v13515_v19  ;;  %v15167_v52 = vpack.c.bf16 %v3270_v41, %v3270_v41  ;;  %v12464_v19 = vcombine.high %v3299_v48, %v3307_v51  ;;  %v3379_v41 = vld [vmem:[#allocation16 + $0x318] sm:$0xff]  ;;  %v3394_v51 = vld [vmem:[#allocation16 + $0x390] sm:$0xff] }
 0x5d5   :  { %10448 = vmatprep.subr.bf16.mxu1 %v13530_v22  ;;  %10653 = vmatprep.subr.bf16.mxu0 %v13532_v23  ;;  %v3314_v22 = vld [vmem:[#allocation16 + $0x110] sm:$0xff] }
 0x5d6   :  { %v3322_v23 = vld [vmem:[#allocation16 + $0x150] sm:$0xff] }
 0x5d7   :  { %v12477_v3 = vcombine.low %v3314_v22, %v3322_v23 }
 0x5d8   :  { %10449 = vmatpush1.bf16.msra.mxu1 %v13529_v57  ;;  %10654 = vmatpush1.bf16.msra.mxu0 %v13531_v58  ;;  %v12478_v57 = vcombine.high %v3314_v22, %v3322_v23  ;;  %v12480_v58 = vcombine.high %v3315_v34, %v3323_v53  ;;  %v3410_v53 = vld [vmem:[#allocation16 + $0x410] sm:$0xff] }
 0x5d9   :  { %10450 = vmatprep.subr.bf16.mxu1 %v13546_v62  ;;  %10655 = vmatprep.subr.bf16.mxu0 %v13548_v60  ;;  %v3330_v62 = vld [vmem:[#allocation16 + $0x190] sm:$0xff] }
 0x5da   :  { %v3338_v60 = vld [vmem:[#allocation16 + $0x1d0] sm:$0xff] }
 0x5db   :  { %v12493_v9 = vcombine.low %v3330_v62, %v3338_v60 }
 0x5dc   :  { %10451 = vmatpush1.bf16.msra.mxu1 %v13545_v6  ;;  %10656 = vmatpush1.bf16.msra.mxu0 %v13547_v7  ;;  %v12494_v6 = vcombine.high %v3330_v62, %v3338_v60  ;;  %v12496_v7 = vcombine.high %v3331_v50, %v3339_v4  ;;  %v3426_v4 = vld [vmem:[#allocation16 + $0x490] sm:$0xff] }
 0x5dd   :  { %10452 = vmatprep.subr.bf16.mxu1 %v13562_v14  ;;  %10657 = vmatprep.subr.bf16.mxu0 %v13564_v29  ;;  %v3346_v14 = vld [vmem:[#allocation16 + $0x210] sm:$0xff] }
 0x5de   :  { %v3354_v29 = vld [vmem:[#allocation16 + $0x250] sm:$0xff] }
 0x5df   :  { %v12509_v26 = vcombine.low %v3346_v14, %v3354_v29 }
 0x5e0   :  { %10453 = vmatpush1.bf16.msra.mxu1 %v13561_v39  ;;  %10658 = vmatpush1.bf16.msra.mxu0 %v13563_v20  ;;  %v12510_v39 = vcombine.high %v3346_v14, %v3354_v29  ;;  %v12512_v20 = vcombine.high %v3347_v37, %v3355_v55  ;;  %v3442_v55 = vld [vmem:[#allocation16 + $0x510] sm:$0xff] }
 0x5e1   :  { %10454 = vmatprep.subr.bf16.mxu1 %v13578_v21  ;;  %10659 = vmatprep.subr.bf16.mxu0 %v13580_v12  ;;  %v3362_v21 = vld [vmem:[#allocation16 + $0x290] sm:$0xff] }
 0x5e2   :  { %v3370_v12 = vld [vmem:[#allocation16 + $0x2d0] sm:$0xff] }
 0x5e3   :  { %v12526_v15 = vcombine.high %v3362_v21, %v3370_v12 }
 0x5e4   :  { %10455 = vmatpush1.bf16.msra.mxu1 %v13577_v10  ;;  %10660 = vmatpush1.bf16.msra.mxu0 %v13579_v33  ;;  %v3378_v10 = vld [vmem:[#allocation16 + $0x310] sm:$0xff] }
 0x5e5   :  { %10686 = vmatprep.subr.bf16.mxu1 %v12446_v43  ;;  %10891 = vmatprep.subr.bf16.mxu0 %v12448_v44  ;;  %v3386_v33 = vld [vmem:[#allocation16 + $0x350] sm:$0xff]  ;;  %v3387_v43 = vld [vmem:[#allocation16 + $0x358] sm:$0xff]  ;;  %v12525_v44 = vcombine.low %v3362_v21, %v3370_v12 }
 0x5e6   :  { %v12542_v47 = vcombine.high %v3378_v10, %v3386_v33  ;;  %v12544_v48 = vcombine.high %v3379_v41, %v3387_v43  ;;  %v12543_v22 = vcombine.low %v3379_v41, %v3387_v43  ;;  %v3474_v43 = vld [vmem:[#allocation16 + $0x610] sm:$0xff] }
 0x5e7   :  { %10473 = vmatmul.mubr.bf16.vlgmr.msra.gmra.mrb[20].mxu1 %v15167_v52  ;;  %10678 = vmatmul.mubr.bf16.vlgmr.msra.gmra.mrb[20].mxu0 %v15167_v52 }
 0x5e8   :  { %10687 = vmatpush1.bf16.msra.mxu1 %v12445_v63  ;;  %10718 = vmatprep.mubr.bf16.mxu1 %v15065_v32  ;;  %v3402_v63 = vld [vmem:[#allocation16 + $0x3d0] sm:$0xff] }
 0x5e9   :  { %10892 = vmatpush1.bf16.msra.mxu0 %v12447_v28  ;;  %10923 = vmatprep.mubr.bf16.mxu0 %v15065_v32  ;;  %v3395_v28 = vld [vmem:[#allocation16 + $0x398] sm:$0xff]  ;;  %v12558_v23 = vcombine.high %v3394_v51, %v3402_v63 }
 0x5ea   :  { %10688 = vmatprep.subr.bf16.mxu1 %v12462_v35  ;;  %10893 = vmatprep.subr.bf16.mxu0 %v12464_v19  ;;  %v3403_v35 = vld [vmem:[#allocation16 + $0x3d8] sm:$0xff]  ;;  %v12541_v19 = vcombine.low %v3378_v10, %v3386_v33 }
 0x5eb   :  { %v12560_v34 = vcombine.high %v3395_v28, %v3403_v35  ;;  %v12559_v62 = vcombine.low %v3395_v28, %v3403_v35  ;;  %v3490_v35 = vld [vmem:[#allocation16 + $0x690] sm:$0xff] }
 0x5ec   :  { %10689 = vmatpush1.bf16.msra.mxu1 %v12461_v54  ;;  %v3418_v54 = vld [vmem:[#allocation16 + $0x450] sm:$0xff] }
 0x5ed   :  { %10894 = vmatpush1.bf16.msra.mxu0 %v12463_v49  ;;  %10690 = vmatprep.subr.bf16.mxu1 %v12478_v57  ;;  %v3411_v49 = vld [vmem:[#allocation16 + $0x418] sm:$0xff]  ;;  %v12574_v60 = vcombine.high %v3410_v53, %v3418_v54 }
 0x5ee   :  { %10895 = vmatprep.subr.bf16.mxu0 %v12480_v58  ;;  %v3419_v57 = vld [vmem:[#allocation16 + $0x458] sm:$0xff]  ;;  %v12557_v58 = vcombine.low %v3394_v51, %v3402_v63 }
 0x5ef   :  { %v12576_v50 = vcombine.high %v3411_v49, %v3419_v57  ;;  %v12575_v14 = vcombine.low %v3411_v49, %v3419_v57  ;;  %v3506_v57 = vld [vmem:[#allocation16 + $0x710] sm:$0xff] }
 0x5f0   :  { %10691 = vmatpush1.bf16.msra.mxu1 %v12477_v3  ;;  %v3434_v3 = vld [vmem:[#allocation16 + $0x4d0] sm:$0xff] }
 0x5f1   :  { %10896 = vmatpush1.bf16.msra.mxu0 %v12479_v5  ;;  %10692 = vmatprep.subr.bf16.mxu1 %v12494_v6  ;;  %v3427_v5 = vld [vmem:[#allocation16 + $0x498] sm:$0xff]  ;;  %v12590_v29 = vcombine.high %v3426_v4, %v3434_v3 }
 0x5f2   :  { %10897 = vmatprep.subr.bf16.mxu0 %v12496_v7  ;;  %v3435_v6 = vld [vmem:[#allocation16 + $0x4d8] sm:$0xff]  ;;  %v12573_v7 = vcombine.low %v3410_v53, %v3418_v54 }
 0x5f3   :  { %v12592_v37 = vcombine.high %v3427_v5, %v3435_v6  ;;  %v12591_v21 = vcombine.low %v3427_v5, %v3435_v6  ;;  %v3522_v6 = vld [vmem:[#allocation16 + $0x790] sm:$0xff] }
 0x5f4   :  { %10693 = vmatpush1.bf16.msra.mxu1 %v12493_v9  ;;  %v3450_v9 = vld [vmem:[#allocation16 + $0x550] sm:$0xff] }
 0x5f5   :  { %10898 = vmatpush1.bf16.msra.mxu0 %v12495_v17  ;;  %10694 = vmatprep.subr.bf16.mxu1 %v12510_v39  ;;  %v3443_v17 = vld [vmem:[#allocation16 + $0x518] sm:$0xff]  ;;  %v12606_v12 = vcombine.high %v3442_v55, %v3450_v9 }
 0x5f6   :  { %10899 = vmatprep.subr.bf16.mxu0 %v12512_v20  ;;  %v3451_v39 = vld [vmem:[#allocation16 + $0x558] sm:$0xff]  ;;  %v12589_v20 = vcombine.low %v3426_v4, %v3434_v3 }
 0x5f7   :  { %v12608_v24 = vcombine.high %v3443_v17, %v3451_v39  ;;  %v12607_v10 = vcombine.low %v3443_v17, %v3451_v39  ;;  %v3538_v39 = vld [vmem:[#allocation16 + $0x810] sm:$0xff] }
 0x5f8   :  { %10695 = vmatpush1.bf16.msra.mxu1 %v12509_v26  ;;  %v3466_v26 = vld [vmem:[#allocation16 + $0x5d0] sm:$0xff] }
 0x5f9   :  { %10900 = vmatpush1.bf16.msra.mxu0 %v12511_v27  ;;  %10696 = vmatprep.subr.bf16.mxu1 %v12526_v15  ;;  %v3459_v27 = vld [vmem:[#allocation16 + $0x598] sm:$0xff]  ;;  %v12622_v33 = vcombine.high %v3458_v25, %v3466_v26 }
 0x5fa   :  { %10901 = vmatprep.subr.bf16.mxu0 %v12528_v30  ;;  %v3467_v15 = vld [vmem:[#allocation16 + $0x5d8] sm:$0xff]  ;;  %v12605_v30 = vcombine.low %v3442_v55, %v3450_v9 }
 0x5fb   :  { %v12624_v41 = vcombine.high %v3459_v27, %v3467_v15  ;;  %v12623_v51 = vcombine.low %v3459_v27, %v3467_v15  ;;  %v3554_v15 = vld [vmem:[#allocation16 + $0x890] sm:$0xff] }
 0x5fc   :  { %10697 = vmatpush1.bf16.msra.mxu1 %v12525_v44  ;;  %v3482_v44 = vld [vmem:[#allocation16 + $0x650] sm:$0xff] }
 0x5fd   :  { %10902 = vmatpush1.bf16.msra.mxu0 %v12527_v45  ;;  %10698 = vmatprep.subr.bf16.mxu1 %v12542_v47  ;;  %v3475_v45 = vld [vmem:[#allocation16 + $0x618] sm:$0xff]  ;;  %v12638_v63 = vcombine.high %v3474_v43, %v3482_v44 }
 0x5fe   :  { %10903 = vmatprep.subr.bf16.mxu0 %v12544_v48  ;;  %v3483_v47 = vld [vmem:[#allocation16 + $0x658] sm:$0xff]  ;;  %v12621_v48 = vcombine.low %v3458_v25, %v3466_v26 }
 0x5ff   :  { %v12640_v28 = vcombine.high %v3475_v45, %v3483_v47  ;;  %v12639_v53 = vcombine.low %v3475_v45, %v3483_v47  ;;  %v3570_v45 = vld [vmem:[#allocation16 + $0x910] sm:$0xff] }
 0x600   :  { %10699 = vmatpush1.bf16.msra.mxu1 %v12541_v19  ;;  %v3498_v19 = vld [vmem:[#allocation16 + $0x6d0] sm:$0xff] }
 0x601   :  { %10904 = vmatpush1.bf16.msra.mxu0 %v12543_v22  ;;  %10700 = vmatprep.subr.bf16.mxu1 %v12558_v23  ;;  %v3491_v22 = vld [vmem:[#allocation16 + $0x698] sm:$0xff]  ;;  %v12654_v54 = vcombine.high %v3490_v35, %v3498_v19  ;;  %v3578_v47 = vld [vmem:[#allocation16 + $0x950] sm:$0xff] }
 0x602   :  { %10905 = vmatprep.subr.bf16.mxu0 %v12560_v34  ;;  %v3499_v23 = vld [vmem:[#allocation16 + $0x6d8] sm:$0xff]  ;;  %v12637_v34 = vcombine.low %v3474_v43, %v3482_v44 }
 0x603   :  { %v12656_v49 = vcombine.high %v3491_v22, %v3499_v23  ;;  %v12655_v4 = vcombine.low %v3491_v22, %v3499_v23  ;;  %v3586_v23 = vld [vmem:[#allocation16 + $0x990] sm:$0xff] }
 0x604   :  { %10701 = vmatpush1.bf16.msra.mxu1 %v12557_v58  ;;  %v3514_v58 = vld [vmem:[#allocation16 + $0x750] sm:$0xff] }
 0x605   :  { %10906 = vmatpush1.bf16.msra.mxu0 %v12559_v62  ;;  %10702 = vmatprep.subr.bf16.mxu1 %v12574_v60  ;;  %v3507_v62 = vld [vmem:[#allocation16 + $0x718] sm:$0xff]  ;;  %v12670_v3 = vcombine.high %v3506_v57, %v3514_v58 }
 0x606   :  { %10907 = vmatprep.subr.bf16.mxu0 %v12576_v50  ;;  %v3515_v60 = vld [vmem:[#allocation16 + $0x758] sm:$0xff]  ;;  %v12653_v50 = vcombine.low %v3490_v35, %v3498_v19  ;;  %v12734_v19 = vcombine.high %v3570_v45, %v3578_v47 }
 0x607   :  { %v12672_v5 = vcombine.high %v3507_v62, %v3515_v60  ;;  %v12671_v55 = vcombine.low %v3507_v62, %v3515_v60  ;;  %v3602_v60 = vld [vmem:[#allocation16 + $0xa10] sm:$0xff] }
 0x608   :  { %10703 = vmatpush1.bf16.msra.mxu1 %v12573_v7  ;;  %v3530_v7 = vld [vmem:[#allocation16 + $0x7d0] sm:$0xff] }
 0x609   :  { %10908 = vmatpush1.bf16.msra.mxu0 %v12575_v14  ;;  %10704 = vmatprep.subr.bf16.mxu1 %v12590_v29  ;;  %v3523_v14 = vld [vmem:[#allocation16 + $0x798] sm:$0xff]  ;;  %v12686_v9 = vcombine.high %v3522_v6, %v3530_v7 }
 0x60a   :  { %10909 = vmatprep.subr.bf16.mxu0 %v12592_v37  ;;  %v3531_v29 = vld [vmem:[#allocation16 + $0x7d8] sm:$0xff]  ;;  %v12669_v37 = vcombine.low %v3506_v57, %v3514_v58 }
 0x60b   :  { %v12688_v17 = vcombine.high %v3523_v14, %v3531_v29  ;;  %v12687_v25 = vcombine.low %v3523_v14, %v3531_v29  ;;  %v3618_v29 = vld [vmem:[#allocation16 + $0xa90] sm:$0xff] }
 0x60c   :  { %10705 = vmatpush1.bf16.msra.mxu1 %v12589_v20  ;;  %v3546_v20 = vld [vmem:[#allocation16 + $0x850] sm:$0xff] }
 0x60d   :  { %10910 = vmatpush1.bf16.msra.mxu0 %v12591_v21  ;;  %10706 = vmatprep.subr.bf16.mxu1 %v12606_v12  ;;  %v3539_v21 = vld [vmem:[#allocation16 + $0x818] sm:$0xff]  ;;  %v12702_v26 = vcombine.high %v3538_v39, %v3546_v20 }
 0x60e   :  { %10911 = vmatprep.subr.bf16.mxu0 %v12608_v24  ;;  %v3547_v12 = vld [vmem:[#allocation16 + $0x858] sm:$0xff]  ;;  %v12685_v24 = vcombine.low %v3522_v6, %v3530_v7 }
 0x60f   :  { %v12704_v27 = vcombine.high %v3539_v21, %v3547_v12  ;;  %v12703_v43 = vcombine.low %v3539_v21, %v3547_v12  ;;  %v3634_v12 = vld [vmem:[#allocation16 + $0xb10] sm:$0xff] }
 0x610   :  { %10707 = vmatpush1.bf16.msra.mxu1 %v12605_v30  ;;  %v3562_v30 = vld [vmem:[#allocation16 + $0x8d0] sm:$0xff] }
 0x611   :  { %10912 = vmatpush1.bf16.msra.mxu0 %v12607_v10  ;;  %10708 = vmatprep.subr.bf16.mxu1 %v12622_v33  ;;  %v12701_v10 = vcombine.low %v3538_v39, %v3546_v20  ;;  %v3555_v33 = vld [vmem:[#allocation16 + $0x898] sm:$0xff]  ;;  %v12718_v44 = vcombine.high %v3554_v15, %v3562_v30 }
 0x612   :  { %10913 = vmatprep.subr.bf16.mxu0 %v12624_v41  ;;  %v3563_v41 = vld [vmem:[#allocation16 + $0x8d8] sm:$0xff] }
 0x613   :  { %v12719_v35 = vcombine.low %v3555_v33, %v3563_v41 }
 0x614   :  { %10709 = vmatpush1.bf16.msra.mxu1 %v12621_v48  ;;  %v12720_v48 = vcombine.high %v3555_v33, %v3563_v41  ;;  %v3650_v33 = vld [vmem:[#allocation16 + $0xb90] sm:$0xff] }
 0x615   :  { %10914 = vmatpush1.bf16.msra.mxu0 %v12623_v51  ;;  %10710 = vmatprep.subr.bf16.mxu1 %v12638_v63  ;;  %v3571_v51 = vld [vmem:[#allocation16 + $0x918] sm:$0xff]  ;;  %v3658_v41 = vld [vmem:[#allocation16 + $0xbd0] sm:$0xff] }
 0x616   :  { %10915 = vmatprep.subr.bf16.mxu0 %v12640_v28  ;;  %v3579_v63 = vld [vmem:[#allocation16 + $0x958] sm:$0xff]  ;;  %v12717_v28 = vcombine.low %v3554_v15, %v3562_v30 }
 0x617   :  { %v12736_v22 = vcombine.high %v3571_v51, %v3579_v63  ;;  %v12735_v57 = vcombine.low %v3571_v51, %v3579_v63  ;;  %v3666_v63 = vld [vmem:[#allocation16 + $0xc10] sm:$0xff] }
 0x618   :  { %10711 = vmatpush1.bf16.msra.mxu1 %v12637_v34  ;;  %v3594_v34 = vld [vmem:[#allocation16 + $0x9d0] sm:$0xff] }
 0x619   :  { %10916 = vmatpush1.bf16.msra.mxu0 %v12639_v53  ;;  %10712 = vmatprep.subr.bf16.mxu1 %v12654_v54  ;;  %v3587_v53 = vld [vmem:[#allocation16 + $0x998] sm:$0xff]  ;;  %v12750_v58 = vcombine.high %v3586_v23, %v3594_v34 }
 0x61a   :  { %10917 = vmatprep.subr.bf16.mxu0 %v12656_v49  ;;  %v3595_v54 = vld [vmem:[#allocation16 + $0x9d8] sm:$0xff]  ;;  %v12733_v49 = vcombine.low %v3570_v45, %v3578_v47 }
 0x61b   :  { %v12752_v62 = vcombine.high %v3587_v53, %v3595_v54  ;;  %v12751_v6 = vcombine.low %v3587_v53, %v3595_v54  ;;  %v3682_v54 = vld [vmem:[#allocation16 + $0xc90] sm:$0xff] }
 0x61c   :  { %10713 = vmatpush1.bf16.msra.mxu1 %v12653_v50  ;;  %v3610_v50 = vld [vmem:[#allocation16 + $0xa50] sm:$0xff] }
 0x61d   :  { %10918 = vmatpush1.bf16.msra.mxu0 %v12655_v4  ;;  %10714 = vmatprep.subr.bf16.mxu1 %v12670_v3  ;;  %v3603_v4 = vld [vmem:[#allocation16 + $0xa18] sm:$0xff]  ;;  %v12766_v7 = vcombine.high %v3602_v60, %v3610_v50 }
 0x61e   :  { %10919 = vmatprep.subr.bf16.mxu0 %v12672_v5  ;;  %v3611_v3 = vld [vmem:[#allocation16 + $0xa58] sm:$0xff]  ;;  %v12749_v5 = vcombine.low %v3586_v23, %v3594_v34 }
 0x61f   :  { %v12768_v14 = vcombine.high %v3603_v4, %v3611_v3  ;;  %v12767_v39 = vcombine.low %v3603_v4, %v3611_v3  ;;  %v3698_v3 = vld [vmem:[#allocation16 + $0xd10] sm:$0xff] }
 0x620   :  { %10715 = vmatpush1.bf16.msra.mxu1 %v12669_v37  ;;  %v3626_v37 = vld [vmem:[#allocation16 + $0xad0] sm:$0xff] }
 0x621   :  { %10920 = vmatpush1.bf16.msra.mxu0 %v12671_v55  ;;  %10716 = vmatprep.subr.bf16.mxu1 %v12686_v9  ;;  %v3619_v55 = vld [vmem:[#allocation16 + $0xa98] sm:$0xff]  ;;  %v12782_v20 = vcombine.high %v3618_v29, %v3626_v37 }
 0x622   :  { %10921 = vmatprep.subr.bf16.mxu0 %v12688_v17  ;;  %v3627_v9 = vld [vmem:[#allocation16 + $0xad8] sm:$0xff]  ;;  %v12765_v17 = vcombine.low %v3602_v60, %v3610_v50 }
 0x623   :  { %v12784_v21 = vcombine.high %v3619_v55, %v3627_v9  ;;  %v12783_v15 = vcombine.low %v3619_v55, %v3627_v9  ;;  %v3714_v9 = vld [vmem:[#allocation16 + $0xd90] sm:$0xff] }
 0x624   :  { %10717 = vmatpush1.bf16.msra.mxu1 %v12685_v24  ;;  %v3642_v24 = vld [vmem:[#allocation16 + $0xb50] sm:$0xff] }
 0x625   :  { %10922 = vmatpush1.bf16.msra.mxu0 %v12687_v25  ;;  %10727 = vmatprep.subr.bf16.mxu1 %v12702_v26  ;;  %v3635_v25 = vld [vmem:[#allocation16 + $0xb18] sm:$0xff]  ;;  %v12798_v30 = vcombine.high %v3634_v12, %v3642_v24  ;;  %v12797_v45 = vcombine.low %v3634_v12, %v3642_v24 }
 0x626   :  { %10932 = vmatprep.subr.bf16.mxu0 %v12704_v27  ;;  %v3643_v26 = vld [vmem:[#allocation16 + $0xb58] sm:$0xff]  ;;  %v12781_v27 = vcombine.low %v3618_v29, %v3626_v37 }
 0x627   :  { %10719 = vmatmul.mubr.bf16.vlgmr.msra.gmra.mrb[24].mxu1 %v15070_v36  ;;  %v12799_v47 = vcombine.low %v3635_v25, %v3643_v26 }
 0x628   :  { %10924 = vmatmul.mubr.bf16.vlgmr.msra.gmra.mrb[24].mxu0 %v15070_v36  ;;  %10728 = vmatpush1.bf16.msra.mxu1 %v12701_v10  ;;  %v12800_v10 = vcombine.high %v3635_v25, %v3643_v26  ;;  %v3730_v26 = vld [vmem:[#allocation16 + $0xe10] sm:$0xff] }
 0x629   :  { %10759 = vmatprep.mubr.bf16.mxu1 %v15074_v46  ;;  %10933 = vmatpush1.bf16.msra.mxu0 %v12703_v43  ;;  %v3651_v43 = vld [vmem:[#allocation16 + $0xb98] sm:$0xff] }
 0x62a   :  { %10964 = vmatprep.mubr.bf16.mxu0 %v15074_v46  ;;  %10729 = vmatprep.subr.bf16.mxu1 %v12718_v44  ;;  %v3659_v44 = vld [vmem:[#allocation16 + $0xbd8] sm:$0xff] }
 0x62b   :  { %10934 = vmatprep.subr.bf16.mxu0 %v12720_v48  ;;  %v12814_v48 = vcombine.high %v3650_v33, %v3658_v41  ;;  %v12816_v51 = vcombine.high %v3651_v43, %v3659_v44  ;;  %v12815_v23 = vcombine.low %v3651_v43, %v3659_v44  ;;  %v3746_v44 = vld [vmem:[#allocation16 + $0xe90] sm:$0xff] }
 0x62c   :  { %10730 = vmatpush1.bf16.msra.mxu1 %v12717_v28  ;;  %v3674_v28 = vld [vmem:[#allocation16 + $0xc50] sm:$0xff] }
 0x62d   :  { %10935 = vmatpush1.bf16.msra.mxu0 %v12719_v35  ;;  %10731 = vmatprep.subr.bf16.mxu1 %v12734_v19  ;;  %v3667_v35 = vld [vmem:[#allocation16 + $0xc18] sm:$0xff]  ;;  %v12830_v34 = vcombine.high %v3666_v63, %v3674_v28 }
 0x62e   :  { %10936 = vmatprep.subr.bf16.mxu0 %v12736_v22  ;;  %v3675_v19 = vld [vmem:[#allocation16 + $0xc58] sm:$0xff]  ;;  %v12813_v22 = vcombine.low %v3650_v33, %v3658_v41 }
 0x62f   :  { %v12832_v53 = vcombine.high %v3667_v35, %v3675_v19  ;;  %v12831_v60 = vcombine.low %v3667_v35, %v3675_v19  ;;  %v3762_v19 = vld [vmem:[#allocation16 + $0xf10] sm:$0xff] }
 0x630   :  { %10732 = vmatpush1.bf16.msra.mxu1 %v12733_v49  ;;  %v3690_v49 = vld [vmem:[#allocation16 + $0xcd0] sm:$0xff] }
 0x631   :  { %10937 = vmatpush1.bf16.msra.mxu0 %v12735_v57  ;;  %10733 = vmatprep.subr.bf16.mxu1 %v12750_v58  ;;  %v3683_v57 = vld [vmem:[#allocation16 + $0xc98] sm:$0xff]  ;;  %v12846_v50 = vcombine.high %v3682_v54, %v3690_v49 }
 0x632   :  { %10938 = vmatprep.subr.bf16.mxu0 %v12752_v62  ;;  %v3691_v58 = vld [vmem:[#allocation16 + $0xcd8] sm:$0xff]  ;;  %v12829_v62 = vcombine.low %v3666_v63, %v3674_v28 }
 0x633   :  { %v12848_v4 = vcombine.high %v3683_v57, %v3691_v58  ;;  %v12847_v29 = vcombine.low %v3683_v57, %v3691_v58  ;;  %v3778_v58 = vld [vmem:[#allocation16 + $0xf90] sm:$0xff] }
 0x634   :  { %10734 = vmatpush1.bf16.msra.mxu1 %v12749_v5  ;;  %v3706_v5 = vld [vmem:[#allocation16 + $0xd50] sm:$0xff] }
 0x635   :  { %10939 = vmatpush1.bf16.msra.mxu0 %v12751_v6  ;;  %10735 = vmatprep.subr.bf16.mxu1 %v12766_v7  ;;  %v3699_v6 = vld [vmem:[#allocation16 + $0xd18] sm:$0xff]  ;;  %v12862_v37 = vcombine.high %v3698_v3, %v3706_v5 }
 0x636   :  { %10940 = vmatprep.subr.bf16.mxu0 %v12768_v14  ;;  %v3707_v7 = vld [vmem:[#allocation16 + $0xd58] sm:$0xff]  ;;  %v12845_v14 = vcombine.low %v3682_v54, %v3690_v49 }
 0x637   :  { %v12864_v55 = vcombine.high %v3699_v6, %v3707_v7  ;;  %v12863_v12 = vcombine.low %v3699_v6, %v3707_v7  ;;  %v3794_v7 = vld [vmem:[#allocation16 + $0x1010] sm:$0xff] }
 0x638   :  { %10736 = vmatpush1.bf16.msra.mxu1 %v12765_v17  ;;  %v3722_v17 = vld [vmem:[#allocation16 + $0xdd0] sm:$0xff] }
 0x639   :  { %10941 = vmatpush1.bf16.msra.mxu0 %v12767_v39  ;;  %10737 = vmatprep.subr.bf16.mxu1 %v12782_v20  ;;  %v3715_v39 = vld [vmem:[#allocation16 + $0xd98] sm:$0xff]  ;;  %v12878_v24 = vcombine.high %v3714_v9, %v3722_v17 }
 0x63a   :  { %10942 = vmatprep.subr.bf16.mxu0 %v12784_v21  ;;  %v3723_v20 = vld [vmem:[#allocation16 + $0xdd8] sm:$0xff]  ;;  %v12861_v21 = vcombine.low %v3698_v3, %v3706_v5 }
 0x63b   :  { %v12880_v25 = vcombine.high %v3715_v39, %v3723_v20  ;;  %v12879_v33 = vcombine.low %v3715_v39, %v3723_v20  ;;  %v3810_v20 = vld [vmem:[#allocation16 + $0x1090] sm:$0xff] }
 0x63c   :  { %10738 = vmatpush1.bf16.msra.mxu1 %v12781_v27  ;;  %v3738_v27 = vld [vmem:[#allocation16 + $0xe50] sm:$0xff] }
 0x63d   :  { %10943 = vmatpush1.bf16.msra.mxu0 %v12783_v15  ;;  %10739 = vmatprep.subr.bf16.mxu1 %v12798_v30  ;;  %v3731_v15 = vld [vmem:[#allocation16 + $0xe18] sm:$0xff]  ;;  %v12894_v41 = vcombine.high %v3730_v26, %v3738_v27 }
 0x63e   :  { %10944 = vmatprep.subr.bf16.mxu0 %v12800_v10  ;;  %v3739_v30 = vld [vmem:[#allocation16 + $0xe58] sm:$0xff]  ;;  %v12877_v10 = vcombine.low %v3714_v9, %v3722_v17 }
 0x63f   :  { %v12896_v43 = vcombine.high %v3731_v15, %v3739_v30  ;;  %v12895_v63 = vcombine.low %v3731_v15, %v3739_v30  ;;  %v3826_v15 = vld [vmem:[#allocation16 + $0x1110] sm:$0xff] }
 0x640   :  { %10740 = vmatpush1.bf16.msra.mxu1 %v12797_v45  ;;  %v3754_v45 = vld [vmem:[#allocation16 + $0xed0] sm:$0xff] }
 0x641   :  { %10945 = vmatpush1.bf16.msra.mxu0 %v12799_v47  ;;  %10741 = vmatprep.subr.bf16.mxu1 %v12814_v48  ;;  %v3747_v47 = vld [vmem:[#allocation16 + $0xe98] sm:$0xff]  ;;  %v12910_v28 = vcombine.high %v3746_v44, %v3754_v45  ;;  %v3834_v30 = vld [vmem:[#allocation16 + $0x1150] sm:$0xff] }
 0x642   :  { %10946 = vmatprep.subr.bf16.mxu0 %v12816_v51  ;;  %v3755_v48 = vld [vmem:[#allocation16 + $0xed8] sm:$0xff]  ;;  %v12893_v51 = vcombine.low %v3730_v26, %v3738_v27 }
 0x643   :  { %v12912_v35 = vcombine.high %v3747_v47, %v3755_v48  ;;  %v12911_v54 = vcombine.low %v3747_v47, %v3755_v48  ;;  %v3842_v48 = vld [vmem:[#allocation16 + $0x1190] sm:$0xff] }
 0x644   :  { %10742 = vmatpush1.bf16.msra.mxu1 %v12813_v22  ;;  %v3770_v22 = vld [vmem:[#allocation16 + $0xf50] sm:$0xff] }
 0x645   :  { %10947 = vmatpush1.bf16.msra.mxu0 %v12815_v23  ;;  %10743 = vmatprep.subr.bf16.mxu1 %v12830_v34  ;;  %v3763_v23 = vld [vmem:[#allocation16 + $0xf18] sm:$0xff]  ;;  %v12926_v49 = vcombine.high %v3762_v19, %v3770_v22 }
 0x646   :  { %10948 = vmatprep.subr.bf16.mxu0 %v12832_v53  ;;  %v3771_v34 = vld [vmem:[#allocation16 + $0xf58] sm:$0xff]  ;;  %v12909_v53 = vcombine.low %v3746_v44, %v3754_v45  ;;  %v12990_v45 = vcombine.high %v3826_v15, %v3834_v30 }
 0x647   :  { %v12928_v57 = vcombine.high %v3763_v23, %v3771_v34  ;;  %v12927_v3 = vcombine.low %v3763_v23, %v3771_v34  ;;  %v3858_v34 = vld [vmem:[#allocation16 + $0x1210] sm:$0xff] }
 0x648   :  { %10744 = vmatpush1.bf16.msra.mxu1 %v12829_v62  ;;  %v3786_v62 = vld [vmem:[#allocation16 + $0xfd0] sm:$0xff] }
 0x649   :  { %10949 = vmatpush1.bf16.msra.mxu0 %v12831_v60  ;;  %10745 = vmatprep.subr.bf16.mxu1 %v12846_v50  ;;  %v3779_v60 = vld [vmem:[#allocation16 + $0xf98] sm:$0xff]  ;;  %v12942_v5 = vcombine.high %v3778_v58, %v3786_v62 }
 0x64a   :  { %10950 = vmatprep.subr.bf16.mxu0 %v12848_v4  ;;  %v3787_v50 = vld [vmem:[#allocation16 + $0xfd8] sm:$0xff]  ;;  %v12925_v4 = vcombine.low %v3762_v19, %v3770_v22 }
 0x64b   :  { %v12944_v6 = vcombine.high %v3779_v60, %v3787_v50  ;;  %v12943_v9 = vcombine.low %v3779_v60, %v3787_v50  ;;  %v3874_v50 = vld [vmem:[#allocation16 + $0x1290] sm:$0xff] }
 0x64c   :  { %10746 = vmatpush1.bf16.msra.mxu1 %v12845_v14  ;;  %v3802_v14 = vld [vmem:[#allocation16 + $0x1050] sm:$0xff] }
 0x64d   :  { %10951 = vmatpush1.bf16.msra.mxu0 %v12847_v29  ;;  %10747 = vmatprep.subr.bf16.mxu1 %v12862_v37  ;;  %v3795_v29 = vld [vmem:[#allocation16 + $0x1018] sm:$0xff]  ;;  %v12958_v17 = vcombine.high %v3794_v7, %v3802_v14 }
 0x64e   :  { %10952 = vmatprep.subr.bf16.mxu0 %v12864_v55  ;;  %v3803_v37 = vld [vmem:[#allocation16 + $0x1058] sm:$0xff]  ;;  %v12941_v55 = vcombine.low %v3778_v58, %v3786_v62 }
 0x64f   :  { %v12960_v39 = vcombine.high %v3795_v29, %v3803_v37  ;;  %v12959_v26 = vcombine.low %v3795_v29, %v3803_v37  ;;  %v3890_v37 = vld [vmem:[#allocation16 + $0x1310] sm:$0xff] }
 0x650   :  { %10748 = vmatpush1.bf16.msra.mxu1 %v12861_v21  ;;  %v3818_v21 = vld [vmem:[#allocation16 + $0x10d0] sm:$0xff] }
 0x651   :  { %10953 = vmatpush1.bf16.msra.mxu0 %v12863_v12  ;;  %10749 = vmatprep.subr.bf16.mxu1 %v12878_v24  ;;  %v12957_v12 = vcombine.low %v3794_v7, %v3802_v14  ;;  %v3811_v24 = vld [vmem:[#allocation16 + $0x1098] sm:$0xff]  ;;  %v12974_v27 = vcombine.high %v3810_v20, %v3818_v21 }
 0x652   :  { %10954 = vmatprep.subr.bf16.mxu0 %v12880_v25  ;;  %v3819_v25 = vld [vmem:[#allocation16 + $0x10d8] sm:$0xff] }
 0x653   :  { %v12975_v44 = vcombine.low %v3811_v24, %v3819_v25 }
 0x654   :  { %10750 = vmatpush1.bf16.msra.mxu1 %v12877_v10  ;;  %v12976_v10 = vcombine.high %v3811_v24, %v3819_v25  ;;  %v3906_v24 = vld [vmem:[#allocation16 + $0x1390] sm:$0xff] }
 0x655   :  { %10955 = vmatpush1.bf16.msra.mxu0 %v12879_v33  ;;  %10751 = vmatprep.subr.bf16.mxu1 %v12894_v41  ;;  %v3827_v33 = vld [vmem:[#allocation16 + $0x1118] sm:$0xff]  ;;  %v3914_v25 = vld [vmem:[#allocation16 + $0x13d0] sm:$0xff] }
 0x656   :  { %10956 = vmatprep.subr.bf16.mxu0 %v12896_v43  ;;  %v3835_v41 = vld [vmem:[#allocation16 + $0x1158] sm:$0xff]  ;;  %v12973_v43 = vcombine.low %v3810_v20, %v3818_v21 }
 0x657   :  { %v12992_v47 = vcombine.high %v3827_v33, %v3835_v41  ;;  %v12991_v19 = vcombine.low %v3827_v33, %v3835_v41  ;;  %v3922_v41 = vld [vmem:[#allocation16 + $0x1410] sm:$0xff] }
 0x658   :  { %10752 = vmatpush1.bf16.msra.mxu1 %v12893_v51  ;;  %v3850_v51 = vld [vmem:[#allocation16 + $0x11d0] sm:$0xff] }
 0x659   :  { %10957 = vmatpush1.bf16.msra.mxu0 %v12895_v63  ;;  %10753 = vmatprep.subr.bf16.mxu1 %v12910_v28  ;;  %v3843_v63 = vld [vmem:[#allocation16 + $0x1198] sm:$0xff]  ;;  %v13006_v22 = vcombine.high %v3842_v48, %v3850_v51 }
 0x65a   :  { %10958 = vmatprep.subr.bf16.mxu0 %v12912_v35  ;;  %v3851_v28 = vld [vmem:[#allocation16 + $0x11d8] sm:$0xff]  ;;  %v12989_v35 = vcombine.low %v3826_v15, %v3834_v30 }
 0x65b   :  { %v13008_v23 = vcombine.high %v3843_v63, %v3851_v28  ;;  %v13007_v58 = vcombine.low %v3843_v63, %v3851_v28  ;;  %v3938_v28 = vld [vmem:[#allocation16 + $0x1490] sm:$0xff] }
 0x65c   :  { %10754 = vmatpush1.bf16.msra.mxu1 %v12909_v53  ;;  %v3866_v53 = vld [vmem:[#allocation16 + $0x1250] sm:$0xff] }
 0x65d   :  { %10959 = vmatpush1.bf16.msra.mxu0 %v12911_v54  ;;  %10755 = vmatprep.subr.bf16.mxu1 %v12926_v49  ;;  %v3859_v54 = vld [vmem:[#allocation16 + $0x1218] sm:$0xff]  ;;  %v13022_v62 = vcombine.high %v3858_v34, %v3866_v53 }
 0x65e   :  { %10960 = vmatprep.subr.bf16.mxu0 %v12928_v57  ;;  %v3867_v49 = vld [vmem:[#allocation16 + $0x1258] sm:$0xff]  ;;  %v13005_v57 = vcombine.low %v3842_v48, %v3850_v51 }
 0x65f   :  { %v13024_v60 = vcombine.high %v3859_v54, %v3867_v49  ;;  %v13023_v7 = vcombine.low %v3859_v54, %v3867_v49  ;;  %v3954_v49 = vld [vmem:[#allocation16 + $0x1510] sm:$0xff] }
 0x660   :  { %10756 = vmatpush1.bf16.msra.mxu1 %v12925_v4  ;;  %v3882_v4 = vld [vmem:[#allocation16 + $0x12d0] sm:$0xff] }
 0x661   :  { %10961 = vmatpush1.bf16.msra.mxu0 %v12927_v3  ;;  %10757 = vmatprep.subr.bf16.mxu1 %v12942_v5  ;;  %v3875_v3 = vld [vmem:[#allocation16 + $0x1298] sm:$0xff]  ;;  %v13038_v14 = vcombine.high %v3874_v50, %v3882_v4 }
 0x662   :  { %10962 = vmatprep.subr.bf16.mxu0 %v12944_v6  ;;  %v3883_v5 = vld [vmem:[#allocation16 + $0x12d8] sm:$0xff]  ;;  %v13021_v6 = vcombine.low %v3858_v34, %v3866_v53 }
 0x663   :  { %v13040_v29 = vcombine.high %v3875_v3, %v3883_v5  ;;  %v13039_v20 = vcombine.low %v3875_v3, %v3883_v5  ;;  %v3970_v5 = vld [vmem:[#allocation16 + $0x1590] sm:$0xff] }
 0x664   :  { %10758 = vmatpush1.bf16.msra.mxu1 %v12941_v55  ;;  %v3898_v55 = vld [vmem:[#allocation16 + $0x1350] sm:$0xff] }
 0x665   :  { %10963 = vmatpush1.bf16.msra.mxu0 %v12943_v9  ;;  %10768 = vmatprep.subr.bf16.mxu1 %v12958_v17  ;;  %v3891_v9 = vld [vmem:[#allocation16 + $0x1318] sm:$0xff]  ;;  %v13054_v21 = vcombine.high %v3890_v37, %v3898_v55  ;;  %v13053_v15 = vcombine.low %v3890_v37, %v3898_v55 }
 0x666   :  { %10973 = vmatprep.subr.bf16.mxu0 %v12960_v39  ;;  %v3899_v17 = vld [vmem:[#allocation16 + $0x1358] sm:$0xff]  ;;  %v13037_v39 = vcombine.low %v3874_v50, %v3882_v4 }
 0x667   :  { %10760 = vmatmul.mubr.bf16.vlgmr.msra.gmra.mrb[24].mxu1 %v15091_v16  ;;  %v13055_v30 = vcombine.low %v3891_v9, %v3899_v17 }
 0x668   :  { %10965 = vmatmul.mubr.bf16.vlgmr.msra.gmra.mrb[24].mxu0 %v15091_v16  ;;  %10769 = vmatpush1.bf16.msra.mxu1 %v12957_v12  ;;  %v13056_v12 = vcombine.high %v3891_v9, %v3899_v17  ;;  %v3986_v17 = vld [vmem:[#allocation16 + $0x1610] sm:$0xff] }
 0x669   :  { %10800 = vmatprep.mubr.bf16.mxu1 %v15130_v59  ;;  %10974 = vmatpush1.bf16.msra.mxu0 %v12959_v26  ;;  %v3907_v26 = vld [vmem:[#allocation16 + $0x1398] sm:$0xff] }
 0x66a   :  { %11005 = vmatprep.mubr.bf16.mxu0 %v15130_v59  ;;  %10770 = vmatprep.subr.bf16.mxu1 %v12974_v27  ;;  %v3915_v27 = vld [vmem:[#allocation16 + $0x13d8] sm:$0xff] }
 0x66b   :  { %10975 = vmatprep.subr.bf16.mxu0 %v12976_v10  ;;  %v13070_v10 = vcombine.high %v3906_v24, %v3914_v25  ;;  %v13072_v33 = vcombine.high %v3907_v26, %v3915_v27  ;;  %v13071_v48 = vcombine.low %v3907_v26, %v3915_v27  ;;  %v4002_v27 = vld [vmem:[#allocation16 + $0x1690] sm:$0xff] }
 0x66c   :  { %10771 = vmatpush1.bf16.msra.mxu1 %v12973_v43  ;;  %v3930_v43 = vld [vmem:[#allocation16 + $0x1450] sm:$0xff] }
 0x66d   :  { %10976 = vmatpush1.bf16.msra.mxu0 %v12975_v44  ;;  %10772 = vmatprep.subr.bf16.mxu1 %v12990_v45  ;;  %v3923_v44 = vld [vmem:[#allocation16 + $0x1418] sm:$0xff]  ;;  %v13086_v51 = vcombine.high %v3922_v41, %v3930_v43 }
 0x66e   :  { %10977 = vmatprep.subr.bf16.mxu0 %v12992_v47  ;;  %v3931_v45 = vld [vmem:[#allocation16 + $0x1458] sm:$0xff]  ;;  %v13069_v47 = vcombine.low %v3906_v24, %v3914_v25 }
 0x66f   :  { %v13088_v63 = vcombine.high %v3923_v44, %v3931_v45  ;;  %v13087_v34 = vcombine.low %v3923_v44, %v3931_v45  ;;  %v4018_v45 = vld [vmem:[#allocation16 + $0x1710] sm:$0xff] }
 0x670   :  { %10773 = vmatpush1.bf16.msra.mxu1 %v12989_v35  ;;  %v3946_v35 = vld [vmem:[#allocation16 + $0x14d0] sm:$0xff] }
 0x671   :  { %10978 = vmatpush1.bf16.msra.mxu0 %v12991_v19  ;;  %10774 = vmatprep.subr.bf16.mxu1 %v13006_v22  ;;  %v3939_v19 = vld [vmem:[#allocation16 + $0x1498] sm:$0xff]  ;;  %v13102_v53 = vcombine.high %v3938_v28, %v3946_v35 }
 0x672   :  { %10979 = vmatprep.subr.bf16.mxu0 %v13008_v23  ;;  %v3947_v22 = vld [vmem:[#allocation16 + $0x14d8] sm:$0xff]  ;;  %v13085_v23 = vcombine.low %v3922_v41, %v3930_v43 }
 0x673   :  { %v13104_v54 = vcombine.high %v3939_v19, %v3947_v22  ;;  %v13103_v50 = vcombine.low %v3939_v19, %v3947_v22  ;;  %v4034_v22 = vld [vmem:[#allocation16 + $0x1790] sm:$0xff] }
 0x674   :  { %10775 = vmatpush1.bf16.msra.mxu1 %v13005_v57  ;;  %v3962_v57 = vld [vmem:[#allocation16 + $0x1550] sm:$0xff] }
 0x675   :  { %10980 = vmatpush1.bf16.msra.mxu0 %v13007_v58  ;;  %10776 = vmatprep.subr.bf16.mxu1 %v13022_v62  ;;  %v3955_v58 = vld [vmem:[#allocation16 + $0x1518] sm:$0xff]  ;;  %v13118_v4 = vcombine.high %v3954_v49, %v3962_v57 }
 0x676   :  { %10981 = vmatprep.subr.bf16.mxu0 %v13024_v60  ;;  %v3963_v62 = vld [vmem:[#allocation16 + $0x1558] sm:$0xff]  ;;  %v13101_v60 = vcombine.low %v3938_v28, %v3946_v35 }
 0x677   :  { %v13120_v3 = vcombine.high %v3955_v58, %v3963_v62  ;;  %v13119_v37 = vcombine.low %v3955_v58, %v3963_v62  ;;  %v4050_v62 = vld [vmem:[#allocation16 + $0x1810] sm:$0xff] }
 0x678   :  { %10777 = vmatpush1.bf16.msra.mxu1 %v13021_v6  ;;  %v3978_v6 = vld [vmem:[#allocation16 + $0x15d0] sm:$0xff] }
 0x679   :  { %10982 = vmatpush1.bf16.msra.mxu0 %v13023_v7  ;;  %10778 = vmatprep.subr.bf16.mxu1 %v13038_v14  ;;  %v3971_v7 = vld [vmem:[#allocation16 + $0x1598] sm:$0xff]  ;;  %v13134_v55 = vcombine.high %v3970_v5, %v3978_v6 }
 0x67a   :  { %10983 = vmatprep.subr.bf16.mxu0 %v13040_v29  ;;  %v3979_v14 = vld [vmem:[#allocation16 + $0x15d8] sm:$0xff]  ;;  %v13117_v29 = vcombine.low %v3954_v49, %v3962_v57 }
 0x67b   :  { %v13136_v9 = vcombine.high %v3971_v7, %v3979_v14  ;;  %v13135_v24 = vcombine.low %v3971_v7, %v3979_v14  ;;  %v4066_v14 = vld [vmem:[#allocation16 + $0x1890] sm:$0xff] }
 0x67c   :  { %10779 = vmatpush1.bf16.msra.mxu1 %v13037_v39  ;;  %v3994_v39 = vld [vmem:[#allocation16 + $0x1650] sm:$0xff] }
 0x67d   :  { %10984 = vmatpush1.bf16.msra.mxu0 %v13039_v20  ;;  %10780 = vmatprep.subr.bf16.mxu1 %v13054_v21  ;;  %v3987_v20 = vld [vmem:[#allocation16 + $0x1618] sm:$0xff]  ;;  %v13150_v25 = vcombine.high %v3986_v17, %v3994_v39 }
 0x67e   :  { %10985 = vmatprep.subr.bf16.mxu0 %v13056_v12  ;;  %v3995_v21 = vld [vmem:[#allocation16 + $0x1658] sm:$0xff]  ;;  %v13133_v12 = vcombine.low %v3970_v5, %v3978_v6 }
 0x67f   :  { %v13152_v26 = vcombine.high %v3987_v20, %v3995_v21  ;;  %v13151_v41 = vcombine.low %v3987_v20, %v3995_v21  ;;  %v4082_v20 = vld [vmem:[#allocation16 + $0x1910] sm:$0xff] }
 0x680   :  { %10781 = vmatpush1.bf16.msra.mxu1 %v13053_v15  ;;  %v4010_v15 = vld [vmem:[#allocation16 + $0x16d0] sm:$0xff] }
 0x681   :  { %10986 = vmatpush1.bf16.msra.mxu0 %v13055_v30  ;;  %10782 = vmatprep.subr.bf16.mxu1 %v13070_v10  ;;  %v4003_v30 = vld [vmem:[#allocation16 + $0x1698] sm:$0xff]  ;;  %v13166_v43 = vcombine.high %v4002_v27, %v4010_v15  ;;  %v4090_v21 = vld [vmem:[#allocation16 + $0x1950] sm:$0xff] }
 0x682   :  { %10987 = vmatprep.subr.bf16.mxu0 %v13072_v33  ;;  %v4011_v10 = vld [vmem:[#allocation16 + $0x16d8] sm:$0xff]  ;;  %v13149_v33 = vcombine.low %v3986_v17, %v3994_v39 }
 0x683   :  { %v13168_v44 = vcombine.high %v4003_v30, %v4011_v10  ;;  %v13167_v28 = vcombine.low %v4003_v30, %v4011_v10  ;;  %v4098_v10 = vld [vmem:[#allocation16 + $0x1990] sm:$0xff] }
 0x684   :  { %10783 = vmatpush1.bf16.msra.mxu1 %v13069_v47  ;;  %v4026_v47 = vld [vmem:[#allocation16 + $0x1750] sm:$0xff] }
 0x685   :  { %10988 = vmatpush1.bf16.msra.mxu0 %v13071_v48  ;;  %10784 = vmatprep.subr.bf16.mxu1 %v13086_v51  ;;  %v4019_v48 = vld [vmem:[#allocation16 + $0x1718] sm:$0xff]  ;;  %v13182_v35 = vcombine.high %v4018_v45, %v4026_v47 }
 0x686   :  { %10989 = vmatprep.subr.bf16.mxu0 %v13088_v63  ;;  %v4027_v51 = vld [vmem:[#allocation16 + $0x1758] sm:$0xff]  ;;  %v13165_v63 = vcombine.low %v4002_v27, %v4010_v15  ;;  %v13246_v15 = vcombine.high %v4082_v20, %v4090_v21 }
 0x687   :  { %v13184_v19 = vcombine.high %v4019_v48, %v4027_v51  ;;  %v13183_v49 = vcombine.low %v4019_v48, %v4027_v51  ;;  %v4114_v51 = vld [vmem:[#allocation16 + $0x1a10] sm:$0xff] }
 0x688   :  { %10785 = vmatpush1.bf16.msra.mxu1 %v13085_v23  ;;  %v4042_v23 = vld [vmem:[#allocation16 + $0x17d0] sm:$0xff] }
 0x689   :  { %10990 = vmatpush1.bf16.msra.mxu0 %v13087_v34  ;;  %10786 = vmatprep.subr.bf16.mxu1 %v13102_v53  ;;  %v4035_v34 = vld [vmem:[#allocation16 + $0x1798] sm:$0xff]  ;;  %v13198_v57 = vcombine.high %v4034_v22, %v4042_v23 }
 0x68a   :  { %10991 = vmatprep.subr.bf16.mxu0 %v13104_v54  ;;  %v4043_v53 = vld [vmem:[#allocation16 + $0x17d8] sm:$0xff]  ;;  %v13181_v54 = vcombine.low %v4018_v45, %v4026_v47 }
 0x68b   :  { %v13200_v58 = vcombine.high %v4035_v34, %v4043_v53  ;;  %v13199_v5 = vcombine.low %v4035_v34, %v4043_v53  ;;  %v4130_v53 = vld [vmem:[#allocation16 + $0x1a90] sm:$0xff] }
 0x68c   :  { %10787 = vmatpush1.bf16.msra.mxu1 %v13101_v60  ;;  %v4058_v60 = vld [vmem:[#allocation16 + $0x1850] sm:$0xff] }
 0x68d   :  { %10992 = vmatpush1.bf16.msra.mxu0 %v13103_v50  ;;  %10788 = vmatprep.subr.bf16.mxu1 %v13118_v4  ;;  %v4051_v50 = vld [vmem:[#allocation16 + $0x1818] sm:$0xff]  ;;  %v13214_v6 = vcombine.high %v4050_v62, %v4058_v60 }
 0x68e   :  { %10993 = vmatprep.subr.bf16.mxu0 %v13120_v3  ;;  %v4059_v4 = vld [vmem:[#allocation16 + $0x1858] sm:$0xff]  ;;  %v13197_v3 = vcombine.low %v4034_v22, %v4042_v23 }
 0x68f   :  { %v13216_v7 = vcombine.high %v4051_v50, %v4059_v4  ;;  %v13215_v17 = vcombine.low %v4051_v50, %v4059_v4  ;;  %v4146_v4 = vld [vmem:[#allocation16 + $0x1b10] sm:$0xff] }
 0x690   :  { %10789 = vmatpush1.bf16.msra.mxu1 %v13117_v29  ;;  %v4074_v29 = vld [vmem:[#allocation16 + $0x18d0] sm:$0xff] }
 0x691   :  { %10994 = vmatpush1.bf16.msra.mxu0 %v13119_v37  ;;  %10790 = vmatprep.subr.bf16.mxu1 %v13134_v55  ;;  %v13213_v37 = vcombine.low %v4050_v62, %v4058_v60  ;;  %v4067_v55 = vld [vmem:[#allocation16 + $0x1898] sm:$0xff]  ;;  %v13230_v39 = vcombine.high %v4066_v14, %v4074_v29 }
 0x692   :  { %10995 = vmatprep.subr.bf16.mxu0 %v13136_v9  ;;  %v4075_v9 = vld [vmem:[#allocation16 + $0x18d8] sm:$0xff] }
 0x693   :  { %v13231_v27 = vcombine.low %v4067_v55, %v4075_v9 }
 0x694   :  { %10791 = vmatpush1.bf16.msra.mxu1 %v13133_v12  ;;  %v13232_v12 = vcombine.high %v4067_v55, %v4075_v9 }
 0x695   :  { %10996 = vmatpush1.bf16.msra.mxu0 %v13135_v24  ;;  %10792 = vmatprep.subr.bf16.mxu1 %v13150_v25  ;;  %v4083_v24 = vld [vmem:[#allocation16 + $0x1918] sm:$0xff] }
 0x696   :  { %10997 = vmatprep.subr.bf16.mxu0 %v13152_v26  ;;  %v4091_v25 = vld [vmem:[#allocation16 + $0x1958] sm:$0xff]  ;;  %v13229_v26 = vcombine.low %v4066_v14, %v4074_v29 }
 0x697   :  { %v13248_v30 = vcombine.high %v4083_v24, %v4091_v25  ;;  %v13247_v45 = vcombine.low %v4083_v24, %v4091_v25  ;;  %v4171_v24 = vld [vmem:[#allocation16 + $0x1bd8] sm:$0xff] }
 0x698   :  { %10793 = vmatpush1.bf16.msra.mxu1 %v13149_v33  ;;  %v4106_v33 = vld [vmem:[#allocation16 + $0x19d0] sm:$0xff] }
 0x699   :  { %10998 = vmatpush1.bf16.msra.mxu0 %v13151_v41  ;;  %10794 = vmatprep.subr.bf16.mxu1 %v13166_v43  ;;  %v4099_v41 = vld [vmem:[#allocation16 + $0x1998] sm:$0xff]  ;;  %v13262_v47 = vcombine.high %v4098_v10, %v4106_v33 }
 0x69a   :  { %10999 = vmatprep.subr.bf16.mxu0 %v13168_v44  ;;  %v4107_v43 = vld [vmem:[#allocation16 + $0x19d8] sm:$0xff]  ;;  %v13245_v44 = vcombine.low %v4082_v20, %v4090_v21 }
 0x69b   :  { %v13264_v48 = vcombine.high %v4099_v41, %v4107_v43  ;;  %v13263_v22 = vcombine.low %v4099_v41, %v4107_v43  ;;  %v4178_v43 = vld [vmem:[#allocation16 + $0x1c10] sm:$0xff] }
 0x69c   :  { %10795 = vmatpush1.bf16.msra.mxu1 %v13165_v63  ;;  %v4122_v63 = vld [vmem:[#allocation16 + $0x1a50] sm:$0xff] }
 0x69d   :  { %11000 = vmatpush1.bf16.msra.mxu0 %v13167_v28  ;;  %10796 = vmatprep.subr.bf16.mxu1 %v13182_v35  ;;  %v4115_v28 = vld [vmem:[#allocation16 + $0x1a18] sm:$0xff]  ;;  %v13278_v23 = vcombine.high %v4114_v51, %v4122_v63 }
 0x69e   :  { %11001 = vmatprep.subr.bf16.mxu0 %v13184_v19  ;;  %v4123_v35 = vld [vmem:[#allocation16 + $0x1a58] sm:$0xff]  ;;  %v13261_v19 = vcombine.low %v4098_v10, %v4106_v33 }
 0x69f   :  { %v13280_v34 = vcombine.high %v4115_v28, %v4123_v35  ;;  %v13279_v62 = vcombine.low %v4115_v28, %v4123_v35  ;;  %v4194_v35 = vld [vmem:[#allocation16 + $0x1c90] sm:$0xff] }
 0x6a0   :  { %10797 = vmatpush1.bf16.msra.mxu1 %v13181_v54  ;;  %v4138_v54 = vld [vmem:[#allocation16 + $0x1ad0] sm:$0xff] }
 0x6a1   :  { %11002 = vmatpush1.bf16.msra.mxu0 %v13183_v49  ;;  %10798 = vmatprep.subr.bf16.mxu1 %v13198_v57  ;;  %v4131_v49 = vld [vmem:[#allocation16 + $0x1a98] sm:$0xff]  ;;  %v13294_v60 = vcombine.high %v4130_v53, %v4138_v54 }
 0x6a2   :  { %11003 = vmatprep.subr.bf16.mxu0 %v13200_v58  ;;  %v4139_v57 = vld [vmem:[#allocation16 + $0x1ad8] sm:$0xff]  ;;  %v13277_v58 = vcombine.low %v4114_v51, %v4122_v63 }
 0x6a3   :  { %v13296_v50 = vcombine.high %v4131_v49, %v4139_v57  ;;  %v13295_v14 = vcombine.low %v4131_v49, %v4139_v57  ;;  %v4210_v57 = vld [vmem:[#allocation16 + $0x1d10] sm:$0xff] }
 0x6a4   :  { %10799 = vmatpush1.bf16.msra.mxu1 %v13197_v3  ;;  %v4154_v3 = vld [vmem:[#allocation16 + $0x1b50] sm:$0xff] }
 0x6a5   :  { %11004 = vmatpush1.bf16.msra.mxu0 %v13199_v5  ;;  %10809 = vmatprep.subr.bf16.mxu1 %v13214_v6  ;;  %v4147_v5 = vld [vmem:[#allocation16 + $0x1b18] sm:$0xff]  ;;  %v13310_v29 = vcombine.high %v4146_v4, %v4154_v3 }
 0x6a6   :  { %11014 = vmatprep.subr.bf16.mxu0 %v13216_v7  ;;  %v4155_v6 = vld [vmem:[#allocation16 + $0x1b58] sm:$0xff]  ;;  %v13293_v7 = vcombine.low %v4130_v53, %v4138_v54 }
 0x6a7   :  { %10801 = vmatmul.mubr.bf16.vlgmr.msra.gmra.mrb[24].mxu1 %v15132_v31  ;;  %v13312_v9 = vcombine.high %v4147_v5, %v4155_v6  ;;  %v13311_v10 = vcombine.low %v4147_v5, %v4155_v6  ;;  %v4226_v6 = vld [vmem:[#allocation16 + $0x1d90] sm:$0xff] }
 0x6a8   :  { %11006 = vmatmul.mubr.bf16.vlgmr.msra.gmra.mrb[24].mxu0 %v15132_v31  ;;  %10810 = vmatpush1.bf16.msra.mxu1 %v13213_v37 }
 0x6a9   :  { %10841 = vmatprep.mubr.bf16.mxu1 %v15139_v11  ;;  %11015 = vmatpush1.bf16.msra.mxu0 %v13215_v17  ;;  %v4162_v17 = vld [vmem:[#allocation16 + $0x1b90] sm:$0xff] }
 0x6aa   :  { %11046 = vmatprep.mubr.bf16.mxu0 %v15139_v11  ;;  %10811 = vmatprep.subr.bf16.mxu1 %v13230_v39  ;;  %v4170_v39 = vld [vmem:[#allocation16 + $0x1bd0] sm:$0xff] }
 0x6ab   :  { %11016 = vmatprep.subr.bf16.mxu0 %v13232_v12  ;;  %v4163_v12 = vld [vmem:[#allocation16 + $0x1b98] sm:$0xff]  ;;  %v13326_v33 = vcombine.high %v4162_v17, %v4170_v39 }
 0x6ac   :  { %10812 = vmatpush1.bf16.msra.mxu1 %v13229_v26  ;;  %v13328_v41 = vcombine.high %v4163_v12, %v4171_v24  ;;  %v13327_v51 = vcombine.low %v4163_v12, %v4171_v24  ;;  %v4242_v24 = vld [vmem:[#allocation16 + $0x1e10] sm:$0xff] }
 0x6ad   :  { %11017 = vmatpush1.bf16.msra.mxu0 %v13231_v27  ;;  %10813 = vmatprep.subr.bf16.mxu1 %v13246_v15  ;;  %v13309_v27 = vcombine.low %v4146_v4, %v4154_v3 }
 0x6ae   :  { %11018 = vmatprep.subr.bf16.mxu0 %v13248_v30 }
 0x6b0   :  { %10814 = vmatpush1.bf16.msra.mxu1 %v13245_v44  ;;  %v4186_v44 = vld [vmem:[#allocation16 + $0x1c50] sm:$0xff] }
 0x6b1   :  { %11019 = vmatpush1.bf16.msra.mxu0 %v13247_v45  ;;  %10815 = vmatprep.subr.bf16.mxu1 %v13262_v47  ;;  %v4179_v45 = vld [vmem:[#allocation16 + $0x1c18] sm:$0xff]  ;;  %v13342_v63 = vcombine.high %v4178_v43, %v4186_v44 }
 0x6b2   :  { %11020 = vmatprep.subr.bf16.mxu0 %v13264_v48  ;;  %v4187_v47 = vld [vmem:[#allocation16 + $0x1c58] sm:$0xff]  ;;  %v13325_v48 = vcombine.low %v4162_v17, %v4170_v39 }
 0x6b3   :  { %v13344_v28 = vcombine.high %v4179_v45, %v4187_v47  ;;  %v13343_v53 = vcombine.low %v4179_v45, %v4187_v47  ;;  %v4267_v45 = vld [vmem:[#allocation16 + $0x1ed8] sm:$0xff] }
 0x6b4   :  { %10816 = vmatpush1.bf16.msra.mxu1 %v13261_v19  ;;  %v4202_v19 = vld [vmem:[#allocation16 + $0x1cd0] sm:$0xff] }
 0x6b5   :  { %11021 = vmatpush1.bf16.msra.mxu0 %v13263_v22  ;;  %10817 = vmatprep.subr.bf16.mxu1 %v13278_v23  ;;  %v4195_v22 = vld [vmem:[#allocation16 + $0x1c98] sm:$0xff]  ;;  %v13358_v54 = vcombine.high %v4194_v35, %v4202_v19 }
 0x6b6   :  { %11022 = vmatprep.subr.bf16.mxu0 %v13280_v34  ;;  %v4203_v23 = vld [vmem:[#allocation16 + $0x1cd8] sm:$0xff]  ;;  %v13341_v34 = vcombine.low %v4178_v43, %v4186_v44  ;;  %v4266_v43 = vld [vmem:[#allocation16 + $0x1ed0] sm:$0xff] }
 0x6b7   :  { %v13360_v49 = vcombine.high %v4195_v22, %v4203_v23  ;;  %v13359_v4 = vcombine.low %v4195_v22, %v4203_v23  ;;  %v4259_v44 = vld [vmem:[#allocation16 + $0x1e98] sm:$0xff] }
 0x6b8   :  { %10818 = vmatpush1.bf16.msra.mxu1 %v13277_v58  ;;  %v4218_v58 = vld [vmem:[#allocation16 + $0x1d50] sm:$0xff]  ;;  %v4283_v22 = vld [vmem:[#allocation16 + $0x1f58] sm:$0xff] }
 0x6b9   :  { %11023 = vmatpush1.bf16.msra.mxu0 %v13279_v62  ;;  %10819 = vmatprep.subr.bf16.mxu1 %v13294_v60  ;;  %v4211_v62 = vld [vmem:[#allocation16 + $0x1d18] sm:$0xff]  ;;  %v13374_v3 = vcombine.high %v4210_v57, %v4218_v58 }
 0x6ba   :  { %v15185_v37 = vpop.f32.mrb[20].mxu1  ;;  %v15187_v55 = vpop.f32.mrb[20].mxu0  ;;  %11024 = vmatprep.subr.bf16.mxu0 %v13296_v50  ;;  %v4219_v60 = vld [vmem:[#allocation16 + $0x1d58] sm:$0xff]  ;;  %v13357_v50 = vcombine.low %v4194_v35, %v4202_v19  ;;  %v4282_v35 = vld [vmem:[#allocation16 + $0x1f50] sm:$0xff] }
 0x6bb   :  { %v15189_v20 = vpop.f32.mrb[21].mxu1  ;;  %v15191_v21 = vpop.f32.mrb[21].mxu0  ;;  %v13376_v5 = vcombine.high %v4211_v62, %v4219_v60  ;;  %v13375_v17 = vcombine.low %v4211_v62, %v4219_v60  ;;  %v4275_v19 = vld [vmem:[#allocation16 + $0x1f18] sm:$0xff] }
 0x6bc   :  { %v10478_v25 = vpop.f32.mrb[22].mxu1  ;;  %v10683_v26 = vpop.f32.mrb[22].mxu0  ;;  %10820 = vmatpush1.bf16.msra.mxu1 %v13293_v7  ;;  %v4234_v7 = vld [vmem:[#allocation16 + $0x1dd0] sm:$0xff]  ;;  %v4299_v62 = vld [vmem:[#allocation16 + $0x1fd8] sm:$0xff] }
 0x6bd   :  { %11025 = vmatpush1.bf16.msra.mxu0 %v13295_v14  ;;  %v10479_v15 = vpop.f32.mrb[23].mxu1  ;;  %v10684_v30 = vpop.f32.mrb[23].mxu0  ;;  %10821 = vmatprep.subr.bf16.mxu1 %v13310_v29  ;;  %v4227_v14 = vld [vmem:[#allocation16 + $0x1d98] sm:$0xff]  ;;  %v13390_v39 = vcombine.high %v4226_v6, %v4234_v7  ;;  %v4250_v25 = vld [vmem:[#allocation16 + $0x1e50] sm:$0xff] }
 0x6be   :  { %11026 = vmatprep.subr.bf16.mxu0 %v13312_v9  ;;  %v4235_v29 = vld [vmem:[#allocation16 + $0x1dd8] sm:$0xff]  ;;  %v13373_v9 = vcombine.low %v4210_v57, %v4218_v58  ;;  %v13389_v15 = vcombine.low %v4226_v6, %v4234_v7  ;;  %v13405_v47 = vcombine.low %v4242_v24, %v4250_v25  ;;  %v4298_v57 = vld [vmem:[#allocation16 + $0x1fd0] sm:$0xff] }
 0x6bf   :  { %v13392_v12 = vcombine.high %v4227_v14, %v4235_v29  ;;  %v4243_v26 = vld [vmem:[#allocation16 + $0x1e18] sm:$0xff]  ;;  %v13391_v30 = vcombine.low %v4227_v14, %v4235_v29  ;;  %v4314_v6 = vld [vmem:[#allocation16 + $0x2050] sm:$0xff] }
 0x6c0   :  { %10822 = vmatpush1.bf16.msra.mxu1 %v13309_v27  ;;  %v4251_v27 = vld [vmem:[#allocation16 + $0x1e58] sm:$0xff] }
 0x6c1   :  { %11027 = vmatpush1.bf16.msra.mxu0 %v13311_v10  ;;  %10823 = vmatprep.subr.bf16.mxu1 %v13326_v33  ;;  %v13406_v10 = vcombine.high %v4242_v24, %v4250_v25  ;;  %v13408_v33 = vcombine.high %v4243_v26, %v4251_v27  ;;  %v4291_v58 = vld [vmem:[#allocation16 + $0x1f98] sm:$0xff]  ;;  %v4330_v24 = vld [vmem:[#allocation16 + $0x20d0] sm:$0xff] }
 0x6c2   :  { %11028 = vmatprep.subr.bf16.mxu0 %v13328_v41  ;;  %v4258_v41 = vld [vmem:[#allocation16 + $0x1e90] sm:$0xff]  ;;  %v4307_v7 = vld [vmem:[#allocation16 + $0x2018] sm:$0xff] }
 0x6c3   :  { %v13421_v23 = vcombine.low %v4258_v41, %v4266_v43  ;;  %v4315_v14 = vld [vmem:[#allocation16 + $0x2058] sm:$0xff] }
 0x6c4   :  { %10824 = vmatpush1.bf16.msra.mxu1 %v13325_v48  ;;  %v13407_v48 = vcombine.low %v4243_v26, %v4251_v27  ;;  %v4323_v25 = vld [vmem:[#allocation16 + $0x2098] sm:$0xff] }
 0x6c5   :  { %11029 = vmatpush1.bf16.msra.mxu0 %v13327_v51  ;;  %10825 = vmatprep.subr.bf16.mxu1 %v13342_v63  ;;  %v13422_v51 = vcombine.high %v4258_v41, %v4266_v43  ;;  %v13424_v63 = vcombine.high %v4259_v44, %v4267_v45  ;;  %v4331_v26 = vld [vmem:[#allocation16 + $0x20d8] sm:$0xff]  ;;  %v4346_v41 = vld [vmem:[#allocation16 + $0x2150] sm:$0xff] }
 0x6c6   :  { %11030 = vmatprep.subr.bf16.mxu0 %v13344_v28  ;;  %v4274_v28 = vld [vmem:[#allocation16 + $0x1f10] sm:$0xff]  ;;  %v4339_v43 = vld [vmem:[#allocation16 + $0x2118] sm:$0xff] }
 0x6c7   :  { %v13437_v60 = vcombine.low %v4274_v28, %v4282_v35 }
 0x6c8   :  { %10826 = vmatpush1.bf16.msra.mxu1 %v13341_v34  ;;  %v13423_v34 = vcombine.low %v4259_v44, %v4267_v45  ;;  %v4347_v44 = vld [vmem:[#allocation16 + $0x2158] sm:$0xff] }
 0x6c9   :  { %11031 = vmatpush1.bf16.msra.mxu0 %v13343_v53  ;;  %10827 = vmatprep.subr.bf16.mxu1 %v13358_v54  ;;  %v13438_v53 = vcombine.high %v4274_v28, %v4282_v35  ;;  %v13440_v54 = vcombine.high %v4275_v19, %v4283_v22  ;;  %v4362_v28 = vld [vmem:[#allocation16 + $0x21d0] sm:$0xff]  ;;  %v4355_v35 = vld [vmem:[#allocation16 + $0x2198] sm:$0xff] }
 0x6ca   :  { %11032 = vmatprep.subr.bf16.mxu0 %v13360_v49  ;;  %v4290_v49 = vld [vmem:[#allocation16 + $0x1f90] sm:$0xff] }
 0x6cb   :  { %v13453_v29 = vcombine.low %v4290_v49, %v4298_v57 }
 0x6cc   :  { %10828 = vmatpush1.bf16.msra.mxu1 %v13357_v50  ;;  %v13439_v50 = vcombine.low %v4275_v19, %v4283_v22  ;;  %v4363_v19 = vld [vmem:[#allocation16 + $0x21d8] sm:$0xff] }
 0x6cd   :  { %11033 = vmatpush1.bf16.msra.mxu0 %v13359_v4  ;;  %10829 = vmatprep.subr.bf16.mxu1 %v13374_v3  ;;  %v13454_v4 = vcombine.high %v4290_v49, %v4298_v57  ;;  %v13456_v3 = vcombine.high %v4291_v58, %v4299_v62  ;;  %v4378_v49 = vld [vmem:[#allocation16 + $0x2250] sm:$0xff]  ;;  %v4371_v57 = vld [vmem:[#allocation16 + $0x2218] sm:$0xff] }
 0x6ce   :  { %11034 = vmatprep.subr.bf16.mxu0 %v13376_v5  ;;  %v4306_v5 = vld [vmem:[#allocation16 + $0x2010] sm:$0xff] }
 0x6cf   :  { %v13469_v27 = vcombine.low %v4306_v5, %v4314_v6 }
 0x6d0   :  { %10830 = vmatpush1.bf16.msra.mxu1 %v13373_v9  ;;  %v13455_v9 = vcombine.low %v4291_v58, %v4299_v62  ;;  %v4379_v58 = vld [vmem:[#allocation16 + $0x2258] sm:$0xff] }
 0x6d1   :  { %11035 = vmatpush1.bf16.msra.mxu0 %v13375_v17  ;;  %10831 = vmatprep.subr.bf16.mxu1 %v13390_v39  ;;  %v13470_v17 = vcombine.high %v4306_v5, %v4314_v6  ;;  %v13472_v39 = vcombine.high %v4307_v7, %v4315_v14  ;;  %v4394_v5 = vld [vmem:[#allocation16 + $0x22d0] sm:$0xff]  ;;  %v4387_v6 = vld [vmem:[#allocation16 + $0x2298] sm:$0xff] }
 0x6d2   :  { %11036 = vmatprep.subr.bf16.mxu0 %v13392_v12  ;;  %v4322_v12 = vld [vmem:[#allocation16 + $0x2090] sm:$0xff] }
 0x6d3   :  { %v13485_v45 = vcombine.low %v4322_v12, %v4330_v24 }
 0x6d4   :  { %10832 = vmatpush1.bf16.msra.mxu1 %v13389_v15  ;;  %v13471_v15 = vcombine.low %v4307_v7, %v4315_v14  ;;  %v4395_v7 = vld [vmem:[#allocation16 + $0x22d8] sm:$0xff] }
 0x6d5   :  { %11037 = vmatpush1.bf16.msra.mxu0 %v13391_v30  ;;  %10833 = vmatprep.subr.bf16.mxu1 %v13406_v10  ;;  %v13486_v30 = vcombine.high %v4322_v12, %v4330_v24  ;;  %v13488_v10 = vcombine.high %v4323_v25, %v4331_v26  ;;  %v4410_v12 = vld [vmem:[#allocation16 + $0x2350] sm:$0xff]  ;;  %v4403_v24 = vld [vmem:[#allocation16 + $0x2318] sm:$0xff] }
 0x6d6   :  { %11038 = vmatprep.subr.bf16.mxu0 %v13408_v33  ;;  %v4338_v33 = vld [vmem:[#allocation16 + $0x2110] sm:$0xff] }
 0x6d7   :  { %v13501_v22 = vcombine.low %v4338_v33, %v4346_v41 }
 0x6d8   :  { %10834 = vmatpush1.bf16.msra.mxu1 %v13405_v47  ;;  %v13487_v47 = vcombine.low %v4323_v25, %v4331_v26  ;;  %v4411_v25 = vld [vmem:[#allocation16 + $0x2358] sm:$0xff] }
 0x6d9   :  { %11039 = vmatpush1.bf16.msra.mxu0 %v13407_v48  ;;  %10835 = vmatprep.subr.bf16.mxu1 %v13422_v51  ;;  %v13502_v48 = vcombine.high %v4338_v33, %v4346_v41  ;;  %v13504_v51 = vcombine.high %v4339_v43, %v4347_v44  ;;  %v4426_v33 = vld [vmem:[#allocation16 + $0x23d0] sm:$0xff]  ;;  %v4419_v41 = vld [vmem:[#allocation16 + $0x2398] sm:$0xff] }
 0x6da   :  { %11040 = vmatprep.subr.bf16.mxu0 %v13424_v63  ;;  %v4354_v63 = vld [vmem:[#allocation16 + $0x2190] sm:$0xff] }
 0x6db   :  { %v13517_v62 = vcombine.low %v4354_v63, %v4362_v28 }
 0x6dc   :  { %10836 = vmatpush1.bf16.msra.mxu1 %v13421_v23  ;;  %v13503_v23 = vcombine.low %v4339_v43, %v4347_v44  ;;  %v4427_v43 = vld [vmem:[#allocation16 + $0x23d8] sm:$0xff] }
 0x6dd   :  { %11041 = vmatpush1.bf16.msra.mxu0 %v13423_v34  ;;  %10837 = vmatprep.subr.bf16.mxu1 %v13438_v53  ;;  %v13518_v34 = vcombine.high %v4354_v63, %v4362_v28  ;;  %v13520_v53 = vcombine.high %v4355_v35, %v4363_v19  ;;  %v3292_v63 = vld [vmem:[#allocation16 + $0x60] sm:$0xff]  ;;  %v3285_v28 = vld [vmem:[#allocation16 + $0x28] sm:$0xff] }
 0x6de   :  { %11042 = vmatprep.subr.bf16.mxu0 %v13440_v54  ;;  %v4370_v54 = vld [vmem:[#allocation16 + $0x2210] sm:$0xff] }
 0x6df   :  { %v13533_v14 = vcombine.low %v4370_v54, %v4378_v49 }
 0x6e0   :  { %10838 = vmatpush1.bf16.msra.mxu1 %v13437_v60  ;;  %v13519_v60 = vcombine.low %v4355_v35, %v4363_v19  ;;  %v3293_v35 = vld [vmem:[#allocation16 + $0x68] sm:$0xff] }
 0x6e1   :  { %11043 = vmatpush1.bf16.msra.mxu0 %v13439_v50  ;;  %10839 = vmatprep.subr.bf16.mxu1 %v13454_v4  ;;  %v13534_v50 = vcombine.high %v4370_v54, %v4378_v49  ;;  %v13536_v4 = vcombine.high %v4371_v57, %v4379_v58  ;;  %v3308_v54 = vld [vmem:[#allocation16 + $0xe0] sm:$0xff] }
 0x6e2   :  { %11044 = vmatprep.subr.bf16.mxu0 %v13456_v3  ;;  %v4386_v3 = vld [vmem:[#allocation16 + $0x2290] sm:$0xff] }
 0x6e3   :  { %v13549_v26 = vcombine.low %v4386_v3, %v4394_v5 }
 0x6e4   :  { %10840 = vmatpush1.bf16.msra.mxu1 %v13453_v29  ;;  %v13535_v29 = vcombine.low %v4371_v57, %v4379_v58  ;;  %v3301_v57 = vld [vmem:[#allocation16 + $0xa8] sm:$0xff] }
 0x6e5   :  { %11045 = vmatpush1.bf16.msra.mxu0 %v13455_v9  ;;  %10850 = vmatprep.subr.bf16.mxu1 %v13470_v17  ;;  %v13550_v9 = vcombine.high %v4386_v3, %v4394_v5  ;;  %v13552_v17 = vcombine.high %v4387_v6, %v4395_v7  ;;  %v3309_v58 = vld [vmem:[#allocation16 + $0xe8] sm:$0xff] }
 0x6e6   :  { %11055 = vmatprep.subr.bf16.mxu0 %v13472_v39  ;;  %v4402_v39 = vld [vmem:[#allocation16 + $0x2310] sm:$0xff]  ;;  %v12468_v3 = vcombine.high %v3301_v57, %v3309_v58  ;;  %v3317_v5 = vld [vmem:[#allocation16 + $0x128] sm:$0xff] }
 0x6e7   :  { %10842 = vmatmul.mubr.bf16.vlgmr.msra.gmra.mrb[24].mxu1 %v15156_v0  ;;  %v13565_v44 = vcombine.low %v4402_v39, %v4410_v12 }
 0x6e8   :  { %11047 = vmatmul.mubr.bf16.vlgmr.msra.gmra.mrb[24].mxu0 %v15156_v0  ;;  %10851 = vmatpush1.bf16.msra.mxu1 %v13469_v27  ;;  %v13551_v27 = vcombine.low %v4387_v6, %v4395_v7  ;;  %v3325_v6 = vld [vmem:[#allocation16 + $0x168] sm:$0xff] }
 0x6e9   :  { %11056 = vmatpush1.bf16.msra.mxu0 %v13471_v15  ;;  %10852 = vmatprep.subr.bf16.mxu1 %v13486_v30  ;;  %v13566_v15 = vcombine.high %v4402_v39, %v4410_v12  ;;  %v13568_v30 = vcombine.high %v4403_v24, %v4411_v25  ;;  %v3340_v39 = vld [vmem:[#allocation16 + $0x1e0] sm:$0xff]  ;;  %v3333_v12 = vld [vmem:[#allocation16 + $0x1a8] sm:$0xff] }
 0x6ea   :  { %11057 = vmatprep.subr.bf16.mxu0 %v13488_v10  ;;  %10882 = vmatprep.mubr.bf16.mxu1 %v14765_v18  ;;  %v4418_v10 = vld [vmem:[#allocation16 + $0x2390] sm:$0xff] }
 0x6eb   :  { %11087 = vmatprep.mubr.bf16.mxu0 %v14765_v18  ;;  %v13581_v19 = vcombine.low %v4418_v10, %v4426_v33 }
 0x6ec   :  { %10853 = vmatpush1.bf16.msra.mxu1 %v13485_v45  ;;  %v13567_v45 = vcombine.low %v4403_v24, %v4411_v25  ;;  %v3341_v24 = vld [vmem:[#allocation16 + $0x1e8] sm:$0xff] }
 0x6ed   :  { %11058 = vmatpush1.bf16.msra.mxu0 %v13487_v47  ;;  %10854 = vmatprep.subr.bf16.mxu1 %v13502_v48  ;;  %v13582_v47 = vcombine.high %v4418_v10, %v4426_v33  ;;  %v13584_v48 = vcombine.high %v4419_v41, %v4427_v43  ;;  %v3356_v10 = vld [vmem:[#allocation16 + $0x260] sm:$0xff]  ;;  %v3349_v33 = vld [vmem:[#allocation16 + $0x228] sm:$0xff] }
 0x6ee   :  { %11059 = vmatprep.subr.bf16.mxu0 %v13504_v51  ;;  %v3284_v51 = vld [vmem:[#allocation16 + $0x20] sm:$0xff] }
 0x6ef   :  { %v12449_v49 = vcombine.low %v3284_v51, %v3292_v63 }
 0x6f0   :  { %10855 = vmatpush1.bf16.msra.mxu1 %v13501_v22  ;;  %v13583_v22 = vcombine.low %v4419_v41, %v4427_v43  ;;  %v3357_v41 = vld [vmem:[#allocation16 + $0x268] sm:$0xff] }
 0x6f1   :  { %11060 = vmatpush1.bf16.msra.mxu0 %v13503_v23  ;;  %10856 = vmatprep.subr.bf16.mxu1 %v13518_v34  ;;  %v12450_v23 = vcombine.high %v3284_v51, %v3292_v63  ;;  %v12452_v34 = vcombine.high %v3285_v28, %v3293_v35  ;;  %v3372_v51 = vld [vmem:[#allocation16 + $0x2e0] sm:$0xff]  ;;  %v3365_v63 = vld [vmem:[#allocation16 + $0x2a8] sm:$0xff] }
 0x6f2   :  { %11061 = vmatprep.subr.bf16.mxu0 %v13520_v53  ;;  %v3300_v53 = vld [vmem:[#allocation16 + $0xa0] sm:$0xff] }
 0x6f3   :  { %v12465_v7 = vcombine.low %v3300_v53, %v3308_v54 }
 0x6f4   :  { %10857 = vmatpush1.bf16.msra.mxu1 %v13517_v62  ;;  %v12451_v62 = vcombine.low %v3285_v28, %v3293_v35  ;;  %v3373_v28 = vld [vmem:[#allocation16 + $0x2e8] sm:$0xff] }
 0x6f5   :  { %11062 = vmatpush1.bf16.msra.mxu0 %v13519_v60  ;;  %10858 = vmatprep.subr.bf16.mxu1 %v13534_v50  ;;  %v12466_v60 = vcombine.high %v3300_v53, %v3308_v54  ;;  %v3316_v50 = vld [vmem:[#allocation16 + $0x120] sm:$0xff]  ;;  %v3381_v54 = vld [vmem:[#allocation16 + $0x328] sm:$0xff] }
 0x6f6   :  { %11063 = vmatprep.subr.bf16.mxu0 %v13536_v4  ;;  %v3324_v4 = vld [vmem:[#allocation16 + $0x160] sm:$0xff] }
 0x6f7   :  { %v12481_v25 = vcombine.low %v3316_v50, %v3324_v4  ;;  %v3388_v53 = vld [vmem:[#allocation16 + $0x360] sm:$0xff] }
 0x6f8   :  { %10859 = vmatpush1.bf16.msra.mxu1 %v13533_v14  ;;  %v12467_v14 = vcombine.low %v3301_v57, %v3309_v58  ;;  %v12531_v58 = vcombine.low %v3365_v63, %v3373_v28 }
 0x6f9   :  { %11064 = vmatpush1.bf16.msra.mxu0 %v13535_v29  ;;  %10860 = vmatprep.subr.bf16.mxu1 %v13550_v9  ;;  %v12482_v29 = vcombine.high %v3316_v50, %v3324_v4  ;;  %v12484_v9 = vcombine.high %v3317_v5, %v3325_v6  ;;  %v3396_v50 = vld [vmem:[#allocation16 + $0x3a0] sm:$0xff] }
 0x6fa   :  { %11065 = vmatprep.subr.bf16.mxu0 %v13552_v17  ;;  %v3332_v17 = vld [vmem:[#allocation16 + $0x1a0] sm:$0xff] }
 0x6fb   :  { %v12497_v43 = vcombine.low %v3332_v17, %v3340_v39  ;;  %v3404_v4 = vld [vmem:[#allocation16 + $0x3e0] sm:$0xff] }
 0x6fc   :  { %10861 = vmatpush1.bf16.msra.mxu1 %v13549_v26  ;;  %v12483_v26 = vcombine.low %v3317_v5, %v3325_v6  ;;  %v3405_v5 = vld [vmem:[#allocation16 + $0x3e8] sm:$0xff] }
 0x6fd   :  { %11066 = vmatpush1.bf16.msra.mxu0 %v13551_v27  ;;  %10862 = vmatprep.subr.bf16.mxu1 %v13566_v15  ;;  %v12498_v27 = vcombine.high %v3332_v17, %v3340_v39  ;;  %v12500_v15 = vcombine.high %v3333_v12, %v3341_v24  ;;  %v3420_v17 = vld [vmem:[#allocation16 + $0x460] sm:$0xff]  ;;  %v3413_v39 = vld [vmem:[#allocation16 + $0x428] sm:$0xff] }
 0x6fe   :  { %11067 = vmatprep.subr.bf16.mxu0 %v13568_v30  ;;  %v3348_v30 = vld [vmem:[#allocation16 + $0x220] sm:$0xff] }
 0x6ff   :  { %v12513_v35 = vcombine.low %v3348_v30, %v3356_v10 }
 0x700   :  { %10863 = vmatpush1.bf16.msra.mxu1 %v13565_v44  ;;  %v12499_v44 = vcombine.low %v3333_v12, %v3341_v24  ;;  %v3421_v12 = vld [vmem:[#allocation16 + $0x468] sm:$0xff]  ;;  %v12561_v24 = vcombine.low %v3396_v50, %v3404_v4 }
 0x701   :  { %11068 = vmatpush1.bf16.msra.mxu0 %v13567_v45  ;;  %10864 = vmatprep.subr.bf16.mxu1 %v13582_v47  ;;  %v12514_v45 = vcombine.high %v3348_v30, %v3356_v10  ;;  %v12516_v47 = vcombine.high %v3349_v33, %v3357_v41  ;;  %v3436_v30 = vld [vmem:[#allocation16 + $0x4e0] sm:$0xff]  ;;  %v3429_v10 = vld [vmem:[#allocation16 + $0x4a8] sm:$0xff] }
 0x702   :  { %11069 = vmatprep.subr.bf16.mxu0 %v13584_v48  ;;  %v3364_v48 = vld [vmem:[#allocation16 + $0x2a0] sm:$0xff] }
 0x703   :  { %v12529_v57 = vcombine.low %v3364_v48, %v3372_v51 }
 0x704   :  { %10865 = vmatpush1.bf16.msra.mxu1 %v13581_v19  ;;  %v12515_v19 = vcombine.low %v3349_v33, %v3357_v41  ;;  %v3437_v33 = vld [vmem:[#allocation16 + $0x4e8] sm:$0xff] }
 0x705   :  { %11070 = vmatpush1.bf16.msra.mxu0 %v13583_v22  ;;  %11096 = vmatprep.subr.bf16.mxu1 %v12450_v23  ;;  %v12530_v22 = vcombine.high %v3364_v48, %v3372_v51  ;;  %v12532_v23 = vcombine.high %v3365_v63, %v3373_v28  ;;  %v3452_v48 = vld [vmem:[#allocation16 + $0x560] sm:$0xff]  ;;  %v3445_v51 = vld [vmem:[#allocation16 + $0x528] sm:$0xff] }
 0x706   :  { %11301 = vmatprep.subr.bf16.mxu0 %v12452_v34  ;;  %v3380_v34 = vld [vmem:[#allocation16 + $0x320] sm:$0xff]  ;;  %v3453_v63 = vld [vmem:[#allocation16 + $0x568] sm:$0xff] }
 0x707   :  { %10883 = vmatmul.mubr.bf16.vlgmr.msra.gmra.mrb[24].mxu1 %v15167_v52  ;;  %v12545_v6 = vcombine.low %v3380_v34, %v3388_v53 }
 0x708   :  { %11088 = vmatmul.mubr.bf16.vlgmr.msra.gmra.mrb[24].mxu0 %v15167_v52  ;;  %11097 = vmatpush1.bf16.msra.mxu1 %v12449_v49  ;;  %v3389_v49 = vld [vmem:[#allocation16 + $0x368] sm:$0xff] }
 0x709   :  { %11128 = vmatprep.mubr.bf16.mxu1 %v15065_v32  ;;  %11302 = vmatpush1.bf16.msra.mxu0 %v12451_v62  ;;  %v12546_v62 = vcombine.high %v3380_v34, %v3388_v53  ;;  %v3468_v34 = vld [vmem:[#allocation16 + $0x5e0] sm:$0xff]  ;;  %v3461_v53 = vld [vmem:[#allocation16 + $0x5a8] sm:$0xff] }
 0x70a   :  { %11333 = vmatprep.mubr.bf16.mxu0 %v15065_v32  ;;  %11098 = vmatprep.subr.bf16.mxu1 %v12466_v60  ;;  %v12548_v60 = vcombine.high %v3381_v54, %v3389_v49 }
 0x70b   :  { %11303 = vmatprep.subr.bf16.mxu0 %v12468_v3  ;;  %v3397_v3 = vld [vmem:[#allocation16 + $0x3a8] sm:$0xff] }
 0x70c   :  { %11099 = vmatpush1.bf16.msra.mxu1 %v12465_v7  ;;  %v12547_v7 = vcombine.low %v3381_v54, %v3389_v49  ;;  %v3469_v54 = vld [vmem:[#allocation16 + $0x5e8] sm:$0xff] }
 0x70d   :  { %11304 = vmatpush1.bf16.msra.mxu0 %v12467_v14  ;;  %11100 = vmatprep.subr.bf16.mxu1 %v12482_v29  ;;  %v12562_v14 = vcombine.high %v3396_v50, %v3404_v4  ;;  %v12564_v29 = vcombine.high %v3397_v3, %v3405_v5  ;;  %v3484_v50 = vld [vmem:[#allocation16 + $0x660] sm:$0xff]  ;;  %v3477_v4 = vld [vmem:[#allocation16 + $0x628] sm:$0xff] }
 0x70e   :  { %11305 = vmatprep.subr.bf16.mxu0 %v12484_v9  ;;  %v3412_v9 = vld [vmem:[#allocation16 + $0x420] sm:$0xff] }
 0x70f   :  { %v12577_v41 = vcombine.low %v3412_v9, %v3420_v17 }
 0x710   :  { %11101 = vmatpush1.bf16.msra.mxu1 %v12481_v25  ;;  %v12563_v25 = vcombine.low %v3397_v3, %v3405_v5  ;;  %v3485_v3 = vld [vmem:[#allocation16 + $0x668] sm:$0xff] }
 0x711   :  { %11306 = vmatpush1.bf16.msra.mxu0 %v12483_v26  ;;  %11102 = vmatprep.subr.bf16.mxu1 %v12498_v27  ;;  %v12578_v26 = vcombine.high %v3412_v9, %v3420_v17  ;;  %v12580_v27 = vcombine.high %v3413_v39, %v3421_v12  ;;  %v3500_v9 = vld [vmem:[#allocation16 + $0x6e0] sm:$0xff]  ;;  %v3493_v17 = vld [vmem:[#allocation16 + $0x6a8] sm:$0xff] }
 0x712   :  { %11307 = vmatprep.subr.bf16.mxu0 %v12500_v15  ;;  %v3428_v15 = vld [vmem:[#allocation16 + $0x4a0] sm:$0xff] }
 0x713   :  { %v12593_v28 = vcombine.low %v3428_v15, %v3436_v30 }
 0x714   :  { %11103 = vmatpush1.bf16.msra.mxu1 %v12497_v43  ;;  %v12579_v43 = vcombine.low %v3413_v39, %v3421_v12  ;;  %v3501_v39 = vld [vmem:[#allocation16 + $0x6e8] sm:$0xff] }
 0x715   :  { %11308 = vmatpush1.bf16.msra.mxu0 %v12499_v44  ;;  %11104 = vmatprep.subr.bf16.mxu1 %v12514_v45  ;;  %v12594_v44 = vcombine.high %v3428_v15, %v3436_v30  ;;  %v12596_v45 = vcombine.high %v3429_v10, %v3437_v33  ;;  %v3516_v15 = vld [vmem:[#allocation16 + $0x760] sm:$0xff]  ;;  %v3509_v30 = vld [vmem:[#allocation16 + $0x728] sm:$0xff] }
 0x716   :  { %11309 = vmatprep.subr.bf16.mxu0 %v12516_v47  ;;  %v3444_v47 = vld [vmem:[#allocation16 + $0x520] sm:$0xff] }
 0x717   :  { %v12609_v49 = vcombine.low %v3444_v47, %v3452_v48 }
 0x718   :  { %11105 = vmatpush1.bf16.msra.mxu1 %v12513_v35  ;;  %v12595_v35 = vcombine.low %v3429_v10, %v3437_v33  ;;  %v3517_v10 = vld [vmem:[#allocation16 + $0x768] sm:$0xff] }
 0x719   :  { %11310 = vmatpush1.bf16.msra.mxu0 %v12515_v19  ;;  %11106 = vmatprep.subr.bf16.mxu1 %v12530_v22  ;;  %v12610_v19 = vcombine.high %v3444_v47, %v3452_v48  ;;  %v12612_v22 = vcombine.high %v3445_v51, %v3453_v63  ;;  %v3532_v47 = vld [vmem:[#allocation16 + $0x7e0] sm:$0xff]  ;;  %v3525_v48 = vld [vmem:[#allocation16 + $0x7a8] sm:$0xff] }
 0x71a   :  { %11311 = vmatprep.subr.bf16.mxu0 %v12532_v23  ;;  %v3460_v23 = vld [vmem:[#allocation16 + $0x5a0] sm:$0xff] }
 0x71b   :  { %v12625_v5 = vcombine.low %v3460_v23, %v3468_v34 }
 0x71c   :  { %11107 = vmatpush1.bf16.msra.mxu1 %v12529_v57  ;;  %v12611_v57 = vcombine.low %v3445_v51, %v3453_v63  ;;  %v3533_v51 = vld [vmem:[#allocation16 + $0x7e8] sm:$0xff] }
 0x71d   :  { %11312 = vmatpush1.bf16.msra.mxu0 %v12531_v58  ;;  %11108 = vmatprep.subr.bf16.mxu1 %v12546_v62  ;;  %v12626_v58 = vcombine.high %v3460_v23, %v3468_v34  ;;  %v12628_v62 = vcombine.high %v3461_v53, %v3469_v54  ;;  %v3548_v23 = vld [vmem:[#allocation16 + $0x860] sm:$0xff]  ;;  %v3541_v34 = vld [vmem:[#allocation16 + $0x828] sm:$0xff] }
 0x71e   :  { %11313 = vmatprep.subr.bf16.mxu0 %v12548_v60  ;;  %v3476_v60 = vld [vmem:[#allocation16 + $0x620] sm:$0xff] }
 0x71f   :  { %v12641_v12 = vcombine.low %v3476_v60, %v3484_v50 }
 0x720   :  { %11109 = vmatpush1.bf16.msra.mxu1 %v12545_v6  ;;  %v12627_v6 = vcombine.low %v3461_v53, %v3469_v54  ;;  %v3549_v53 = vld [vmem:[#allocation16 + $0x868] sm:$0xff] }
 0x721   :  { %11314 = vmatpush1.bf16.msra.mxu0 %v12547_v7  ;;  %11110 = vmatprep.subr.bf16.mxu1 %v12562_v14  ;;  %v12642_v7 = vcombine.high %v3476_v60, %v3484_v50  ;;  %v12644_v14 = vcombine.high %v3477_v4, %v3485_v3  ;;  %v3564_v60 = vld [vmem:[#allocation16 + $0x8e0] sm:$0xff] }
 0x722   :  { %11315 = vmatprep.subr.bf16.mxu0 %v12564_v29  ;;  %v3492_v29 = vld [vmem:[#allocation16 + $0x6a0] sm:$0xff] }
 0x723   :  { %v12657_v33 = vcombine.low %v3492_v29, %v3500_v9 }
 0x724   :  { %11111 = vmatpush1.bf16.msra.mxu1 %v12561_v24  ;;  %v12643_v24 = vcombine.low %v3477_v4, %v3485_v3  ;;  %v3557_v4 = vld [vmem:[#allocation16 + $0x8a8] sm:$0xff] }
 0x725   :  { %11316 = vmatpush1.bf16.msra.mxu0 %v12563_v25  ;;  %11112 = vmatprep.subr.bf16.mxu1 %v12578_v26  ;;  %v12658_v25 = vcombine.high %v3492_v29, %v3500_v9  ;;  %v12660_v26 = vcombine.high %v3493_v17, %v3501_v39  ;;  %v3565_v3 = vld [vmem:[#allocation16 + $0x8e8] sm:$0xff] }
 0x726   :  { %11317 = vmatprep.subr.bf16.mxu0 %v12580_v27  ;;  %v3508_v27 = vld [vmem:[#allocation16 + $0x720] sm:$0xff]  ;;  %v12724_v29 = vcombine.high %v3557_v4, %v3565_v3  ;;  %v3573_v9 = vld [vmem:[#allocation16 + $0x928] sm:$0xff] }
 0x727   :  { %v12673_v63 = vcombine.low %v3508_v27, %v3516_v15 }
 0x728   :  { %11113 = vmatpush1.bf16.msra.mxu1 %v12577_v41  ;;  %v12659_v41 = vcombine.low %v3493_v17, %v3501_v39  ;;  %v3581_v17 = vld [vmem:[#allocation16 + $0x968] sm:$0xff] }
 0x729   :  { %11318 = vmatpush1.bf16.msra.mxu0 %v12579_v43  ;;  %11114 = vmatprep.subr.bf16.mxu1 %v12594_v44  ;;  %v12674_v43 = vcombine.high %v3508_v27, %v3516_v15  ;;  %v12676_v44 = vcombine.high %v3509_v30, %v3517_v10  ;;  %v3596_v27 = vld [vmem:[#allocation16 + $0x9e0] sm:$0xff]  ;;  %v3589_v15 = vld [vmem:[#allocation16 + $0x9a8] sm:$0xff] }
 0x72a   :  { %11319 = vmatprep.subr.bf16.mxu0 %v12596_v45  ;;  %v3524_v45 = vld [vmem:[#allocation16 + $0x7a0] sm:$0xff] }
 0x72b   :  { %v12689_v54 = vcombine.low %v3524_v45, %v3532_v47 }
 0x72c   :  { %11115 = vmatpush1.bf16.msra.mxu1 %v12593_v28  ;;  %v12675_v28 = vcombine.low %v3509_v30, %v3517_v10  ;;  %v3597_v30 = vld [vmem:[#allocation16 + $0x9e8] sm:$0xff] }
 0x72d   :  { %11320 = vmatpush1.bf16.msra.mxu0 %v12595_v35  ;;  %11116 = vmatprep.subr.bf16.mxu1 %v12610_v19  ;;  %v12690_v35 = vcombine.high %v3524_v45, %v3532_v47  ;;  %v12692_v19 = vcombine.high %v3525_v48, %v3533_v51  ;;  %v3612_v45 = vld [vmem:[#allocation16 + $0xa60] sm:$0xff]  ;;  %v3605_v47 = vld [vmem:[#allocation16 + $0xa28] sm:$0xff] }
 0x72e   :  { %11321 = vmatprep.subr.bf16.mxu0 %v12612_v22  ;;  %v3540_v22 = vld [vmem:[#allocation16 + $0x820] sm:$0xff] }
 0x72f   :  { %v12705_v50 = vcombine.low %v3540_v22, %v3548_v23 }
 0x730   :  { %11117 = vmatpush1.bf16.msra.mxu1 %v12609_v49  ;;  %v12691_v49 = vcombine.low %v3525_v48, %v3533_v51  ;;  %v3613_v48 = vld [vmem:[#allocation16 + $0xa68] sm:$0xff] }
 0x731   :  { %11322 = vmatpush1.bf16.msra.mxu0 %v12611_v57  ;;  %11118 = vmatprep.subr.bf16.mxu1 %v12626_v58  ;;  %v12706_v57 = vcombine.high %v3540_v22, %v3548_v23  ;;  %v12708_v58 = vcombine.high %v3541_v34, %v3549_v53  ;;  %v3628_v22 = vld [vmem:[#allocation16 + $0xae0] sm:$0xff]  ;;  %v3621_v23 = vld [vmem:[#allocation16 + $0xaa8] sm:$0xff] }
 0x732   :  { %11323 = vmatprep.subr.bf16.mxu0 %v12628_v62  ;;  %v3556_v62 = vld [vmem:[#allocation16 + $0x8a0] sm:$0xff] }
 0x733   :  { %v12721_v39 = vcombine.low %v3556_v62, %v3564_v60 }
 0x734   :  { %11119 = vmatpush1.bf16.msra.mxu1 %v12625_v5  ;;  %v12707_v5 = vcombine.low %v3541_v34, %v3549_v53  ;;  %v3629_v34 = vld [vmem:[#allocation16 + $0xae8] sm:$0xff] }
 0x735   :  { %11324 = vmatpush1.bf16.msra.mxu0 %v12627_v6  ;;  %11120 = vmatprep.subr.bf16.mxu1 %v12642_v7  ;;  %v12722_v6 = vcombine.high %v3556_v62, %v3564_v60  ;;  %v3572_v7 = vld [vmem:[#allocation16 + $0x920] sm:$0xff]  ;;  %v3637_v60 = vld [vmem:[#allocation16 + $0xb28] sm:$0xff] }
 0x736   :  { %11325 = vmatprep.subr.bf16.mxu0 %v12644_v14  ;;  %v3580_v14 = vld [vmem:[#allocation16 + $0x960] sm:$0xff] }
 0x737   :  { %v12737_v10 = vcombine.low %v3572_v7, %v3580_v14  ;;  %v3644_v62 = vld [vmem:[#allocation16 + $0xb60] sm:$0xff] }
 0x738   :  { %11121 = vmatpush1.bf16.msra.mxu1 %v12641_v12  ;;  %v12723_v12 = vcombine.low %v3557_v4, %v3565_v3  ;;  %v12787_v3 = vcombine.low %v3621_v23, %v3629_v34 }
 0x739   :  { %11326 = vmatpush1.bf16.msra.mxu0 %v12643_v24  ;;  %11122 = vmatprep.subr.bf16.mxu1 %v12658_v25  ;;  %v12738_v24 = vcombine.high %v3572_v7, %v3580_v14  ;;  %v12740_v25 = vcombine.high %v3573_v9, %v3581_v17  ;;  %v3652_v7 = vld [vmem:[#allocation16 + $0xba0] sm:$0xff] }
 0x73a   :  { %11327 = vmatprep.subr.bf16.mxu0 %v12660_v26  ;;  %v3588_v26 = vld [vmem:[#allocation16 + $0x9a0] sm:$0xff] }
 0x73b   :  { %v12753_v51 = vcombine.low %v3588_v26, %v3596_v27  ;;  %v3660_v14 = vld [vmem:[#allocation16 + $0xbe0] sm:$0xff] }
 0x73c   :  { %11123 = vmatpush1.bf16.msra.mxu1 %v12657_v33  ;;  %v12739_v33 = vcombine.low %v3573_v9, %v3581_v17  ;;  %v3661_v9 = vld [vmem:[#allocation16 + $0xbe8] sm:$0xff] }
 0x73d   :  { %11328 = vmatpush1.bf16.msra.mxu0 %v12659_v41  ;;  %11124 = vmatprep.subr.bf16.mxu1 %v12674_v43  ;;  %v12754_v41 = vcombine.high %v3588_v26, %v3596_v27  ;;  %v12756_v43 = vcombine.high %v3589_v15, %v3597_v30  ;;  %v3676_v26 = vld [vmem:[#allocation16 + $0xc60] sm:$0xff]  ;;  %v3669_v27 = vld [vmem:[#allocation16 + $0xc28] sm:$0xff] }
 0x73e   :  { %11329 = vmatprep.subr.bf16.mxu0 %v12676_v44  ;;  %v3604_v44 = vld [vmem:[#allocation16 + $0xa20] sm:$0xff] }
 0x73f   :  { %v12769_v53 = vcombine.low %v3604_v44, %v3612_v45 }
 0x740   :  { %11125 = vmatpush1.bf16.msra.mxu1 %v12673_v63  ;;  %v12755_v63 = vcombine.low %v3589_v15, %v3597_v30  ;;  %v3677_v15 = vld [vmem:[#allocation16 + $0xc68] sm:$0xff]  ;;  %v12817_v30 = vcombine.low %v3652_v7, %v3660_v14 }
 0x741   :  { %11330 = vmatpush1.bf16.msra.mxu0 %v12675_v28  ;;  %11126 = vmatprep.subr.bf16.mxu1 %v12690_v35  ;;  %v12770_v28 = vcombine.high %v3604_v44, %v3612_v45  ;;  %v12772_v35 = vcombine.high %v3605_v47, %v3613_v48  ;;  %v3692_v44 = vld [vmem:[#allocation16 + $0xce0] sm:$0xff]  ;;  %v3685_v45 = vld [vmem:[#allocation16 + $0xca8] sm:$0xff] }
 0x742   :  { %11331 = vmatprep.subr.bf16.mxu0 %v12692_v19  ;;  %v3620_v19 = vld [vmem:[#allocation16 + $0xaa0] sm:$0xff] }
 0x743   :  { %v12785_v4 = vcombine.low %v3620_v19, %v3628_v22 }
 0x744   :  { %11127 = vmatpush1.bf16.msra.mxu1 %v12689_v54  ;;  %v12771_v54 = vcombine.low %v3605_v47, %v3613_v48  ;;  %v3693_v47 = vld [vmem:[#allocation16 + $0xce8] sm:$0xff] }
 0x745   :  { %11332 = vmatpush1.bf16.msra.mxu0 %v12691_v49  ;;  %11137 = vmatprep.subr.bf16.mxu1 %v12706_v57  ;;  %v12786_v49 = vcombine.high %v3620_v19, %v3628_v22  ;;  %v12788_v57 = vcombine.high %v3621_v23, %v3629_v34  ;;  %v3708_v19 = vld [vmem:[#allocation16 + $0xd60] sm:$0xff]  ;;  %v3701_v22 = vld [vmem:[#allocation16 + $0xd28] sm:$0xff] }
 0x746   :  { %11342 = vmatprep.subr.bf16.mxu0 %v12708_v58  ;;  %v3636_v58 = vld [vmem:[#allocation16 + $0xb20] sm:$0xff]  ;;  %v3709_v23 = vld [vmem:[#allocation16 + $0xd68] sm:$0xff] }
 0x747   :  { %11129 = vmatmul.mubr.bf16.vlgmr.msra.gmra.mrb[28].mxu1 %v15070_v36  ;;  %v12801_v17 = vcombine.low %v3636_v58, %v3644_v62 }
 0x748   :  { %11334 = vmatmul.mubr.bf16.vlgmr.msra.gmra.mrb[28].mxu0 %v15070_v36  ;;  %11138 = vmatpush1.bf16.msra.mxu1 %v12705_v50  ;;  %v3645_v50 = vld [vmem:[#allocation16 + $0xb68] sm:$0xff] }
 0x749   :  { %11169 = vmatprep.mubr.bf16.mxu1 %v15074_v46  ;;  %11343 = vmatpush1.bf16.msra.mxu0 %v12707_v5  ;;  %v12802_v5 = vcombine.high %v3636_v58, %v3644_v62  ;;  %v3724_v58 = vld [vmem:[#allocation16 + $0xde0] sm:$0xff]  ;;  %v3717_v62 = vld [vmem:[#allocation16 + $0xda8] sm:$0xff] }
 0x74a   :  { %11374 = vmatprep.mubr.bf16.mxu0 %v15074_v46  ;;  %11139 = vmatprep.subr.bf16.mxu1 %v12722_v6  ;;  %v12804_v6 = vcombine.high %v3637_v60, %v3645_v50 }
 0x74b   :  { %11344 = vmatprep.subr.bf16.mxu0 %v12724_v29  ;;  %v3653_v29 = vld [vmem:[#allocation16 + $0xba8] sm:$0xff] }
 0x74c   :  { %11140 = vmatpush1.bf16.msra.mxu1 %v12721_v39  ;;  %v12803_v39 = vcombine.low %v3637_v60, %v3645_v50  ;;  %v3725_v60 = vld [vmem:[#allocation16 + $0xde8] sm:$0xff] }
 0x74d   :  { %11345 = vmatpush1.bf16.msra.mxu0 %v12723_v12  ;;  %11141 = vmatprep.subr.bf16.mxu1 %v12738_v24  ;;  %v12818_v12 = vcombine.high %v3652_v7, %v3660_v14  ;;  %v12820_v24 = vcombine.high %v3653_v29, %v3661_v9  ;;  %v3740_v7 = vld [vmem:[#allocation16 + $0xe60] sm:$0xff]  ;;  %v3733_v14 = vld [vmem:[#allocation16 + $0xe28] sm:$0xff] }
 0x74e   :  { %11346 = vmatprep.subr.bf16.mxu0 %v12740_v25  ;;  %v3668_v25 = vld [vmem:[#allocation16 + $0xc20] sm:$0xff] }
 0x74f   :  { %v12833_v48 = vcombine.low %v3668_v25, %v3676_v26 }
 0x750   :  { %11142 = vmatpush1.bf16.msra.mxu1 %v12737_v10  ;;  %v12819_v10 = vcombine.low %v3653_v29, %v3661_v9  ;;  %v3741_v29 = vld [vmem:[#allocation16 + $0xe68] sm:$0xff] }
 0x751   :  { %11347 = vmatpush1.bf16.msra.mxu0 %v12739_v33  ;;  %11143 = vmatprep.subr.bf16.mxu1 %v12754_v41  ;;  %v12834_v33 = vcombine.high %v3668_v25, %v3676_v26  ;;  %v12836_v41 = vcombine.high %v3669_v27, %v3677_v15  ;;  %v3756_v25 = vld [vmem:[#allocation16 + $0xee0] sm:$0xff]  ;;  %v3749_v26 = vld [vmem:[#allocation16 + $0xea8] sm:$0xff] }
 0x752   :  { %11348 = vmatprep.subr.bf16.mxu0 %v12756_v43  ;;  %v3684_v43 = vld [vmem:[#allocation16 + $0xca0] sm:$0xff] }
 0x753   :  { %v12849_v34 = vcombine.low %v3684_v43, %v3692_v44 }
 0x754   :  { %11144 = vmatpush1.bf16.msra.mxu1 %v12753_v51  ;;  %v12835_v51 = vcombine.low %v3669_v27, %v3677_v15  ;;  %v3757_v27 = vld [vmem:[#allocation16 + $0xee8] sm:$0xff] }
 0x755   :  { %11349 = vmatpush1.bf16.msra.mxu0 %v12755_v63  ;;  %11145 = vmatprep.subr.bf16.mxu1 %v12770_v28  ;;  %v12850_v63 = vcombine.high %v3684_v43, %v3692_v44  ;;  %v12852_v28 = vcombine.high %v3685_v45, %v3693_v47  ;;  %v3772_v43 = vld [vmem:[#allocation16 + $0xf60] sm:$0xff]  ;;  %v3765_v44 = vld [vmem:[#allocation16 + $0xf28] sm:$0xff] }
 0x756   :  { %11350 = vmatprep.subr.bf16.mxu0 %v12772_v35  ;;  %v3700_v35 = vld [vmem:[#allocation16 + $0xd20] sm:$0xff] }
 0x757   :  { %v12865_v50 = vcombine.low %v3700_v35, %v3708_v19 }
 0x758   :  { %11146 = vmatpush1.bf16.msra.mxu1 %v12769_v53  ;;  %v12851_v53 = vcombine.low %v3685_v45, %v3693_v47  ;;  %v3773_v45 = vld [vmem:[#allocation16 + $0xf68] sm:$0xff] }
 0x759   :  { %11351 = vmatpush1.bf16.msra.mxu0 %v12771_v54  ;;  %11147 = vmatprep.subr.bf16.mxu1 %v12786_v49  ;;  %v12866_v54 = vcombine.high %v3700_v35, %v3708_v19  ;;  %v12868_v49 = vcombine.high %v3701_v22, %v3709_v23  ;;  %v3788_v35 = vld [vmem:[#allocation16 + $0xfe0] sm:$0xff]  ;;  %v3781_v19 = vld [vmem:[#allocation16 + $0xfa8] sm:$0xff] }
 0x75a   :  { %11352 = vmatprep.subr.bf16.mxu0 %v12788_v57  ;;  %v3716_v57 = vld [vmem:[#allocation16 + $0xda0] sm:$0xff] }
 0x75b   :  { %v12881_v9 = vcombine.low %v3716_v57, %v3724_v58 }
 0x75c   :  { %11148 = vmatpush1.bf16.msra.mxu1 %v12785_v4  ;;  %v12867_v4 = vcombine.low %v3701_v22, %v3709_v23  ;;  %v3789_v22 = vld [vmem:[#allocation16 + $0xfe8] sm:$0xff] }
 0x75d   :  { %11353 = vmatpush1.bf16.msra.mxu0 %v12787_v3  ;;  %11149 = vmatprep.subr.bf16.mxu1 %v12802_v5  ;;  %v12882_v3 = vcombine.high %v3716_v57, %v3724_v58  ;;  %v12884_v5 = vcombine.high %v3717_v62, %v3725_v60  ;;  %v3804_v57 = vld [vmem:[#allocation16 + $0x1060] sm:$0xff]  ;;  %v3797_v58 = vld [vmem:[#allocation16 + $0x1028] sm:$0xff] }
 0x75e   :  { %11354 = vmatprep.subr.bf16.mxu0 %v12804_v6  ;;  %v3732_v6 = vld [vmem:[#allocation16 + $0xe20] sm:$0xff] }
 0x75f   :  { %v12897_v15 = vcombine.low %v3732_v6, %v3740_v7 }
 0x760   :  { %11150 = vmatpush1.bf16.msra.mxu1 %v12801_v17  ;;  %v12883_v17 = vcombine.low %v3717_v62, %v3725_v60  ;;  %v3805_v62 = vld [vmem:[#allocation16 + $0x1068] sm:$0xff] }
 0x761   :  { %11355 = vmatpush1.bf16.msra.mxu0 %v12803_v39  ;;  %11151 = vmatprep.subr.bf16.mxu1 %v12818_v12  ;;  %v12898_v39 = vcombine.high %v3732_v6, %v3740_v7  ;;  %v12900_v12 = vcombine.high %v3733_v14, %v3741_v29  ;;  %v3820_v6 = vld [vmem:[#allocation16 + $0x10e0] sm:$0xff] }
 0x762   :  { %11356 = vmatprep.subr.bf16.mxu0 %v12820_v24  ;;  %v3748_v24 = vld [vmem:[#allocation16 + $0xea0] sm:$0xff] }
 0x763   :  { %v12913_v47 = vcombine.low %v3748_v24, %v3756_v25 }
 0x764   :  { %11152 = vmatpush1.bf16.msra.mxu1 %v12817_v30  ;;  %v12899_v30 = vcombine.low %v3733_v14, %v3741_v29  ;;  %v3813_v14 = vld [vmem:[#allocation16 + $0x10a8] sm:$0xff] }
 0x765   :  { %11357 = vmatpush1.bf16.msra.mxu0 %v12819_v10  ;;  %11153 = vmatprep.subr.bf16.mxu1 %v12834_v33  ;;  %v12914_v10 = vcombine.high %v3748_v24, %v3756_v25  ;;  %v12916_v33 = vcombine.high %v3749_v26, %v3757_v27  ;;  %v3821_v29 = vld [vmem:[#allocation16 + $0x10e8] sm:$0xff] }
 0x766   :  { %11358 = vmatprep.subr.bf16.mxu0 %v12836_v41  ;;  %v3764_v41 = vld [vmem:[#allocation16 + $0xf20] sm:$0xff]  ;;  %v12980_v24 = vcombine.high %v3813_v14, %v3821_v29  ;;  %v3829_v25 = vld [vmem:[#allocation16 + $0x1128] sm:$0xff] }
 0x767   :  { %v12929_v23 = vcombine.low %v3764_v41, %v3772_v43 }
 0x768   :  { %11154 = vmatpush1.bf16.msra.mxu1 %v12833_v48  ;;  %v12915_v48 = vcombine.low %v3749_v26, %v3757_v27  ;;  %v3837_v26 = vld [vmem:[#allocation16 + $0x1168] sm:$0xff] }
 0x769   :  { %11359 = vmatpush1.bf16.msra.mxu0 %v12835_v51  ;;  %11155 = vmatprep.subr.bf16.mxu1 %v12850_v63  ;;  %v12930_v51 = vcombine.high %v3764_v41, %v3772_v43  ;;  %v12932_v63 = vcombine.high %v3765_v44, %v3773_v45  ;;  %v3852_v41 = vld [vmem:[#allocation16 + $0x11e0] sm:$0xff]  ;;  %v3845_v43 = vld [vmem:[#allocation16 + $0x11a8] sm:$0xff] }
 0x76a   :  { %11360 = vmatprep.subr.bf16.mxu0 %v12852_v28  ;;  %v3780_v28 = vld [vmem:[#allocation16 + $0xfa0] sm:$0xff] }
 0x76b   :  { %v12945_v60 = vcombine.low %v3780_v28, %v3788_v35 }
 0x76c   :  { %11156 = vmatpush1.bf16.msra.mxu1 %v12849_v34  ;;  %v12931_v34 = vcombine.low %v3765_v44, %v3773_v45  ;;  %v3853_v44 = vld [vmem:[#allocation16 + $0x11e8] sm:$0xff] }
 0x76d   :  { %11361 = vmatpush1.bf16.msra.mxu0 %v12851_v53  ;;  %11157 = vmatprep.subr.bf16.mxu1 %v12866_v54  ;;  %v12946_v53 = vcombine.high %v3780_v28, %v3788_v35  ;;  %v12948_v54 = vcombine.high %v3781_v19, %v3789_v22  ;;  %v3868_v28 = vld [vmem:[#allocation16 + $0x1260] sm:$0xff]  ;;  %v3861_v35 = vld [vmem:[#allocation16 + $0x1228] sm:$0xff] }
 0x76e   :  { %11362 = vmatprep.subr.bf16.mxu0 %v12868_v49  ;;  %v3796_v49 = vld [vmem:[#allocation16 + $0x1020] sm:$0xff] }
 0x76f   :  { %v12961_v7 = vcombine.low %v3796_v49, %v3804_v57 }
 0x770   :  { %11158 = vmatpush1.bf16.msra.mxu1 %v12865_v50  ;;  %v12947_v50 = vcombine.low %v3781_v19, %v3789_v22  ;;  %v3869_v19 = vld [vmem:[#allocation16 + $0x1268] sm:$0xff] }
 0x771   :  { %11363 = vmatpush1.bf16.msra.mxu0 %v12867_v4  ;;  %11159 = vmatprep.subr.bf16.mxu1 %v12882_v3  ;;  %v12962_v4 = vcombine.high %v3796_v49, %v3804_v57  ;;  %v12964_v3 = vcombine.high %v3797_v58, %v3805_v62  ;;  %v3884_v49 = vld [vmem:[#allocation16 + $0x12e0] sm:$0xff]  ;;  %v3877_v57 = vld [vmem:[#allocation16 + $0x12a8] sm:$0xff] }
 0x772   :  { %11364 = vmatprep.subr.bf16.mxu0 %v12884_v5  ;;  %v3812_v5 = vld [vmem:[#allocation16 + $0x10a0] sm:$0xff] }
 0x773   :  { %v12977_v27 = vcombine.low %v3812_v5, %v3820_v6 }
 0x774   :  { %11160 = vmatpush1.bf16.msra.mxu1 %v12881_v9  ;;  %v12963_v9 = vcombine.low %v3797_v58, %v3805_v62  ;;  %v3885_v58 = vld [vmem:[#allocation16 + $0x12e8] sm:$0xff] }
 0x775   :  { %11365 = vmatpush1.bf16.msra.mxu0 %v12883_v17  ;;  %11161 = vmatprep.subr.bf16.mxu1 %v12898_v39  ;;  %v12978_v17 = vcombine.high %v3812_v5, %v3820_v6  ;;  %v3828_v39 = vld [vmem:[#allocation16 + $0x1120] sm:$0xff]  ;;  %v3893_v6 = vld [vmem:[#allocation16 + $0x1328] sm:$0xff] }
 0x776   :  { %11366 = vmatprep.subr.bf16.mxu0 %v12900_v12  ;;  %v3836_v12 = vld [vmem:[#allocation16 + $0x1160] sm:$0xff] }
 0x777   :  { %v12993_v45 = vcombine.low %v3828_v39, %v3836_v12  ;;  %v3900_v5 = vld [vmem:[#allocation16 + $0x1360] sm:$0xff] }
 0x778   :  { %11162 = vmatpush1.bf16.msra.mxu1 %v12897_v15  ;;  %v12979_v15 = vcombine.low %v3813_v14, %v3821_v29  ;;  %v13043_v29 = vcombine.low %v3877_v57, %v3885_v58 }
 0x779   :  { %11367 = vmatpush1.bf16.msra.mxu0 %v12899_v30  ;;  %11163 = vmatprep.subr.bf16.mxu1 %v12914_v10  ;;  %v12994_v30 = vcombine.high %v3828_v39, %v3836_v12  ;;  %v12996_v10 = vcombine.high %v3829_v25, %v3837_v26  ;;  %v3908_v39 = vld [vmem:[#allocation16 + $0x13a0] sm:$0xff] }
 0x77a   :  { %11368 = vmatprep.subr.bf16.mxu0 %v12916_v33  ;;  %v3844_v33 = vld [vmem:[#allocation16 + $0x11a0] sm:$0xff] }
 0x77b   :  { %v13009_v22 = vcombine.low %v3844_v33, %v3852_v41  ;;  %v3916_v12 = vld [vmem:[#allocation16 + $0x13e0] sm:$0xff] }
 0x77c   :  { %11164 = vmatpush1.bf16.msra.mxu1 %v12913_v47  ;;  %v12995_v47 = vcombine.low %v3829_v25, %v3837_v26  ;;  %v3917_v25 = vld [vmem:[#allocation16 + $0x13e8] sm:$0xff] }
 0x77d   :  { %11369 = vmatpush1.bf16.msra.mxu0 %v12915_v48  ;;  %11165 = vmatprep.subr.bf16.mxu1 %v12930_v51  ;;  %v13010_v48 = vcombine.high %v3844_v33, %v3852_v41  ;;  %v13012_v51 = vcombine.high %v3845_v43, %v3853_v44  ;;  %v3932_v33 = vld [vmem:[#allocation16 + $0x1460] sm:$0xff]  ;;  %v3925_v41 = vld [vmem:[#allocation16 + $0x1428] sm:$0xff] }
 0x77e   :  { %11370 = vmatprep.subr.bf16.mxu0 %v12932_v63  ;;  %v3860_v63 = vld [vmem:[#allocation16 + $0x1220] sm:$0xff] }
 0x77f   :  { %v13025_v62 = vcombine.low %v3860_v63, %v3868_v28 }
 0x780   :  { %11166 = vmatpush1.bf16.msra.mxu1 %v12929_v23  ;;  %v13011_v23 = vcombine.low %v3845_v43, %v3853_v44  ;;  %v3933_v43 = vld [vmem:[#allocation16 + $0x1468] sm:$0xff]  ;;  %v13073_v44 = vcombine.low %v3908_v39, %v3916_v12 }
 0x781   :  { %11371 = vmatpush1.bf16.msra.mxu0 %v12931_v34  ;;  %11167 = vmatprep.subr.bf16.mxu1 %v12946_v53  ;;  %v13026_v34 = vcombine.high %v3860_v63, %v3868_v28  ;;  %v13028_v53 = vcombine.high %v3861_v35, %v3869_v19  ;;  %v3948_v63 = vld [vmem:[#allocation16 + $0x14e0] sm:$0xff]  ;;  %v3941_v28 = vld [vmem:[#allocation16 + $0x14a8] sm:$0xff] }
 0x782   :  { %11372 = vmatprep.subr.bf16.mxu0 %v12948_v54  ;;  %v3876_v54 = vld [vmem:[#allocation16 + $0x12a0] sm:$0xff] }
 0x783   :  { %v13041_v14 = vcombine.low %v3876_v54, %v3884_v49 }
 0x784   :  { %11168 = vmatpush1.bf16.msra.mxu1 %v12945_v60  ;;  %v13027_v60 = vcombine.low %v3861_v35, %v3869_v19  ;;  %v3949_v35 = vld [vmem:[#allocation16 + $0x14e8] sm:$0xff] }
 0x785   :  { %11373 = vmatpush1.bf16.msra.mxu0 %v12947_v50  ;;  %11178 = vmatprep.subr.bf16.mxu1 %v12962_v4  ;;  %v13042_v50 = vcombine.high %v3876_v54, %v3884_v49  ;;  %v13044_v4 = vcombine.high %v3877_v57, %v3885_v58  ;;  %v3964_v54 = vld [vmem:[#allocation16 + $0x1560] sm:$0xff]  ;;  %v3957_v49 = vld [vmem:[#allocation16 + $0x1528] sm:$0xff] }
 0x786   :  { %11383 = vmatprep.subr.bf16.mxu0 %v12964_v3  ;;  %v3892_v3 = vld [vmem:[#allocation16 + $0x1320] sm:$0xff]  ;;  %v3965_v57 = vld [vmem:[#allocation16 + $0x1568] sm:$0xff] }
 0x787   :  { %11170 = vmatmul.mubr.bf16.vlgmr.msra.gmra.mrb[28].mxu1 %v15091_v16  ;;  %v13057_v26 = vcombine.low %v3892_v3, %v3900_v5 }
 0x788   :  { %11375 = vmatmul.mubr.bf16.vlgmr.msra.gmra.mrb[28].mxu0 %v15091_v16  ;;  %11179 = vmatpush1.bf16.msra.mxu1 %v12961_v7  ;;  %v3901_v7 = vld [vmem:[#allocation16 + $0x1368] sm:$0xff] }
 0x789   :  { %11210 = vmatprep.mubr.bf16.mxu1 %v15130_v59  ;;  %11384 = vmatpush1.bf16.msra.mxu0 %v12963_v9  ;;  %v13058_v9 = vcombine.high %v3892_v3, %v3900_v5  ;;  %v3980_v3 = vld [vmem:[#allocation16 + $0x15e0] sm:$0xff]  ;;  %v3973_v5 = vld [vmem:[#allocation16 + $0x15a8] sm:$0xff] }
 0x78a   :  { %11415 = vmatprep.mubr.bf16.mxu0 %v15130_v59  ;;  %11180 = vmatprep.subr.bf16.mxu1 %v12978_v17  ;;  %v13060_v17 = vcombine.high %v3893_v6, %v3901_v7 }
 0x78b   :  { %11385 = vmatprep.subr.bf16.mxu0 %v12980_v24  ;;  %v3909_v24 = vld [vmem:[#allocation16 + $0x13a8] sm:$0xff] }
 0x78c   :  { %11181 = vmatpush1.bf16.msra.mxu1 %v12977_v27  ;;  %v13059_v27 = vcombine.low %v3893_v6, %v3901_v7  ;;  %v3981_v6 = vld [vmem:[#allocation16 + $0x15e8] sm:$0xff] }
 0x78d   :  { %11386 = vmatpush1.bf16.msra.mxu0 %v12979_v15  ;;  %11182 = vmatprep.subr.bf16.mxu1 %v12994_v30  ;;  %v13074_v15 = vcombine.high %v3908_v39, %v3916_v12  ;;  %v13076_v30 = vcombine.high %v3909_v24, %v3917_v25  ;;  %v3996_v39 = vld [vmem:[#allocation16 + $0x1660] sm:$0xff]  ;;  %v3989_v12 = vld [vmem:[#allocation16 + $0x1628] sm:$0xff] }
 0x78e   :  { %11387 = vmatprep.subr.bf16.mxu0 %v12996_v10  ;;  %v3924_v10 = vld [vmem:[#allocation16 + $0x1420] sm:$0xff] }
 0x78f   :  { %v13089_v19 = vcombine.low %v3924_v10, %v3932_v33 }
 0x790   :  { %11183 = vmatpush1.bf16.msra.mxu1 %v12993_v45  ;;  %v13075_v45 = vcombine.low %v3909_v24, %v3917_v25  ;;  %v3997_v24 = vld [vmem:[#allocation16 + $0x1668] sm:$0xff] }
 0x791   :  { %11388 = vmatpush1.bf16.msra.mxu0 %v12995_v47  ;;  %11184 = vmatprep.subr.bf16.mxu1 %v13010_v48  ;;  %v13090_v47 = vcombine.high %v3924_v10, %v3932_v33  ;;  %v13092_v48 = vcombine.high %v3925_v41, %v3933_v43  ;;  %v4012_v10 = vld [vmem:[#allocation16 + $0x16e0] sm:$0xff]  ;;  %v4005_v33 = vld [vmem:[#allocation16 + $0x16a8] sm:$0xff] }
 0x792   :  { %11389 = vmatprep.subr.bf16.mxu0 %v13012_v51  ;;  %v3940_v51 = vld [vmem:[#allocation16 + $0x14a0] sm:$0xff] }
 0x793   :  { %v13105_v58 = vcombine.low %v3940_v51, %v3948_v63 }
 0x794   :  { %11185 = vmatpush1.bf16.msra.mxu1 %v13009_v22  ;;  %v13091_v22 = vcombine.low %v3925_v41, %v3933_v43  ;;  %v4013_v41 = vld [vmem:[#allocation16 + $0x16e8] sm:$0xff] }
 0x795   :  { %11390 = vmatpush1.bf16.msra.mxu0 %v13011_v23  ;;  %11186 = vmatprep.subr.bf16.mxu1 %v13026_v34  ;;  %v13106_v23 = vcombine.high %v3940_v51, %v3948_v63  ;;  %v13108_v34 = vcombine.high %v3941_v28, %v3949_v35  ;;  %v4028_v51 = vld [vmem:[#allocation16 + $0x1760] sm:$0xff]  ;;  %v4021_v63 = vld [vmem:[#allocation16 + $0x1728] sm:$0xff] }
 0x796   :  { %11391 = vmatprep.subr.bf16.mxu0 %v13028_v53  ;;  %v3956_v53 = vld [vmem:[#allocation16 + $0x1520] sm:$0xff] }
 0x797   :  { %v13121_v7 = vcombine.low %v3956_v53, %v3964_v54 }
 0x798   :  { %11187 = vmatpush1.bf16.msra.mxu1 %v13025_v62  ;;  %v13107_v62 = vcombine.low %v3941_v28, %v3949_v35  ;;  %v4029_v28 = vld [vmem:[#allocation16 + $0x1768] sm:$0xff] }
 0x799   :  { %11392 = vmatpush1.bf16.msra.mxu0 %v13027_v60  ;;  %11188 = vmatprep.subr.bf16.mxu1 %v13042_v50  ;;  %v13122_v60 = vcombine.high %v3956_v53, %v3964_v54  ;;  %v13124_v50 = vcombine.high %v3957_v49, %v3965_v57  ;;  %v4044_v53 = vld [vmem:[#allocation16 + $0x17e0] sm:$0xff]  ;;  %v4037_v54 = vld [vmem:[#allocation16 + $0x17a8] sm:$0xff] }
 0x79a   :  { %11393 = vmatprep.subr.bf16.mxu0 %v13044_v4  ;;  %v3972_v4 = vld [vmem:[#allocation16 + $0x15a0] sm:$0xff] }
 0x79b   :  { %v13137_v25 = vcombine.low %v3972_v4, %v3980_v3 }
 0x79c   :  { %11189 = vmatpush1.bf16.msra.mxu1 %v13041_v14  ;;  %v13123_v14 = vcombine.low %v3957_v49, %v3965_v57  ;;  %v4045_v49 = vld [vmem:[#allocation16 + $0x17e8] sm:$0xff] }
 0x79d   :  { %11394 = vmatpush1.bf16.msra.mxu0 %v13043_v29  ;;  %11190 = vmatprep.subr.bf16.mxu1 %v13058_v9  ;;  %v13138_v29 = vcombine.high %v3972_v4, %v3980_v3  ;;  %v13140_v9 = vcombine.high %v3973_v5, %v3981_v6  ;;  %v4060_v4 = vld [vmem:[#allocation16 + $0x1860] sm:$0xff]  ;;  %v4053_v3 = vld [vmem:[#allocation16 + $0x1828] sm:$0xff] }
 0x79e   :  { %11395 = vmatprep.subr.bf16.mxu0 %v13060_v17  ;;  %v3988_v17 = vld [vmem:[#allocation16 + $0x1620] sm:$0xff] }
 0x79f   :  { %v13153_v43 = vcombine.low %v3988_v17, %v3996_v39 }
 0x7a0   :  { %11191 = vmatpush1.bf16.msra.mxu1 %v13057_v26  ;;  %v13139_v26 = vcombine.low %v3973_v5, %v3981_v6  ;;  %v4061_v5 = vld [vmem:[#allocation16 + $0x1868] sm:$0xff] }
 0x7a1   :  { %11396 = vmatpush1.bf16.msra.mxu0 %v13059_v27  ;;  %11192 = vmatprep.subr.bf16.mxu1 %v13074_v15  ;;  %v13154_v27 = vcombine.high %v3988_v17, %v3996_v39  ;;  %v13156_v15 = vcombine.high %v3989_v12, %v3997_v24  ;;  %v4076_v17 = vld [vmem:[#allocation16 + $0x18e0] sm:$0xff] }
 0x7a2   :  { %11397 = vmatprep.subr.bf16.mxu0 %v13076_v30  ;;  %v4004_v30 = vld [vmem:[#allocation16 + $0x16a0] sm:$0xff] }
 0x7a3   :  { %v13169_v35 = vcombine.low %v4004_v30, %v4012_v10 }
 0x7a4   :  { %11193 = vmatpush1.bf16.msra.mxu1 %v13073_v44  ;;  %v13155_v44 = vcombine.low %v3989_v12, %v3997_v24  ;;  %v4069_v12 = vld [vmem:[#allocation16 + $0x18a8] sm:$0xff] }
 0x7a5   :  { %11398 = vmatpush1.bf16.msra.mxu0 %v13075_v45  ;;  %11194 = vmatprep.subr.bf16.mxu1 %v13090_v47  ;;  %v13170_v45 = vcombine.high %v4004_v30, %v4012_v10  ;;  %v13172_v47 = vcombine.high %v4005_v33, %v4013_v41  ;;  %v4077_v24 = vld [vmem:[#allocation16 + $0x18e8] sm:$0xff] }
 0x7a6   :  { %11399 = vmatprep.subr.bf16.mxu0 %v13092_v48  ;;  %v4020_v48 = vld [vmem:[#allocation16 + $0x1720] sm:$0xff]  ;;  %v13236_v30 = vcombine.high %v4069_v12, %v4077_v24  ;;  %v4085_v10 = vld [vmem:[#allocation16 + $0x1928] sm:$0xff] }
 0x7a7   :  { %v13185_v57 = vcombine.low %v4020_v48, %v4028_v51 }
 0x7a8   :  { %11195 = vmatpush1.bf16.msra.mxu1 %v13089_v19  ;;  %v13171_v19 = vcombine.low %v4005_v33, %v4013_v41  ;;  %v4093_v33 = vld [vmem:[#allocation16 + $0x1968] sm:$0xff] }
 0x7a9   :  { %11400 = vmatpush1.bf16.msra.mxu0 %v13091_v22  ;;  %11196 = vmatprep.subr.bf16.mxu1 %v13106_v23  ;;  %v13186_v22 = vcombine.high %v4020_v48, %v4028_v51  ;;  %v13188_v23 = vcombine.high %v4021_v63, %v4029_v28  ;;  %v4108_v48 = vld [vmem:[#allocation16 + $0x19e0] sm:$0xff]  ;;  %v4101_v51 = vld [vmem:[#allocation16 + $0x19a8] sm:$0xff] }
 0x7aa   :  { %11401 = vmatprep.subr.bf16.mxu0 %v13108_v34  ;;  %v4036_v34 = vld [vmem:[#allocation16 + $0x17a0] sm:$0xff] }
 0x7ab   :  { %v13201_v6 = vcombine.low %v4036_v34, %v4044_v53 }
 0x7ac   :  { %11197 = vmatpush1.bf16.msra.mxu1 %v13105_v58  ;;  %v13187_v58 = vcombine.low %v4021_v63, %v4029_v28  ;;  %v4109_v63 = vld [vmem:[#allocation16 + $0x19e8] sm:$0xff] }
 0x7ad   :  { %11402 = vmatpush1.bf16.msra.mxu0 %v13107_v62  ;;  %11198 = vmatprep.subr.bf16.mxu1 %v13122_v60  ;;  %v13202_v62 = vcombine.high %v4036_v34, %v4044_v53  ;;  %v13204_v60 = vcombine.high %v4037_v54, %v4045_v49  ;;  %v4124_v34 = vld [vmem:[#allocation16 + $0x1a60] sm:$0xff]  ;;  %v4117_v53 = vld [vmem:[#allocation16 + $0x1a28] sm:$0xff] }
 0x7ae   :  { %11403 = vmatprep.subr.bf16.mxu0 %v13124_v50  ;;  %v4052_v50 = vld [vmem:[#allocation16 + $0x1820] sm:$0xff] }
 0x7af   :  { %v13217_v39 = vcombine.low %v4052_v50, %v4060_v4 }
 0x7b0   :  { %11199 = vmatpush1.bf16.msra.mxu1 %v13121_v7  ;;  %v13203_v7 = vcombine.low %v4037_v54, %v4045_v49  ;;  %v4125_v54 = vld [vmem:[#allocation16 + $0x1a68] sm:$0xff] }
 0x7b1   :  { %11404 = vmatpush1.bf16.msra.mxu0 %v13123_v14  ;;  %11200 = vmatprep.subr.bf16.mxu1 %v13138_v29  ;;  %v13218_v14 = vcombine.high %v4052_v50, %v4060_v4  ;;  %v13220_v29 = vcombine.high %v4053_v3, %v4061_v5  ;;  %v4140_v50 = vld [vmem:[#allocation16 + $0x1ae0] sm:$0xff]  ;;  %v4133_v4 = vld [vmem:[#allocation16 + $0x1aa8] sm:$0xff] }
 0x7b2   :  { %11405 = vmatprep.subr.bf16.mxu0 %v13140_v9  ;;  %v4068_v9 = vld [vmem:[#allocation16 + $0x18a0] sm:$0xff] }
 0x7b3   :  { %v13233_v41 = vcombine.low %v4068_v9, %v4076_v17 }
 0x7b4   :  { %11201 = vmatpush1.bf16.msra.mxu1 %v13137_v25  ;;  %v13219_v25 = vcombine.low %v4053_v3, %v4061_v5  ;;  %v4141_v3 = vld [vmem:[#allocation16 + $0x1ae8] sm:$0xff] }
 0x7b5   :  { %11406 = vmatpush1.bf16.msra.mxu0 %v13139_v26  ;;  %11202 = vmatprep.subr.bf16.mxu1 %v13154_v27  ;;  %v13234_v26 = vcombine.high %v4068_v9, %v4076_v17  ;;  %v4084_v27 = vld [vmem:[#allocation16 + $0x1920] sm:$0xff]  ;;  %v4149_v17 = vld [vmem:[#allocation16 + $0x1b28] sm:$0xff] }
 0x7b6   :  { %11407 = vmatprep.subr.bf16.mxu0 %v13156_v15  ;;  %v4092_v15 = vld [vmem:[#allocation16 + $0x1960] sm:$0xff] }
 0x7b7   :  { %v13249_v28 = vcombine.low %v4084_v27, %v4092_v15  ;;  %v4156_v9 = vld [vmem:[#allocation16 + $0x1b60] sm:$0xff] }
 0x7b8   :  { %11203 = vmatpush1.bf16.msra.mxu1 %v13153_v43  ;;  %v13235_v43 = vcombine.low %v4069_v12, %v4077_v24  ;;  %v13299_v24 = vcombine.low %v4133_v4, %v4141_v3 }
 0x7b9   :  { %11408 = vmatpush1.bf16.msra.mxu0 %v13155_v44  ;;  %11204 = vmatprep.subr.bf16.mxu1 %v13170_v45  ;;  %v13250_v44 = vcombine.high %v4084_v27, %v4092_v15  ;;  %v13252_v45 = vcombine.high %v4085_v10, %v4093_v33  ;;  %v4164_v15 = vld [vmem:[#allocation16 + $0x1ba0] sm:$0xff] }
 0x7ba   :  { %11409 = vmatprep.subr.bf16.mxu0 %v13172_v47  ;;  %v4100_v47 = vld [vmem:[#allocation16 + $0x19a0] sm:$0xff] }
 0x7bb   :  { %v13265_v49 = vcombine.low %v4100_v47, %v4108_v48 }
 0x7bc   :  { %11205 = vmatpush1.bf16.msra.mxu1 %v13169_v35  ;;  %v13251_v35 = vcombine.low %v4085_v10, %v4093_v33 }
 0x7bd   :  { %11410 = vmatpush1.bf16.msra.mxu0 %v13171_v19  ;;  %11206 = vmatprep.subr.bf16.mxu1 %v13186_v22  ;;  %v13266_v19 = vcombine.high %v4100_v47, %v4108_v48  ;;  %v13268_v22 = vcombine.high %v4101_v51, %v4109_v63 }
 0x7be   :  { %11411 = vmatprep.subr.bf16.mxu0 %v13188_v23  ;;  %v4116_v23 = vld [vmem:[#allocation16 + $0x1a20] sm:$0xff] }
 0x7bf   :  { %v13281_v5 = vcombine.low %v4116_v23, %v4124_v34 }
 0x7c0   :  { %11207 = vmatpush1.bf16.msra.mxu1 %v13185_v57  ;;  %v13267_v57 = vcombine.low %v4101_v51, %v4109_v63 }
 0x7c1   :  { %11412 = vmatpush1.bf16.msra.mxu0 %v13187_v58  ;;  %11208 = vmatprep.subr.bf16.mxu1 %v13202_v62  ;;  %v13282_v58 = vcombine.high %v4116_v23, %v4124_v34  ;;  %v13284_v62 = vcombine.high %v4117_v53, %v4125_v54  ;;  %v4188_v23 = vld [vmem:[#allocation16 + $0x1c60] sm:$0xff]  ;;  %v4181_v34 = vld [vmem:[#allocation16 + $0x1c28] sm:$0xff] }
 0x7c2   :  { %11413 = vmatprep.subr.bf16.mxu0 %v13204_v60  ;;  %v4132_v60 = vld [vmem:[#allocation16 + $0x1aa0] sm:$0xff] }
 0x7c3   :  { %v13297_v12 = vcombine.low %v4132_v60, %v4140_v50 }
 0x7c4   :  { %11209 = vmatpush1.bf16.msra.mxu1 %v13201_v6  ;;  %v13283_v6 = vcombine.low %v4117_v53, %v4125_v54  ;;  %v4189_v53 = vld [vmem:[#allocation16 + $0x1c68] sm:$0xff] }
 0x7c5   :  { %11414 = vmatpush1.bf16.msra.mxu0 %v13203_v7  ;;  %11219 = vmatprep.subr.bf16.mxu1 %v13218_v14  ;;  %v13298_v7 = vcombine.high %v4132_v60, %v4140_v50  ;;  %v13300_v14 = vcombine.high %v4133_v4, %v4141_v3  ;;  %v4204_v60 = vld [vmem:[#allocation16 + $0x1ce0] sm:$0xff]  ;;  %v4197_v50 = vld [vmem:[#allocation16 + $0x1ca8] sm:$0xff] }
 0x7c6   :  { %11424 = vmatprep.subr.bf16.mxu0 %v13220_v29  ;;  %v4148_v29 = vld [vmem:[#allocation16 + $0x1b20] sm:$0xff]  ;;  %v4205_v4 = vld [vmem:[#allocation16 + $0x1ce8] sm:$0xff] }
 0x7c7   :  { %11211 = vmatmul.mubr.bf16.vlgmr.msra.gmra.mrb[28].mxu1 %v15132_v31  ;;  %v13313_v47 = vcombine.low %v4148_v29, %v4156_v9 }
 0x7c8   :  { %11416 = vmatmul.mubr.bf16.vlgmr.msra.gmra.mrb[28].mxu0 %v15132_v31  ;;  %11220 = vmatpush1.bf16.msra.mxu1 %v13217_v39  ;;  %v4157_v39 = vld [vmem:[#allocation16 + $0x1b68] sm:$0xff] }
 0x7c9   :  { %11251 = vmatprep.mubr.bf16.mxu1 %v15139_v11  ;;  %11425 = vmatpush1.bf16.msra.mxu0 %v13219_v25  ;;  %v13314_v25 = vcombine.high %v4148_v29, %v4156_v9  ;;  %v13316_v27 = vcombine.high %v4149_v17, %v4157_v39  ;;  %v13315_v63 = vcombine.low %v4149_v17, %v4157_v39  ;;  %v4220_v29 = vld [vmem:[#allocation16 + $0x1d60] sm:$0xff]  ;;  %v4213_v9 = vld [vmem:[#allocation16 + $0x1d28] sm:$0xff] }
 0x7ca   :  { %11456 = vmatprep.mubr.bf16.mxu0 %v15139_v11  ;;  %11221 = vmatprep.subr.bf16.mxu1 %v13234_v26  ;;  %v4221_v17 = vld [vmem:[#allocation16 + $0x1d68] sm:$0xff] }
 0x7cb   :  { %11426 = vmatprep.subr.bf16.mxu0 %v13236_v30  ;;  %v4172_v30 = vld [vmem:[#allocation16 + $0x1be0] sm:$0xff] }
 0x7cc   :  { %11222 = vmatpush1.bf16.msra.mxu1 %v13233_v41  ;;  %v4165_v41 = vld [vmem:[#allocation16 + $0x1ba8] sm:$0xff]  ;;  %v13329_v54 = vcombine.low %v4164_v15, %v4172_v30 }
 0x7cd   :  { %11427 = vmatpush1.bf16.msra.mxu0 %v13235_v43  ;;  %11223 = vmatprep.subr.bf16.mxu1 %v13250_v44  ;;  %v4173_v43 = vld [vmem:[#allocation16 + $0x1be8] sm:$0xff] }
 0x7ce   :  { %11428 = vmatprep.subr.bf16.mxu0 %v13252_v45 }
 0x7d0   :  { %11224 = vmatpush1.bf16.msra.mxu1 %v13249_v28  ;;  %v13330_v28 = vcombine.high %v4164_v15, %v4172_v30  ;;  %v4236_v15 = vld [vmem:[#allocation16 + $0x1de0] sm:$0xff]  ;;  %v4229_v30 = vld [vmem:[#allocation16 + $0x1da8] sm:$0xff] }
 0x7d1   :  { %11429 = vmatpush1.bf16.msra.mxu0 %v13251_v35  ;;  %11225 = vmatprep.subr.bf16.mxu1 %v13266_v19  ;;  %v13332_v19 = vcombine.high %v4165_v41, %v4173_v43 }
 0x7d2   :  { %11430 = vmatprep.subr.bf16.mxu0 %v13268_v22  ;;  %v4180_v22 = vld [vmem:[#allocation16 + $0x1c20] sm:$0xff] }
 0x7d3   :  { %v13345_v3 = vcombine.low %v4180_v22, %v4188_v23 }
 0x7d4   :  { %11226 = vmatpush1.bf16.msra.mxu1 %v13265_v49  ;;  %v13331_v49 = vcombine.low %v4165_v41, %v4173_v43  ;;  %v4237_v41 = vld [vmem:[#allocation16 + $0x1de8] sm:$0xff] }
 0x7d5   :  { %11431 = vmatpush1.bf16.msra.mxu0 %v13267_v57  ;;  %11227 = vmatprep.subr.bf16.mxu1 %v13282_v58  ;;  %v13346_v57 = vcombine.high %v4180_v22, %v4188_v23  ;;  %v13348_v58 = vcombine.high %v4181_v34, %v4189_v53  ;;  %v13395_v22 = vcombine.low %v4229_v30, %v4237_v41 }
 0x7d6   :  { %11432 = vmatprep.subr.bf16.mxu0 %v13284_v62  ;;  %v4196_v62 = vld [vmem:[#allocation16 + $0x1ca0] sm:$0xff] }
 0x7d7   :  { %v13361_v39 = vcombine.low %v4196_v62, %v4204_v60 }
 0x7d8   :  { %11228 = vmatpush1.bf16.msra.mxu1 %v13281_v5  ;;  %v13347_v5 = vcombine.low %v4181_v34, %v4189_v53  ;;  %v4260_v53 = vld [vmem:[#allocation16 + $0x1ea0] sm:$0xff] }
 0x7d9   :  { %11433 = vmatpush1.bf16.msra.mxu0 %v13283_v6  ;;  %11229 = vmatprep.subr.bf16.mxu1 %v13298_v7  ;;  %v13362_v6 = vcombine.high %v4196_v62, %v4204_v60  ;;  %v13364_v7 = vcombine.high %v4197_v50, %v4205_v4 }
 0x7da   :  { %v15213_v26 = vpop.f32.mrb[24].mxu1  ;;  %11434 = vmatprep.subr.bf16.mxu0 %v13300_v14  ;;  %v4212_v14 = vld [vmem:[#allocation16 + $0x1d20] sm:$0xff] }
 0x7db   :  { %v15215_v10 = vpop.f32.mrb[24].mxu0  ;;  %v15217_v33 = vpop.f32.mrb[25].mxu1  ;;  %v13377_v43 = vcombine.low %v4212_v14, %v4220_v29 }
 0x7dc   :  { %v15219_v44 = vpop.f32.mrb[25].mxu0  ;;  %v10888_v45 = vpop.f32.mrb[26].mxu1  ;;  %11230 = vmatpush1.bf16.msra.mxu1 %v13297_v12  ;;  %v13363_v12 = vcombine.low %v4197_v50, %v4205_v4  ;;  %v4276_v4 = vld [vmem:[#allocation16 + $0x1f20] sm:$0xff] }
 0x7dd   :  { %v11093_v48 = vpop.f32.mrb[26].mxu0  ;;  %11435 = vmatpush1.bf16.msra.mxu0 %v13299_v24  ;;  %v10889_v51 = vpop.f32.mrb[27].mxu1  ;;  %11231 = vmatprep.subr.bf16.mxu1 %v13314_v25  ;;  %v13378_v24 = vcombine.high %v4212_v14, %v4220_v29  ;;  %v13380_v25 = vcombine.high %v4213_v9, %v4221_v17  ;;  %v13379_v45 = vcombine.low %v4213_v9, %v4221_v17  ;;  %v4292_v17 = vld [vmem:[#allocation16 + $0x1fa0] sm:$0xff] }
 0x7de   :  { %v11094_v35 = vpop.f32.mrb[27].mxu0  ;;  %11436 = vmatprep.subr.bf16.mxu0 %v13316_v27  ;;  %v4228_v27 = vld [vmem:[#allocation16 + $0x1da0] sm:$0xff]  ;;  %v13396_v48 = vcombine.high %v4229_v30, %v4237_v41 }
 0x7df   :  { %v4244_v51 = vld [vmem:[#allocation16 + $0x1e20] sm:$0xff]  ;;  %v4253_v35 = vld [vmem:[#allocation16 + $0x1e68] sm:$0xff] }
 0x7e0   :  { %11232 = vmatpush1.bf16.msra.mxu1 %v13313_v47  ;;  %v13394_v47 = vcombine.high %v4228_v27, %v4236_v15  ;;  %v4308_v41 = vld [vmem:[#allocation16 + $0x2020] sm:$0xff] }
 0x7e1   :  { %11437 = vmatpush1.bf16.msra.mxu0 %v13315_v63  ;;  %11233 = vmatprep.subr.bf16.mxu1 %v13330_v28  ;;  %v4252_v63 = vld [vmem:[#allocation16 + $0x1e60] sm:$0xff]  ;;  %v4245_v28 = vld [vmem:[#allocation16 + $0x1e28] sm:$0xff] }
 0x7e2   :  { %11438 = vmatprep.subr.bf16.mxu0 %v13332_v19  ;;  %v13393_v19 = vcombine.low %v4228_v27, %v4236_v15  ;;  %v13410_v23 = vcombine.high %v4244_v51, %v4252_v63  ;;  %v13412_v34 = vcombine.high %v4245_v28, %v4253_v35  ;;  %v13411_v62 = vcombine.low %v4245_v28, %v4253_v35  ;;  %v4324_v35 = vld [vmem:[#allocation16 + $0x20a0] sm:$0xff] }
 0x7e4   :  { %11234 = vmatpush1.bf16.msra.mxu1 %v13329_v54  ;;  %v4268_v54 = vld [vmem:[#allocation16 + $0x1ee0] sm:$0xff] }
 0x7e5   :  { %11439 = vmatpush1.bf16.msra.mxu0 %v13331_v49  ;;  %11235 = vmatprep.subr.bf16.mxu1 %v13346_v57  ;;  %v4261_v49 = vld [vmem:[#allocation16 + $0x1ea8] sm:$0xff]  ;;  %v13426_v60 = vcombine.high %v4260_v53, %v4268_v54 }
 0x7e6   :  { %11440 = vmatprep.subr.bf16.mxu0 %v13348_v58  ;;  %v4269_v57 = vld [vmem:[#allocation16 + $0x1ee8] sm:$0xff]  ;;  %v13409_v58 = vcombine.low %v4244_v51, %v4252_v63 }
 0x7e7   :  { %v13428_v50 = vcombine.high %v4261_v49, %v4269_v57  ;;  %v13427_v14 = vcombine.low %v4261_v49, %v4269_v57  ;;  %v4340_v57 = vld [vmem:[#allocation16 + $0x2120] sm:$0xff] }
 0x7e8   :  { %11236 = vmatpush1.bf16.msra.mxu1 %v13345_v3  ;;  %v4284_v3 = vld [vmem:[#allocation16 + $0x1f60] sm:$0xff] }
 0x7e9   :  { %11441 = vmatpush1.bf16.msra.mxu0 %v13347_v5  ;;  %11237 = vmatprep.subr.bf16.mxu1 %v13362_v6  ;;  %v4277_v5 = vld [vmem:[#allocation16 + $0x1f28] sm:$0xff]  ;;  %v13442_v29 = vcombine.high %v4276_v4, %v4284_v3 }
 0x7ea   :  { %11442 = vmatprep.subr.bf16.mxu0 %v13364_v7  ;;  %v4285_v6 = vld [vmem:[#allocation16 + $0x1f68] sm:$0xff]  ;;  %v13425_v7 = vcombine.low %v4260_v53, %v4268_v54 }
 0x7eb   :  { %v13444_v9 = vcombine.high %v4277_v5, %v4285_v6  ;;  %v13443_v27 = vcombine.low %v4277_v5, %v4285_v6  ;;  %v4356_v6 = vld [vmem:[#allocation16 + $0x21a0] sm:$0xff] }
 0x7ec   :  { %11238 = vmatpush1.bf16.msra.mxu1 %v13361_v39  ;;  %v4300_v39 = vld [vmem:[#allocation16 + $0x1fe0] sm:$0xff] }
 0x7ed   :  { %11443 = vmatpush1.bf16.msra.mxu0 %v13363_v12  ;;  %11239 = vmatprep.subr.bf16.mxu1 %v13378_v24  ;;  %v4293_v12 = vld [vmem:[#allocation16 + $0x1fa8] sm:$0xff]  ;;  %v13458_v15 = vcombine.high %v4292_v17, %v4300_v39 }
 0x7ee   :  { %11444 = vmatprep.subr.bf16.mxu0 %v13380_v25  ;;  %v4301_v24 = vld [vmem:[#allocation16 + $0x1fe8] sm:$0xff]  ;;  %v13441_v25 = vcombine.low %v4276_v4, %v4284_v3 }
 0x7ef   :  { %v13460_v30 = vcombine.high %v4293_v12, %v4301_v24  ;;  %v13459_v51 = vcombine.low %v4293_v12, %v4301_v24  ;;  %v4372_v24 = vld [vmem:[#allocation16 + $0x2220] sm:$0xff] }
 0x7f0   :  { %11240 = vmatpush1.bf16.msra.mxu1 %v13377_v43  ;;  %v4316_v43 = vld [vmem:[#allocation16 + $0x2060] sm:$0xff] }
 0x7f1   :  { %11445 = vmatpush1.bf16.msra.mxu0 %v13379_v45  ;;  %11241 = vmatprep.subr.bf16.mxu1 %v13394_v47  ;;  %v4309_v45 = vld [vmem:[#allocation16 + $0x2028] sm:$0xff]  ;;  %v13474_v63 = vcombine.high %v4308_v41, %v4316_v43 }
 0x7f2   :  { %11446 = vmatprep.subr.bf16.mxu0 %v13396_v48  ;;  %v4317_v47 = vld [vmem:[#allocation16 + $0x2068] sm:$0xff]  ;;  %v13457_v48 = vcombine.low %v4292_v17, %v4300_v39 }
 0x7f3   :  { %v13476_v28 = vcombine.high %v4309_v45, %v4317_v47  ;;  %v13475_v53 = vcombine.low %v4309_v45, %v4317_v47  ;;  %v4388_v47 = vld [vmem:[#allocation16 + $0x22a0] sm:$0xff] }
 0x7f4   :  { %11242 = vmatpush1.bf16.msra.mxu1 %v13393_v19  ;;  %v4332_v19 = vld [vmem:[#allocation16 + $0x20e0] sm:$0xff] }
 0x7f5   :  { %11447 = vmatpush1.bf16.msra.mxu0 %v13395_v22  ;;  %11243 = vmatprep.subr.bf16.mxu1 %v13410_v23  ;;  %v4325_v22 = vld [vmem:[#allocation16 + $0x20a8] sm:$0xff]  ;;  %v13490_v54 = vcombine.high %v4324_v35, %v4332_v19 }
 0x7f6   :  { %11448 = vmatprep.subr.bf16.mxu0 %v13412_v34  ;;  %v4333_v23 = vld [vmem:[#allocation16 + $0x20e8] sm:$0xff]  ;;  %v13473_v34 = vcombine.low %v4308_v41, %v4316_v43 }
 0x7f7   :  { %v13492_v49 = vcombine.high %v4325_v22, %v4333_v23  ;;  %v13491_v4 = vcombine.low %v4325_v22, %v4333_v23  ;;  %v4404_v23 = vld [vmem:[#allocation16 + $0x2320] sm:$0xff] }
 0x7f8   :  { %11244 = vmatpush1.bf16.msra.mxu1 %v13409_v58  ;;  %v4348_v58 = vld [vmem:[#allocation16 + $0x2160] sm:$0xff] }
 0x7f9   :  { %11449 = vmatpush1.bf16.msra.mxu0 %v13411_v62  ;;  %11245 = vmatprep.subr.bf16.mxu1 %v13426_v60  ;;  %v4341_v62 = vld [vmem:[#allocation16 + $0x2128] sm:$0xff]  ;;  %v13506_v3 = vcombine.high %v4340_v57, %v4348_v58 }
 0x7fa   :  { %11450 = vmatprep.subr.bf16.mxu0 %v13428_v50  ;;  %v4349_v60 = vld [vmem:[#allocation16 + $0x2168] sm:$0xff]  ;;  %v13489_v50 = vcombine.low %v4324_v35, %v4332_v19 }
 0x7fb   :  { %v13508_v5 = vcombine.high %v4341_v62, %v4349_v60  ;;  %v13507_v17 = vcombine.low %v4341_v62, %v4349_v60  ;;  %v4420_v60 = vld [vmem:[#allocation16 + $0x23a0] sm:$0xff] }
 0x7fc   :  { %11246 = vmatpush1.bf16.msra.mxu1 %v13425_v7  ;;  %v4364_v7 = vld [vmem:[#allocation16 + $0x21e0] sm:$0xff] }
 0x7fd   :  { %11451 = vmatpush1.bf16.msra.mxu0 %v13427_v14  ;;  %11247 = vmatprep.subr.bf16.mxu1 %v13442_v29  ;;  %v4357_v14 = vld [vmem:[#allocation16 + $0x21a8] sm:$0xff]  ;;  %v13522_v39 = vcombine.high %v4356_v6, %v4364_v7 }
 0x7fe   :  { %11452 = vmatprep.subr.bf16.mxu0 %v13444_v9  ;;  %v4365_v29 = vld [vmem:[#allocation16 + $0x21e8] sm:$0xff]  ;;  %v13505_v9 = vcombine.low %v4340_v57, %v4348_v58 }
 0x7ff   :  { %v13524_v12 = vcombine.high %v4357_v14, %v4365_v29  ;;  %v13523_v41 = vcombine.low %v4357_v14, %v4365_v29  ;;  %v3286_v29 = vld [vmem:[#allocation16 + $0x30] sm:$0xff] }
 0x800   :  { %11248 = vmatpush1.bf16.msra.mxu1 %v13441_v25  ;;  %v4380_v25 = vld [vmem:[#allocation16 + $0x2260] sm:$0xff] }
 0x801   :  { %11453 = vmatpush1.bf16.msra.mxu0 %v13443_v27  ;;  %11249 = vmatprep.subr.bf16.mxu1 %v13458_v15  ;;  %v4373_v27 = vld [vmem:[#allocation16 + $0x2228] sm:$0xff]  ;;  %v13538_v43 = vcombine.high %v4372_v24, %v4380_v25 }
 0x802   :  { %11454 = vmatprep.subr.bf16.mxu0 %v13460_v30  ;;  %v4381_v15 = vld [vmem:[#allocation16 + $0x2268] sm:$0xff]  ;;  %v13521_v30 = vcombine.low %v4356_v6, %v4364_v7 }
 0x803   :  { %v13540_v45 = vcombine.high %v4373_v27, %v4381_v15  ;;  %v13539_v35 = vcombine.low %v4373_v27, %v4381_v15  ;;  %v3302_v15 = vld [vmem:[#allocation16 + $0xb0] sm:$0xff] }
 0x804   :  { %11250 = vmatpush1.bf16.msra.mxu1 %v13457_v48  ;;  %v4396_v48 = vld [vmem:[#allocation16 + $0x22e0] sm:$0xff] }
 0x805   :  { %11455 = vmatpush1.bf16.msra.mxu0 %v13459_v51  ;;  %11260 = vmatprep.subr.bf16.mxu1 %v13474_v63  ;;  %v4389_v51 = vld [vmem:[#allocation16 + $0x22a8] sm:$0xff]  ;;  %v13554_v19 = vcombine.high %v4388_v47, %v4396_v48 }
 0x806   :  { %11465 = vmatprep.subr.bf16.mxu0 %v13476_v28  ;;  %v4397_v63 = vld [vmem:[#allocation16 + $0x22e8] sm:$0xff]  ;;  %v13537_v28 = vcombine.low %v4372_v24, %v4380_v25 }
 0x807   :  { %11252 = vmatmul.mubr.bf16.vlgmr.msra.gmra.mrb[28].mxu1 %v15156_v0  ;;  %v13556_v22 = vcombine.high %v4389_v51, %v4397_v63  ;;  %v13555_v57 = vcombine.low %v4389_v51, %v4397_v63  ;;  %v3318_v51 = vld [vmem:[#allocation16 + $0x130] sm:$0xff] }
 0x808   :  { %11457 = vmatmul.mubr.bf16.vlgmr.msra.gmra.mrb[28].mxu0 %v15156_v0  ;;  %11261 = vmatpush1.bf16.msra.mxu1 %v13473_v34  ;;  %v4412_v34 = vld [vmem:[#allocation16 + $0x2360] sm:$0xff]  ;;  %v3326_v63 = vld [vmem:[#allocation16 + $0x170] sm:$0xff] }
 0x809   :  { %11466 = vmatpush1.bf16.msra.mxu0 %v13475_v53  ;;  %11262 = vmatprep.subr.bf16.mxu1 %v13490_v54  ;;  %v4405_v53 = vld [vmem:[#allocation16 + $0x2328] sm:$0xff]  ;;  %v13570_v58 = vcombine.high %v4404_v23, %v4412_v34 }
 0x80a   :  { %11467 = vmatprep.subr.bf16.mxu0 %v13492_v49  ;;  %11292 = vmatprep.mubr.bf16.mxu1 %v14765_v18  ;;  %v4413_v54 = vld [vmem:[#allocation16 + $0x2368] sm:$0xff]  ;;  %v13553_v49 = vcombine.low %v4388_v47, %v4396_v48 }
 0x80b   :  { %11497 = vmatprep.mubr.bf16.mxu0 %v14765_v18  ;;  %v13572_v62 = vcombine.high %v4405_v53, %v4413_v54  ;;  %v13571_v6 = vcombine.low %v4405_v53, %v4413_v54  ;;  %v3334_v54 = vld [vmem:[#allocation16 + $0x1b0] sm:$0xff] }
 0x80c   :  { %11263 = vmatpush1.bf16.msra.mxu1 %v13489_v50  ;;  %v4428_v50 = vld [vmem:[#allocation16 + $0x23e0] sm:$0xff] }
 0x80d   :  { %11468 = vmatpush1.bf16.msra.mxu0 %v13491_v4  ;;  %11264 = vmatprep.subr.bf16.mxu1 %v13506_v3  ;;  %v4421_v4 = vld [vmem:[#allocation16 + $0x23a8] sm:$0xff]  ;;  %v13586_v7 = vcombine.high %v4420_v60, %v4428_v50 }
 0x80e   :  { %11469 = vmatprep.subr.bf16.mxu0 %v13508_v5  ;;  %v4429_v3 = vld [vmem:[#allocation16 + $0x23e8] sm:$0xff]  ;;  %v13569_v5 = vcombine.low %v4404_v23, %v4412_v34  ;;  %v12486_v34 = vcombine.high %v3318_v51, %v3326_v63 }
 0x80f   :  { %v13588_v14 = vcombine.high %v4421_v4, %v4429_v3  ;;  %v13587_v24 = vcombine.low %v4421_v4, %v4429_v3  ;;  %v3350_v3 = vld [vmem:[#allocation16 + $0x230] sm:$0xff] }
 0x810   :  { %11265 = vmatpush1.bf16.msra.mxu1 %v13505_v9  ;;  %v3294_v9 = vld [vmem:[#allocation16 + $0x70] sm:$0xff] }
 0x811   :  { %11470 = vmatpush1.bf16.msra.mxu0 %v13507_v17  ;;  %11266 = vmatprep.subr.bf16.mxu1 %v13522_v39  ;;  %v3287_v17 = vld [vmem:[#allocation16 + $0x38] sm:$0xff]  ;;  %v12454_v25 = vcombine.high %v3286_v29, %v3294_v9 }
 0x812   :  { %11471 = vmatprep.subr.bf16.mxu0 %v13524_v12  ;;  %v3295_v39 = vld [vmem:[#allocation16 + $0x78] sm:$0xff]  ;;  %v13585_v12 = vcombine.low %v4420_v60, %v4428_v50 }
 0x813   :  { %v12456_v27 = vcombine.high %v3287_v17, %v3295_v39  ;;  %v12455_v47 = vcombine.low %v3287_v17, %v3295_v39  ;;  %v3366_v17 = vld [vmem:[#allocation16 + $0x2b0] sm:$0xff] }
 0x814   :  { %11267 = vmatpush1.bf16.msra.mxu1 %v13521_v30  ;;  %v3310_v30 = vld [vmem:[#allocation16 + $0xf0] sm:$0xff] }
 0x815   :  { %11472 = vmatpush1.bf16.msra.mxu0 %v13523_v41  ;;  %11268 = vmatprep.subr.bf16.mxu1 %v13538_v43  ;;  %v12453_v41 = vcombine.low %v3286_v29, %v3294_v9  ;;  %v3303_v43 = vld [vmem:[#allocation16 + $0xb8] sm:$0xff]  ;;  %v12470_v48 = vcombine.high %v3302_v15, %v3310_v30  ;;  %v3374_v39 = vld [vmem:[#allocation16 + $0x2f0] sm:$0xff] }
 0x816   :  { %11473 = vmatprep.subr.bf16.mxu0 %v13540_v45  ;;  %v3311_v45 = vld [vmem:[#allocation16 + $0xf8] sm:$0xff] }
 0x817   :  { %v12471_v23 = vcombine.low %v3303_v43, %v3311_v45 }
 0x818   :  { %11269 = vmatpush1.bf16.msra.mxu1 %v13537_v28  ;;  %v12472_v28 = vcombine.high %v3303_v43, %v3311_v45  ;;  %v3390_v43 = vld [vmem:[#allocation16 + $0x370] sm:$0xff]  ;;  %v3383_v45 = vld [vmem:[#allocation16 + $0x338] sm:$0xff] }
 0x819   :  { %11474 = vmatpush1.bf16.msra.mxu0 %v13539_v35  ;;  %11270 = vmatprep.subr.bf16.mxu1 %v13554_v19  ;;  %v3319_v35 = vld [vmem:[#allocation16 + $0x138] sm:$0xff] }
 0x81a   :  { %11475 = vmatprep.subr.bf16.mxu0 %v13556_v22  ;;  %v3327_v19 = vld [vmem:[#allocation16 + $0x178] sm:$0xff]  ;;  %v12469_v22 = vcombine.low %v3302_v15, %v3310_v30  ;;  %v12534_v15 = vcombine.high %v3366_v17, %v3374_v39 }
 0x81b   :  { %v12488_v53 = vcombine.high %v3319_v35, %v3327_v19  ;;  %v12487_v60 = vcombine.low %v3319_v35, %v3327_v19  ;;  %v3398_v35 = vld [vmem:[#allocation16 + $0x3b0] sm:$0xff] }
 0x81c   :  { %11271 = vmatpush1.bf16.msra.mxu1 %v13553_v49  ;;  %v3342_v49 = vld [vmem:[#allocation16 + $0x1f0] sm:$0xff] }
 0x81d   :  { %11476 = vmatpush1.bf16.msra.mxu0 %v13555_v57  ;;  %11272 = vmatprep.subr.bf16.mxu1 %v13570_v58  ;;  %v3335_v57 = vld [vmem:[#allocation16 + $0x1b8] sm:$0xff]  ;;  %v12502_v50 = vcombine.high %v3334_v54, %v3342_v49  ;;  %v3406_v19 = vld [vmem:[#allocation16 + $0x3f0] sm:$0xff] }
 0x81e   :  { %11477 = vmatprep.subr.bf16.mxu0 %v13572_v62  ;;  %v3343_v58 = vld [vmem:[#allocation16 + $0x1f8] sm:$0xff]  ;;  %v12485_v62 = vcombine.low %v3318_v51, %v3326_v63 }
 0x81f   :  { %v12504_v4 = vcombine.high %v3335_v57, %v3343_v58 }
 0x820   :  { %11273 = vmatpush1.bf16.msra.mxu1 %v13569_v5  ;;  %v3358_v5 = vld [vmem:[#allocation16 + $0x270] sm:$0xff] }
 0x821   :  { %11478 = vmatpush1.bf16.msra.mxu0 %v13571_v6  ;;  %11274 = vmatprep.subr.bf16.mxu1 %v13586_v7  ;;  %v3351_v6 = vld [vmem:[#allocation16 + $0x238] sm:$0xff]  ;;  %v12518_v29 = vcombine.high %v3350_v3, %v3358_v5 }
 0x822   :  { %11479 = vmatprep.subr.bf16.mxu0 %v13588_v14  ;;  %v3359_v7 = vld [vmem:[#allocation16 + $0x278] sm:$0xff]  ;;  %v12503_v14 = vcombine.low %v3335_v57, %v3343_v58  ;;  %v3414_v57 = vld [vmem:[#allocation16 + $0x430] sm:$0xff] }
 0x823   :  { %v12520_v9 = vcombine.high %v3351_v6, %v3359_v7  ;;  %v3422_v58 = vld [vmem:[#allocation16 + $0x470] sm:$0xff] }
 0x824   :  { %11275 = vmatpush1.bf16.msra.mxu1 %v13585_v12  ;;  %v3367_v12 = vld [vmem:[#allocation16 + $0x2b8] sm:$0xff] }
 0x825   :  { %11480 = vmatpush1.bf16.msra.mxu0 %v13587_v24  ;;  %11506 = vmatprep.subr.bf16.mxu1 %v12454_v25  ;;  %v3375_v24 = vld [vmem:[#allocation16 + $0x2f8] sm:$0xff]  ;;  %v12517_v25 = vcombine.low %v3350_v3, %v3358_v5  ;;  %v12582_v3 = vcombine.high %v3414_v57, %v3422_v58 }
 0x826   :  { %11711 = vmatprep.subr.bf16.mxu0 %v12456_v27  ;;  %v12519_v27 = vcombine.low %v3351_v6, %v3359_v7  ;;  %v12536_v30 = vcombine.high %v3367_v12, %v3375_v24  ;;  %v12535_v51 = vcombine.low %v3367_v12, %v3375_v24  ;;  %v3430_v6 = vld [vmem:[#allocation16 + $0x4b0] sm:$0xff] }
 0x827   :  { %11293 = vmatmul.mubr.bf16.vlgmr.msra.gmra.mrb[28].mxu1 %v15167_v52  ;;  %v3438_v7 = vld [vmem:[#allocation16 + $0x4f0] sm:$0xff] }
 0x828   :  { %11498 = vmatmul.mubr.bf16.vlgmr.msra.gmra.mrb[28].mxu0 %v15167_v52  ;;  %11507 = vmatpush1.bf16.msra.mxu1 %v12453_v41  ;;  %v3382_v41 = vld [vmem:[#allocation16 + $0x330] sm:$0xff] }
 0x829   :  { %11538 = vmatprep.mubr.bf16.mxu1 %v15065_v32  ;;  %11712 = vmatpush1.bf16.msra.mxu0 %v12455_v47  ;;  %v3391_v47 = vld [vmem:[#allocation16 + $0x378] sm:$0xff]  ;;  %v12550_v63 = vcombine.high %v3382_v41, %v3390_v43  ;;  %v3446_v12 = vld [vmem:[#allocation16 + $0x530] sm:$0xff] }
 0x82a   :  { %11743 = vmatprep.mubr.bf16.mxu0 %v15065_v32  ;;  %11508 = vmatprep.subr.bf16.mxu1 %v12470_v48  ;;  %v12501_v32 = vcombine.low %v3334_v54, %v3342_v49  ;;  %v12533_v48 = vcombine.low %v3366_v17, %v3374_v39  ;;  %v12566_v54 = vcombine.high %v3398_v35, %v3406_v19  ;;  %v3454_v24 = vld [vmem:[#allocation16 + $0x570] sm:$0xff] }
 0x82b   :  { %11713 = vmatprep.subr.bf16.mxu0 %v12472_v28  ;;  %v12552_v28 = vcombine.high %v3383_v45, %v3391_v47  ;;  %v12598_v17 = vcombine.high %v3430_v6, %v3438_v7 }
 0x82c   :  { %11509 = vmatpush1.bf16.msra.mxu1 %v12469_v22  ;;  %v3399_v22 = vld [vmem:[#allocation16 + $0x3b8] sm:$0xff] }
 0x82d   :  { %11714 = vmatpush1.bf16.msra.mxu0 %v12471_v23  ;;  %11510 = vmatprep.subr.bf16.mxu1 %v12486_v34  ;;  %v3407_v23 = vld [vmem:[#allocation16 + $0x3f8] sm:$0xff]  ;;  %v12549_v34 = vcombine.low %v3382_v41, %v3390_v43  ;;  %v12614_v41 = vcombine.high %v3446_v12, %v3454_v24 }
 0x82e   :  { %11715 = vmatprep.subr.bf16.mxu0 %v12488_v53  ;;  %v12551_v53 = vcombine.low %v3383_v45, %v3391_v47  ;;  %v12568_v49 = vcombine.high %v3399_v22, %v3407_v23  ;;  %v3462_v45 = vld [vmem:[#allocation16 + $0x5b0] sm:$0xff] }
 0x82f   :  { %v3470_v47 = vld [vmem:[#allocation16 + $0x5f0] sm:$0xff] }
 0x830   :  { %11511 = vmatpush1.bf16.msra.mxu1 %v12485_v62  ;;  %v3415_v62 = vld [vmem:[#allocation16 + $0x438] sm:$0xff] }
 0x831   :  { %11716 = vmatpush1.bf16.msra.mxu0 %v12487_v60  ;;  %11512 = vmatprep.subr.bf16.mxu1 %v12502_v50  ;;  %v3423_v60 = vld [vmem:[#allocation16 + $0x478] sm:$0xff]  ;;  %v12565_v50 = vcombine.low %v3398_v35, %v3406_v19  ;;  %v12630_v35 = vcombine.high %v3462_v45, %v3470_v47 }
 0x832   :  { %11717 = vmatprep.subr.bf16.mxu0 %v12504_v4  ;;  %v12567_v4 = vcombine.low %v3399_v22, %v3407_v23  ;;  %v12584_v5 = vcombine.high %v3415_v62, %v3423_v60  ;;  %v3478_v22 = vld [vmem:[#allocation16 + $0x630] sm:$0xff] }
 0x833   :  { %v3486_v23 = vld [vmem:[#allocation16 + $0x670] sm:$0xff] }
 0x834   :  { %11513 = vmatpush1.bf16.msra.mxu1 %v12501_v32  ;;  %v3431_v32 = vld [vmem:[#allocation16 + $0x4b8] sm:$0xff] }
 0x835   :  { %11718 = vmatpush1.bf16.msra.mxu0 %v12503_v14  ;;  %11514 = vmatprep.subr.bf16.mxu1 %v12518_v29  ;;  %v3439_v14 = vld [vmem:[#allocation16 + $0x4f8] sm:$0xff]  ;;  %v12581_v29 = vcombine.low %v3414_v57, %v3422_v58  ;;  %v12646_v57 = vcombine.high %v3478_v22, %v3486_v23 }
 0x836   :  { %11719 = vmatprep.subr.bf16.mxu0 %v12520_v9  ;;  %v12583_v9 = vcombine.low %v3415_v62, %v3423_v60  ;;  %v12600_v39 = vcombine.high %v3431_v32, %v3439_v14  ;;  %v3494_v62 = vld [vmem:[#allocation16 + $0x6b0] sm:$0xff] }
 0x837   :  { %v3502_v60 = vld [vmem:[#allocation16 + $0x6f0] sm:$0xff] }
 0x838   :  { %11515 = vmatpush1.bf16.msra.mxu1 %v12517_v25  ;;  %v3447_v25 = vld [vmem:[#allocation16 + $0x538] sm:$0xff] }
 0x839   :  { %11720 = vmatpush1.bf16.msra.mxu0 %v12519_v27  ;;  %11516 = vmatprep.subr.bf16.mxu1 %v12534_v15  ;;  %v3455_v27 = vld [vmem:[#allocation16 + $0x578] sm:$0xff]  ;;  %v12597_v15 = vcombine.low %v3430_v6, %v3438_v7  ;;  %v12662_v6 = vcombine.high %v3494_v62, %v3502_v60 }
 0x83a   :  { %11721 = vmatprep.subr.bf16.mxu0 %v12536_v30  ;;  %v12599_v30 = vcombine.low %v3431_v32, %v3439_v14  ;;  %v12616_v43 = vcombine.high %v3447_v25, %v3455_v27  ;;  %v3510_v32 = vld [vmem:[#allocation16 + $0x730] sm:$0xff] }
 0x83b   :  { %v3518_v14 = vld [vmem:[#allocation16 + $0x770] sm:$0xff] }
 0x83c   :  { %11517 = vmatpush1.bf16.msra.mxu1 %v12533_v48  ;;  %v3463_v48 = vld [vmem:[#allocation16 + $0x5b8] sm:$0xff] }
 0x83d   :  { %11722 = vmatpush1.bf16.msra.mxu0 %v12535_v51  ;;  %11518 = vmatprep.subr.bf16.mxu1 %v12550_v63  ;;  %v3471_v51 = vld [vmem:[#allocation16 + $0x5f8] sm:$0xff]  ;;  %v12613_v63 = vcombine.low %v3446_v12, %v3454_v24  ;;  %v12678_v12 = vcombine.high %v3510_v32, %v3518_v14 }
 0x83e   :  { %11723 = vmatprep.subr.bf16.mxu0 %v12552_v28  ;;  %v12615_v28 = vcombine.low %v3447_v25, %v3455_v27  ;;  %v12632_v19 = vcombine.high %v3463_v48, %v3471_v51  ;;  %v3526_v25 = vld [vmem:[#allocation16 + $0x7b0] sm:$0xff] }
 0x83f   :  { %v3534_v27 = vld [vmem:[#allocation16 + $0x7f0] sm:$0xff] }
 0x840   :  { %11519 = vmatpush1.bf16.msra.mxu1 %v12549_v34  ;;  %v3479_v34 = vld [vmem:[#allocation16 + $0x638] sm:$0xff] }
 0x841   :  { %11724 = vmatpush1.bf16.msra.mxu0 %v12551_v53  ;;  %11520 = vmatprep.subr.bf16.mxu1 %v12566_v54  ;;  %v3487_v53 = vld [vmem:[#allocation16 + $0x678] sm:$0xff]  ;;  %v12629_v54 = vcombine.low %v3462_v45, %v3470_v47  ;;  %v12694_v45 = vcombine.high %v3526_v25, %v3534_v27 }
 0x842   :  { %11725 = vmatprep.subr.bf16.mxu0 %v12568_v49  ;;  %v12631_v49 = vcombine.low %v3463_v48, %v3471_v51  ;;  %v12648_v58 = vcombine.high %v3479_v34, %v3487_v53  ;;  %v3542_v48 = vld [vmem:[#allocation16 + $0x830] sm:$0xff] }
 0x843   :  { %v3550_v51 = vld [vmem:[#allocation16 + $0x870] sm:$0xff] }
 0x844   :  { %11521 = vmatpush1.bf16.msra.mxu1 %v12565_v50  ;;  %v3495_v50 = vld [vmem:[#allocation16 + $0x6b8] sm:$0xff] }
 0x845   :  { %11726 = vmatpush1.bf16.msra.mxu0 %v12567_v4  ;;  %11522 = vmatprep.subr.bf16.mxu1 %v12582_v3  ;;  %v3503_v4 = vld [vmem:[#allocation16 + $0x6f8] sm:$0xff]  ;;  %v12645_v3 = vcombine.low %v3478_v22, %v3486_v23  ;;  %v12710_v22 = vcombine.high %v3542_v48, %v3550_v51 }
 0x846   :  { %11727 = vmatprep.subr.bf16.mxu0 %v12584_v5  ;;  %v12647_v5 = vcombine.low %v3479_v34, %v3487_v53  ;;  %v12664_v7 = vcombine.high %v3495_v50, %v3503_v4  ;;  %v3558_v34 = vld [vmem:[#allocation16 + $0x8b0] sm:$0xff] }
 0x847   :  { %v3566_v53 = vld [vmem:[#allocation16 + $0x8f0] sm:$0xff] }
 0x848   :  { %11523 = vmatpush1.bf16.msra.mxu1 %v12581_v29  ;;  %v3511_v29 = vld [vmem:[#allocation16 + $0x738] sm:$0xff] }
 0x849   :  { %11728 = vmatpush1.bf16.msra.mxu0 %v12583_v9  ;;  %11524 = vmatprep.subr.bf16.mxu1 %v12598_v17  ;;  %v3519_v9 = vld [vmem:[#allocation16 + $0x778] sm:$0xff]  ;;  %v12661_v17 = vcombine.low %v3494_v62, %v3502_v60  ;;  %v12726_v62 = vcombine.high %v3558_v34, %v3566_v53  ;;  %v3574_v60 = vld [vmem:[#allocation16 + $0x930] sm:$0xff] }
 0x84a   :  { %11729 = vmatprep.subr.bf16.mxu0 %v12600_v39  ;;  %v12663_v39 = vcombine.low %v3495_v50, %v3503_v4  ;;  %v12680_v24 = vcombine.high %v3511_v29, %v3519_v9  ;;  %v3582_v50 = vld [vmem:[#allocation16 + $0x970] sm:$0xff] }
 0x84c   :  { %11525 = vmatpush1.bf16.msra.mxu1 %v12597_v15  ;;  %v3527_v15 = vld [vmem:[#allocation16 + $0x7b8] sm:$0xff] }
 0x84d   :  { %11730 = vmatpush1.bf16.msra.mxu0 %v12599_v30  ;;  %11526 = vmatprep.subr.bf16.mxu1 %v12614_v41  ;;  %v3535_v30 = vld [vmem:[#allocation16 + $0x7f8] sm:$0xff]  ;;  %v12677_v41 = vcombine.low %v3510_v32, %v3518_v14  ;;  %v12742_v32 = vcombine.high %v3574_v60, %v3582_v50 }
 0x84e   :  { %11731 = vmatprep.subr.bf16.mxu0 %v12616_v43  ;;  %v12679_v43 = vcombine.low %v3511_v29, %v3519_v9  ;;  %v12696_v47 = vcombine.high %v3527_v15, %v3535_v30  ;;  %v3590_v29 = vld [vmem:[#allocation16 + $0x9b0] sm:$0xff] }
 0x84f   :  { %v3598_v9 = vld [vmem:[#allocation16 + $0x9f0] sm:$0xff] }
 0x850   :  { %11527 = vmatpush1.bf16.msra.mxu1 %v12613_v63  ;;  %v3543_v63 = vld [vmem:[#allocation16 + $0x838] sm:$0xff] }
 0x851   :  { %11732 = vmatpush1.bf16.msra.mxu0 %v12615_v28  ;;  %11528 = vmatprep.subr.bf16.mxu1 %v12630_v35  ;;  %v3551_v28 = vld [vmem:[#allocation16 + $0x878] sm:$0xff]  ;;  %v12693_v35 = vcombine.low %v3526_v25, %v3534_v27  ;;  %v3606_v27 = vld [vmem:[#allocation16 + $0xa30] sm:$0xff] }
 0x852   :  { %11733 = vmatprep.subr.bf16.mxu0 %v12632_v19  ;;  %v12695_v19 = vcombine.low %v3527_v15, %v3535_v30  ;;  %v12712_v23 = vcombine.high %v3543_v63, %v3551_v28  ;;  %v3614_v15 = vld [vmem:[#allocation16 + $0xa70] sm:$0xff]  ;;  %v3607_v30 = vld [vmem:[#allocation16 + $0xa38] sm:$0xff] }
 0x854   :  { %11529 = vmatpush1.bf16.msra.mxu1 %v12629_v54  ;;  %v12709_v54 = vcombine.low %v3542_v48, %v3550_v51  ;;  %v3622_v48 = vld [vmem:[#allocation16 + $0xab0] sm:$0xff] }
 0x855   :  { %11734 = vmatpush1.bf16.msra.mxu0 %v12631_v49  ;;  %11530 = vmatprep.subr.bf16.mxu1 %v12646_v57  ;;  %v3559_v49 = vld [vmem:[#allocation16 + $0x8b8] sm:$0xff]  ;;  %v3630_v51 = vld [vmem:[#allocation16 + $0xaf0] sm:$0xff] }
 0x856   :  { %11735 = vmatprep.subr.bf16.mxu0 %v12648_v58  ;;  %v3567_v57 = vld [vmem:[#allocation16 + $0x8f8] sm:$0xff]  ;;  %v12711_v58 = vcombine.low %v3543_v63, %v3551_v28 }
 0x857   :  { %v12728_v4 = vcombine.high %v3559_v49, %v3567_v57  ;;  %v3623_v63 = vld [vmem:[#allocation16 + $0xab8] sm:$0xff] }
 0x858   :  { %11531 = vmatpush1.bf16.msra.mxu1 %v12645_v3  ;;  %v3575_v3 = vld [vmem:[#allocation16 + $0x938] sm:$0xff] }
 0x859   :  { %11736 = vmatpush1.bf16.msra.mxu0 %v12647_v5  ;;  %11532 = vmatprep.subr.bf16.mxu1 %v12662_v6  ;;  %v3583_v5 = vld [vmem:[#allocation16 + $0x978] sm:$0xff]  ;;  %v12725_v6 = vcombine.low %v3558_v34, %v3566_v53  ;;  %v3638_v34 = vld [vmem:[#allocation16 + $0xb30] sm:$0xff] }
 0x85a   :  { %11737 = vmatprep.subr.bf16.mxu0 %v12664_v7  ;;  %v12727_v7 = vcombine.low %v3559_v49, %v3567_v57  ;;  %v12744_v14 = vcombine.high %v3575_v3, %v3583_v5  ;;  %v3631_v28 = vld [vmem:[#allocation16 + $0xaf8] sm:$0xff]  ;;  %v3646_v53 = vld [vmem:[#allocation16 + $0xb70] sm:$0xff]  ;;  %v12789_v57 = vcombine.low %v3622_v48, %v3630_v51 }
 0x85b   :  { %v3647_v49 = vld [vmem:[#allocation16 + $0xb78] sm:$0xff] }
 0x85c   :  { %11533 = vmatpush1.bf16.msra.mxu1 %v12661_v17  ;;  %v3591_v17 = vld [vmem:[#allocation16 + $0x9b8] sm:$0xff] }
 0x85d   :  { %11738 = vmatpush1.bf16.msra.mxu0 %v12663_v39  ;;  %11534 = vmatprep.subr.bf16.mxu1 %v12678_v12  ;;  %v3599_v39 = vld [vmem:[#allocation16 + $0x9f8] sm:$0xff]  ;;  %v12741_v12 = vcombine.low %v3574_v60, %v3582_v50  ;;  %v3654_v50 = vld [vmem:[#allocation16 + $0xbb0] sm:$0xff] }
 0x85e   :  { %11739 = vmatprep.subr.bf16.mxu0 %v12680_v24  ;;  %v12758_v24 = vcombine.high %v3590_v29, %v3598_v9  ;;  %v12760_v25 = vcombine.high %v3591_v17, %v3599_v39 }
 0x860   :  { %11535 = vmatpush1.bf16.msra.mxu1 %v12677_v41  ;;  %v3615_v41 = vld [vmem:[#allocation16 + $0xa78] sm:$0xff] }
 0x861   :  { %11740 = vmatpush1.bf16.msra.mxu0 %v12679_v43  ;;  %11536 = vmatprep.subr.bf16.mxu1 %v12694_v45  ;;  %v12759_v43 = vcombine.low %v3591_v17, %v3599_v39  ;;  %v12774_v45 = vcombine.high %v3606_v27, %v3614_v15  ;;  %v3671_v17 = vld [vmem:[#allocation16 + $0xc38] sm:$0xff] }
 0x862   :  { %11741 = vmatprep.subr.bf16.mxu0 %v12696_v47  ;;  %v12776_v47 = vcombine.high %v3607_v30, %v3615_v41  ;;  %v3679_v39 = vld [vmem:[#allocation16 + $0xc78] sm:$0xff] }
 0x864   :  { %11537 = vmatpush1.bf16.msra.mxu1 %v12693_v35  ;;  %v12773_v35 = vcombine.low %v3606_v27, %v3614_v15  ;;  %v3686_v27 = vld [vmem:[#allocation16 + $0xcb0] sm:$0xff] }
 0x865   :  { %11742 = vmatpush1.bf16.msra.mxu0 %v12695_v19  ;;  %11547 = vmatprep.subr.bf16.mxu1 %v12710_v22  ;;  %v12775_v19 = vcombine.low %v3607_v30, %v3615_v41  ;;  %v12790_v22 = vcombine.high %v3622_v48, %v3630_v51  ;;  %v3694_v15 = vld [vmem:[#allocation16 + $0xcf0] sm:$0xff]  ;;  %v3687_v30 = vld [vmem:[#allocation16 + $0xcb8] sm:$0xff] }
 0x866   :  { %11752 = vmatprep.subr.bf16.mxu0 %v12712_v23  ;;  %v12792_v23 = vcombine.high %v3623_v63, %v3631_v28  ;;  %v3695_v41 = vld [vmem:[#allocation16 + $0xcf8] sm:$0xff]  ;;  %v3702_v48 = vld [vmem:[#allocation16 + $0xd30] sm:$0xff] }
 0x867   :  { %11539 = vmatmul.mubr.bf16.vlgmr.msra.gmra.mrb[32].mxu1 %v15070_v36  ;;  %v3710_v51 = vld [vmem:[#allocation16 + $0xd70] sm:$0xff] }
 0x868   :  { %11744 = vmatmul.mubr.bf16.vlgmr.msra.gmra.mrb[32].mxu0 %v15070_v36  ;;  %11548 = vmatpush1.bf16.msra.mxu1 %v12709_v54  ;;  %v12743_v36 = vcombine.low %v3575_v3, %v3583_v5  ;;  %v3639_v54 = vld [vmem:[#allocation16 + $0xb38] sm:$0xff] }
 0x869   :  { %11579 = vmatprep.mubr.bf16.mxu1 %v15074_v46  ;;  %11753 = vmatpush1.bf16.msra.mxu0 %v12711_v58  ;;  %v12791_v58 = vcombine.low %v3623_v63, %v3631_v28  ;;  %v12808_v60 = vcombine.high %v3639_v54, %v3647_v49  ;;  %v3655_v3 = vld [vmem:[#allocation16 + $0xbb8] sm:$0xff] }
 0x86a   :  { %11784 = vmatprep.mubr.bf16.mxu0 %v15074_v46  ;;  %11549 = vmatprep.subr.bf16.mxu1 %v12726_v62  ;;  %v12757_v46 = vcombine.low %v3590_v29, %v3598_v9  ;;  %v12806_v62 = vcombine.high %v3638_v34, %v3646_v53  ;;  %v3663_v5 = vld [vmem:[#allocation16 + $0xbf8] sm:$0xff]  ;;  %v3670_v29 = vld [vmem:[#allocation16 + $0xc30] sm:$0xff] }
 0x86b   :  { %11754 = vmatprep.subr.bf16.mxu0 %v12728_v4  ;;  %v3662_v4 = vld [vmem:[#allocation16 + $0xbf0] sm:$0xff]  ;;  %v3703_v63 = vld [vmem:[#allocation16 + $0xd38] sm:$0xff] }
 0x86c   :  { %11550 = vmatpush1.bf16.msra.mxu1 %v12725_v6  ;;  %v12805_v6 = vcombine.low %v3638_v34, %v3646_v53  ;;  %v3678_v9 = vld [vmem:[#allocation16 + $0xc70] sm:$0xff]  ;;  %v3711_v28 = vld [vmem:[#allocation16 + $0xd78] sm:$0xff] }
 0x86d   :  { %11755 = vmatpush1.bf16.msra.mxu0 %v12727_v7  ;;  %11551 = vmatprep.subr.bf16.mxu1 %v12742_v32  ;;  %v12807_v7 = vcombine.low %v3639_v54, %v3647_v49  ;;  %v12822_v32 = vcombine.high %v3654_v50, %v3662_v4  ;;  %v3718_v34 = vld [vmem:[#allocation16 + $0xdb0] sm:$0xff]  ;;  %v3719_v54 = vld [vmem:[#allocation16 + $0xdb8] sm:$0xff] }
 0x86e   :  { %11756 = vmatprep.subr.bf16.mxu0 %v12744_v14  ;;  %v12824_v14 = vcombine.high %v3655_v3, %v3663_v5  ;;  %v3726_v53 = vld [vmem:[#allocation16 + $0xdf0] sm:$0xff]  ;;  %v3727_v49 = vld [vmem:[#allocation16 + $0xdf8] sm:$0xff] }
 0x870   :  { %11552 = vmatpush1.bf16.msra.mxu1 %v12741_v12  ;;  %v12821_v12 = vcombine.low %v3654_v50, %v3662_v4  ;;  %v3734_v50 = vld [vmem:[#allocation16 + $0xe30] sm:$0xff] }
 0x871   :  { %11757 = vmatpush1.bf16.msra.mxu0 %v12743_v36  ;;  %11553 = vmatprep.subr.bf16.mxu1 %v12758_v24  ;;  %v12823_v36 = vcombine.low %v3655_v3, %v3663_v5  ;;  %v12838_v24 = vcombine.high %v3670_v29, %v3678_v9  ;;  %v3742_v4 = vld [vmem:[#allocation16 + $0xe70] sm:$0xff]  ;;  %v3735_v3 = vld [vmem:[#allocation16 + $0xe38] sm:$0xff] }
 0x872   :  { %11758 = vmatprep.subr.bf16.mxu0 %v12760_v25  ;;  %v12840_v25 = vcombine.high %v3671_v17, %v3679_v39  ;;  %v3743_v5 = vld [vmem:[#allocation16 + $0xe78] sm:$0xff] }
 0x874   :  { %11554 = vmatpush1.bf16.msra.mxu1 %v12757_v46  ;;  %v12837_v46 = vcombine.low %v3670_v29, %v3678_v9  ;;  %v3750_v29 = vld [vmem:[#allocation16 + $0xeb0] sm:$0xff] }
 0x875   :  { %11759 = vmatpush1.bf16.msra.mxu0 %v12759_v43  ;;  %11555 = vmatprep.subr.bf16.mxu1 %v12774_v45  ;;  %v12839_v43 = vcombine.low %v3671_v17, %v3679_v39  ;;  %v12854_v45 = vcombine.high %v3686_v27, %v3694_v15  ;;  %v3758_v9 = vld [vmem:[#allocation16 + $0xef0] sm:$0xff]  ;;  %v3751_v17 = vld [vmem:[#allocation16 + $0xeb8] sm:$0xff] }
 0x876   :  { %11760 = vmatprep.subr.bf16.mxu0 %v12776_v47  ;;  %v12856_v47 = vcombine.high %v3687_v30, %v3695_v41  ;;  %v3759_v39 = vld [vmem:[#allocation16 + $0xef8] sm:$0xff] }
 0x878   :  { %11556 = vmatpush1.bf16.msra.mxu1 %v12773_v35  ;;  %v12853_v35 = vcombine.low %v3686_v27, %v3694_v15  ;;  %v3766_v27 = vld [vmem:[#allocation16 + $0xf30] sm:$0xff] }
 0x879   :  { %11761 = vmatpush1.bf16.msra.mxu0 %v12775_v19  ;;  %11557 = vmatprep.subr.bf16.mxu1 %v12790_v22  ;;  %v12855_v19 = vcombine.low %v3687_v30, %v3695_v41  ;;  %v12870_v22 = vcombine.high %v3702_v48, %v3710_v51  ;;  %v3774_v15 = vld [vmem:[#allocation16 + $0xf70] sm:$0xff]  ;;  %v3767_v30 = vld [vmem:[#allocation16 + $0xf38] sm:$0xff] }
 0x87a   :  { %11762 = vmatprep.subr.bf16.mxu0 %v12792_v23  ;;  %v12872_v23 = vcombine.high %v3703_v63, %v3711_v28  ;;  %v3775_v41 = vld [vmem:[#allocation16 + $0xf78] sm:$0xff] }
 0x87c   :  { %11558 = vmatpush1.bf16.msra.mxu1 %v12789_v57  ;;  %v12869_v57 = vcombine.low %v3702_v48, %v3710_v51  ;;  %v3782_v48 = vld [vmem:[#allocation16 + $0xfb0] sm:$0xff] }
 0x87d   :  { %11763 = vmatpush1.bf16.msra.mxu0 %v12791_v58  ;;  %11559 = vmatprep.subr.bf16.mxu1 %v12806_v62  ;;  %v12871_v58 = vcombine.low %v3703_v63, %v3711_v28  ;;  %v12886_v62 = vcombine.high %v3718_v34, %v3726_v53  ;;  %v3790_v51 = vld [vmem:[#allocation16 + $0xff0] sm:$0xff]  ;;  %v3783_v63 = vld [vmem:[#allocation16 + $0xfb8] sm:$0xff] }
 0x87e   :  { %11764 = vmatprep.subr.bf16.mxu0 %v12808_v60  ;;  %v12888_v60 = vcombine.high %v3719_v54, %v3727_v49  ;;  %v3791_v28 = vld [vmem:[#allocation16 + $0xff8] sm:$0xff] }
 0x880   :  { %11560 = vmatpush1.bf16.msra.mxu1 %v12805_v6  ;;  %v12885_v6 = vcombine.low %v3718_v34, %v3726_v53  ;;  %v3798_v34 = vld [vmem:[#allocation16 + $0x1030] sm:$0xff] }
 0x881   :  { %11765 = vmatpush1.bf16.msra.mxu0 %v12807_v7  ;;  %11561 = vmatprep.subr.bf16.mxu1 %v12822_v32  ;;  %v12887_v7 = vcombine.low %v3719_v54, %v3727_v49  ;;  %v12902_v32 = vcombine.high %v3734_v50, %v3742_v4  ;;  %v3806_v53 = vld [vmem:[#allocation16 + $0x1070] sm:$0xff]  ;;  %v3799_v54 = vld [vmem:[#allocation16 + $0x1038] sm:$0xff] }
 0x882   :  { %11766 = vmatprep.subr.bf16.mxu0 %v12824_v14  ;;  %v12904_v14 = vcombine.high %v3735_v3, %v3743_v5  ;;  %v3807_v49 = vld [vmem:[#allocation16 + $0x1078] sm:$0xff] }
 0x884   :  { %11562 = vmatpush1.bf16.msra.mxu1 %v12821_v12  ;;  %v12901_v12 = vcombine.low %v3734_v50, %v3742_v4  ;;  %v3814_v50 = vld [vmem:[#allocation16 + $0x10b0] sm:$0xff] }
 0x885   :  { %11767 = vmatpush1.bf16.msra.mxu0 %v12823_v36  ;;  %11563 = vmatprep.subr.bf16.mxu1 %v12838_v24  ;;  %v12903_v36 = vcombine.low %v3735_v3, %v3743_v5  ;;  %v12918_v24 = vcombine.high %v3750_v29, %v3758_v9  ;;  %v3822_v4 = vld [vmem:[#allocation16 + $0x10f0] sm:$0xff]  ;;  %v12965_v3 = vcombine.low %v3798_v34, %v3806_v53  ;;  %v3815_v5 = vld [vmem:[#allocation16 + $0x10b8] sm:$0xff] }
 0x886   :  { %11768 = vmatprep.subr.bf16.mxu0 %v12840_v25  ;;  %v12920_v25 = vcombine.high %v3751_v17, %v3759_v39 }
 0x888   :  { %11564 = vmatpush1.bf16.msra.mxu1 %v12837_v46  ;;  %v12917_v46 = vcombine.low %v3750_v29, %v3758_v9  ;;  %v3838_v29 = vld [vmem:[#allocation16 + $0x1170] sm:$0xff] }
 0x889   :  { %11769 = vmatpush1.bf16.msra.mxu0 %v12839_v43  ;;  %11565 = vmatprep.subr.bf16.mxu1 %v12854_v45  ;;  %v12919_v43 = vcombine.low %v3751_v17, %v3759_v39  ;;  %v12934_v45 = vcombine.high %v3766_v27, %v3774_v15  ;;  %v3831_v17 = vld [vmem:[#allocation16 + $0x1138] sm:$0xff] }
 0x88a   :  { %11770 = vmatprep.subr.bf16.mxu0 %v12856_v47  ;;  %v12936_v47 = vcombine.high %v3767_v30, %v3775_v41  ;;  %v3839_v39 = vld [vmem:[#allocation16 + $0x1178] sm:$0xff] }
 0x88c   :  { %11566 = vmatpush1.bf16.msra.mxu1 %v12853_v35  ;;  %v12933_v35 = vcombine.low %v3766_v27, %v3774_v15  ;;  %v3846_v27 = vld [vmem:[#allocation16 + $0x11b0] sm:$0xff] }
 0x88d   :  { %11771 = vmatpush1.bf16.msra.mxu0 %v12855_v19  ;;  %11567 = vmatprep.subr.bf16.mxu1 %v12870_v22  ;;  %v12935_v19 = vcombine.low %v3767_v30, %v3775_v41  ;;  %v12950_v22 = vcombine.high %v3782_v48, %v3790_v51  ;;  %v3854_v15 = vld [vmem:[#allocation16 + $0x11f0] sm:$0xff]  ;;  %v3847_v30 = vld [vmem:[#allocation16 + $0x11b8] sm:$0xff] }
 0x88e   :  { %11772 = vmatprep.subr.bf16.mxu0 %v12872_v23  ;;  %v12952_v23 = vcombine.high %v3783_v63, %v3791_v28  ;;  %v3855_v41 = vld [vmem:[#allocation16 + $0x11f8] sm:$0xff] }
 0x890   :  { %11568 = vmatpush1.bf16.msra.mxu1 %v12869_v57  ;;  %v12949_v57 = vcombine.low %v3782_v48, %v3790_v51  ;;  %v3870_v48 = vld [vmem:[#allocation16 + $0x1270] sm:$0xff]  ;;  %v3863_v51 = vld [vmem:[#allocation16 + $0x1238] sm:$0xff] }
 0x891   :  { %11773 = vmatpush1.bf16.msra.mxu0 %v12871_v58  ;;  %11569 = vmatprep.subr.bf16.mxu1 %v12886_v62  ;;  %v12951_v58 = vcombine.low %v3783_v63, %v3791_v28  ;;  %v12966_v62 = vcombine.high %v3798_v34, %v3806_v53  ;;  %v3871_v63 = vld [vmem:[#allocation16 + $0x1278] sm:$0xff]  ;;  %v13015_v28 = vcombine.low %v3847_v30, %v3855_v41 }
 0x892   :  { %11774 = vmatprep.subr.bf16.mxu0 %v12888_v60  ;;  %v12968_v60 = vcombine.high %v3799_v54, %v3807_v49  ;;  %v3879_v34 = vld [vmem:[#allocation16 + $0x12b8] sm:$0xff] }
 0x893   :  { %v3887_v53 = vld [vmem:[#allocation16 + $0x12f8] sm:$0xff] }
 0x894   :  { %11570 = vmatpush1.bf16.msra.mxu1 %v12885_v6  ;;  %v3823_v6 = vld [vmem:[#allocation16 + $0x10f8] sm:$0xff] }
 0x895   :  { %11775 = vmatpush1.bf16.msra.mxu0 %v12887_v7  ;;  %11571 = vmatprep.subr.bf16.mxu1 %v12902_v32  ;;  %v12967_v7 = vcombine.low %v3799_v54, %v3807_v49  ;;  %v12982_v32 = vcombine.high %v3814_v50, %v3822_v4  ;;  %v12984_v9 = vcombine.high %v3815_v5, %v3823_v6 }
 0x896   :  { %11776 = vmatprep.subr.bf16.mxu0 %v12904_v14  ;;  %v3830_v14 = vld [vmem:[#allocation16 + $0x1130] sm:$0xff]  ;;  %v13031_v49 = vcombine.low %v3863_v51, %v3871_v63 }
 0x898   :  { %11572 = vmatpush1.bf16.msra.mxu1 %v12901_v12  ;;  %v12981_v12 = vcombine.low %v3814_v50, %v3822_v4  ;;  %v3895_v50 = vld [vmem:[#allocation16 + $0x1338] sm:$0xff] }
 0x899   :  { %11777 = vmatpush1.bf16.msra.mxu0 %v12903_v36  ;;  %11573 = vmatprep.subr.bf16.mxu1 %v12918_v24  ;;  %v12983_v36 = vcombine.low %v3815_v5, %v3823_v6  ;;  %v12998_v24 = vcombine.high %v3830_v14, %v3838_v29  ;;  %v3903_v4 = vld [vmem:[#allocation16 + $0x1378] sm:$0xff]  ;;  %v13047_v5 = vcombine.low %v3879_v34, %v3887_v53 }
 0x89a   :  { %11778 = vmatprep.subr.bf16.mxu0 %v12920_v25  ;;  %v13000_v25 = vcombine.high %v3831_v17, %v3839_v39 }
 0x89c   :  { %11574 = vmatpush1.bf16.msra.mxu1 %v12917_v46  ;;  %v12997_v46 = vcombine.low %v3830_v14, %v3838_v29  ;;  %v3918_v14 = vld [vmem:[#allocation16 + $0x13f0] sm:$0xff]  ;;  %v3911_v29 = vld [vmem:[#allocation16 + $0x13b8] sm:$0xff] }
 0x89d   :  { %11779 = vmatpush1.bf16.msra.mxu0 %v12919_v43  ;;  %11575 = vmatprep.subr.bf16.mxu1 %v12934_v45  ;;  %v13014_v43 = vcombine.high %v3846_v27, %v3854_v15  ;;  %v13016_v45 = vcombine.high %v3847_v30, %v3855_v41 }
 0x89e   :  { %11780 = vmatprep.subr.bf16.mxu0 %v12936_v47  ;;  %v3862_v47 = vld [vmem:[#allocation16 + $0x1230] sm:$0xff] }
 0x89f   :  { %v13029_v54 = vcombine.low %v3862_v47, %v3870_v48 }
 0x8a0   :  { %11576 = vmatpush1.bf16.msra.mxu1 %v12933_v35  ;;  %v13030_v35 = vcombine.high %v3862_v47, %v3870_v48  ;;  %v3943_v47 = vld [vmem:[#allocation16 + $0x14b8] sm:$0xff] }
 0x8a1   :  { %11781 = vmatpush1.bf16.msra.mxu0 %v12935_v19  ;;  %11577 = vmatprep.subr.bf16.mxu1 %v12950_v22  ;;  %v13032_v19 = vcombine.high %v3863_v51, %v3871_v63  ;;  %v3878_v22 = vld [vmem:[#allocation16 + $0x12b0] sm:$0xff]  ;;  %v3951_v48 = vld [vmem:[#allocation16 + $0x14f8] sm:$0xff] }
 0x8a2   :  { %11782 = vmatprep.subr.bf16.mxu0 %v12952_v23  ;;  %v3886_v23 = vld [vmem:[#allocation16 + $0x12f0] sm:$0xff] }
 0x8a4   :  { %11578 = vmatpush1.bf16.msra.mxu1 %v12949_v57  ;;  %v13046_v57 = vcombine.high %v3878_v22, %v3886_v23 }
 0x8a5   :  { %11783 = vmatpush1.bf16.msra.mxu0 %v12951_v58  ;;  %11588 = vmatprep.subr.bf16.mxu1 %v12966_v62  ;;  %v13048_v58 = vcombine.high %v3879_v34, %v3887_v53  ;;  %v3894_v62 = vld [vmem:[#allocation16 + $0x1330] sm:$0xff]  ;;  %v13111_v53 = vcombine.low %v3943_v47, %v3951_v48 }
 0x8a6   :  { %11793 = vmatprep.subr.bf16.mxu0 %v12968_v60  ;;  %v3902_v60 = vld [vmem:[#allocation16 + $0x1370] sm:$0xff] }
 0x8a7   :  { %11580 = vmatmul.mubr.bf16.vlgmr.msra.gmra.mrb[32].mxu1 %v15091_v16  ;;  %v13062_v6 = vcombine.high %v3894_v62, %v3902_v60 }
 0x8a8   :  { %11785 = vmatmul.mubr.bf16.vlgmr.msra.gmra.mrb[32].mxu0 %v15091_v16  ;;  %11589 = vmatpush1.bf16.msra.mxu1 %v12965_v3  ;;  %v12999_v16 = vcombine.low %v3831_v17, %v3839_v39  ;;  %v13045_v3 = vcombine.low %v3878_v22, %v3886_v23  ;;  %v13061_v17 = vcombine.low %v3894_v62, %v3902_v60  ;;  %v3959_v22 = vld [vmem:[#allocation16 + $0x1538] sm:$0xff] }
 0x8a9   :  { %11620 = vmatprep.mubr.bf16.mxu1 %v15130_v59  ;;  %11794 = vmatpush1.bf16.msra.mxu0 %v12967_v7  ;;  %v13064_v7 = vcombine.high %v3895_v50, %v3903_v4  ;;  %v13063_v39 = vcombine.low %v3895_v50, %v3903_v4  ;;  %v3967_v23 = vld [vmem:[#allocation16 + $0x1578] sm:$0xff] }
 0x8aa   :  { %11825 = vmatprep.mubr.bf16.mxu0 %v15130_v59  ;;  %11590 = vmatprep.subr.bf16.mxu1 %v12982_v32  ;;  %v13013_v59 = vcombine.low %v3846_v27, %v3854_v15  ;;  %v3910_v32 = vld [vmem:[#allocation16 + $0x13b0] sm:$0xff]  ;;  %v3927_v27 = vld [vmem:[#allocation16 + $0x1438] sm:$0xff]  ;;  %v13127_v4 = vcombine.low %v3959_v22, %v3967_v23 }
 0x8ab   :  { %11795 = vmatprep.subr.bf16.mxu0 %v12984_v9  ;;  %v3919_v9 = vld [vmem:[#allocation16 + $0x13f8] sm:$0xff]  ;;  %v13077_v30 = vcombine.low %v3910_v32, %v3918_v14 }
 0x8ac   :  { %11591 = vmatpush1.bf16.msra.mxu1 %v12981_v12  ;;  %v13078_v12 = vcombine.high %v3910_v32, %v3918_v14  ;;  %v3935_v15 = vld [vmem:[#allocation16 + $0x1478] sm:$0xff]  ;;  %v13079_v41 = vcombine.low %v3911_v29, %v3919_v9 }
 0x8ad   :  { %11796 = vmatpush1.bf16.msra.mxu0 %v12983_v36  ;;  %11592 = vmatprep.subr.bf16.mxu1 %v12998_v24  ;;  %v13080_v36 = vcombine.high %v3911_v29, %v3919_v9  ;;  %v3926_v24 = vld [vmem:[#allocation16 + $0x1430] sm:$0xff]  ;;  %v13095_v63 = vcombine.low %v3927_v27, %v3935_v15  ;;  %v3975_v62 = vld [vmem:[#allocation16 + $0x15b8] sm:$0xff] }
 0x8ae   :  { %11797 = vmatprep.subr.bf16.mxu0 %v13000_v25  ;;  %v3934_v25 = vld [vmem:[#allocation16 + $0x1470] sm:$0xff]  ;;  %v3983_v60 = vld [vmem:[#allocation16 + $0x15f8] sm:$0xff] }
 0x8af   :  { %v13093_v51 = vcombine.low %v3926_v24, %v3934_v25  ;;  %v3991_v32 = vld [vmem:[#allocation16 + $0x1638] sm:$0xff]  ;;  %v13143_v9 = vcombine.low %v3975_v62, %v3983_v60 }
 0x8b0   :  { %11593 = vmatpush1.bf16.msra.mxu1 %v12997_v46  ;;  %v13094_v46 = vcombine.high %v3926_v24, %v3934_v25  ;;  %v3999_v14 = vld [vmem:[#allocation16 + $0x1678] sm:$0xff] }
 0x8b1   :  { %11798 = vmatpush1.bf16.msra.mxu0 %v12999_v16  ;;  %11594 = vmatprep.subr.bf16.mxu1 %v13014_v43  ;;  %v13096_v16 = vcombine.high %v3927_v27, %v3935_v15  ;;  %v3942_v43 = vld [vmem:[#allocation16 + $0x14b0] sm:$0xff]  ;;  %v4007_v24 = vld [vmem:[#allocation16 + $0x16b8] sm:$0xff]  ;;  %v13159_v15 = vcombine.low %v3991_v32, %v3999_v14 }
 0x8b2   :  { %11799 = vmatprep.subr.bf16.mxu0 %v13016_v45  ;;  %v3950_v45 = vld [vmem:[#allocation16 + $0x14f0] sm:$0xff]  ;;  %v4015_v25 = vld [vmem:[#allocation16 + $0x16f8] sm:$0xff] }
 0x8b3   :  { %v13109_v34 = vcombine.low %v3942_v43, %v3950_v45 }
 0x8b4   :  { %11595 = vmatpush1.bf16.msra.mxu1 %v13013_v59  ;;  %v13110_v59 = vcombine.high %v3942_v43, %v3950_v45  ;;  %v4023_v43 = vld [vmem:[#allocation16 + $0x1738] sm:$0xff] }
 0x8b5   :  { %11800 = vmatpush1.bf16.msra.mxu0 %v13015_v28  ;;  %11596 = vmatprep.subr.bf16.mxu1 %v13030_v35  ;;  %v13112_v28 = vcombine.high %v3943_v47, %v3951_v48  ;;  %v3958_v35 = vld [vmem:[#allocation16 + $0x1530] sm:$0xff]  ;;  %v4031_v45 = vld [vmem:[#allocation16 + $0x1778] sm:$0xff]  ;;  %v13175_v48 = vcombine.low %v4007_v24, %v4015_v25 }
 0x8b6   :  { %11801 = vmatprep.subr.bf16.mxu0 %v13032_v19  ;;  %v3966_v19 = vld [vmem:[#allocation16 + $0x1570] sm:$0xff] }
 0x8b7   :  { %v13125_v50 = vcombine.low %v3958_v35, %v3966_v19 }
 0x8b8   :  { %11597 = vmatpush1.bf16.msra.mxu1 %v13029_v54  ;;  %v13126_v54 = vcombine.high %v3958_v35, %v3966_v19  ;;  %v4039_v35 = vld [vmem:[#allocation16 + $0x17b8] sm:$0xff] }
 0x8b9   :  { %11802 = vmatpush1.bf16.msra.mxu0 %v13031_v49  ;;  %11598 = vmatprep.subr.bf16.mxu1 %v13046_v57  ;;  %v13128_v49 = vcombine.high %v3959_v22, %v3967_v23  ;;  %v3974_v57 = vld [vmem:[#allocation16 + $0x15b0] sm:$0xff]  ;;  %v4047_v19 = vld [vmem:[#allocation16 + $0x17f8] sm:$0xff]  ;;  %v13191_v23 = vcombine.low %v4023_v43, %v4031_v45 }
 0x8ba   :  { %11803 = vmatprep.subr.bf16.mxu0 %v13048_v58  ;;  %v3982_v58 = vld [vmem:[#allocation16 + $0x15f0] sm:$0xff] }
 0x8bb   :  { %v13141_v29 = vcombine.low %v3974_v57, %v3982_v58 }
 0x8bc   :  { %11599 = vmatpush1.bf16.msra.mxu1 %v13045_v3  ;;  %v13142_v3 = vcombine.high %v3974_v57, %v3982_v58  ;;  %v4055_v57 = vld [vmem:[#allocation16 + $0x1838] sm:$0xff] }
 0x8bd   :  { %11804 = vmatpush1.bf16.msra.mxu0 %v13047_v5  ;;  %11600 = vmatprep.subr.bf16.mxu1 %v13062_v6  ;;  %v13144_v5 = vcombine.high %v3975_v62, %v3983_v60  ;;  %v3990_v6 = vld [vmem:[#allocation16 + $0x1630] sm:$0xff]  ;;  %v4063_v58 = vld [vmem:[#allocation16 + $0x1878] sm:$0xff]  ;;  %v13207_v60 = vcombine.low %v4039_v35, %v4047_v19 }
 0x8be   :  { %11805 = vmatprep.subr.bf16.mxu0 %v13064_v7  ;;  %v3998_v7 = vld [vmem:[#allocation16 + $0x1670] sm:$0xff] }
 0x8bf   :  { %v13157_v27 = vcombine.low %v3990_v6, %v3998_v7 }
 0x8c0   :  { %11601 = vmatpush1.bf16.msra.mxu1 %v13061_v17  ;;  %v13158_v17 = vcombine.high %v3990_v6, %v3998_v7  ;;  %v4071_v7 = vld [vmem:[#allocation16 + $0x18b8] sm:$0xff] }
 0x8c1   :  { %11806 = vmatpush1.bf16.msra.mxu0 %v13063_v39  ;;  %11602 = vmatprep.subr.bf16.mxu1 %v13078_v12  ;;  %v13160_v39 = vcombine.high %v3991_v32, %v3999_v14  ;;  %v4006_v12 = vld [vmem:[#allocation16 + $0x16b0] sm:$0xff]  ;;  %v4079_v32 = vld [vmem:[#allocation16 + $0x18f8] sm:$0xff]  ;;  %v13223_v14 = vcombine.low %v4055_v57, %v4063_v58 }
 0x8c2   :  { %11807 = vmatprep.subr.bf16.mxu0 %v13080_v36  ;;  %v4014_v36 = vld [vmem:[#allocation16 + $0x16f0] sm:$0xff] }
 0x8c3   :  { %v13173_v47 = vcombine.low %v4006_v12, %v4014_v36 }
 0x8c4   :  { %11603 = vmatpush1.bf16.msra.mxu1 %v13077_v30  ;;  %v13174_v30 = vcombine.high %v4006_v12, %v4014_v36  ;;  %v4087_v12 = vld [vmem:[#allocation16 + $0x1938] sm:$0xff] }
 0x8c5   :  { %11808 = vmatpush1.bf16.msra.mxu0 %v13079_v41  ;;  %11604 = vmatprep.subr.bf16.mxu1 %v13094_v46  ;;  %v13176_v41 = vcombine.high %v4007_v24, %v4015_v25  ;;  %v4022_v46 = vld [vmem:[#allocation16 + $0x1730] sm:$0xff]  ;;  %v4095_v36 = vld [vmem:[#allocation16 + $0x1978] sm:$0xff]  ;;  %v13239_v25 = vcombine.low %v4071_v7, %v4079_v32 }
 0x8c6   :  { %11809 = vmatprep.subr.bf16.mxu0 %v13096_v16  ;;  %v4030_v16 = vld [vmem:[#allocation16 + $0x1770] sm:$0xff] }
 0x8c7   :  { %v13189_v22 = vcombine.low %v4022_v46, %v4030_v16 }
 0x8c8   :  { %11605 = vmatpush1.bf16.msra.mxu1 %v13093_v51  ;;  %v13190_v51 = vcombine.high %v4022_v46, %v4030_v16  ;;  %v4103_v46 = vld [vmem:[#allocation16 + $0x19b8] sm:$0xff] }
 0x8c9   :  { %11810 = vmatpush1.bf16.msra.mxu0 %v13095_v63  ;;  %11606 = vmatprep.subr.bf16.mxu1 %v13110_v59  ;;  %v13192_v63 = vcombine.high %v4023_v43, %v4031_v45  ;;  %v4038_v59 = vld [vmem:[#allocation16 + $0x17b0] sm:$0xff]  ;;  %v4111_v16 = vld [vmem:[#allocation16 + $0x19f8] sm:$0xff] }
 0x8ca   :  { %11811 = vmatprep.subr.bf16.mxu0 %v13112_v28  ;;  %v4046_v28 = vld [vmem:[#allocation16 + $0x17f0] sm:$0xff] }
 0x8cb   :  { %v13205_v62 = vcombine.low %v4038_v59, %v4046_v28 }
 0x8cc   :  { %11607 = vmatpush1.bf16.msra.mxu1 %v13109_v34  ;;  %v13206_v34 = vcombine.high %v4038_v59, %v4046_v28  ;;  %v4127_v59 = vld [vmem:[#allocation16 + $0x1a78] sm:$0xff]  ;;  %v13271_v28 = vcombine.low %v4103_v46, %v4111_v16 }
 0x8cd   :  { %11812 = vmatpush1.bf16.msra.mxu0 %v13111_v53  ;;  %11608 = vmatprep.subr.bf16.mxu1 %v13126_v54  ;;  %v13208_v53 = vcombine.high %v4039_v35, %v4047_v19  ;;  %v4054_v54 = vld [vmem:[#allocation16 + $0x1830] sm:$0xff] }
 0x8ce   :  { %11813 = vmatprep.subr.bf16.mxu0 %v13128_v49  ;;  %v4062_v49 = vld [vmem:[#allocation16 + $0x1870] sm:$0xff] }
 0x8cf   :  { %v13221_v6 = vcombine.low %v4054_v54, %v4062_v49 }
 0x8d0   :  { %11609 = vmatpush1.bf16.msra.mxu1 %v13125_v50  ;;  %v13222_v50 = vcombine.high %v4054_v54, %v4062_v49 }
 0x8d1   :  { %11814 = vmatpush1.bf16.msra.mxu0 %v13127_v4  ;;  %11610 = vmatprep.subr.bf16.mxu1 %v13142_v3  ;;  %v13224_v4 = vcombine.high %v4055_v57, %v4063_v58  ;;  %v4070_v3 = vld [vmem:[#allocation16 + $0x18b0] sm:$0xff] }
 0x8d2   :  { %11815 = vmatprep.subr.bf16.mxu0 %v13144_v5  ;;  %v4078_v5 = vld [vmem:[#allocation16 + $0x18f0] sm:$0xff] }
 0x8d3   :  { %v13237_v24 = vcombine.low %v4070_v3, %v4078_v5 }
 0x8d4   :  { %11611 = vmatpush1.bf16.msra.mxu1 %v13141_v29  ;;  %v13238_v29 = vcombine.high %v4070_v3, %v4078_v5 }
 0x8d5   :  { %11816 = vmatpush1.bf16.msra.mxu0 %v13143_v9  ;;  %11612 = vmatprep.subr.bf16.mxu1 %v13158_v17  ;;  %v4086_v9 = vld [vmem:[#allocation16 + $0x1930] sm:$0xff] }
 0x8d6   :  { %11817 = vmatprep.subr.bf16.mxu0 %v13160_v39  ;;  %v4094_v17 = vld [vmem:[#allocation16 + $0x1970] sm:$0xff]  ;;  %v13240_v39 = vcombine.high %v4071_v7, %v4079_v32 }
 0x8d7   :  { %v13253_v43 = vcombine.low %v4086_v9, %v4094_v17 }
 0x8d8   :  { %11613 = vmatpush1.bf16.msra.mxu1 %v13157_v27  ;;  %v13254_v27 = vcombine.high %v4086_v9, %v4094_v17 }
 0x8d9   :  { %11818 = vmatpush1.bf16.msra.mxu0 %v13159_v15  ;;  %11614 = vmatprep.subr.bf16.mxu1 %v13174_v30  ;;  %v13256_v15 = vcombine.high %v4087_v12, %v4095_v36  ;;  %v4102_v30 = vld [vmem:[#allocation16 + $0x19b0] sm:$0xff] }
 0x8da   :  { %11819 = vmatprep.subr.bf16.mxu0 %v13176_v41  ;;  %v4110_v41 = vld [vmem:[#allocation16 + $0x19f0] sm:$0xff] }
 0x8db   :  { %v13270_v45 = vcombine.high %v4102_v30, %v4110_v41 }
 0x8dc   :  { %11615 = vmatpush1.bf16.msra.mxu1 %v13173_v47  ;;  %v13272_v47 = vcombine.high %v4103_v46, %v4111_v16 }
 0x8dd   :  { %11820 = vmatpush1.bf16.msra.mxu0 %v13175_v48  ;;  %11616 = vmatprep.subr.bf16.mxu1 %v13190_v51  ;;  %v4118_v48 = vld [vmem:[#allocation16 + $0x1a30] sm:$0xff] }
 0x8de   :  { %11821 = vmatprep.subr.bf16.mxu0 %v13192_v63  ;;  %v4126_v51 = vld [vmem:[#allocation16 + $0x1a70] sm:$0xff]  ;;  %v4119_v63 = vld [vmem:[#allocation16 + $0x1a38] sm:$0xff] }
 0x8df   :  { %v13286_v35 = vcombine.high %v4118_v48, %v4126_v51  ;;  %v13288_v19 = vcombine.high %v4119_v63, %v4127_v59  ;;  %v13285_v54 = vcombine.low %v4118_v48, %v4126_v51  ;;  %v13287_v49 = vcombine.low %v4119_v63, %v4127_v59 }
 0x8e0   :  { %11617 = vmatpush1.bf16.msra.mxu1 %v13189_v22  ;;  %v4134_v22 = vld [vmem:[#allocation16 + $0x1ab0] sm:$0xff] }
 0x8e1   :  { %11822 = vmatpush1.bf16.msra.mxu0 %v13191_v23  ;;  %11618 = vmatprep.subr.bf16.mxu1 %v13206_v34  ;;  %v4142_v23 = vld [vmem:[#allocation16 + $0x1af0] sm:$0xff]  ;;  %v4135_v34 = vld [vmem:[#allocation16 + $0x1ab8] sm:$0xff] }
 0x8e2   :  { %11823 = vmatprep.subr.bf16.mxu0 %v13208_v53  ;;  %v4143_v53 = vld [vmem:[#allocation16 + $0x1af8] sm:$0xff]  ;;  %v13302_v57 = vcombine.high %v4134_v22, %v4142_v23  ;;  %v13301_v3 = vcombine.low %v4134_v22, %v4142_v23 }
 0x8e3   :  { %v13304_v58 = vcombine.high %v4135_v34, %v4143_v53  ;;  %v13303_v5 = vcombine.low %v4135_v34, %v4143_v53 }
 0x8e4   :  { %11619 = vmatpush1.bf16.msra.mxu1 %v13205_v62  ;;  %v4150_v62 = vld [vmem:[#allocation16 + $0x1b30] sm:$0xff] }
 0x8e5   :  { %11824 = vmatpush1.bf16.msra.mxu0 %v13207_v60  ;;  %11629 = vmatprep.subr.bf16.mxu1 %v13222_v50  ;;  %v4158_v60 = vld [vmem:[#allocation16 + $0x1b70] sm:$0xff]  ;;  %v4151_v50 = vld [vmem:[#allocation16 + $0x1b38] sm:$0xff] }
 0x8e6   :  { %11834 = vmatprep.subr.bf16.mxu0 %v13224_v4  ;;  %v4159_v4 = vld [vmem:[#allocation16 + $0x1b78] sm:$0xff] }
 0x8e7   :  { %11621 = vmatmul.mubr.bf16.vlgmr.msra.gmra.mrb[32].mxu1 %v15132_v31  ;;  %v13320_v32 = vcombine.high %v4151_v50, %v4159_v4 }
 0x8e8   :  { %11826 = vmatmul.mubr.bf16.vlgmr.msra.gmra.mrb[32].mxu0 %v15132_v31  ;;  %11630 = vmatpush1.bf16.msra.mxu1 %v13221_v6  ;;  %v13255_v31 = vcombine.low %v4087_v12, %v4095_v36  ;;  %v13318_v6 = vcombine.high %v4150_v62, %v4158_v60  ;;  %v4175_v12 = vld [vmem:[#allocation16 + $0x1bf8] sm:$0xff] }
 0x8e9   :  { %11661 = vmatprep.mubr.bf16.mxu1 %v15139_v11  ;;  %11835 = vmatpush1.bf16.msra.mxu0 %v13223_v14  ;;  %v4166_v14 = vld [vmem:[#allocation16 + $0x1bb0] sm:$0xff] }
 0x8ea   :  { %11866 = vmatprep.mubr.bf16.mxu0 %v15139_v11  ;;  %11631 = vmatprep.subr.bf16.mxu1 %v13238_v29  ;;  %v13269_v11 = vcombine.low %v4102_v30, %v4110_v41  ;;  %v4174_v29 = vld [vmem:[#allocation16 + $0x1bf0] sm:$0xff]  ;;  %v13319_v30 = vcombine.low %v4151_v50, %v4159_v4 }
 0x8eb   :  { %11836 = vmatprep.subr.bf16.mxu0 %v13240_v39  ;;  %v4167_v39 = vld [vmem:[#allocation16 + $0x1bb8] sm:$0xff]  ;;  %v13334_v41 = vcombine.high %v4166_v14, %v4174_v29  ;;  %v13333_v48 = vcombine.low %v4166_v14, %v4174_v29 }
 0x8ec   :  { %11632 = vmatpush1.bf16.msra.mxu1 %v13237_v24  ;;  %v13336_v16 = vcombine.high %v4167_v39, %v4175_v12  ;;  %v13335_v51 = vcombine.low %v4167_v39, %v4175_v12 }
 0x8ed   :  { %11837 = vmatpush1.bf16.msra.mxu0 %v13239_v25  ;;  %11633 = vmatprep.subr.bf16.mxu1 %v13254_v27  ;;  %v13317_v25 = vcombine.low %v4150_v62, %v4158_v60 }
 0x8ee   :  { %11838 = vmatprep.subr.bf16.mxu0 %v13256_v15 }
 0x8f0   :  { %11634 = vmatpush1.bf16.msra.mxu1 %v13253_v43  ;;  %v4182_v43 = vld [vmem:[#allocation16 + $0x1c30] sm:$0xff] }
 0x8f1   :  { %11839 = vmatpush1.bf16.msra.mxu0 %v13255_v31  ;;  %11635 = vmatprep.subr.bf16.mxu1 %v13270_v45  ;;  %v4190_v31 = vld [vmem:[#allocation16 + $0x1c70] sm:$0xff]  ;;  %v4183_v45 = vld [vmem:[#allocation16 + $0x1c38] sm:$0xff] }
 0x8f2   :  { %11840 = vmatprep.subr.bf16.mxu0 %v13272_v47  ;;  %v4191_v47 = vld [vmem:[#allocation16 + $0x1c78] sm:$0xff]  ;;  %v13350_v63 = vcombine.high %v4182_v43, %v4190_v31  ;;  %v13349_v22 = vcombine.low %v4182_v43, %v4190_v31  ;;  %v4262_v43 = vld [vmem:[#allocation16 + $0x1eb0] sm:$0xff] }
 0x8f3   :  { %v13352_v59 = vcombine.high %v4183_v45, %v4191_v47  ;;  %v13351_v23 = vcombine.low %v4183_v45, %v4191_v47  ;;  %v4270_v31 = vld [vmem:[#allocation16 + $0x1ef0] sm:$0xff]  ;;  %v4263_v45 = vld [vmem:[#allocation16 + $0x1eb8] sm:$0xff] }
 0x8f4   :  { %11636 = vmatpush1.bf16.msra.mxu1 %v13269_v11  ;;  %v4198_v11 = vld [vmem:[#allocation16 + $0x1cb0] sm:$0xff]  ;;  %v4271_v47 = vld [vmem:[#allocation16 + $0x1ef8] sm:$0xff] }
 0x8f5   :  { %11841 = vmatpush1.bf16.msra.mxu0 %v13271_v28  ;;  %11637 = vmatprep.subr.bf16.mxu1 %v13286_v35  ;;  %v4206_v28 = vld [vmem:[#allocation16 + $0x1cf0] sm:$0xff]  ;;  %v4199_v35 = vld [vmem:[#allocation16 + $0x1cb8] sm:$0xff] }
 0x8f6   :  { %11842 = vmatprep.subr.bf16.mxu0 %v13288_v19  ;;  %v4207_v19 = vld [vmem:[#allocation16 + $0x1cf8] sm:$0xff]  ;;  %v13366_v34 = vcombine.high %v4198_v11, %v4206_v28  ;;  %v13365_v62 = vcombine.low %v4198_v11, %v4206_v28  ;;  %v4278_v11 = vld [vmem:[#allocation16 + $0x1f30] sm:$0xff] }
 0x8f7   :  { %v13368_v53 = vcombine.high %v4199_v35, %v4207_v19  ;;  %v13367_v60 = vcombine.low %v4199_v35, %v4207_v19  ;;  %v4286_v28 = vld [vmem:[#allocation16 + $0x1f70] sm:$0xff]  ;;  %v4279_v35 = vld [vmem:[#allocation16 + $0x1f38] sm:$0xff] }
 0x8f8   :  { %11638 = vmatpush1.bf16.msra.mxu1 %v13285_v54  ;;  %v4214_v54 = vld [vmem:[#allocation16 + $0x1d30] sm:$0xff]  ;;  %v4287_v19 = vld [vmem:[#allocation16 + $0x1f78] sm:$0xff] }
 0x8f9   :  { %11843 = vmatpush1.bf16.msra.mxu0 %v13287_v49  ;;  %11639 = vmatprep.subr.bf16.mxu1 %v13302_v57  ;;  %v4222_v49 = vld [vmem:[#allocation16 + $0x1d70] sm:$0xff]  ;;  %v4215_v57 = vld [vmem:[#allocation16 + $0x1d38] sm:$0xff] }
 0x8fa   :  { %v15241_v7 = vpop.f32.mrb[28].mxu1  ;;  %11844 = vmatprep.subr.bf16.mxu0 %v13304_v58  ;;  %v4223_v58 = vld [vmem:[#allocation16 + $0x1d78] sm:$0xff]  ;;  %v13382_v50 = vcombine.high %v4214_v54, %v4222_v49  ;;  %v13381_v14 = vcombine.low %v4214_v54, %v4222_v49  ;;  %v4294_v54 = vld [vmem:[#allocation16 + $0x1fb0] sm:$0xff] }
 0x8fb   :  { %v15243_v9 = vpop.f32.mrb[28].mxu0  ;;  %v15245_v17 = vpop.f32.mrb[29].mxu1  ;;  %v13384_v4 = vcombine.high %v4215_v57, %v4223_v58  ;;  %v13383_v29 = vcombine.low %v4215_v57, %v4223_v58  ;;  %v4302_v49 = vld [vmem:[#allocation16 + $0x1ff0] sm:$0xff]  ;;  %v4295_v57 = vld [vmem:[#allocation16 + $0x1fb8] sm:$0xff] }
 0x8fc   :  { %v15247_v36 = vpop.f32.mrb[29].mxu0  ;;  %v11298_v24 = vpop.f32.mrb[30].mxu1  ;;  %11640 = vmatpush1.bf16.msra.mxu1 %v13301_v3  ;;  %v4230_v3 = vld [vmem:[#allocation16 + $0x1db0] sm:$0xff]  ;;  %v4303_v58 = vld [vmem:[#allocation16 + $0x1ff8] sm:$0xff] }
 0x8fd   :  { %v11503_v27 = vpop.f32.mrb[30].mxu0  ;;  %11845 = vmatpush1.bf16.msra.mxu0 %v13303_v5  ;;  %v11299_v15 = vpop.f32.mrb[31].mxu1  ;;  %11641 = vmatprep.subr.bf16.mxu1 %v13318_v6  ;;  %v4238_v5 = vld [vmem:[#allocation16 + $0x1df0] sm:$0xff]  ;;  %v4231_v6 = vld [vmem:[#allocation16 + $0x1db8] sm:$0xff] }
 0x8fe   :  { %v11504_v46 = vpop.f32.mrb[31].mxu0  ;;  %11846 = vmatprep.subr.bf16.mxu0 %v13320_v32  ;;  %v4239_v32 = vld [vmem:[#allocation16 + $0x1df8] sm:$0xff]  ;;  %v13398_v39 = vcombine.high %v4230_v3, %v4238_v5  ;;  %v4246_v24 = vld [vmem:[#allocation16 + $0x1e30] sm:$0xff] }
 0x8ff   :  { %v13400_v12 = vcombine.high %v4231_v6, %v4239_v32  ;;  %v4247_v27 = vld [vmem:[#allocation16 + $0x1e38] sm:$0xff] }
 0x900   :  { %11642 = vmatpush1.bf16.msra.mxu1 %v13317_v25  ;;  %v4254_v25 = vld [vmem:[#allocation16 + $0x1e70] sm:$0xff]  ;;  %v4255_v15 = vld [vmem:[#allocation16 + $0x1e78] sm:$0xff] }
 0x901   :  { %11847 = vmatpush1.bf16.msra.mxu0 %v13319_v30  ;;  %11643 = vmatprep.subr.bf16.mxu1 %v13334_v41  ;;  %v13397_v30 = vcombine.low %v4230_v3, %v4238_v5  ;;  %v13399_v41 = vcombine.low %v4231_v6, %v4239_v32  ;;  %v13414_v46 = vcombine.high %v4246_v24, %v4254_v25  ;;  %v4310_v3 = vld [vmem:[#allocation16 + $0x2030] sm:$0xff]  ;;  %v4311_v6 = vld [vmem:[#allocation16 + $0x2038] sm:$0xff] }
 0x902   :  { %11848 = vmatprep.subr.bf16.mxu0 %v13336_v16  ;;  %v13416_v16 = vcombine.high %v4247_v27, %v4255_v15  ;;  %v4318_v5 = vld [vmem:[#allocation16 + $0x2070] sm:$0xff]  ;;  %v4319_v32 = vld [vmem:[#allocation16 + $0x2078] sm:$0xff] }
 0x904   :  { %11644 = vmatpush1.bf16.msra.mxu1 %v13333_v48  ;;  %v13413_v48 = vcombine.low %v4246_v24, %v4254_v25  ;;  %v4326_v24 = vld [vmem:[#allocation16 + $0x20b0] sm:$0xff] }
 0x905   :  { %11849 = vmatpush1.bf16.msra.mxu0 %v13335_v51  ;;  %11645 = vmatprep.subr.bf16.mxu1 %v13350_v63  ;;  %v13415_v51 = vcombine.low %v4247_v27, %v4255_v15  ;;  %v13430_v63 = vcombine.high %v4262_v43, %v4270_v31  ;;  %v4334_v25 = vld [vmem:[#allocation16 + $0x20f0] sm:$0xff]  ;;  %v4327_v27 = vld [vmem:[#allocation16 + $0x20b8] sm:$0xff] }
 0x906   :  { %11850 = vmatprep.subr.bf16.mxu0 %v13352_v59  ;;  %v13432_v59 = vcombine.high %v4263_v45, %v4271_v47  ;;  %v4335_v15 = vld [vmem:[#allocation16 + $0x20f8] sm:$0xff] }
 0x908   :  { %11646 = vmatpush1.bf16.msra.mxu1 %v13349_v22  ;;  %v13429_v22 = vcombine.low %v4262_v43, %v4270_v31  ;;  %v4342_v43 = vld [vmem:[#allocation16 + $0x2130] sm:$0xff] }
 0x909   :  { %11851 = vmatpush1.bf16.msra.mxu0 %v13351_v23  ;;  %11647 = vmatprep.subr.bf16.mxu1 %v13366_v34  ;;  %v13431_v23 = vcombine.low %v4263_v45, %v4271_v47  ;;  %v13446_v34 = vcombine.high %v4278_v11, %v4286_v28  ;;  %v4350_v31 = vld [vmem:[#allocation16 + $0x2170] sm:$0xff]  ;;  %v4343_v45 = vld [vmem:[#allocation16 + $0x2138] sm:$0xff] }
 0x90a   :  { %11852 = vmatprep.subr.bf16.mxu0 %v13368_v53  ;;  %v13448_v53 = vcombine.high %v4279_v35, %v4287_v19  ;;  %v4351_v47 = vld [vmem:[#allocation16 + $0x2178] sm:$0xff] }
 0x90c   :  { %11648 = vmatpush1.bf16.msra.mxu1 %v13365_v62  ;;  %v13445_v62 = vcombine.low %v4278_v11, %v4286_v28  ;;  %v4358_v11 = vld [vmem:[#allocation16 + $0x21b0] sm:$0xff] }
 0x90d   :  { %11853 = vmatpush1.bf16.msra.mxu0 %v13367_v60  ;;  %11649 = vmatprep.subr.bf16.mxu1 %v13382_v50  ;;  %v13447_v60 = vcombine.low %v4279_v35, %v4287_v19  ;;  %v13462_v50 = vcombine.high %v4294_v54, %v4302_v49  ;;  %v4366_v28 = vld [vmem:[#allocation16 + $0x21f0] sm:$0xff]  ;;  %v4359_v35 = vld [vmem:[#allocation16 + $0x21b8] sm:$0xff] }
 0x90e   :  { %11854 = vmatprep.subr.bf16.mxu0 %v13384_v4  ;;  %v13464_v4 = vcombine.high %v4295_v57, %v4303_v58  ;;  %v4367_v19 = vld [vmem:[#allocation16 + $0x21f8] sm:$0xff] }
 0x910   :  { %11650 = vmatpush1.bf16.msra.mxu1 %v13381_v14  ;;  %v13461_v14 = vcombine.low %v4294_v54, %v4302_v49  ;;  %v4382_v54 = vld [vmem:[#allocation16 + $0x2270] sm:$0xff]  ;;  %v4375_v49 = vld [vmem:[#allocation16 + $0x2238] sm:$0xff] }
 0x911   :  { %11855 = vmatpush1.bf16.msra.mxu0 %v13383_v29  ;;  %11651 = vmatprep.subr.bf16.mxu1 %v13398_v39  ;;  %v13463_v29 = vcombine.low %v4295_v57, %v4303_v58  ;;  %v13478_v39 = vcombine.high %v4310_v3, %v4318_v5  ;;  %v4383_v57 = vld [vmem:[#allocation16 + $0x2278] sm:$0xff]  ;;  %v13525_v58 = vcombine.low %v4358_v11, %v4366_v28 }
 0x912   :  { %11856 = vmatprep.subr.bf16.mxu0 %v13400_v12  ;;  %v13480_v12 = vcombine.high %v4311_v6, %v4319_v32 }
 0x914   :  { %11652 = vmatpush1.bf16.msra.mxu1 %v13397_v30  ;;  %v13477_v30 = vcombine.low %v4310_v3, %v4318_v5  ;;  %v4391_v3 = vld [vmem:[#allocation16 + $0x22b8] sm:$0xff] }
 0x915   :  { %11857 = vmatpush1.bf16.msra.mxu0 %v13399_v41  ;;  %11653 = vmatprep.subr.bf16.mxu1 %v13414_v46  ;;  %v13479_v41 = vcombine.low %v4311_v6, %v4319_v32  ;;  %v13494_v46 = vcombine.high %v4326_v24, %v4334_v25  ;;  %v4399_v5 = vld [vmem:[#allocation16 + $0x22f8] sm:$0xff]  ;;  %v13543_v32 = vcombine.low %v4375_v49, %v4383_v57 }
 0x916   :  { %11858 = vmatprep.subr.bf16.mxu0 %v13416_v16  ;;  %v13496_v16 = vcombine.high %v4327_v27, %v4335_v15 }
 0x918   :  { %11654 = vmatpush1.bf16.msra.mxu1 %v13413_v48  ;;  %v13493_v48 = vcombine.low %v4326_v24, %v4334_v25  ;;  %v4407_v24 = vld [vmem:[#allocation16 + $0x2338] sm:$0xff] }
 0x919   :  { %11859 = vmatpush1.bf16.msra.mxu0 %v13415_v51  ;;  %11655 = vmatprep.subr.bf16.mxu1 %v13430_v63  ;;  %v13495_v51 = vcombine.low %v4327_v27, %v4335_v15  ;;  %v13510_v63 = vcombine.high %v4342_v43, %v4350_v31  ;;  %v4415_v25 = vld [vmem:[#allocation16 + $0x2378] sm:$0xff]  ;;  %v13559_v15 = vcombine.low %v4391_v3, %v4399_v5 }
 0x91a   :  { %11860 = vmatprep.subr.bf16.mxu0 %v13432_v59  ;;  %v13512_v59 = vcombine.high %v4343_v45, %v4351_v47 }
 0x91c   :  { %11656 = vmatpush1.bf16.msra.mxu1 %v13429_v22  ;;  %v13509_v22 = vcombine.low %v4342_v43, %v4350_v31  ;;  %v4423_v43 = vld [vmem:[#allocation16 + $0x23b8] sm:$0xff] }
 0x91d   :  { %11861 = vmatpush1.bf16.msra.mxu0 %v13431_v23  ;;  %11657 = vmatprep.subr.bf16.mxu1 %v13446_v34  ;;  %v13526_v23 = vcombine.high %v4358_v11, %v4366_v28  ;;  %v13528_v34 = vcombine.high %v4359_v35, %v4367_v19  ;;  %v4431_v31 = vld [vmem:[#allocation16 + $0x23f8] sm:$0xff]  ;;  %v4432_v11 = vld [vmem:[#allocation17] sm:$0xff] }
 0x91e   :  { %11862 = vmatprep.subr.bf16.mxu0 %v13448_v53  ;;  %v4374_v53 = vld [vmem:[#allocation16 + $0x2230] sm:$0xff]  ;;  %v4439_v28 = vrot.slane %v4432_v11, %v14988_v40 }
 0x91f   :  { %v13541_v6 = vcombine.low %v4374_v53, %v4382_v54 }
 0x920   :  { %11658 = vmatpush1.bf16.msra.mxu1 %v13445_v62  ;;  %v13527_v62 = vcombine.low %v4359_v35, %v4367_v19  ;;  %v4447_v35 = vrot.slane %v4432_v11, %v15015_v2  ;;  %v15258_v19 = vadd.f32 %v15185_v37, %v4439_v28 }
 0x921   :  { %11863 = vmatpush1.bf16.msra.mxu0 %v13447_v60  ;;  %11659 = vmatprep.subr.bf16.mxu1 %v13462_v50  ;;  %v13542_v60 = vcombine.high %v4374_v53, %v4382_v54  ;;  %v4390_v50 = vld [vmem:[#allocation16 + $0x22b0] sm:$0xff]  ;;  %v4455_v53 = vrot.slane %v4432_v11, %v15096_v56 }
 0x922   :  { %11864 = vmatprep.subr.bf16.mxu0 %v13464_v4  ;;  %v4398_v4 = vld [vmem:[#allocation16 + $0x22f0] sm:$0xff] }
 0x923   :  { %v13557_v27 = vcombine.low %v4390_v50, %v4398_v4 }
 0x924   :  { %11660 = vmatpush1.bf16.msra.mxu1 %v13461_v14  ;;  %v13558_v14 = vcombine.high %v4390_v50, %v4398_v4 }
 0x925   :  { %11865 = vmatpush1.bf16.msra.mxu0 %v13463_v29  ;;  %11670 = vmatprep.subr.bf16.mxu1 %v13478_v39  ;;  %v13560_v29 = vcombine.high %v4391_v3, %v4399_v5  ;;  %v4406_v39 = vld [vmem:[#allocation16 + $0x2330] sm:$0xff] }
 0x926   :  { %11875 = vmatprep.subr.bf16.mxu0 %v13480_v12  ;;  %v4414_v12 = vld [vmem:[#allocation16 + $0x2370] sm:$0xff] }
 0x927   :  { %11662 = vmatmul.mubr.bf16.vlgmr.msra.gmra.mrb[32].mxu1 %v15156_v0 }
 0x928   :  { %11867 = vmatmul.mubr.bf16.vlgmr.msra.gmra.mrb[32].mxu0 %v15156_v0  ;;  %11671 = vmatpush1.bf16.msra.mxu1 %v13477_v30  ;;  %v13511_v0 = vcombine.low %v4343_v45, %v4351_v47  ;;  %v13574_v30 = vcombine.high %v4406_v39, %v4414_v12  ;;  %v13573_v45 = vcombine.low %v4406_v39, %v4414_v12 }
 0x929   :  { %11876 = vmatpush1.bf16.msra.mxu0 %v13479_v41  ;;  %11672 = vmatprep.subr.bf16.mxu1 %v13494_v46  ;;  %v13576_v41 = vcombine.high %v4407_v24, %v4415_v25  ;;  %v4422_v46 = vld [vmem:[#allocation16 + $0x23b0] sm:$0xff]  ;;  %v13575_v47 = vcombine.low %v4407_v24, %v4415_v25 }
 0x92a   :  { %11877 = vmatprep.subr.bf16.mxu0 %v13496_v16  ;;  %11702 = vmatprep.mubr.bf16.mxu1 %v14765_v18  ;;  %v4430_v16 = vld [vmem:[#allocation16 + $0x23f0] sm:$0xff] }
 0x92b   :  { %11907 = vmatprep.mubr.bf16.mxu0 %v14765_v18  ;;  %v13544_v18 = vcombine.high %v4375_v49, %v4383_v57  ;;  %v4463_v57 = vrot.slane %v4432_v11, %v15137_v8 }
 0x92c   :  { %11673 = vmatpush1.bf16.msra.mxu1 %v13493_v48  ;;  %v13590_v48 = vcombine.high %v4422_v46, %v4430_v16 }
 0x92d   :  { %11878 = vmatpush1.bf16.msra.mxu0 %v13495_v51  ;;  %11674 = vmatprep.subr.bf16.mxu1 %v13510_v63  ;;  %v13592_v51 = vcombine.high %v4423_v43, %v4431_v31  ;;  %v13589_v63 = vcombine.low %v4422_v46, %v4430_v16 }
 0x92e   :  { %11879 = vmatprep.subr.bf16.mxu0 %v13512_v59  ;;  %v13591_v59 = vcombine.low %v4423_v43, %v4431_v31  ;;  %v11917_v31 = vand.u32 127, %v298_v38 }
 0x930   :  { %11675 = vmatpush1.bf16.msra.mxu1 %v13509_v22  ;;  %v15261_v22 = vadd.f32 %v15187_v55, %v4447_v35  ;;  %v15276_v55 = vadd.f32 %v15213_v26, %v4455_v53  ;;  %v4467_v26 = vrot.slane %v4432_v11, %v15102_v1  ;;  %vm11918_vm2 = vcmp.eq.s32.totalorder %v11917_v31, 48 }
 0x931   :  { %11880 = vmatpush1.bf16.msra.mxu0 %v13511_v0  ;;  %11676 = vmatprep.subr.bf16.mxu1 %v13526_v23  ;;  %v4443_v0 = vrot.slane %v4432_v11, %v14991_v42 }
 0x932   :  { %11881 = vmatprep.subr.bf16.mxu0 %v13528_v34  ;;  %v11923_v23 = vmax.f32 %v15258_v19, %v15261_v22  ;;  %v15293_v3 = vadd.f32 %v15219_v44, %v4467_v26 }
 0x933   :  { %v15267_v34 = vadd.f32 %v15189_v20, %v4443_v0  ;;  %v15282_v20 = vadd.f32 %v15215_v10, %v4463_v57 }
 0x934   :  { %11677 = vmatpush1.bf16.msra.mxu1 %v13525_v58 }
 0x935   :  { %11882 = vmatpush1.bf16.msra.mxu0 %v13527_v62  ;;  %11678 = vmatprep.subr.bf16.mxu1 %v13542_v60  ;;  %v11925_v54 = vmax.f32 %v15267_v34, %v11923_v23  ;;  %v4459_v62 = vrot.slane %v4432_v11, %v15099_v61  ;;  %v4433_v60 = vld [vmem:[#allocation17 + $0x8] sm:$0xff] }
 0x936   :  { %11883 = vmatprep.subr.bf16.mxu0 %v13544_v18  ;;  %v4471_v50 = vrot.slane %v4433_v60, %v14988_v40  ;;  %v4483_v44 = vrot.slane %v4433_v60, %v14998_v13  ;;  %v4487_v39 = vrot.slane %v4433_v60, %v15096_v56  ;;  %v4495_v12 = vrot.slane %v4433_v60, %v15137_v8 }
 0x937   :  { %v4499_v46 = vrot.slane %v4433_v60, %v15102_v1 }
 0x938   :  { %11679 = vmatpush1.bf16.msra.mxu1 %v13541_v6  ;;  %v15296_v10 = vadd.f32 %v15241_v7, %v4471_v50  ;;  %v4479_v6 = vrot.slane %v4433_v60, %v15015_v2  ;;  %v15313_v2 = vadd.f32 %v15247_v36, %v4483_v44 }
 0x939   :  { %11884 = vmatpush1.bf16.msra.mxu0 %v13543_v32  ;;  %11680 = vmatprep.subr.bf16.mxu1 %v13558_v14  ;;  %v4475_v14 = vrot.slane %v4433_v60, %v14991_v42 }
 0x93a   :  { %11885 = vmatprep.subr.bf16.mxu0 %v13560_v29 }
 0x93b   :  { %v15307_v29 = vadd.f32 %v15245_v17, %v4475_v14  ;;  %v4491_v17 = vrot.slane %v4433_v60, %v15099_v61 }
 0x93c   :  { %11681 = vmatpush1.bf16.msra.mxu1 %v13557_v27 }
 0x93d   :  { %11886 = vmatpush1.bf16.msra.mxu0 %v13559_v15  ;;  %11682 = vmatprep.subr.bf16.mxu1 %v13574_v30 }
 0x93e   :  { %11887 = vmatprep.subr.bf16.mxu0 %v13576_v41 }
 0x940   :  { %11683 = vmatpush1.bf16.msra.mxu1 %v13573_v45 }
 0x941   :  { %11888 = vmatpush1.bf16.msra.mxu0 %v13575_v47  ;;  %11684 = vmatprep.subr.bf16.mxu1 %v13590_v48 }
 0x942   :  { %11889 = vmatprep.subr.bf16.mxu0 %v13592_v51 }
 0x944   :  { %11685 = vmatpush1.bf16.msra.mxu1 %v13589_v63 }
 0x945   :  { %11890 = vmatpush1.bf16.msra.mxu0 %v13591_v59 }
 0x947   :  { %11703 = vmatmul.mubr.bf16.vlgmr.msra.gmra.mrb[32].mxu1 %v15167_v52 }
 0x948   :  { %11908 = vmatmul.mubr.bf16.vlgmr.msra.gmra.mrb[32].mxu0 %v15167_v52  ;;  %v4451_v52 = vrot.slane %v4432_v11, %v14998_v13 }
 0x94a   :  { %v15273_v37 = vadd.f32 %v15191_v21, %v4451_v52  ;;  %v15287_v21 = vadd.f32 %v15217_v33, %v4459_v62  ;;  %v15302_v33 = vadd.f32 %v15243_v9, %v4479_v6 }
 0x94c   :  { %v11924_v49 = vmax.f32 %v15273_v37, %v11925_v54 }
 0x94e   :  { %v11926_v58 = vmax.f32 %v15276_v55, %v11924_v49 }
 0x950   :  { %v11927_v18 = vmax.f32 %v15282_v20, %v11926_v58 }
 0x952   :  { %v11929_v4 = vmax.f32 %v15287_v21, %v11927_v18 }
 0x954   :  { %v11928_v5 = vmax.f32 %v15293_v3, %v11929_v4 }
 0x956   :  { %v11930_v32 = vmax.f32 %v15296_v10, %v11928_v5 }
 0x958   :  { %v11931_v40 = vmax.f32 %v15302_v33, %v11930_v32 }
 0x95a   :  { %v11933_v7 = vmax.f32 %v15307_v29, %v11931_v40 }
 0x95c   :  { %v11932_v24 = vmax.f32 %v15313_v2, %v11933_v7 }
 0xa1a   :  { %v11704_v9 = vpop.f32.mrb[32].mxu1 }
 0xa1b   :  { %v15317_v42 = vadd.f32 %v11704_v9, %v4487_v39  ;;  %v11909_v25 = vpop.f32.mrb[32].mxu0  ;;  %v11706_v27 = vpop.f32.mrb[33].mxu1 }
 0xa1c   :  { %v11911_v15 = vpop.f32.mrb[33].mxu0  ;;  %v11708_v13 = vpop.f32.mrb[34].mxu1  ;;  %v15321_v41 = vadd.f32 %v11909_v25, %v4495_v12  ;;  %v15325_v43 = vadd.f32 %v11706_v27, %v4491_v17 }
 0xa1d   :  { %v11934_v30 = vmax.f32 %v15317_v42, %v11932_v24  ;;  %v11913_v56 = vpop.f32.mrb[34].mxu0  ;;  %v11709_v36 = vpop.f32.mrb[35].mxu1  ;;  %v13689_v45 = vadd.f32 %v11911_v15, %v4499_v46 }
 0xa1e   :  { %v11914_v8 = vpop.f32.mrb[35].mxu0 }
 0xa1f   :  { %v11935_v16 = vmax.f32 %v15321_v41, %v11934_v30  ;;  %v15329_v47 = vsel %vm11918_vm2, -1e+30, %v13689_v45  ;;  %v11919_v48 = vsel %vm11918_vm2, %v13689_v45, 0.0 }
 0xa21   :  { %v11936_v61 = vmax.f32 %v15325_v43, %v11935_v16 }
 0xa23   :  { %11937 = vmax.xlane.f32.xlu0 %v11936_v61 }
 0xa27   :  { %11939 = vmax.xlane.f32.xlu0 %v15329_v47 }
 0xa2b   :  { %11920 = vadd.xlane.f32.xlu0 %v11919_v48 }
 0xab0   :  { %v11938_v51 = vpop.xlane.xlu0 %11937 }
 0xab4   :  { %v11940_v1 = vpop.xlane.xlu0 %11939 }
 0xab5   :  { %v15332_v63 = vmax.f32 %v11938_v51, %v11940_v1 }
 0xab7   :  { %v11942_v59 = vsub.f32 %v15258_v19, %v15332_v63  ;;  %v11943_v38 = vsub.f32 %v15267_v34, %v15332_v63  ;;  %v11944_v28 = vsub.f32 %v15261_v22, %v15332_v63  ;;  %v11945_v35 = vsub.f32 %v15273_v37, %v15332_v63 }
 0xab8   :  { %v11921_v11 = vpop.xlane.xlu0 %11920  ;;  %v11946_v52 = vsub.f32 %v15276_v55, %v15332_v63  ;;  %v11947_v19 = vsub.f32 %v15287_v21, %v15332_v63  ;;  %v11948_v54 = vsub.f32 %v15282_v20, %v15332_v63  ;;  %v11949_v37 = vsub.f32 %v15293_v3, %v15332_v63 }
 0xab9   :  { %14452 = vtanh.f32 %v11921_v11  ;;  %v11957_v0 = vmul.f32 1.442695, %v11942_v59  ;;  %v11959_v23 = vmul.f32 1.442695, %v11943_v38  ;;  %v11961_v53 = vmul.f32 1.442695, %v11944_v28 }
 0xaba   :  { %v11963_v34 = vmul.f32 1.442695, %v11945_v35  ;;  %v11965_v22 = vmul.f32 1.442695, %v11946_v52  ;;  %v11967_v49 = vmul.f32 1.442695, %v11947_v19  ;;  %v11950_v55 = vsub.f32 %v15296_v10, %v15332_v63 }
 0xabb   :  { %14454 = vpow2.f32 %v11957_v0  ;;  %v11969_v58 = vmul.f32 1.442695, %v11948_v54  ;;  %v11951_v20 = vsub.f32 %v15307_v29, %v15332_v63  ;;  %v11971_v62 = vmul.f32 1.442695, %v11949_v37 }
 0xabc   :  { %14456 = vpow2.f32 %v11959_v23  ;;  %v11952_v21 = vsub.f32 %v15302_v33, %v15332_v63  ;;  %v11973_v26 = vmul.f32 1.442695, %v11950_v55  ;;  %v11953_v3 = vsub.f32 %v15313_v2, %v15332_v63 }
 0xabd   :  { %14458 = vpow2.f32 %v11961_v53  ;;  %v11975_v10 = vmul.f32 1.442695, %v11951_v20  ;;  %v11954_v32 = vsub.f32 %v15317_v42, %v15332_v63  ;;  %v11955_v33 = vsub.f32 %v15325_v43, %v15332_v63 }
 0xabe   :  { %14460 = vpow2.f32 %v11963_v34  ;;  %v11977_v14 = vmul.f32 1.442695, %v11952_v21  ;;  %v11979_v44 = vmul.f32 1.442695, %v11953_v3  ;;  %v11956_v2 = vsub.f32 %v15321_v41, %v15332_v63 }
 0xabf   :  { %14462 = vpow2.f32 %v11965_v22  ;;  %v11981_v12 = vmul.f32 1.442695, %v11954_v32  ;;  %v11983_v42 = vmul.f32 1.442695, %v11955_v33  ;;  %v11987_v30 = vsub.f32 %v15329_v47, %v15332_v63 }
 0xac0   :  { %14464 = vpow2.f32 %v11967_v49  ;;  %v11985_v27 = vmul.f32 1.442695, %v11956_v2 }
 0xac1   :  { %14466 = vpow2.f32 %v11969_v58  ;;  %v11988_v8 = vmul.f32 1.442695, %v11987_v30 }
 0xac2   :  { %14468 = vpow2.f32 %v11971_v62 }
 0xac3   :  { %v14453_v57 = vpop.eup %14452  ;;  %14470 = vpow2.f32 %v11973_v26 }
 0xac4   :  { %12045 = vst.msk [vmem:[%s15393_s12] sm:$0xff] %vm12044_vm3, %v14453_v57  ;;  %14472 = vpow2.f32 %v11975_v10  ;;  %s14766_s12 = smov [#allocation19]  }
 0xac5   :  { %v14455_v60 = vpop.eup %14454  ;;  %14474 = vpow2.f32 %v11977_v14  ;;  %s12052_s14 = sshll.u32 %s14766_s12, 4  ;;  %s12053_s14 = int_to_ptr.vmem [resolvable:$true] %s12052_s14 }
 0xac6   :  { %v14457_v18 = vpop.eup %14456  ;;  %14476 = vpow2.f32 %v11979_v44  ;;  %s14709_s6 = scalar_lea.vmem %s12053_s14, 2048  ;;  %p14714_p11 = scmp.lt.s32.totalorder %s12053_s14, %s12053_s14 }
 0xac7   :  { %v11990_v50 = vadd.f32 %v14457_v18, %v14455_v60  ;;  %v14459_v4 = vpop.eup %14458  ;;  %14478 = vpow2.f32 %v11981_v12  ;;  %p14710_p10 = scmp.ne.s32.totalorder %s12053_s14, %s14709_s6  ;;  %p14715_p12 = scmp.lt.s32.totalorder %s14709_s6, %s14709_s6 }
 0xac8   :  { %v14461_v6 = vpop.eup %14460  ;;  %14480 = vpow2.f32 %v11983_v42 }
 0xac9   :  { %v11991_v5 = vadd.f32 %v14459_v4, %v11990_v50  ;;  %v14463_v29 = vpop.eup %14462  ;;  %14482 = vpow2.f32 %v11985_v27  ;;  %p14716_p13 = por %p14715_p12, %p14714_p11 }
 0xaca   :  { %v14465_v39 = vpop.eup %14464  ;;  %14484 = vpow2.f32 %v11988_v8 }
 0xacb   :  { %v11992_v40 = vadd.f32 %v14461_v6, %v11991_v5  ;;  %v14467_v24 = vpop.eup %14466  ;;  %p14717_p0 = pnand %p14716_p13, %p14710_p10 }
 0xacc   :  { %v14469_v17 = vpop.eup %14468 }
 0xacd   :  { %v11993_v7 = vadd.f32 %v14463_v29, %v11992_v40  ;;  %v14471_v13 = vpop.eup %14470 }
 0xace   :  { %v14473_v36 = vpop.eup %14472 }
 0xacf   :  { %v11994_v9 = vadd.f32 %v14465_v39, %v11993_v7  ;;  %v14475_v46 = vpop.eup %14474 }
 0xad0   :  { %v14477_v43 = vpop.eup %14476 }
 0xad1   :  { %v11995_v25 = vadd.f32 %v14467_v24, %v11994_v9  ;;  %v14479_v61 = vpop.eup %14478 }
 0xad2   :  { %v14481_v48 = vpop.eup %14480 }
 0xad3   :  { %v11996_v15 = vadd.f32 %v14469_v17, %v11995_v25  ;;  %v14483_v1 = vpop.eup %14482 }
 0xad4   :  { %v14485_v38 = vpop.eup %14484 }
 0xad5   :  { %v11997_v56 = vadd.f32 %v14471_v13, %v11996_v15 }
 0xad7   :  { %v11998_v41 = vadd.f32 %v14473_v36, %v11997_v56 }
 0xad9   :  { %v11999_v16 = vadd.f32 %v14475_v46, %v11998_v41 }
 0xadb   :  { %v12000_v31 = vadd.f32 %v14477_v43, %v11999_v16 }
 0xadd   :  { %v12001_v45 = vadd.f32 %v14479_v61, %v12000_v31 }
 0xadf   :  { %v12002_v51 = vadd.f32 %v14481_v48, %v12001_v45 }
 0xae1   :  { %v12003_v59 = vadd.f32 %v14483_v1, %v12002_v51 }
 0xae3   :  { %12004 = vadd.xlane.f32.xlu1 %v12003_v59 }
 0xae7   :  { %12006 = vadd.xlane.f32.xlu1 %v14485_v38 }
 0xb70   :  { %v12005_v47 = vpop.xlane.xlu1 %12004 }
 0xb74   :  { %v12007_v63 = vpop.xlane.xlu1 %12006 }
 0xb75   :  { %v12008_v11 = vadd.f32 %v12007_v63, %v12005_v47 }
 0xb77   :  { %14486 = vrcp.f32 %v12008_v11 }
 0xb81   :  { %v14487_v28 = vpop.eup %14486 }
 0xb82   :  { %v12011_v35 = vmul.f32 %v14487_v28, %v14455_v60  ;;  %v12012_v0 = vmul.f32 %v14487_v28, %v14457_v18  ;;  %v12013_v23 = vmul.f32 %v14487_v28, %v14459_v4  ;;  %v12014_v52 = vmul.f32 %v14487_v28, %v14461_v6 }
 0xb83   :  { %v12015_v53 = vmul.f32 %v14487_v28, %v14463_v29  ;;  %v12016_v19 = vmul.f32 %v14487_v28, %v14465_v39  ;;  %v12017_v34 = vmul.f32 %v14487_v28, %v14467_v24  ;;  %v12018_v54 = vmul.f32 %v14487_v28, %v14469_v17 }
 0xb84   :  { %v12019_v22 = vmul.f32 %v14487_v28, %v14471_v13  ;;  %v12020_v37 = vmul.f32 %v14487_v28, %v14473_v36  ;;  %v12021_v49 = vmul.f32 %v14487_v28, %v14475_v46  ;;  %v12022_v57 = vmul.f32 %v14487_v28, %v14477_v43  ;;  %12026 = vst [vmem:[#allocation19] sm:$0xff] %v12011_v35 }
 0xb85   :  { %12027 = vst [vmem:[#allocation19 + $0x8] sm:$0xff] %v12012_v0  ;;  %12028 = vst [vmem:[#allocation19 + $0x10] sm:$0xff] %v12013_v23  ;;  %v12023_v55 = vmul.f32 %v14487_v28, %v14479_v61  ;;  %v12024_v58 = vmul.f32 %v14487_v28, %v14481_v48  ;;  %v12025_v20 = vmul.f32 %v14487_v28, %v14483_v1 }
 0xb86   :  { %12029 = vst [vmem:[#allocation19 + $0x18] sm:$0xff] %v12014_v52  ;;  %12030 = vst [vmem:[#allocation19 + $0x20] sm:$0xff] %v12015_v53  ;;  %v12041_v62 = vmul.f32 %v14487_v28, %v14485_v38 }
 0xb87   :  { %12031 = vst [vmem:[#allocation19 + $0x28] sm:$0xff] %v12016_v19  ;;  %12032 = vst [vmem:[#allocation19 + $0x30] sm:$0xff] %v12017_v34 }
 0xb88   :  { %12033 = vst [vmem:[#allocation19 + $0x38] sm:$0xff] %v12018_v54  ;;  %12034 = vst [vmem:[#allocation19 + $0x40] sm:$0xff] %v12019_v22 }
 0xb89   :  { %12035 = vst [vmem:[#allocation19 + $0x48] sm:$0xff] %v12020_v37  ;;  %12036 = vst [vmem:[#allocation19 + $0x50] sm:$0xff] %v12021_v49 }
 0xb8a   :  { %12037 = vst [vmem:[#allocation19 + $0x58] sm:$0xff] %v12022_v57  ;;  %12038 = vst [vmem:[#allocation19 + $0x60] sm:$0xff] %v12023_v55 }
 0xb8b   :  { %12039 = vst [vmem:[#allocation19 + $0x68] sm:$0xff] %v12024_v58  ;;  %12040 = vst [vmem:[#allocation19 + $0x70] sm:$0xff] %v12025_v20 }
 0xb8c   :  { %12042 = vst [vmem:[#allocation19 + $0x78] sm:$0xff] %v12041_v62 }
 0xb8d   :  { %14720 = shalt.err (!%p14717_p0)
}
 0xb8e   :  { %s14721_s15 = scalar_lea.hbm %s15392_s11, 2048 }
 0xb8f   :  { %p14722_p1 = scmp.ne.s32.totalorder %s15392_s11, %s14721_s15  ;;  %p14725_p2 = scmp.lt.u32.totalorder %s14721_s15, %s15392_s11 }
 0xb91   :  { %p14727_p3 = pnand %p14725_p2, %p14722_p1 }
 0xb93   :  { %14730 = shalt.err (!%p14727_p3)
}
 0xb94   :  { %12055 = dma.vmem_to_hbm [thread:$0]  %s12053_s14, 2048, %s15392_s11, [#allocation4]  }
 0xb95   :  { %14743 = dma.done.wait [#allocation4], 2048  }
 0xb96   :  { %14744 = vsyncadd [#allocation4], 4294965248 }
 0xb97   :  { %12063 = vsyncpa [#allocation3], 1 }
 0xb98   :  { %12064 = vsyncpa [#allocation6], 1 }
 0xb99   :  { %12065 = vsyncpa [#allocation9], 1 }
 0xb9a   :  { %12066 = vsyncpa [#allocation12], 1 }
 0xb9b   :  { %12067 = vsyncpa [#allocation15], 1 }
 0xb9c   :  { %12068 = vsyncpa [#allocation18], 1 }
 0xb9d   :  { %12069 = vsyncpa [#allocation4], 1 }

</bundles_post_ra>
